<compile_context>
chip_gen: v6e
topology: v6e:2x2x1
jax: 0.10.0
libtpu: 0.0.40
codegen_flags: <defaults>
</compile_context>

<pallas_src>
import functools

import jax
import jax.numpy as jnp
from jax.experimental import pallas as pl
from jax.experimental.pallas import tpu as pltpu

_BN_EPS = 1e-5


# ---------------------------------------------------------------------------
# Kernel 1: fused  proj Linear + ReLU  +  ConvTranspose#0 (1x1 -> 2x2)
# ---------------------------------------------------------------------------
def _proj_conv0_kernel(z_ref, wp_ref, bp_ref, w0_ref, y_ref, sum_ref, ssq_ref,
                       *, c0):
    z = z_ref[...]                                            # (B, n_z) f32
    h = jnp.dot(z.astype(jnp.bfloat16), wp_ref[...],
                preferred_element_type=jnp.float32) + bp_ref[...]
    h = jnp.maximum(h, 0.0)                                   # proj ReLU
    # conv0 acts on 1x1 spatial input -> the transposed conv is a plain GEMM
    # (only taps (kh,kw) in {1,2}x{1,2} reach the 2x2 output).  conv0 bias is
    # dropped: BatchNorm0 (training mode) cancels it.
    y = jnp.dot(h.astype(jnp.bfloat16), w0_ref[...],
                preferred_element_type=jnp.float32)           # (B, 4*c0)
    y_ref[...] = y.astype(y_ref.dtype)                        # bf16 store
    # BatchNorm0 statistics epilogue (f32, before the bf16 cast).
    sq = y * y
    pix_sum = (y[:, 0:c0] + y[:, c0:2 * c0]
               + y[:, 2 * c0:3 * c0] + y[:, 3 * c0:4 * c0])
    pix_ssq = (sq[:, 0:c0] + sq[:, c0:2 * c0]
               + sq[:, 2 * c0:3 * c0] + sq[:, 3 * c0:4 * c0])
    sum_ref[...] = jnp.sum(pix_sum, axis=0, keepdims=True)
    ssq_ref[...] = jnp.sum(pix_ssq, axis=0, keepdims=True)


def proj_conv0(z, wp, bp, w0, c0):
    b = z.shape[0]
    vmem = pl.BlockSpec(memory_space=pltpu.MemorySpace.VMEM)
    # These tensors are tiny (spatial 1x1 -> 2x2); a single whole-array VMEM
    # call beats gridding for any realistic latent batch.
    return pl.pallas_call(
        functools.partial(_proj_conv0_kernel, c0=c0),
        out_shape=(jax.ShapeDtypeStruct((b, 4 * c0), jnp.bfloat16),
                   jax.ShapeDtypeStruct((1, c0), jnp.float32),
                   jax.ShapeDtypeStruct((1, c0), jnp.float32)),
        in_specs=[vmem] * 4,
        out_specs=(vmem, vmem, vmem),
    )(z, wp, bp, w0)


# ---------------------------------------------------------------------------
# Kernel 2: fused  [BN+ReLU of previous layer]  +  ConvTranspose2d(4, 2, 1)
#           (+ optional bias + sigmoid for the last layer)  + BN-stats epilogue
# ---------------------------------------------------------------------------
def _deconv_kernel(x_ref, w_ref, scale_ref, shift_ref, *rest,
                   H, W, cout, apply_bias, sigmoid_out, with_stats):
    if apply_bias:
        bias_ref, rest = rest[0], rest[1:]
    if with_stats:
        out_ref, sum_ref, ssq_ref = rest
    else:
        (out_ref,) = rest

    # Fused BatchNorm + ReLU of the previous layer (per-channel scale/shift),
    # hidden under this layer's MXU/DMA work.
    x = x_ref[...].astype(jnp.float32)                        # (R, cin)
    xa = jnp.maximum(x * scale_ref[...] + shift_ref[...], 0.0)
    R = xa.shape[0]

    # Row / column index of the flattened pixel r = b*H*W + i*W + j.
    # H, W are powers of two -> cheap VPU bit ops (no integer divide).
    lw = W.bit_length() - 1
    row = jax.lax.broadcasted_iota(jnp.int32, (R, 1), 0)
    j_idx = row & (W - 1)
    i_idx = (row >> lw) & (H - 1)

    def _roll(a, k):                 # circular: out[r] = a[(r - k) mod R]
        return pltpu.roll(a, k % R, axis=0)

    def down_rows(a):   # a[r - W]; zero on the top image row (i == 0)
        return jnp.where(i_idx == 0, 0.0, _roll(a, W))

    def up_rows(a):     # a[r + W]; zero on the bottom image row
        return jnp.where(i_idx == H - 1, 0.0, _roll(a, R - W))

    def down_cols(a):   # a[r - 1]; zero on the left image column
        return jnp.where(j_idx == 0, 0.0, _roll(a, 1))

    def up_cols(a):     # a[r + 1]; zero on the right image column
        return jnp.where(j_idx == W - 1, 0.0, _roll(a, R - 1))

    # Row-parity (kh) taps folded into the GEMM contraction:
    #   even output rows (py=0): kh=1 from input row i, kh=3 from row i-1
    #   odd  output rows (py=1): kh=2 from input row i, kh=0 from row i+1
    # w_ref[kh] is (cin, 4*cout) with lanes ordered (kw, cout).  Two dots per
    # parity (instead of one dot on a concatenated input) avoid a lane-concat
    # copy; f32 accumulation on the MXU, bf16 operands.
    xa_bf = xa.astype(jnp.bfloat16)
    xd_bf = down_rows(xa).astype(jnp.bfloat16)
    xu_bf = up_rows(xa).astype(jnp.bfloat16)

    y_even = (jnp.dot(xa_bf, w_ref[1], preferred_element_type=jnp.float32)
              + jnp.dot(xd_bf, w_ref[3], preferred_element_type=jnp.float32))
    y_odd = (jnp.dot(xa_bf, w_ref[2], preferred_element_type=jnp.float32)
             + jnp.dot(xu_bf, w_ref[0], preferred_element_type=jnp.float32))

    # Column-parity (kw) combine: output col 2j   <- kw=1 (col j) + kw=3 (col j-1)
    #                             output col 2j+1 <- kw=2 (col j) + kw=0 (col j+1)
    def col_combine(y):
        pe = y[:, cout:2 * cout] + down_cols(y[:, 3 * cout:4 * cout])
        po = y[:, 2 * cout:3 * cout] + up_cols(y[:, 0:cout])
        return pe, po

    p00, p01 = col_combine(y_even)
    p10, p11 = col_combine(y_odd)

    if with_stats:
        # BatchNorm statistics epilogue (raw conv output, pre-activation, f32).
        sum_ref[0] = jnp.sum(p00 + p01 + p10 + p11, axis=0, keepdims=True)
        ssq_ref[0] = jnp.sum(p00 * p00 + p01 * p01 + p10 * p10 + p11 * p11,
                             axis=0, keepdims=True)

    phases = (p00, p01, p10, p11)
    if apply_bias:                       # only the final layer keeps its bias
        b = bias_ref[...]
        phases = tuple(p + b for p in phases)
    if sigmoid_out:
        # exp + approximate reciprocal both ride the EUP slot; clip keeps the
        # result in [0, 1] despite the approximation.
        phases = tuple(
            jnp.clip(pl.reciprocal(1.0 + jnp.exp(-p), approx=True), 0.0, 1.0)
            for p in phases)

    # Direct per-phase lane sub-range stores (no concatenate materialization).
    for k, p in enumerate(phases):
        out_ref[0, :, k * cout:(k + 1) * cout] = p.astype(out_ref.dtype)


def _pick_batch_tile(n, hw, cin, cout):
    """Pick a batch tile such that
      - the per-tile working set (f32 intermediates + double-buffered bf16 I/O)
        stays within ~8 MiB (double-buffers comfortably on v7x 64 MiB VMEM,
        ample headroom on v5e/v6e 128 MiB),
      - there are >= 2 grid blocks whenever the batch allows it (v7x megacore,
        pipelining),
      - the tile row count is a multiple of 8 (sublane tiling),
      - if nothing fits the budget, fall back to the SMALLEST legal tile
        (never the full batch) so VMEM cannot be blown.
    Returns (batch_tile, per_tile_bytes_estimate)."""
    f32_rows = 4 * (3 * cin + 12 * cout)        # xa + 2 shifted inputs, y_even/odd, phases
    io_rows = 2 * 2 * (cin + 4 * cout)          # double-buffered bf16 in/out blocks
    per_row = f32_rows + io_rows
    budget = 8 * 1024 * 1024
    cap = max(1, budget // (per_row * hw))

    candidates = [d for d in range(1, n + 1)
                  if n % d == 0 and ((d * hw) % 8 == 0 or d == n)]
    fitting = [d for d in candidates if d <= cap]
    if fitting:
        multi = [d for d in fitting if (n // d) >= 2]
        bt = max(multi) if multi else max(fitting)
    else:
        bt = min(candidates)
    per_tile = per_row * hw * bt + 2 * (4 * cin * 4 * cout * 2)   # + weights (bf16 x2)
    return bt, per_tile


def deconv_layer(x_flat, w4, scale, shift, bias, *, n, h, w, cin, cout,
                 sigmoid_out):
    assert (h & (h - 1)) == 0 and (w & (w - 1)) == 0
    hw = h * w
    bt, per_tile = _pick_batch_tile(n, hw, cin, cout)
    nb = n // bt
    r = bt * hw
    with_stats = not sigmoid_out
    apply_bias = bias is not None

    kernel = functools.partial(_deconv_kernel, H=h, W=w, cout=cout,
                               apply_bias=apply_bias, sigmoid_out=sigmoid_out,
                               with_stats=with_stats)
    in_specs = [
        pl.BlockSpec((r, cin), lambda b: (b, 0)),
        pl.BlockSpec((4, cin, 4 * cout), lambda b: (0, 0, 0)),
        pl.BlockSpec((1, cin), lambda b: (0, 0)),
        pl.BlockSpec((1, cin), lambda b: (0, 0)),
    ]
    args = [x_flat, w4,
            scale.reshape(1, cin).astype(jnp.float32),
            shift.reshape(1, cin).astype(jnp.float32)]
    if apply_bias:
        in_specs.append(pl.BlockSpec((1, cout), lambda b: (0, 0)))
        args.append(bias.reshape(1, cout).astype(jnp.float32))

    out_specs = [pl.BlockSpec((1, r, 4 * cout), lambda b: (b, 0, 0))]
    out_shape = [jax.ShapeDtypeStruct((nb, r, 4 * cout), jnp.bfloat16)]
    if with_stats:
        out_specs += [pl.BlockSpec((1, 1, cout), lambda b: (b, 0, 0))] * 2
        out_shape += [jax.ShapeDtypeStruct((nb, 1, cout), jnp.float32)] * 2

    # VMEM limit derived from the actual per-tile buffers (with headroom),
    # capped so it is always valid on v7x's 64 MiB VMEM.
    vmem_limit = int(min(max(2 * per_tile, 32 * 1024 * 1024),
                         64 * 1024 * 1024))

    outs = pl.pallas_call(
        kernel,
        grid=(nb,),
        in_specs=in_specs,
        out_specs=tuple(out_specs),
        out_shape=tuple(out_shape),
        compiler_params=pltpu.CompilerParams(
            dimension_semantics=("parallel",),   # megacore: TCs split the batch grid
            vmem_limit_bytes=vmem_limit),
    )(*args)
    if with_stats:
        phases, bsum, bssq = outs
        return phases, bsum, bssq, bt
    return outs[0], None, None, bt


# ----------------------------- tiny XLA glue --------------------------------
def _phases_to_rows(phases, n, bt, h, w, cout):
    """(nb, bt*h*w, 4*cout) phase-major bf16 -> (n*2h*2w, cout), rows (b,i',j')."""
    nb = n // bt
    t = phases.reshape(nb, bt, h, w, 2, 2, cout)     # (nb, b, i, j, py, px, c)
    t = t.transpose(0, 1, 2, 4, 3, 5, 6)             # (nb, b, i, py, j, px, c)
    return t.reshape(n * 2 * h * 2 * w, cout)


def _phases_to_nchw(phases, n, bt, h, w, cout):
    nb = n // bt
    t = phases.reshape(nb, bt, h, w, 2, 2, cout)
    t = t.transpose(0, 1, 6, 2, 4, 3, 5)             # (nb, b, c, i, py, j, px)
    return t.reshape(n, cout, 2 * h, 2 * w).astype(jnp.float32)


def _bn_scale_shift(bsum, bssq, count, gamma, beta):
    # NOTE: E[x^2]-E[x]^2 in f32; fine at these sizes (see review note on
    # Welford-style combining for very large batches).
    mean = bsum / count
    var = bssq / count - mean * mean                 # biased, as PyTorch BN
    inv = gamma * jax.lax.rsqrt(var + _BN_EPS)
    return inv, beta - mean * inv


# ------------------------------- parameters ---------------------------------
def init_decoder_params(key, n_channel, dim_h, n_z):
    """Parameters in the PyTorch module's native layouts."""
    chans = [dim_h, 2 * dim_h, 8 * dim_h, 4 * dim_h, dim_h, n_channel]
    keys = jax.random.split(key, 16)
    p = {}
    p["proj_w"] = 0.1 * jax.random.normal(keys[0], (dim_h, n_z), jnp.float32)
    p["proj_b"] = 0.1 * jax.random.normal(keys[1], (dim_h,), jnp.float32)
    for i in range(5):
        cin, cout = chans[i], chans[i + 1]
        p[f"conv{i}_w"] = 0.1 * jax.random.normal(
            keys[2 + 2 * i], (cin, cout, 4, 4), jnp.float32)  # PyTorch layout
        p[f"conv{i}_b"] = 0.1 * jax.random.normal(
            keys[3 + 2 * i], (cout,), jnp.float32)
    for i in range(4):
        cout = chans[i + 1]
        p[f"bn{i}_gamma"] = 1.0 + 0.05 * jax.random.normal(
            keys[12 + i], (cout,), jnp.float32)
        p[f"bn{i}_beta"] = 0.05 * jax.random.normal(
            jax.random.fold_in(keys[12 + i], 7), (cout,), jnp.float32)
    return p


def prepare_params(params):
    """One-time conversion to kernel layouts (hoisted out of the forward):
    bf16 matmul operands; conv1..4 weights as (kh, cin, kw*cout) so the kh
    (row-parity) taps fold into the GEMM contraction.  conv0..conv3 biases are
    dropped: training-mode BatchNorm cancels them exactly."""
    prep = {}
    prep["proj_w"] = params["proj_w"].T.astype(jnp.bfloat16)          # (n_z, dh)
    prep["proj_b"] = params["proj_b"].reshape(1, -1).astype(jnp.float32)
    w0 = params["conv0_w"][:, :, 1:3, 1:3]                            # (ci,co,2,2)
    prep["conv0_w"] = jnp.transpose(w0, (0, 2, 3, 1)).reshape(
        w0.shape[0], -1).astype(jnp.bfloat16)                         # (ci,4*co)
    for i in range(1, 5):
        wi = params[f"conv{i}_w"]                                     # (ci,co,4,4)
        prep[f"conv{i}_w"] = jnp.transpose(wi, (2, 0, 3, 1)).reshape(
            4, wi.shape[0], 4 * wi.shape[1]).astype(jnp.bfloat16)     # (kh,ci,kw*co)
    prep["conv4_b"] = params["conv4_b"].astype(jnp.float32)
    for i in range(4):
        prep[f"bn{i}_gamma"] = params[f"bn{i}_gamma"]
        prep[f"bn{i}_beta"] = params[f"bn{i}_beta"]
    return prep


# -------------------------------- forward -----------------------------------
def decoder_forward(z, prep, *, dim_h, n_channel):
    n = z.shape[0]
    c0 = 2 * dim_h
    chans = [c0, 8 * dim_h, 4 * dim_h, dim_h, n_channel]

    # fused proj Linear(+ReLU) + conv0 (two back-to-back GEMMs, one kernel)
    y0, s0, q0 = proj_conv0(z, prep["proj_w"], prep["proj_b"],
                            prep["conv0_w"], c0)
    scale, shift = _bn_scale_shift(s0[0], q0[0], float(n * 4),
                                   prep["bn0_gamma"], prep["bn0_beta"])
    x_flat = y0.reshape(n * 4, c0)       # bf16 rows: b*4 + i*2 + j  (2x2 spatial)
    h = w = 2

    for li in range(1, 5):
        cin, cout = chans[li - 1], chans[li]
        last = li == 4
        phases, bsum, bssq, bt = deconv_layer(
            x_flat, prep[f"conv{li}_w"], scale, shift,
            prep["conv4_b"] if last else None,
            n=n, h=h, w=w, cin=cin, cout=cout, sigmoid_out=last)
        if last:
            return _phases_to_nchw(phases, n, bt, h, w, cout)   # NCHW f32
        scale, shift = _bn_scale_shift(
            jnp.sum(bsum[:, 0, :], axis=0), jnp.sum(bssq[:, 0, :], axis=0),
            float(n * 4 * h * w),
            prep[f"bn{li}_gamma"], prep[f"bn{li}_beta"])
        x_flat = _phases_to_rows(phases, n, bt, h, w, cout)     # bf16
        h, w = 2 * h, 2 * w


# ------------------------ pure-JAX f32 reference ----------------------------
def reference_forward(z, params, dim_h, n_channel):
    """f32 reference implementing the PyTorch module verbatim (biases kept)."""
    def conv_t(x, w_pt, bias):
        n, h, w, cin = x.shape
        cout = w_pt.shape[1]
        wmat = jnp.transpose(w_pt, (0, 2, 3, 1)).reshape(cin, 16 * cout)
        y = (x.reshape(n * h * w, cin) @ wmat).reshape(n, h, w, 4, 4, cout)
        full = jnp.zeros((n, 2 * h + 2, 2 * w + 2, cout), jnp.float32)
        for kh in range(4):
            for kw in range(4):
                full = full.at[:, kh:kh + 2 * h:2, kw:kw + 2 * w:2, :].add(
                    y[:, :, :, kh, kw, :])
        return full[:, 1:1 + 2 * h, 1:1 + 2 * w, :] + bias

    def bn_relu(x, gamma, beta):
        mean = jnp.mean(x, axis=(0, 1, 2))
        var = jnp.var(x, axis=(0, 1, 2))
        xn = (x - mean) * jax.lax.rsqrt(var + _BN_EPS)
        return jnp.maximum(xn * gamma + beta, 0.0)

    h = jnp.maximum(z @ params["proj_w"].T + params["proj_b"], 0.0)
    x = h.reshape(-1, 1, 1, dim_h)
    for i in range(4):
        x = conv_t(x, params[f"conv{i}_w"], params[f"conv{i}_b"])
        x = bn_relu(x, params[f"bn{i}_gamma"], params[f"bn{i}_beta"])
    x = conv_t(x, params["conv4_w"], params["conv4_b"])
    x = 1.0 / (1.0 + jnp.exp(-x))
    return jnp.transpose(x, (0, 3, 1, 2))


if __name__ == "__main__":
    # CIFAR-consistent config: 1x1 -> 2 -> 4 -> 8 -> 16 -> 32 spatial.
    n_channel, dim_h, n_z = 3, 8, 16
    batch = 2

    key = jax.random.PRNGKey(0)
    kp, kx = jax.random.split(key)
    params = init_decoder_params(kp, n_channel, dim_h, n_z)
    prep = prepare_params(params)
    z = jax.random.normal(kx, (batch, n_z), jnp.float32)

    fwd = jax.jit(functools.partial(decoder_forward, dim_h=dim_h,
                                    n_channel=n_channel))
    out = jax.block_until_ready(fwd(z, prep))

    assert out.shape == (batch, n_channel, 32, 32), out.shape
    assert bool(jnp.all(jnp.isfinite(out)))
    assert bool(jnp.all((out >= 0.0) & (out <= 1.0)))   # sigmoid range

    # numerical check vs f32 reference (kernel uses bf16 matmul operands and
    # bf16 inter-layer activation storage, approx-reciprocal sigmoid)
    ref = jax.jit(functools.partial(reference_forward, dim_h=dim_h,
                                    n_channel=n_channel))(z, params)
    max_err = float(jnp.max(jnp.abs(out - ref)))
    assert max_err < 0.1, max_err

    print("KERNEL_OK")
</pallas_src>

<mosaic_0001>
module attributes {stable_mosaic.version = 11 : i64} {
  func.func @_proj_conv0_kernel(%arg0: memref<2x16xf32, #tpu.memory_space<vmem>>, %arg1: memref<16x8xbf16, #tpu.memory_space<vmem>>, %arg2: memref<1x8xf32, #tpu.memory_space<vmem>>, %arg3: memref<8x64xbf16, #tpu.memory_space<vmem>>, %arg4: memref<2x64xbf16, #tpu.memory_space<vmem>>, %arg5: memref<1x16xf32, #tpu.memory_space<vmem>>, %arg6: memref<1x16xf32, #tpu.memory_space<vmem>>) attributes {dimension_semantics = [], scalar_prefetch = 0 : i64, scratch_operands = 0 : i64, tpu.core_type = #tpu.core_type<tc>} {
    %c0 = arith.constant 0 : index
    %c0_0 = arith.constant 0 : index
    %0 = vector.load %arg0[%c0, %c0_0] : memref<2x16xf32, #tpu.memory_space<vmem>>, vector<2x16xf32>
    %1 = arith.truncf %0 : vector<2x16xf32> to vector<2x16xbf16>
    %c0_1 = arith.constant 0 : index
    %c0_2 = arith.constant 0 : index
    %2 = vector.load %arg1[%c0_1, %c0_2] : memref<16x8xbf16, #tpu.memory_space<vmem>>, vector<16x8xbf16>
    %cst = arith.constant dense<0.000000e+00> : vector<2x8xf32>
    %3 = tpu.matmul %1, %2, %cst {dimension_numbers = #tpu.dot_dimension_numbers<[1], [0], [0], [1], [0, 0, 1, 1], [], []>} : vector<2x16xbf16>, vector<16x8xbf16>, vector<2x8xf32> -> vector<2x8xf32>
    %c0_3 = arith.constant 0 : index
    %c0_4 = arith.constant 0 : index
    %4 = vector.load %arg2[%c0_3, %c0_4] : memref<1x8xf32, #tpu.memory_space<vmem>>, vector<1x8xf32>
    %5 = vector.broadcast %4 : vector<1x8xf32> to vector<2x8xf32>
    %6 = arith.addf %3, %5 : vector<2x8xf32>
    %cst_5 = arith.constant 0.000000e+00 : f32
    %7 = vector.broadcast %cst_5 : f32 to vector<2x8xf32>
    %8 = arith.maximumf %6, %7 : vector<2x8xf32>
    %9 = arith.truncf %8 : vector<2x8xf32> to vector<2x8xbf16>
    %c0_6 = arith.constant 0 : index
    %c0_7 = arith.constant 0 : index
    %10 = vector.load %arg3[%c0_6, %c0_7] : memref<8x64xbf16, #tpu.memory_space<vmem>>, vector<8x64xbf16>
    %cst_8 = arith.constant dense<0.000000e+00> : vector<2x64xf32>
    %11 = tpu.matmul %9, %10, %cst_8 {dimension_numbers = #tpu.dot_dimension_numbers<[1], [0], [0], [1], [0, 0, 1, 1], [], []>} : vector<2x8xbf16>, vector<8x64xbf16>, vector<2x64xf32> -> vector<2x64xf32>
    %12 = arith.truncf %11 : vector<2x64xf32> to vector<2x64xbf16>
    %c0_9 = arith.constant 0 : index
    %c0_10 = arith.constant 0 : index
    %13 = vector.load %arg4[%c0_9, %c0_10] : memref<2x64xbf16, #tpu.memory_space<vmem>>, vector<2x64xbf16>
    tpu.vector_store %arg4[%c0_9, %c0_10], %12 {strides = array<i32>} : memref<2x64xbf16, #tpu.memory_space<vmem>>, vector<2x64xbf16>,
    %14 = arith.mulf %11, %11 : vector<2x64xf32>
    %15 = vector.extract_strided_slice %11 {offsets = [0, 0], sizes = [2, 16], strides = [1, 1]} : vector<2x64xf32> to vector<2x16xf32>
    %16 = vector.extract_strided_slice %11 {offsets = [0, 16], sizes = [2, 16], strides = [1, 1]} : vector<2x64xf32> to vector<2x16xf32>
    %17 = arith.addf %15, %16 : vector<2x16xf32>
    %18 = vector.extract_strided_slice %11 {offsets = [0, 32], sizes = [2, 16], strides = [1, 1]} : vector<2x64xf32> to vector<2x16xf32>
    %19 = arith.addf %17, %18 : vector<2x16xf32>
    %20 = vector.extract_strided_slice %11 {offsets = [0, 48], sizes = [2, 16], strides = [1, 1]} : vector<2x64xf32> to vector<2x16xf32>
    %21 = arith.addf %19, %20 : vector<2x16xf32>
    %22 = vector.extract_strided_slice %14 {offsets = [0, 0], sizes = [2, 16], strides = [1, 1]} : vector<2x64xf32> to vector<2x16xf32>
    %23 = vector.extract_strided_slice %14 {offsets = [0, 16], sizes = [2, 16], strides = [1, 1]} : vector<2x64xf32> to vector<2x16xf32>
    %24 = arith.addf %22, %23 : vector<2x16xf32>
    %25 = vector.extract_strided_slice %14 {offsets = [0, 32], sizes = [2, 16], strides = [1, 1]} : vector<2x64xf32> to vector<2x16xf32>
    %26 = arith.addf %24, %25 : vector<2x16xf32>
    %27 = vector.extract_strided_slice %14 {offsets = [0, 48], sizes = [2, 16], strides = [1, 1]} : vector<2x64xf32> to vector<2x16xf32>
    %28 = arith.addf %26, %27 : vector<2x16xf32>
    %cst_11 = arith.constant dense<0.000000e+00> : vector<16xf32>
    %29 = vector.multi_reduction <add>, %21, %cst_11 [0] : vector<2x16xf32> to vector<16xf32>
    %30 = vector.shape_cast %29 : vector<16xf32> to vector<1x16xf32>
    %c0_12 = arith.constant 0 : index
    %c0_13 = arith.constant 0 : index
    %31 = vector.load %arg5[%c0_12, %c0_13] : memref<1x16xf32, #tpu.memory_space<vmem>>, vector<1x16xf32>
    tpu.vector_store %arg5[%c0_12, %c0_13], %30 {strides = array<i32>} : memref<1x16xf32, #tpu.memory_space<vmem>>, vector<1x16xf32>,
    %cst_14 = arith.constant dense<0.000000e+00> : vector<16xf32>
    %32 = vector.multi_reduction <add>, %28, %cst_14 [0] : vector<2x16xf32> to vector<16xf32>
    %33 = vector.shape_cast %32 : vector<16xf32> to vector<1x16xf32>
    %c0_15 = arith.constant 0 : index
    %c0_16 = arith.constant 0 : index
    %34 = vector.load %arg6[%c0_15, %c0_16] : memref<1x16xf32, #tpu.memory_space<vmem>>, vector<1x16xf32>
    tpu.vector_store %arg6[%c0_15, %c0_16], %33 {strides = array<i32>} : memref<1x16xf32, #tpu.memory_space<vmem>>, vector<1x16xf32>,
    return
  }
}

module attributes {stable_mosaic.version = 11 : i64} {
  func.func @_deconv_kernel(%arg0: i32, %arg1: memref<8x16xbf16, #tpu.memory_space<vmem>>, %arg2: memref<4x16x256xbf16, #tpu.memory_space<vmem>>, %arg3: memref<1x16xf32, #tpu.memory_space<vmem>>, %arg4: memref<1x16xf32, #tpu.memory_space<vmem>>, %arg5: memref<1x8x256xbf16, #tpu.memory_space<vmem>>, %arg6: memref<1x1x64xf32, #tpu.memory_space<vmem>>, %arg7: memref<1x1x64xf32, #tpu.memory_space<vmem>>) attributes {dimension_semantics = [#tpu.dimension_semantics<parallel>], iteration_bounds = array<i64: 1>, scalar_prefetch = 0 : i64, scratch_operands = 0 : i64, tpu.core_type = #tpu.core_type<tc>, window_params = [{transform_indices = @transform_0, window_bounds = array<i64: 8, 16>}, {pipeline_mode = #tpu.pipeline_mode<synchronous>, transform_indices = @transform_1, window_bounds = array<i64: 4, 16, 256>}, {pipeline_mode = #tpu.pipeline_mode<synchronous>, transform_indices = @transform_2, window_bounds = array<i64: 1, 16>}, {pipeline_mode = #tpu.pipeline_mode<synchronous>, transform_indices = @transform_3, window_bounds = array<i64: 1, 16>}, {transform_indices = @transform_4, window_bounds = array<i64: 1, 8, 256>}, {transform_indices = @transform_5, window_bounds = array<i64: 1, 1, 64>}, {transform_indices = @transform_6, window_bounds = array<i64: 1, 1, 64>}]} {
    %c0 = arith.constant 0 : index
    %c0_0 = arith.constant 0 : index
    %0 = vector.load %arg1[%c0, %c0_0] : memref<8x16xbf16, #tpu.memory_space<vmem>>, vector<8x16xbf16>
    %1 = arith.extf %0 : vector<8x16xbf16> to vector<8x16xf32>
    %c0_1 = arith.constant 0 : index
    %c0_2 = arith.constant 0 : index
    %2 = vector.load %arg3[%c0_1, %c0_2] : memref<1x16xf32, #tpu.memory_space<vmem>>, vector<1x16xf32>
    %3 = vector.broadcast %2 : vector<1x16xf32> to vector<8x16xf32>
    %4 = arith.mulf %1, %3 : vector<8x16xf32>
    %c0_3 = arith.constant 0 : index
    %c0_4 = arith.constant 0 : index
    %5 = vector.load %arg4[%c0_3, %c0_4] : memref<1x16xf32, #tpu.memory_space<vmem>>, vector<1x16xf32>
    %6 = vector.broadcast %5 : vector<1x16xf32> to vector<8x16xf32>
    %7 = arith.addf %4, %6 : vector<8x16xf32>
    %cst = arith.constant 0.000000e+00 : f32
    %8 = vector.broadcast %cst : f32 to vector<8x16xf32>
    %9 = arith.maximumf %7, %8 : vector<8x16xf32>
    %10 = tpu.iota {dimensions = array<i32: 0>} : vector<8x1xi32>
    %c1_i32 = arith.constant 1 : i32
    %11 = vector.broadcast %c1_i32 : i32 to vector<8x1xi32>
    %12 = arith.andi %10, %11 : vector<8x1xi32>
    %c1_i32_5 = arith.constant 1 : i32
    %13 = vector.broadcast %c1_i32_5 : i32 to vector<8x1xi32>
    %14 = arith.shrsi %10, %13 : vector<8x1xi32>
    %c1_i32_6 = arith.constant 1 : i32
    %15 = vector.broadcast %c1_i32_6 : i32 to vector<8x1xi32>
    %16 = arith.andi %14, %15 : vector<8x1xi32>
    %17 = arith.truncf %9 : vector<8x16xf32> to vector<8x16xbf16>
    %c0_i32 = arith.constant 0 : i32
    %18 = vector.broadcast %c0_i32 : i32 to vector<8x1xi32>
    %19 = arith.cmpi eq, %16, %18 : vector<8x1xi32>
    %c2_i32 = arith.constant 2 : i32
    %20 = tpu.dynamic_rotate %9 by %c2_i32 dim 0 : vector<8x16xf32>, i32 -> vector<8x16xf32>
    %cst_7 = arith.constant 0.000000e+00 : f32
    %21 = vector.shape_cast %19 : vector<8x1xi1> to vector<8x1xi1>
    %22 = vector.broadcast %21 : vector<8x1xi1> to vector<8x16xi1>
    %23 = vector.broadcast %cst_7 : f32 to vector<8x16xf32>
    %24 = arith.select %22, %23, %20 : vector<8x16xi1>, vector<8x16xf32>
    %25 = arith.truncf %24 : vector<8x16xf32> to vector<8x16xbf16>
    %c1_i32_8 = arith.constant 1 : i32
    %26 = vector.broadcast %c1_i32_8 : i32 to vector<8x1xi32>
    %27 = arith.cmpi eq, %16, %26 : vector<8x1xi32>
    %c6_i32 = arith.constant 6 : i32
    %28 = tpu.dynamic_rotate %9 by %c6_i32 dim 0 : vector<8x16xf32>, i32 -> vector<8x16xf32>
    %cst_9 = arith.constant 0.000000e+00 : f32
    %29 = vector.shape_cast %27 : vector<8x1xi1> to vector<8x1xi1>
    %30 = vector.broadcast %29 : vector<8x1xi1> to vector<8x16xi1>
    %31 = vector.broadcast %cst_9 : f32 to vector<8x16xf32>
    %32 = arith.select %30, %31, %28 : vector<8x16xi1>, vector<8x16xf32>
    %33 = arith.truncf %32 : vector<8x16xf32> to vector<8x16xbf16>
    %c1 = arith.constant 1 : index
    %c0_10 = arith.constant 0 : index
    %c0_11 = arith.constant 0 : index
    %34 = vector.load %arg2[%c1, %c0_10, %c0_11] : memref<4x16x256xbf16, #tpu.memory_space<vmem>>, vector<1x16x256xbf16>
    %35 = vector.shape_cast %34 : vector<1x16x256xbf16> to vector<16x256xbf16>
    %cst_12 = arith.constant dense<0.000000e+00> : vector<8x256xf32>
    %36 = tpu.matmul %17, %35, %cst_12 {dimension_numbers = #tpu.dot_dimension_numbers<[1], [0], [0], [1], [0, 0, 1, 1], [], []>} : vector<8x16xbf16>, vector<16x256xbf16>, vector<8x256xf32> -> vector<8x256xf32>
    %c3 = arith.constant 3 : index
    %c0_13 = arith.constant 0 : index
    %c0_14 = arith.constant 0 : index
    %37 = vector.load %arg2[%c3, %c0_13, %c0_14] : memref<4x16x256xbf16, #tpu.memory_space<vmem>>, vector<1x16x256xbf16>
    %38 = vector.shape_cast %37 : vector<1x16x256xbf16> to vector<16x256xbf16>
    %cst_15 = arith.constant dense<0.000000e+00> : vector<8x256xf32>
    %39 = tpu.matmul %25, %38, %cst_15 {dimension_numbers = #tpu.dot_dimension_numbers<[1], [0], [0], [1], [0, 0, 1, 1], [], []>} : vector<8x16xbf16>, vector<16x256xbf16>, vector<8x256xf32> -> vector<8x256xf32>
    %40 = arith.addf %36, %39 : vector<8x256xf32>
    %c2 = arith.constant 2 : index
    %c0_16 = arith.constant 0 : index
    %c0_17 = arith.constant 0 : index
    %41 = vector.load %arg2[%c2, %c0_16, %c0_17] : memref<4x16x256xbf16, #tpu.memory_space<vmem>>, vector<1x16x256xbf16>
    %42 = vector.shape_cast %41 : vector<1x16x256xbf16> to vector<16x256xbf16>
    %cst_18 = arith.constant dense<0.000000e+00> : vector<8x256xf32>
    %43 = tpu.matmul %17, %42, %cst_18 {dimension_numbers = #tpu.dot_dimension_numbers<[1], [0], [0], [1], [0, 0, 1, 1], [], []>} : vector<8x16xbf16>, vector<16x256xbf16>, vector<8x256xf32> -> vector<8x256xf32>
    %c0_19 = arith.constant 0 : index
    %c0_20 = arith.constant 0 : index
    %c0_21 = arith.constant 0 : index
    %44 = vector.load %arg2[%c0_19, %c0_20, %c0_21] : memref<4x16x256xbf16, #tpu.memory_space<vmem>>, vector<1x16x256xbf16>
    %45 = vector.shape_cast %44 : vector<1x16x256xbf16> to vector<16x256xbf16>
    %cst_22 = arith.constant dense<0.000000e+00> : vector<8x256xf32>
    %46 = tpu.matmul %33, %45, %cst_22 {dimension_numbers = #tpu.dot_dimension_numbers<[1], [0], [0], [1], [0, 0, 1, 1], [], []>} : vector<8x16xbf16>, vector<16x256xbf16>, vector<8x256xf32> -> vector<8x256xf32>
    %47 = arith.addf %43, %46 : vector<8x256xf32>
    %48 = vector.extract_strided_slice %40 {offsets = [0, 64], sizes = [8, 64], strides = [1, 1]} : vector<8x256xf32> to vector<8x64xf32>
    %49 = vector.extract_strided_slice %40 {offsets = [0, 192], sizes = [8, 64], strides = [1, 1]} : vector<8x256xf32> to vector<8x64xf32>
    %c0_i32_23 = arith.constant 0 : i32
    %50 = vector.broadcast %c0_i32_23 : i32 to vector<8x1xi32>
    %51 = arith.cmpi eq, %12, %50 : vector<8x1xi32>
    %c1_i32_24 = arith.constant 1 : i32
    %52 = tpu.dynamic_rotate %49 by %c1_i32_24 dim 0 : vector<8x64xf32>, i32 -> vector<8x64xf32>
    %cst_25 = arith.constant 0.000000e+00 : f32
    %53 = vector.shape_cast %51 : vector<8x1xi1> to vector<8x1xi1>
    %54 = vector.broadcast %53 : vector<8x1xi1> to vector<8x64xi1>
    %55 = vector.broadcast %cst_25 : f32 to vector<8x64xf32>
    %56 = arith.select %54, %55, %52 : vector<8x64xi1>, vector<8x64xf32>
    %57 = arith.addf %48, %56 : vector<8x64xf32>
    %58 = vector.extract_strided_slice %40 {offsets = [0, 128], sizes = [8, 64], strides = [1, 1]} : vector<8x256xf32> to vector<8x64xf32>
    %59 = vector.extract_strided_slice %40 {offsets = [0, 0], sizes = [8, 64], strides = [1, 1]} : vector<8x256xf32> to vector<8x64xf32>
    %c1_i32_26 = arith.constant 1 : i32
    %60 = vector.broadcast %c1_i32_26 : i32 to vector<8x1xi32>
    %61 = arith.cmpi eq, %12, %60 : vector<8x1xi32>
    %c7_i32 = arith.constant 7 : i32
    %62 = tpu.dynamic_rotate %59 by %c7_i32 dim 0 : vector<8x64xf32>, i32 -> vector<8x64xf32>
    %cst_27 = arith.constant 0.000000e+00 : f32
    %63 = vector.shape_cast %61 : vector<8x1xi1> to vector<8x1xi1>
    %64 = vector.broadcast %63 : vector<8x1xi1> to vector<8x64xi1>
    %65 = vector.broadcast %cst_27 : f32 to vector<8x64xf32>
    %66 = arith.select %64, %65, %62 : vector<8x64xi1>, vector<8x64xf32>
    %67 = arith.addf %58, %66 : vector<8x64xf32>
    %68 = vector.extract_strided_slice %47 {offsets = [0, 64], sizes = [8, 64], strides = [1, 1]} : vector<8x256xf32> to vector<8x64xf32>
    %69 = vector.extract_strided_slice %47 {offsets = [0, 192], sizes = [8, 64], strides = [1, 1]} : vector<8x256xf32> to vector<8x64xf32>
    %c0_i32_28 = arith.constant 0 : i32
    %70 = vector.broadcast %c0_i32_28 : i32 to vector<8x1xi32>
    %71 = arith.cmpi eq, %12, %70 : vector<8x1xi32>
    %c1_i32_29 = arith.constant 1 : i32
    %72 = tpu.dynamic_rotate %69 by %c1_i32_29 dim 0 : vector<8x64xf32>, i32 -> vector<8x64xf32>
    %cst_30 = arith.constant 0.000000e+00 : f32
    %73 = vector.shape_cast %71 : vector<8x1xi1> to vector<8x1xi1>
    %74 = vector.broadcast %73 : vector<8x1xi1> to vector<8x64xi1>
    %75 = vector.broadcast %cst_30 : f32 to vector<8x64xf32>
    %76 = arith.select %74, %75, %72 : vector<8x64xi1>, vector<8x64xf32>
    %77 = arith.addf %68, %76 : vector<8x64xf32>
    %78 = vector.extract_strided_slice %47 {offsets = [0, 128], sizes = [8, 64], strides = [1, 1]} : vector<8x256xf32> to vector<8x64xf32>
    %79 = vector.extract_strided_slice %47 {offsets = [0, 0], sizes = [8, 64], strides = [1, 1]} : vector<8x256xf32> to vector<8x64xf32>
    %c1_i32_31 = arith.constant 1 : i32
    %80 = vector.broadcast %c1_i32_31 : i32 to vector<8x1xi32>
    %81 = arith.cmpi eq, %12, %80 : vector<8x1xi32>
    %c7_i32_32 = arith.constant 7 : i32
    %82 = tpu.dynamic_rotate %79 by %c7_i32_32 dim 0 : vector<8x64xf32>, i32 -> vector<8x64xf32>
    %cst_33 = arith.constant 0.000000e+00 : f32
    %83 = vector.shape_cast %81 : vector<8x1xi1> to vector<8x1xi1>
    %84 = vector.broadcast %83 : vector<8x1xi1> to vector<8x64xi1>
    %85 = vector.broadcast %cst_33 : f32 to vector<8x64xf32>
    %86 = arith.select %84, %85, %82 : vector<8x64xi1>, vector<8x64xf32>
    %87 = arith.addf %78, %86 : vector<8x64xf32>
    %88 = arith.addf %57, %67 : vector<8x64xf32>
    %89 = arith.addf %88, %77 : vector<8x64xf32>
    %90 = arith.addf %89, %87 : vector<8x64xf32>
    %cst_34 = arith.constant dense<0.000000e+00> : vector<64xf32>
    %91 = vector.multi_reduction <add>, %90, %cst_34 [0] : vector<8x64xf32> to vector<64xf32>
    %92 = vector.shape_cast %91 : vector<64xf32> to vector<1x64xf32>
    %c0_35 = arith.constant 0 : index
    %c0_36 = arith.constant 0 : index
    %c0_37 = arith.constant 0 : index
    %93 = vector.load %arg6[%c0_35, %c0_36, %c0_37] : memref<1x1x64xf32, #tpu.memory_space<vmem>>, vector<1x1x64xf32>
    %94 = vector.shape_cast %93 : vector<1x1x64xf32> to vector<1x64xf32>
    %95 = vector.shape_cast %92 : vector<1x64xf32> to vector<1x1x64xf32>
    tpu.vector_store %arg6[%c0_35, %c0_36, %c0_37], %95 {strides = array<i32>} : memref<1x1x64xf32, #tpu.memory_space<vmem>>, vector<1x1x64xf32>,
    %96 = arith.mulf %57, %57 : vector<8x64xf32>
    %97 = arith.mulf %67, %67 : vector<8x64xf32>
    %98 = arith.addf %96, %97 : vector<8x64xf32>
    %99 = arith.mulf %77, %77 : vector<8x64xf32>
    %100 = arith.addf %98, %99 : vector<8x64xf32>
    %101 = arith.mulf %87, %87 : vector<8x64xf32>
    %102 = arith.addf %100, %101 : vector<8x64xf32>
    %cst_38 = arith.constant dense<0.000000e+00> : vector<64xf32>
    %103 = vector.multi_reduction <add>, %102, %cst_38 [0] : vector<8x64xf32> to vector<64xf32>
    %104 = vector.shape_cast %103 : vector<64xf32> to vector<1x64xf32>
    %c0_39 = arith.constant 0 : index
    %c0_40 = arith.constant 0 : index
    %c0_41 = arith.constant 0 : index
    %105 = vector.load %arg7[%c0_39, %c0_40, %c0_41] : memref<1x1x64xf32, #tpu.memory_space<vmem>>, vector<1x1x64xf32>
    %106 = vector.shape_cast %105 : vector<1x1x64xf32> to vector<1x64xf32>
    %107 = vector.shape_cast %104 : vector<1x64xf32> to vector<1x1x64xf32>
    tpu.vector_store %arg7[%c0_39, %c0_40, %c0_41], %107 {strides = array<i32>} : memref<1x1x64xf32, #tpu.memory_space<vmem>>, vector<1x1x64xf32>,
    %108 = arith.truncf %57 : vector<8x64xf32> to vector<8x64xbf16>
    %c0_42 = arith.constant 0 : index
    %c0_43 = arith.constant 0 : index
    %c0_44 = arith.constant 0 : index
    %109 = vector.load %arg5[%c0_42, %c0_43, %c0_44] : memref<1x8x256xbf16, #tpu.memory_space<vmem>>, vector<1x8x64xbf16>
    %110 = vector.shape_cast %109 : vector<1x8x64xbf16> to vector<8x64xbf16>
    %111 = vector.shape_cast %108 : vector<8x64xbf16> to vector<1x8x64xbf16>
    tpu.vector_store %arg5[%c0_42, %c0_43, %c0_44], %111 {strides = array<i32>} : memref<1x8x256xbf16, #tpu.memory_space<vmem>>, vector<1x8x64xbf16>,
    %112 = arith.truncf %67 : vector<8x64xf32> to vector<8x64xbf16>
    %c0_45 = arith.constant 0 : index
    %c0_46 = arith.constant 0 : index
    %c64 = arith.constant 64 : index
    %113 = vector.load %arg5[%c0_45, %c0_46, %c64] : memref<1x8x256xbf16, #tpu.memory_space<vmem>>, vector<1x8x64xbf16>
    %114 = vector.shape_cast %113 : vector<1x8x64xbf16> to vector<8x64xbf16>
    %115 = vector.shape_cast %112 : vector<8x64xbf16> to vector<1x8x64xbf16>
    tpu.vector_store %arg5[%c0_45, %c0_46, %c64], %115 {strides = array<i32>} : memref<1x8x256xbf16, #tpu.memory_space<vmem>>, vector<1x8x64xbf16>,
    %116 = arith.truncf %77 : vector<8x64xf32> to vector<8x64xbf16>
    %c0_47 = arith.constant 0 : index
    %c0_48 = arith.constant 0 : index
    %c128 = arith.constant 128 : index
    %117 = vector.load %arg5[%c0_47, %c0_48, %c128] : memref<1x8x256xbf16, #tpu.memory_space<vmem>>, vector<1x8x64xbf16>
    %118 = vector.shape_cast %117 : vector<1x8x64xbf16> to vector<8x64xbf16>
    %119 = vector.shape_cast %116 : vector<8x64xbf16> to vector<1x8x64xbf16>
    tpu.vector_store %arg5[%c0_47, %c0_48, %c128], %119 {strides = array<i32>} : memref<1x8x256xbf16, #tpu.memory_space<vmem>>, vector<1x8x64xbf16>,
    %120 = arith.truncf %87 : vector<8x64xf32> to vector<8x64xbf16>
    %c0_49 = arith.constant 0 : index
    %c0_50 = arith.constant 0 : index
    %c192 = arith.constant 192 : index
    %121 = vector.load %arg5[%c0_49, %c0_50, %c192] : memref<1x8x256xbf16, #tpu.memory_space<vmem>>, vector<1x8x64xbf16>
    %122 = vector.shape_cast %121 : vector<1x8x64xbf16> to vector<8x64xbf16>
    %123 = vector.shape_cast %120 : vector<8x64xbf16> to vector<1x8x64xbf16>
    tpu.vector_store %arg5[%c0_49, %c0_50, %c192], %123 {strides = array<i32>} : memref<1x8x256xbf16, #tpu.memory_space<vmem>>, vector<1x8x64xbf16>,
    return
  }
  func.func @transform_0(%arg0: i32) -> (i32, i32) {
    %c0_i32 = arith.constant 0 : i32
    %c0_i32_0 = arith.constant 0 : i32
    return %arg0, %c0_i32 : i32, i32
  }
  func.func @transform_1(%arg0: i32) -> (i32, i32, i32) {
    %c0_i32 = arith.constant 0 : i32
    %c0_i32_0 = arith.constant 0 : i32
    %c0_i32_1 = arith.constant 0 : i32
    %c0_i32_2 = arith.constant 0 : i32
    return %c0_i32, %c0_i32_0, %c0_i32_1 : i32, i32, i32
  }
  func.func @transform_2(%arg0: i32) -> (i32, i32) {
    %c0_i32 = arith.constant 0 : i32
    %c0_i32_0 = arith.constant 0 : i32
    %c0_i32_1 = arith.constant 0 : i32
    return %c0_i32, %c0_i32_0 : i32, i32
  }
  func.func @transform_3(%arg0: i32) -> (i32, i32) {
    %c0_i32 = arith.constant 0 : i32
    %c0_i32_0 = arith.constant 0 : i32
    %c0_i32_1 = arith.constant 0 : i32
    return %c0_i32, %c0_i32_0 : i32, i32
  }
  func.func @transform_4(%arg0: i32) -> (i32, i32, i32) {
    %c0_i32 = arith.constant 0 : i32
    %c0_i32_0 = arith.constant 0 : i32
    %c0_i32_1 = arith.constant 0 : i32
    return %arg0, %c0_i32, %c0_i32_0 : i32, i32, i32
  }
  func.func @transform_5(%arg0: i32) -> (i32, i32, i32) {
    %c0_i32 = arith.constant 0 : i32
    %c0_i32_0 = arith.constant 0 : i32
    %c0_i32_1 = arith.constant 0 : i32
    return %arg0, %c0_i32, %c0_i32_0 : i32, i32, i32
  }
  func.func @transform_6(%arg0: i32) -> (i32, i32, i32) {
    %c0_i32 = arith.constant 0 : i32
    %c0_i32_0 = arith.constant 0 : i32
    %c0_i32_1 = arith.constant 0 : i32
    return %arg0, %c0_i32, %c0_i32_0 : i32, i32, i32
  }
}

module attributes {stable_mosaic.version = 11 : i64} {
  func.func @_deconv_kernel(%arg0: i32, %arg1: memref<16x64xbf16, #tpu.memory_space<vmem>>, %arg2: memref<4x64x128xbf16, #tpu.memory_space<vmem>>, %arg3: memref<1x64xf32, #tpu.memory_space<vmem>>, %arg4: memref<1x64xf32, #tpu.memory_space<vmem>>, %arg5: memref<1x16x128xbf16, #tpu.memory_space<vmem>>, %arg6: memref<1x1x32xf32, #tpu.memory_space<vmem>>, %arg7: memref<1x1x32xf32, #tpu.memory_space<vmem>>) attributes {dimension_semantics = [#tpu.dimension_semantics<parallel>], iteration_bounds = array<i64: 2>, scalar_prefetch = 0 : i64, scratch_operands = 0 : i64, tpu.core_type = #tpu.core_type<tc>, window_params = [{transform_indices = @transform_0, window_bounds = array<i64: 16, 64>}, {pipeline_mode = #tpu.pipeline_mode<synchronous>, transform_indices = @transform_1, window_bounds = array<i64: 4, 64, 128>}, {pipeline_mode = #tpu.pipeline_mode<synchronous>, transform_indices = @transform_2, window_bounds = array<i64: 1, 64>}, {pipeline_mode = #tpu.pipeline_mode<synchronous>, transform_indices = @transform_3, window_bounds = array<i64: 1, 64>}, {transform_indices = @transform_4, window_bounds = array<i64: 1, 16, 128>}, {transform_indices = @transform_5, window_bounds = array<i64: 1, 1, 32>}, {transform_indices = @transform_6, window_bounds = array<i64: 1, 1, 32>}]} {
    %c0 = arith.constant 0 : index
    %c0_0 = arith.constant 0 : index
    %0 = vector.load %arg1[%c0, %c0_0] : memref<16x64xbf16, #tpu.memory_space<vmem>>, vector<16x64xbf16>
    %1 = arith.extf %0 : vector<16x64xbf16> to vector<16x64xf32>
    %c0_1 = arith.constant 0 : index
    %c0_2 = arith.constant 0 : index
    %2 = vector.load %arg3[%c0_1, %c0_2] : memref<1x64xf32, #tpu.memory_space<vmem>>, vector<1x64xf32>
    %3 = vector.broadcast %2 : vector<1x64xf32> to vector<16x64xf32>
    %4 = arith.mulf %1, %3 : vector<16x64xf32>
    %c0_3 = arith.constant 0 : index
    %c0_4 = arith.constant 0 : index
    %5 = vector.load %arg4[%c0_3, %c0_4] : memref<1x64xf32, #tpu.memory_space<vmem>>, vector<1x64xf32>
    %6 = vector.broadcast %5 : vector<1x64xf32> to vector<16x64xf32>
    %7 = arith.addf %4, %6 : vector<16x64xf32>
    %cst = arith.constant 0.000000e+00 : f32
    %8 = vector.broadcast %cst : f32 to vector<16x64xf32>
    %9 = arith.maximumf %7, %8 : vector<16x64xf32>
    %10 = tpu.iota {dimensions = array<i32: 0>} : vector<16x1xi32>
    %c3_i32 = arith.constant 3 : i32
    %11 = vector.broadcast %c3_i32 : i32 to vector<16x1xi32>
    %12 = arith.andi %10, %11 : vector<16x1xi32>
    %c2_i32 = arith.constant 2 : i32
    %13 = vector.broadcast %c2_i32 : i32 to vector<16x1xi32>
    %14 = arith.shrsi %10, %13 : vector<16x1xi32>
    %c3_i32_5 = arith.constant 3 : i32
    %15 = vector.broadcast %c3_i32_5 : i32 to vector<16x1xi32>
    %16 = arith.andi %14, %15 : vector<16x1xi32>
    %17 = arith.truncf %9 : vector<16x64xf32> to vector<16x64xbf16>
    %c0_i32 = arith.constant 0 : i32
    %18 = vector.broadcast %c0_i32 : i32 to vector<16x1xi32>
    %19 = arith.cmpi eq, %16, %18 : vector<16x1xi32>
    %c4_i32 = arith.constant 4 : i32
    %20 = tpu.dynamic_rotate %9 by %c4_i32 dim 0 : vector<16x64xf32>, i32 -> vector<16x64xf32>
    %cst_6 = arith.constant 0.000000e+00 : f32
    %21 = vector.shape_cast %19 : vector<16x1xi1> to vector<16x1xi1>
    %22 = vector.broadcast %21 : vector<16x1xi1> to vector<16x64xi1>
    %23 = vector.broadcast %cst_6 : f32 to vector<16x64xf32>
    %24 = arith.select %22, %23, %20 : vector<16x64xi1>, vector<16x64xf32>
    %25 = arith.truncf %24 : vector<16x64xf32> to vector<16x64xbf16>
    %c3_i32_7 = arith.constant 3 : i32
    %26 = vector.broadcast %c3_i32_7 : i32 to vector<16x1xi32>
    %27 = arith.cmpi eq, %16, %26 : vector<16x1xi32>
    %c12_i32 = arith.constant 12 : i32
    %28 = tpu.dynamic_rotate %9 by %c12_i32 dim 0 : vector<16x64xf32>, i32 -> vector<16x64xf32>
    %cst_8 = arith.constant 0.000000e+00 : f32
    %29 = vector.shape_cast %27 : vector<16x1xi1> to vector<16x1xi1>
    %30 = vector.broadcast %29 : vector<16x1xi1> to vector<16x64xi1>
    %31 = vector.broadcast %cst_8 : f32 to vector<16x64xf32>
    %32 = arith.select %30, %31, %28 : vector<16x64xi1>, vector<16x64xf32>
    %33 = arith.truncf %32 : vector<16x64xf32> to vector<16x64xbf16>
    %c1 = arith.constant 1 : index
    %c0_9 = arith.constant 0 : index
    %c0_10 = arith.constant 0 : index
    %34 = vector.load %arg2[%c1, %c0_9, %c0_10] : memref<4x64x128xbf16, #tpu.memory_space<vmem>>, vector<1x64x128xbf16>
    %35 = vector.shape_cast %34 : vector<1x64x128xbf16> to vector<64x128xbf16>
    %cst_11 = arith.constant dense<0.000000e+00> : vector<16x128xf32>
    %36 = tpu.matmul %17, %35, %cst_11 {dimension_numbers = #tpu.dot_dimension_numbers<[1], [0], [0], [1], [0, 0, 1, 1], [], []>} : vector<16x64xbf16>, vector<64x128xbf16>, vector<16x128xf32> -> vector<16x128xf32>
    %c3 = arith.constant 3 : index
    %c0_12 = arith.constant 0 : index
    %c0_13 = arith.constant 0 : index
    %37 = vector.load %arg2[%c3, %c0_12, %c0_13] : memref<4x64x128xbf16, #tpu.memory_space<vmem>>, vector<1x64x128xbf16>
    %38 = vector.shape_cast %37 : vector<1x64x128xbf16> to vector<64x128xbf16>
    %cst_14 = arith.constant dense<0.000000e+00> : vector<16x128xf32>
    %39 = tpu.matmul %25, %38, %cst_14 {dimension_numbers = #tpu.dot_dimension_numbers<[1], [0], [0], [1], [0, 0, 1, 1], [], []>} : vector<16x64xbf16>, vector<64x128xbf16>, vector<16x128xf32> -> vector<16x128xf32>
    %40 = arith.addf %36, %39 : vector<16x128xf32>
    %c2 = arith.constant 2 : index
    %c0_15 = arith.constant 0 : index
    %c0_16 = arith.constant 0 : index
    %41 = vector.load %arg2[%c2, %c0_15, %c0_16] : memref<4x64x128xbf16, #tpu.memory_space<vmem>>, vector<1x64x128xbf16>
    %42 = vector.shape_cast %41 : vector<1x64x128xbf16> to vector<64x128xbf16>
    %cst_17 = arith.constant dense<0.000000e+00> : vector<16x128xf32>
    %43 = tpu.matmul %17, %42, %cst_17 {dimension_numbers = #tpu.dot_dimension_numbers<[1], [0], [0], [1], [0, 0, 1, 1], [], []>} : vector<16x64xbf16>, vector<64x128xbf16>, vector<16x128xf32> -> vector<16x128xf32>
    %c0_18 = arith.constant 0 : index
    %c0_19 = arith.constant 0 : index
    %c0_20 = arith.constant 0 : index
    %44 = vector.load %arg2[%c0_18, %c0_19, %c0_20] : memref<4x64x128xbf16, #tpu.memory_space<vmem>>, vector<1x64x128xbf16>
    %45 = vector.shape_cast %44 : vector<1x64x128xbf16> to vector<64x128xbf16>
    %cst_21 = arith.constant dense<0.000000e+00> : vector<16x128xf32>
    %46 = tpu.matmul %33, %45, %cst_21 {dimension_numbers = #tpu.dot_dimension_numbers<[1], [0], [0], [1], [0, 0, 1, 1], [], []>} : vector<16x64xbf16>, vector<64x128xbf16>, vector<16x128xf32> -> vector<16x128xf32>
    %47 = arith.addf %43, %46 : vector<16x128xf32>
    %48 = vector.extract_strided_slice %40 {offsets = [0, 32], sizes = [16, 32], strides = [1, 1]} : vector<16x128xf32> to vector<16x32xf32>
    %49 = vector.extract_strided_slice %40 {offsets = [0, 96], sizes = [16, 32], strides = [1, 1]} : vector<16x128xf32> to vector<16x32xf32>
    %c0_i32_22 = arith.constant 0 : i32
    %50 = vector.broadcast %c0_i32_22 : i32 to vector<16x1xi32>
    %51 = arith.cmpi eq, %12, %50 : vector<16x1xi32>
    %c1_i32 = arith.constant 1 : i32
    %52 = tpu.dynamic_rotate %49 by %c1_i32 dim 0 : vector<16x32xf32>, i32 -> vector<16x32xf32>
    %cst_23 = arith.constant 0.000000e+00 : f32
    %53 = vector.shape_cast %51 : vector<16x1xi1> to vector<16x1xi1>
    %54 = vector.broadcast %53 : vector<16x1xi1> to vector<16x32xi1>
    %55 = vector.broadcast %cst_23 : f32 to vector<16x32xf32>
    %56 = arith.select %54, %55, %52 : vector<16x32xi1>, vector<16x32xf32>
    %57 = arith.addf %48, %56 : vector<16x32xf32>
    %58 = vector.extract_strided_slice %40 {offsets = [0, 64], sizes = [16, 32], strides = [1, 1]} : vector<16x128xf32> to vector<16x32xf32>
    %59 = vector.extract_strided_slice %40 {offsets = [0, 0], sizes = [16, 32], strides = [1, 1]} : vector<16x128xf32> to vector<16x32xf32>
    %c3_i32_24 = arith.constant 3 : i32
    %60 = vector.broadcast %c3_i32_24 : i32 to vector<16x1xi32>
    %61 = arith.cmpi eq, %12, %60 : vector<16x1xi32>
    %c15_i32 = arith.constant 15 : i32
    %62 = tpu.dynamic_rotate %59 by %c15_i32 dim 0 : vector<16x32xf32>, i32 -> vector<16x32xf32>
    %cst_25 = arith.constant 0.000000e+00 : f32
    %63 = vector.shape_cast %61 : vector<16x1xi1> to vector<16x1xi1>
    %64 = vector.broadcast %63 : vector<16x1xi1> to vector<16x32xi1>
    %65 = vector.broadcast %cst_25 : f32 to vector<16x32xf32>
    %66 = arith.select %64, %65, %62 : vector<16x32xi1>, vector<16x32xf32>
    %67 = arith.addf %58, %66 : vector<16x32xf32>
    %68 = vector.extract_strided_slice %47 {offsets = [0, 32], sizes = [16, 32], strides = [1, 1]} : vector<16x128xf32> to vector<16x32xf32>
    %69 = vector.extract_strided_slice %47 {offsets = [0, 96], sizes = [16, 32], strides = [1, 1]} : vector<16x128xf32> to vector<16x32xf32>
    %c0_i32_26 = arith.constant 0 : i32
    %70 = vector.broadcast %c0_i32_26 : i32 to vector<16x1xi32>
    %71 = arith.cmpi eq, %12, %70 : vector<16x1xi32>
    %c1_i32_27 = arith.constant 1 : i32
    %72 = tpu.dynamic_rotate %69 by %c1_i32_27 dim 0 : vector<16x32xf32>, i32 -> vector<16x32xf32>
    %cst_28 = arith.constant 0.000000e+00 : f32
    %73 = vector.shape_cast %71 : vector<16x1xi1> to vector<16x1xi1>
    %74 = vector.broadcast %73 : vector<16x1xi1> to vector<16x32xi1>
    %75 = vector.broadcast %cst_28 : f32 to vector<16x32xf32>
    %76 = arith.select %74, %75, %72 : vector<16x32xi1>, vector<16x32xf32>
    %77 = arith.addf %68, %76 : vector<16x32xf32>
    %78 = vector.extract_strided_slice %47 {offsets = [0, 64], sizes = [16, 32], strides = [1, 1]} : vector<16x128xf32> to vector<16x32xf32>
    %79 = vector.extract_strided_slice %47 {offsets = [0, 0], sizes = [16, 32], strides = [1, 1]} : vector<16x128xf32> to vector<16x32xf32>
    %c3_i32_29 = arith.constant 3 : i32
    %80 = vector.broadcast %c3_i32_29 : i32 to vector<16x1xi32>
    %81 = arith.cmpi eq, %12, %80 : vector<16x1xi32>
    %c15_i32_30 = arith.constant 15 : i32
    %82 = tpu.dynamic_rotate %79 by %c15_i32_30 dim 0 : vector<16x32xf32>, i32 -> vector<16x32xf32>
    %cst_31 = arith.constant 0.000000e+00 : f32
    %83 = vector.shape_cast %81 : vector<16x1xi1> to vector<16x1xi1>
    %84 = vector.broadcast %83 : vector<16x1xi1> to vector<16x32xi1>
    %85 = vector.broadcast %cst_31 : f32 to vector<16x32xf32>
    %86 = arith.select %84, %85, %82 : vector<16x32xi1>, vector<16x32xf32>
    %87 = arith.addf %78, %86 : vector<16x32xf32>
    %88 = arith.addf %57, %67 : vector<16x32xf32>
    %89 = arith.addf %88, %77 : vector<16x32xf32>
    %90 = arith.addf %89, %87 : vector<16x32xf32>
    %cst_32 = arith.constant dense<0.000000e+00> : vector<32xf32>
    %91 = vector.multi_reduction <add>, %90, %cst_32 [0] : vector<16x32xf32> to vector<32xf32>
    %92 = vector.shape_cast %91 : vector<32xf32> to vector<1x32xf32>
    %c0_33 = arith.constant 0 : index
    %c0_34 = arith.constant 0 : index
    %c0_35 = arith.constant 0 : index
    %93 = vector.load %arg6[%c0_33, %c0_34, %c0_35] : memref<1x1x32xf32, #tpu.memory_space<vmem>>, vector<1x1x32xf32>
    %94 = vector.shape_cast %93 : vector<1x1x32xf32> to vector<1x32xf32>
    %95 = vector.shape_cast %92 : vector<1x32xf32> to vector<1x1x32xf32>
    tpu.vector_store %arg6[%c0_33, %c0_34, %c0_35], %95 {strides = array<i32>} : memref<1x1x32xf32, #tpu.memory_space<vmem>>, vector<1x1x32xf32>,
    %96 = arith.mulf %57, %57 : vector<16x32xf32>
    %97 = arith.mulf %67, %67 : vector<16x32xf32>
    %98 = arith.addf %96, %97 : vector<16x32xf32>
    %99 = arith.mulf %77, %77 : vector<16x32xf32>
    %100 = arith.addf %98, %99 : vector<16x32xf32>
    %101 = arith.mulf %87, %87 : vector<16x32xf32>
    %102 = arith.addf %100, %101 : vector<16x32xf32>
    %cst_36 = arith.constant dense<0.000000e+00> : vector<32xf32>
    %103 = vector.multi_reduction <add>, %102, %cst_36 [0] : vector<16x32xf32> to vector<32xf32>
    %104 = vector.shape_cast %103 : vector<32xf32> to vector<1x32xf32>
    %c0_37 = arith.constant 0 : index
    %c0_38 = arith.constant 0 : index
    %c0_39 = arith.constant 0 : index
    %105 = vector.load %arg7[%c0_37, %c0_38, %c0_39] : memref<1x1x32xf32, #tpu.memory_space<vmem>>, vector<1x1x32xf32>
    %106 = vector.shape_cast %105 : vector<1x1x32xf32> to vector<1x32xf32>
    %107 = vector.shape_cast %104 : vector<1x32xf32> to vector<1x1x32xf32>
    tpu.vector_store %arg7[%c0_37, %c0_38, %c0_39], %107 {strides = array<i32>} : memref<1x1x32xf32, #tpu.memory_space<vmem>>, vector<1x1x32xf32>,
    %108 = arith.truncf %57 : vector<16x32xf32> to vector<16x32xbf16>
    %c0_40 = arith.constant 0 : index
    %c0_41 = arith.constant 0 : index
    %c0_42 = arith.constant 0 : index
    %109 = vector.load %arg5[%c0_40, %c0_41, %c0_42] : memref<1x16x128xbf16, #tpu.memory_space<vmem>>, vector<1x16x32xbf16>
    %110 = vector.shape_cast %109 : vector<1x16x32xbf16> to vector<16x32xbf16>
    %111 = vector.shape_cast %108 : vector<16x32xbf16> to vector<1x16x32xbf16>
    tpu.vector_store %arg5[%c0_40, %c0_41, %c0_42], %111 {strides = array<i32>} : memref<1x16x128xbf16, #tpu.memory_space<vmem>>, vector<1x16x32xbf16>,
    %112 = arith.truncf %67 : vector<16x32xf32> to vector<16x32xbf16>
    %c0_43 = arith.constant 0 : index
    %c0_44 = arith.constant 0 : index
    %c32 = arith.constant 32 : index
    %113 = vector.load %arg5[%c0_43, %c0_44, %c32] : memref<1x16x128xbf16, #tpu.memory_space<vmem>>, vector<1x16x32xbf16>
    %114 = vector.shape_cast %113 : vector<1x16x32xbf16> to vector<16x32xbf16>
    %115 = vector.shape_cast %112 : vector<16x32xbf16> to vector<1x16x32xbf16>
    tpu.vector_store %arg5[%c0_43, %c0_44, %c32], %115 {strides = array<i32>} : memref<1x16x128xbf16, #tpu.memory_space<vmem>>, vector<1x16x32xbf16>,
    %116 = arith.truncf %77 : vector<16x32xf32> to vector<16x32xbf16>
    %c0_45 = arith.constant 0 : index
    %c0_46 = arith.constant 0 : index
    %c64 = arith.constant 64 : index
    %117 = vector.load %arg5[%c0_45, %c0_46, %c64] : memref<1x16x128xbf16, #tpu.memory_space<vmem>>, vector<1x16x32xbf16>
    %118 = vector.shape_cast %117 : vector<1x16x32xbf16> to vector<16x32xbf16>
    %119 = vector.shape_cast %116 : vector<16x32xbf16> to vector<1x16x32xbf16>
    tpu.vector_store %arg5[%c0_45, %c0_46, %c64], %119 {strides = array<i32>} : memref<1x16x128xbf16, #tpu.memory_space<vmem>>, vector<1x16x32xbf16>,
    %120 = arith.truncf %87 : vector<16x32xf32> to vector<16x32xbf16>
    %c0_47 = arith.constant 0 : index
    %c0_48 = arith.constant 0 : index
    %c96 = arith.constant 96 : index
    %121 = vector.load %arg5[%c0_47, %c0_48, %c96] : memref<1x16x128xbf16, #tpu.memory_space<vmem>>, vector<1x16x32xbf16>
    %122 = vector.shape_cast %121 : vector<1x16x32xbf16> to vector<16x32xbf16>
    %123 = vector.shape_cast %120 : vector<16x32xbf16> to vector<1x16x32xbf16>
    tpu.vector_store %arg5[%c0_47, %c0_48, %c96], %123 {strides = array<i32>} : memref<1x16x128xbf16, #tpu.memory_space<vmem>>, vector<1x16x32xbf16>,
    return
  }
  func.func @transform_0(%arg0: i32) -> (i32, i32) {
    %c0_i32 = arith.constant 0 : i32
    %c0_i32_0 = arith.constant 0 : i32
    return %arg0, %c0_i32 : i32, i32
  }
  func.func @transform_1(%arg0: i32) -> (i32, i32, i32) {
    %c0_i32 = arith.constant 0 : i32
    %c0_i32_0 = arith.constant 0 : i32
    %c0_i32_1 = arith.constant 0 : i32
    %c0_i32_2 = arith.constant 0 : i32
    return %c0_i32, %c0_i32_0, %c0_i32_1 : i32, i32, i32
  }
  func.func @transform_2(%arg0: i32) -> (i32, i32) {
    %c0_i32 = arith.constant 0 : i32
    %c0_i32_0 = arith.constant 0 : i32
    %c0_i32_1 = arith.constant 0 : i32
    return %c0_i32, %c0_i32_0 : i32, i32
  }
  func.func @transform_3(%arg0: i32) -> (i32, i32) {
    %c0_i32 = arith.constant 0 : i32
    %c0_i32_0 = arith.constant 0 : i32
    %c0_i32_1 = arith.constant 0 : i32
    return %c0_i32, %c0_i32_0 : i32, i32
  }
  func.func @transform_4(%arg0: i32) -> (i32, i32, i32) {
    %c0_i32 = arith.constant 0 : i32
    %c0_i32_0 = arith.constant 0 : i32
    %c0_i32_1 = arith.constant 0 : i32
    return %arg0, %c0_i32, %c0_i32_0 : i32, i32, i32
  }
  func.func @transform_5(%arg0: i32) -> (i32, i32, i32) {
    %c0_i32 = arith.constant 0 : i32
    %c0_i32_0 = arith.constant 0 : i32
    %c0_i32_1 = arith.constant 0 : i32
    return %arg0, %c0_i32, %c0_i32_0 : i32, i32, i32
  }
  func.func @transform_6(%arg0: i32) -> (i32, i32, i32) {
    %c0_i32 = arith.constant 0 : i32
    %c0_i32_0 = arith.constant 0 : i32
    %c0_i32_1 = arith.constant 0 : i32
    return %arg0, %c0_i32, %c0_i32_0 : i32, i32, i32
  }
}

module attributes {stable_mosaic.version = 11 : i64} {
  func.func @_deconv_kernel(%arg0: i32, %arg1: memref<64x32xbf16, #tpu.memory_space<vmem>>, %arg2: memref<4x32x32xbf16, #tpu.memory_space<vmem>>, %arg3: memref<1x32xf32, #tpu.memory_space<vmem>>, %arg4: memref<1x32xf32, #tpu.memory_space<vmem>>, %arg5: memref<1x64x32xbf16, #tpu.memory_space<vmem>>, %arg6: memref<1x1x8xf32, #tpu.memory_space<vmem>>, %arg7: memref<1x1x8xf32, #tpu.memory_space<vmem>>) attributes {dimension_semantics = [#tpu.dimension_semantics<parallel>], iteration_bounds = array<i64: 2>, scalar_prefetch = 0 : i64, scratch_operands = 0 : i64, tpu.core_type = #tpu.core_type<tc>, window_params = [{transform_indices = @transform_0, window_bounds = array<i64: 64, 32>}, {pipeline_mode = #tpu.pipeline_mode<synchronous>, transform_indices = @transform_1, window_bounds = array<i64: 4, 32, 32>}, {pipeline_mode = #tpu.pipeline_mode<synchronous>, transform_indices = @transform_2, window_bounds = array<i64: 1, 32>}, {pipeline_mode = #tpu.pipeline_mode<synchronous>, transform_indices = @transform_3, window_bounds = array<i64: 1, 32>}, {transform_indices = @transform_4, window_bounds = array<i64: 1, 64, 32>}, {transform_indices = @transform_5, window_bounds = array<i64: 1, 1, 8>}, {transform_indices = @transform_6, window_bounds = array<i64: 1, 1, 8>}]} {
    %c0 = arith.constant 0 : index
    %c0_0 = arith.constant 0 : index
    %0 = vector.load %arg1[%c0, %c0_0] : memref<64x32xbf16, #tpu.memory_space<vmem>>, vector<64x32xbf16>
    %1 = arith.extf %0 : vector<64x32xbf16> to vector<64x32xf32>
    %c0_1 = arith.constant 0 : index
    %c0_2 = arith.constant 0 : index
    %2 = vector.load %arg3[%c0_1, %c0_2] : memref<1x32xf32, #tpu.memory_space<vmem>>, vector<1x32xf32>
    %3 = vector.broadcast %2 : vector<1x32xf32> to vector<64x32xf32>
    %4 = arith.mulf %1, %3 : vector<64x32xf32>
    %c0_3 = arith.constant 0 : index
    %c0_4 = arith.constant 0 : index
    %5 = vector.load %arg4[%c0_3, %c0_4] : memref<1x32xf32, #tpu.memory_space<vmem>>, vector<1x32xf32>
    %6 = vector.broadcast %5 : vector<1x32xf32> to vector<64x32xf32>
    %7 = arith.addf %4, %6 : vector<64x32xf32>
    %cst = arith.constant 0.000000e+00 : f32
    %8 = vector.broadcast %cst : f32 to vector<64x32xf32>
    %9 = arith.maximumf %7, %8 : vector<64x32xf32>
    %10 = tpu.iota {dimensions = array<i32: 0>} : vector<64x1xi32>
    %c7_i32 = arith.constant 7 : i32
    %11 = vector.broadcast %c7_i32 : i32 to vector<64x1xi32>
    %12 = arith.andi %10, %11 : vector<64x1xi32>
    %c3_i32 = arith.constant 3 : i32
    %13 = vector.broadcast %c3_i32 : i32 to vector<64x1xi32>
    %14 = arith.shrsi %10, %13 : vector<64x1xi32>
    %c7_i32_5 = arith.constant 7 : i32
    %15 = vector.broadcast %c7_i32_5 : i32 to vector<64x1xi32>
    %16 = arith.andi %14, %15 : vector<64x1xi32>
    %17 = arith.truncf %9 : vector<64x32xf32> to vector<64x32xbf16>
    %c0_i32 = arith.constant 0 : i32
    %18 = vector.broadcast %c0_i32 : i32 to vector<64x1xi32>
    %19 = arith.cmpi eq, %16, %18 : vector<64x1xi32>
    %c8_i32 = arith.constant 8 : i32
    %20 = tpu.dynamic_rotate %9 by %c8_i32 dim 0 : vector<64x32xf32>, i32 -> vector<64x32xf32>
    %cst_6 = arith.constant 0.000000e+00 : f32
    %21 = vector.shape_cast %19 : vector<64x1xi1> to vector<64x1xi1>
    %22 = vector.broadcast %21 : vector<64x1xi1> to vector<64x32xi1>
    %23 = vector.broadcast %cst_6 : f32 to vector<64x32xf32>
    %24 = arith.select %22, %23, %20 : vector<64x32xi1>, vector<64x32xf32>
    %25 = arith.truncf %24 : vector<64x32xf32> to vector<64x32xbf16>
    %c7_i32_7 = arith.constant 7 : i32
    %26 = vector.broadcast %c7_i32_7 : i32 to vector<64x1xi32>
    %27 = arith.cmpi eq, %16, %26 : vector<64x1xi32>
    %c56_i32 = arith.constant 56 : i32
    %28 = tpu.dynamic_rotate %9 by %c56_i32 dim 0 : vector<64x32xf32>, i32 -> vector<64x32xf32>
    %cst_8 = arith.constant 0.000000e+00 : f32
    %29 = vector.shape_cast %27 : vector<64x1xi1> to vector<64x1xi1>
    %30 = vector.broadcast %29 : vector<64x1xi1> to vector<64x32xi1>
    %31 = vector.broadcast %cst_8 : f32 to vector<64x32xf32>
    %32 = arith.select %30, %31, %28 : vector<64x32xi1>, vector<64x32xf32>
    %33 = arith.truncf %32 : vector<64x32xf32> to vector<64x32xbf16>
    %c1 = arith.constant 1 : index
    %c0_9 = arith.constant 0 : index
    %c0_10 = arith.constant 0 : index
    %34 = vector.load %arg2[%c1, %c0_9, %c0_10] : memref<4x32x32xbf16, #tpu.memory_space<vmem>>, vector<1x32x32xbf16>
    %35 = vector.shape_cast %34 : vector<1x32x32xbf16> to vector<32x32xbf16>
    %cst_11 = arith.constant dense<0.000000e+00> : vector<64x32xf32>
    %36 = tpu.matmul %17, %35, %cst_11 {dimension_numbers = #tpu.dot_dimension_numbers<[1], [0], [0], [1], [0, 0, 1, 1], [], []>} : vector<64x32xbf16>, vector<32x32xbf16>, vector<64x32xf32> -> vector<64x32xf32>
    %c3 = arith.constant 3 : index
    %c0_12 = arith.constant 0 : index
    %c0_13 = arith.constant 0 : index
    %37 = vector.load %arg2[%c3, %c0_12, %c0_13] : memref<4x32x32xbf16, #tpu.memory_space<vmem>>, vector<1x32x32xbf16>
    %38 = vector.shape_cast %37 : vector<1x32x32xbf16> to vector<32x32xbf16>
    %cst_14 = arith.constant dense<0.000000e+00> : vector<64x32xf32>
    %39 = tpu.matmul %25, %38, %cst_14 {dimension_numbers = #tpu.dot_dimension_numbers<[1], [0], [0], [1], [0, 0, 1, 1], [], []>} : vector<64x32xbf16>, vector<32x32xbf16>, vector<64x32xf32> -> vector<64x32xf32>
    %40 = arith.addf %36, %39 : vector<64x32xf32>
    %c2 = arith.constant 2 : index
    %c0_15 = arith.constant 0 : index
    %c0_16 = arith.constant 0 : index
    %41 = vector.load %arg2[%c2, %c0_15, %c0_16] : memref<4x32x32xbf16, #tpu.memory_space<vmem>>, vector<1x32x32xbf16>
    %42 = vector.shape_cast %41 : vector<1x32x32xbf16> to vector<32x32xbf16>
    %cst_17 = arith.constant dense<0.000000e+00> : vector<64x32xf32>
    %43 = tpu.matmul %17, %42, %cst_17 {dimension_numbers = #tpu.dot_dimension_numbers<[1], [0], [0], [1], [0, 0, 1, 1], [], []>} : vector<64x32xbf16>, vector<32x32xbf16>, vector<64x32xf32> -> vector<64x32xf32>
    %c0_18 = arith.constant 0 : index
    %c0_19 = arith.constant 0 : index
    %c0_20 = arith.constant 0 : index
    %44 = vector.load %arg2[%c0_18, %c0_19, %c0_20] : memref<4x32x32xbf16, #tpu.memory_space<vmem>>, vector<1x32x32xbf16>
    %45 = vector.shape_cast %44 : vector<1x32x32xbf16> to vector<32x32xbf16>
    %cst_21 = arith.constant dense<0.000000e+00> : vector<64x32xf32>
    %46 = tpu.matmul %33, %45, %cst_21 {dimension_numbers = #tpu.dot_dimension_numbers<[1], [0], [0], [1], [0, 0, 1, 1], [], []>} : vector<64x32xbf16>, vector<32x32xbf16>, vector<64x32xf32> -> vector<64x32xf32>
    %47 = arith.addf %43, %46 : vector<64x32xf32>
    %48 = vector.extract_strided_slice %40 {offsets = [0, 8], sizes = [64, 8], strides = [1, 1]} : vector<64x32xf32> to vector<64x8xf32>
    %49 = vector.extract_strided_slice %40 {offsets = [0, 24], sizes = [64, 8], strides = [1, 1]} : vector<64x32xf32> to vector<64x8xf32>
    %c0_i32_22 = arith.constant 0 : i32
    %50 = vector.broadcast %c0_i32_22 : i32 to vector<64x1xi32>
    %51 = arith.cmpi eq, %12, %50 : vector<64x1xi32>
    %c1_i32 = arith.constant 1 : i32
    %52 = tpu.dynamic_rotate %49 by %c1_i32 dim 0 : vector<64x8xf32>, i32 -> vector<64x8xf32>
    %cst_23 = arith.constant 0.000000e+00 : f32
    %53 = vector.shape_cast %51 : vector<64x1xi1> to vector<64x1xi1>
    %54 = vector.broadcast %53 : vector<64x1xi1> to vector<64x8xi1>
    %55 = vector.broadcast %cst_23 : f32 to vector<64x8xf32>
    %56 = arith.select %54, %55, %52 : vector<64x8xi1>, vector<64x8xf32>
    %57 = arith.addf %48, %56 : vector<64x8xf32>
    %58 = vector.extract_strided_slice %40 {offsets = [0, 16], sizes = [64, 8], strides = [1, 1]} : vector<64x32xf32> to vector<64x8xf32>
    %59 = vector.extract_strided_slice %40 {offsets = [0, 0], sizes = [64, 8], strides = [1, 1]} : vector<64x32xf32> to vector<64x8xf32>
    %c7_i32_24 = arith.constant 7 : i32
    %60 = vector.broadcast %c7_i32_24 : i32 to vector<64x1xi32>
    %61 = arith.cmpi eq, %12, %60 : vector<64x1xi32>
    %c63_i32 = arith.constant 63 : i32
    %62 = tpu.dynamic_rotate %59 by %c63_i32 dim 0 : vector<64x8xf32>, i32 -> vector<64x8xf32>
    %cst_25 = arith.constant 0.000000e+00 : f32
    %63 = vector.shape_cast %61 : vector<64x1xi1> to vector<64x1xi1>
    %64 = vector.broadcast %63 : vector<64x1xi1> to vector<64x8xi1>
    %65 = vector.broadcast %cst_25 : f32 to vector<64x8xf32>
    %66 = arith.select %64, %65, %62 : vector<64x8xi1>, vector<64x8xf32>
    %67 = arith.addf %58, %66 : vector<64x8xf32>
    %68 = vector.extract_strided_slice %47 {offsets = [0, 8], sizes = [64, 8], strides = [1, 1]} : vector<64x32xf32> to vector<64x8xf32>
    %69 = vector.extract_strided_slice %47 {offsets = [0, 24], sizes = [64, 8], strides = [1, 1]} : vector<64x32xf32> to vector<64x8xf32>
    %c0_i32_26 = arith.constant 0 : i32
    %70 = vector.broadcast %c0_i32_26 : i32 to vector<64x1xi32>
    %71 = arith.cmpi eq, %12, %70 : vector<64x1xi32>
    %c1_i32_27 = arith.constant 1 : i32
    %72 = tpu.dynamic_rotate %69 by %c1_i32_27 dim 0 : vector<64x8xf32>, i32 -> vector<64x8xf32>
    %cst_28 = arith.constant 0.000000e+00 : f32
    %73 = vector.shape_cast %71 : vector<64x1xi1> to vector<64x1xi1>
    %74 = vector.broadcast %73 : vector<64x1xi1> to vector<64x8xi1>
    %75 = vector.broadcast %cst_28 : f32 to vector<64x8xf32>
    %76 = arith.select %74, %75, %72 : vector<64x8xi1>, vector<64x8xf32>
    %77 = arith.addf %68, %76 : vector<64x8xf32>
    %78 = vector.extract_strided_slice %47 {offsets = [0, 16], sizes = [64, 8], strides = [1, 1]} : vector<64x32xf32> to vector<64x8xf32>
    %79 = vector.extract_strided_slice %47 {offsets = [0, 0], sizes = [64, 8], strides = [1, 1]} : vector<64x32xf32> to vector<64x8xf32>
    %c7_i32_29 = arith.constant 7 : i32
    %80 = vector.broadcast %c7_i32_29 : i32 to vector<64x1xi32>
    %81 = arith.cmpi eq, %12, %80 : vector<64x1xi32>
    %c63_i32_30 = arith.constant 63 : i32
    %82 = tpu.dynamic_rotate %79 by %c63_i32_30 dim 0 : vector<64x8xf32>, i32 -> vector<64x8xf32>
    %cst_31 = arith.constant 0.000000e+00 : f32
    %83 = vector.shape_cast %81 : vector<64x1xi1> to vector<64x1xi1>
    %84 = vector.broadcast %83 : vector<64x1xi1> to vector<64x8xi1>
    %85 = vector.broadcast %cst_31 : f32 to vector<64x8xf32>
    %86 = arith.select %84, %85, %82 : vector<64x8xi1>, vector<64x8xf32>
    %87 = arith.addf %78, %86 : vector<64x8xf32>
    %88 = arith.addf %57, %67 : vector<64x8xf32>
    %89 = arith.addf %88, %77 : vector<64x8xf32>
    %90 = arith.addf %89, %87 : vector<64x8xf32>
    %cst_32 = arith.constant dense<0.000000e+00> : vector<8xf32>
    %91 = vector.multi_reduction <add>, %90, %cst_32 [0] : vector<64x8xf32> to vector<8xf32>
    %92 = vector.shape_cast %91 : vector<8xf32> to vector<1x8xf32>
    %c0_33 = arith.constant 0 : index
    %c0_34 = arith.constant 0 : index
    %c0_35 = arith.constant 0 : index
    %93 = vector.load %arg6[%c0_33, %c0_34, %c0_35] : memref<1x1x8xf32, #tpu.memory_space<vmem>>, vector<1x1x8xf32>
    %94 = vector.shape_cast %93 : vector<1x1x8xf32> to vector<1x8xf32>
    %95 = vector.shape_cast %92 : vector<1x8xf32> to vector<1x1x8xf32>
    tpu.vector_store %arg6[%c0_33, %c0_34, %c0_35], %95 {strides = array<i32>} : memref<1x1x8xf32, #tpu.memory_space<vmem>>, vector<1x1x8xf32>,
    %96 = arith.mulf %57, %57 : vector<64x8xf32>
    %97 = arith.mulf %67, %67 : vector<64x8xf32>
    %98 = arith.addf %96, %97 : vector<64x8xf32>
    %99 = arith.mulf %77, %77 : vector<64x8xf32>
    %100 = arith.addf %98, %99 : vector<64x8xf32>
    %101 = arith.mulf %87, %87 : vector<64x8xf32>
    %102 = arith.addf %100, %101 : vector<64x8xf32>
    %cst_36 = arith.constant dense<0.000000e+00> : vector<8xf32>
    %103 = vector.multi_reduction <add>, %102, %cst_36 [0] : vector<64x8xf32> to vector<8xf32>
    %104 = vector.shape_cast %103 : vector<8xf32> to vector<1x8xf32>
    %c0_37 = arith.constant 0 : index
    %c0_38 = arith.constant 0 : index
    %c0_39 = arith.constant 0 : index
    %105 = vector.load %arg7[%c0_37, %c0_38, %c0_39] : memref<1x1x8xf32, #tpu.memory_space<vmem>>, vector<1x1x8xf32>
    %106 = vector.shape_cast %105 : vector<1x1x8xf32> to vector<1x8xf32>
    %107 = vector.shape_cast %104 : vector<1x8xf32> to vector<1x1x8xf32>
    tpu.vector_store %arg7[%c0_37, %c0_38, %c0_39], %107 {strides = array<i32>} : memref<1x1x8xf32, #tpu.memory_space<vmem>>, vector<1x1x8xf32>,
    %108 = arith.truncf %57 : vector<64x8xf32> to vector<64x8xbf16>
    %c0_40 = arith.constant 0 : index
    %c0_41 = arith.constant 0 : index
    %c0_42 = arith.constant 0 : index
    %109 = vector.load %arg5[%c0_40, %c0_41, %c0_42] : memref<1x64x32xbf16, #tpu.memory_space<vmem>>, vector<1x64x8xbf16>
    %110 = vector.shape_cast %109 : vector<1x64x8xbf16> to vector<64x8xbf16>
    %111 = vector.shape_cast %108 : vector<64x8xbf16> to vector<1x64x8xbf16>
    tpu.vector_store %arg5[%c0_40, %c0_41, %c0_42], %111 {strides = array<i32>} : memref<1x64x32xbf16, #tpu.memory_space<vmem>>, vector<1x64x8xbf16>,
    %112 = arith.truncf %67 : vector<64x8xf32> to vector<64x8xbf16>
    %c0_43 = arith.constant 0 : index
    %c0_44 = arith.constant 0 : index
    %c8 = arith.constant 8 : index
    %113 = vector.load %arg5[%c0_43, %c0_44, %c8] : memref<1x64x32xbf16, #tpu.memory_space<vmem>>, vector<1x64x8xbf16>
    %114 = vector.shape_cast %113 : vector<1x64x8xbf16> to vector<64x8xbf16>
    %115 = vector.shape_cast %112 : vector<64x8xbf16> to vector<1x64x8xbf16>
    tpu.vector_store %arg5[%c0_43, %c0_44, %c8], %115 {strides = array<i32>} : memref<1x64x32xbf16, #tpu.memory_space<vmem>>, vector<1x64x8xbf16>,
    %116 = arith.truncf %77 : vector<64x8xf32> to vector<64x8xbf16>
    %c0_45 = arith.constant 0 : index
    %c0_46 = arith.constant 0 : index
    %c16 = arith.constant 16 : index
    %117 = vector.load %arg5[%c0_45, %c0_46, %c16] : memref<1x64x32xbf16, #tpu.memory_space<vmem>>, vector<1x64x8xbf16>
    %118 = vector.shape_cast %117 : vector<1x64x8xbf16> to vector<64x8xbf16>
    %119 = vector.shape_cast %116 : vector<64x8xbf16> to vector<1x64x8xbf16>
    tpu.vector_store %arg5[%c0_45, %c0_46, %c16], %119 {strides = array<i32>} : memref<1x64x32xbf16, #tpu.memory_space<vmem>>, vector<1x64x8xbf16>,
    %120 = arith.truncf %87 : vector<64x8xf32> to vector<64x8xbf16>
    %c0_47 = arith.constant 0 : index
    %c0_48 = arith.constant 0 : index
    %c24 = arith.constant 24 : index
    %121 = vector.load %arg5[%c0_47, %c0_48, %c24] : memref<1x64x32xbf16, #tpu.memory_space<vmem>>, vector<1x64x8xbf16>
    %122 = vector.shape_cast %121 : vector<1x64x8xbf16> to vector<64x8xbf16>
    %123 = vector.shape_cast %120 : vector<64x8xbf16> to vector<1x64x8xbf16>
    tpu.vector_store %arg5[%c0_47, %c0_48, %c24], %123 {strides = array<i32>} : memref<1x64x32xbf16, #tpu.memory_space<vmem>>, vector<1x64x8xbf16>,
    return
  }
  func.func @transform_0(%arg0: i32) -> (i32, i32) {
    %c0_i32 = arith.constant 0 : i32
    %c0_i32_0 = arith.constant 0 : i32
    return %arg0, %c0_i32 : i32, i32
  }
  func.func @transform_1(%arg0: i32) -> (i32, i32, i32) {
    %c0_i32 = arith.constant 0 : i32
    %c0_i32_0 = arith.constant 0 : i32
    %c0_i32_1 = arith.constant 0 : i32
    %c0_i32_2 = arith.constant 0 : i32
    return %c0_i32, %c0_i32_0, %c0_i32_1 : i32, i32, i32
  }
  func.func @transform_2(%arg0: i32) -> (i32, i32) {
    %c0_i32 = arith.constant 0 : i32
    %c0_i32_0 = arith.constant 0 : i32
    %c0_i32_1 = arith.constant 0 : i32
    return %c0_i32, %c0_i32_0 : i32, i32
  }
  func.func @transform_3(%arg0: i32) -> (i32, i32) {
    %c0_i32 = arith.constant 0 : i32
    %c0_i32_0 = arith.constant 0 : i32
    %c0_i32_1 = arith.constant 0 : i32
    return %c0_i32, %c0_i32_0 : i32, i32
  }
  func.func @transform_4(%arg0: i32) -> (i32, i32, i32) {
    %c0_i32 = arith.constant 0 : i32
    %c0_i32_0 = arith.constant 0 : i32
    %c0_i32_1 = arith.constant 0 : i32
    return %arg0, %c0_i32, %c0_i32_0 : i32, i32, i32
  }
  func.func @transform_5(%arg0: i32) -> (i32, i32, i32) {
    %c0_i32 = arith.constant 0 : i32
    %c0_i32_0 = arith.constant 0 : i32
    %c0_i32_1 = arith.constant 0 : i32
    return %arg0, %c0_i32, %c0_i32_0 : i32, i32, i32
  }
  func.func @transform_6(%arg0: i32) -> (i32, i32, i32) {
    %c0_i32 = arith.constant 0 : i32
    %c0_i32_0 = arith.constant 0 : i32
    %c0_i32_1 = arith.constant 0 : i32
    return %arg0, %c0_i32, %c0_i32_0 : i32, i32, i32
  }
}

module attributes {stable_mosaic.version = 11 : i64} {
  func.func @_deconv_kernel(%arg0: i32, %arg1: memref<256x8xbf16, #tpu.memory_space<vmem>>, %arg2: memref<4x8x12xbf16, #tpu.memory_space<vmem>>, %arg3: memref<1x8xf32, #tpu.memory_space<vmem>>, %arg4: memref<1x8xf32, #tpu.memory_space<vmem>>, %arg5: memref<1x3xf32, #tpu.memory_space<vmem>>, %arg6: memref<1x256x12xbf16, #tpu.memory_space<vmem>>) attributes {dimension_semantics = [#tpu.dimension_semantics<parallel>], iteration_bounds = array<i64: 2>, scalar_prefetch = 0 : i64, scratch_operands = 0 : i64, tpu.core_type = #tpu.core_type<tc>, window_params = [{transform_indices = @transform_0, window_bounds = array<i64: 256, 8>}, {pipeline_mode = #tpu.pipeline_mode<synchronous>, transform_indices = @transform_1, window_bounds = array<i64: 4, 8, 12>}, {pipeline_mode = #tpu.pipeline_mode<synchronous>, transform_indices = @transform_2, window_bounds = array<i64: 1, 8>}, {pipeline_mode = #tpu.pipeline_mode<synchronous>, transform_indices = @transform_3, window_bounds = array<i64: 1, 8>}, {pipeline_mode = #tpu.pipeline_mode<synchronous>, transform_indices = @transform_4, window_bounds = array<i64: 1, 3>}, {transform_indices = @transform_5, window_bounds = array<i64: 1, 256, 12>}]} {
    %c0 = arith.constant 0 : index
    %c0_0 = arith.constant 0 : index
    %0 = vector.load %arg1[%c0, %c0_0] : memref<256x8xbf16, #tpu.memory_space<vmem>>, vector<256x8xbf16>
    %1 = arith.extf %0 : vector<256x8xbf16> to vector<256x8xf32>
    %c0_1 = arith.constant 0 : index
    %c0_2 = arith.constant 0 : index
    %2 = vector.load %arg3[%c0_1, %c0_2] : memref<1x8xf32, #tpu.memory_space<vmem>>, vector<1x8xf32>
    %3 = vector.broadcast %2 : vector<1x8xf32> to vector<256x8xf32>
    %4 = arith.mulf %1, %3 : vector<256x8xf32>
    %c0_3 = arith.constant 0 : index
    %c0_4 = arith.constant 0 : index
    %5 = vector.load %arg4[%c0_3, %c0_4] : memref<1x8xf32, #tpu.memory_space<vmem>>, vector<1x8xf32>
    %6 = vector.broadcast %5 : vector<1x8xf32> to vector<256x8xf32>
    %7 = arith.addf %4, %6 : vector<256x8xf32>
    %cst = arith.constant 0.000000e+00 : f32
    %8 = vector.broadcast %cst : f32 to vector<256x8xf32>
    %9 = arith.maximumf %7, %8 : vector<256x8xf32>
    %10 = tpu.iota {dimensions = array<i32: 0>} : vector<256x1xi32>
    %c15_i32 = arith.constant 15 : i32
    %11 = vector.broadcast %c15_i32 : i32 to vector<256x1xi32>
    %12 = arith.andi %10, %11 : vector<256x1xi32>
    %c4_i32 = arith.constant 4 : i32
    %13 = vector.broadcast %c4_i32 : i32 to vector<256x1xi32>
    %14 = arith.shrsi %10, %13 : vector<256x1xi32>
    %c15_i32_5 = arith.constant 15 : i32
    %15 = vector.broadcast %c15_i32_5 : i32 to vector<256x1xi32>
    %16 = arith.andi %14, %15 : vector<256x1xi32>
    %17 = arith.truncf %9 : vector<256x8xf32> to vector<256x8xbf16>
    %c0_i32 = arith.constant 0 : i32
    %18 = vector.broadcast %c0_i32 : i32 to vector<256x1xi32>
    %19 = arith.cmpi eq, %16, %18 : vector<256x1xi32>
    %c16_i32 = arith.constant 16 : i32
    %20 = tpu.dynamic_rotate %9 by %c16_i32 dim 0 : vector<256x8xf32>, i32 -> vector<256x8xf32>
    %cst_6 = arith.constant 0.000000e+00 : f32
    %21 = vector.shape_cast %19 : vector<256x1xi1> to vector<256x1xi1>
    %22 = vector.broadcast %21 : vector<256x1xi1> to vector<256x8xi1>
    %23 = vector.broadcast %cst_6 : f32 to vector<256x8xf32>
    %24 = arith.select %22, %23, %20 : vector<256x8xi1>, vector<256x8xf32>
    %25 = arith.truncf %24 : vector<256x8xf32> to vector<256x8xbf16>
    %c15_i32_7 = arith.constant 15 : i32
    %26 = vector.broadcast %c15_i32_7 : i32 to vector<256x1xi32>
    %27 = arith.cmpi eq, %16, %26 : vector<256x1xi32>
    %c240_i32 = arith.constant 240 : i32
    %28 = tpu.dynamic_rotate %9 by %c240_i32 dim 0 : vector<256x8xf32>, i32 -> vector<256x8xf32>
    %cst_8 = arith.constant 0.000000e+00 : f32
    %29 = vector.shape_cast %27 : vector<256x1xi1> to vector<256x1xi1>
    %30 = vector.broadcast %29 : vector<256x1xi1> to vector<256x8xi1>
    %31 = vector.broadcast %cst_8 : f32 to vector<256x8xf32>
    %32 = arith.select %30, %31, %28 : vector<256x8xi1>, vector<256x8xf32>
    %33 = arith.truncf %32 : vector<256x8xf32> to vector<256x8xbf16>
    %c1 = arith.constant 1 : index
    %c0_9 = arith.constant 0 : index
    %c0_10 = arith.constant 0 : index
    %34 = vector.load %arg2[%c1, %c0_9, %c0_10] : memref<4x8x12xbf16, #tpu.memory_space<vmem>>, vector<1x8x12xbf16>
    %35 = vector.shape_cast %34 : vector<1x8x12xbf16> to vector<8x12xbf16>
    %cst_11 = arith.constant dense<0.000000e+00> : vector<256x12xf32>
    %36 = tpu.matmul %17, %35, %cst_11 {dimension_numbers = #tpu.dot_dimension_numbers<[1], [0], [0], [1], [0, 0, 1, 1], [], []>} : vector<256x8xbf16>, vector<8x12xbf16>, vector<256x12xf32> -> vector<256x12xf32>
    %c3 = arith.constant 3 : index
    %c0_12 = arith.constant 0 : index
    %c0_13 = arith.constant 0 : index
    %37 = vector.load %arg2[%c3, %c0_12, %c0_13] : memref<4x8x12xbf16, #tpu.memory_space<vmem>>, vector<1x8x12xbf16>
    %38 = vector.shape_cast %37 : vector<1x8x12xbf16> to vector<8x12xbf16>
    %cst_14 = arith.constant dense<0.000000e+00> : vector<256x12xf32>
    %39 = tpu.matmul %25, %38, %cst_14 {dimension_numbers = #tpu.dot_dimension_numbers<[1], [0], [0], [1], [0, 0, 1, 1], [], []>} : vector<256x8xbf16>, vector<8x12xbf16>, vector<256x12xf32> -> vector<256x12xf32>
    %40 = arith.addf %36, %39 : vector<256x12xf32>
    %c2 = arith.constant 2 : index
    %c0_15 = arith.constant 0 : index
    %c0_16 = arith.constant 0 : index
    %41 = vector.load %arg2[%c2, %c0_15, %c0_16] : memref<4x8x12xbf16, #tpu.memory_space<vmem>>, vector<1x8x12xbf16>
    %42 = vector.shape_cast %41 : vector<1x8x12xbf16> to vector<8x12xbf16>
    %cst_17 = arith.constant dense<0.000000e+00> : vector<256x12xf32>
    %43 = tpu.matmul %17, %42, %cst_17 {dimension_numbers = #tpu.dot_dimension_numbers<[1], [0], [0], [1], [0, 0, 1, 1], [], []>} : vector<256x8xbf16>, vector<8x12xbf16>, vector<256x12xf32> -> vector<256x12xf32>
    %c0_18 = arith.constant 0 : index
    %c0_19 = arith.constant 0 : index
    %c0_20 = arith.constant 0 : index
    %44 = vector.load %arg2[%c0_18, %c0_19, %c0_20] : memref<4x8x12xbf16, #tpu.memory_space<vmem>>, vector<1x8x12xbf16>
    %45 = vector.shape_cast %44 : vector<1x8x12xbf16> to vector<8x12xbf16>
    %cst_21 = arith.constant dense<0.000000e+00> : vector<256x12xf32>
    %46 = tpu.matmul %33, %45, %cst_21 {dimension_numbers = #tpu.dot_dimension_numbers<[1], [0], [0], [1], [0, 0, 1, 1], [], []>} : vector<256x8xbf16>, vector<8x12xbf16>, vector<256x12xf32> -> vector<256x12xf32>
    %47 = arith.addf %43, %46 : vector<256x12xf32>
    %48 = vector.extract_strided_slice %40 {offsets = [0, 3], sizes = [256, 3], strides = [1, 1]} : vector<256x12xf32> to vector<256x3xf32>
    %49 = vector.extract_strided_slice %40 {offsets = [0, 9], sizes = [256, 3], strides = [1, 1]} : vector<256x12xf32> to vector<256x3xf32>
    %c0_i32_22 = arith.constant 0 : i32
    %50 = vector.broadcast %c0_i32_22 : i32 to vector<256x1xi32>
    %51 = arith.cmpi eq, %12, %50 : vector<256x1xi32>
    %c1_i32 = arith.constant 1 : i32
    %52 = tpu.dynamic_rotate %49 by %c1_i32 dim 0 : vector<256x3xf32>, i32 -> vector<256x3xf32>
    %cst_23 = arith.constant 0.000000e+00 : f32
    %53 = vector.shape_cast %51 : vector<256x1xi1> to vector<256x1xi1>
    %54 = vector.broadcast %53 : vector<256x1xi1> to vector<256x3xi1>
    %55 = vector.broadcast %cst_23 : f32 to vector<256x3xf32>
    %56 = arith.select %54, %55, %52 : vector<256x3xi1>, vector<256x3xf32>
    %57 = arith.addf %48, %56 : vector<256x3xf32>
    %58 = vector.extract_strided_slice %40 {offsets = [0, 6], sizes = [256, 3], strides = [1, 1]} : vector<256x12xf32> to vector<256x3xf32>
    %59 = vector.extract_strided_slice %40 {offsets = [0, 0], sizes = [256, 3], strides = [1, 1]} : vector<256x12xf32> to vector<256x3xf32>
    %c15_i32_24 = arith.constant 15 : i32
    %60 = vector.broadcast %c15_i32_24 : i32 to vector<256x1xi32>
    %61 = arith.cmpi eq, %12, %60 : vector<256x1xi32>
    %c255_i32 = arith.constant 255 : i32
    %62 = tpu.dynamic_rotate %59 by %c255_i32 dim 0 : vector<256x3xf32>, i32 -> vector<256x3xf32>
    %cst_25 = arith.constant 0.000000e+00 : f32
    %63 = vector.shape_cast %61 : vector<256x1xi1> to vector<256x1xi1>
    %64 = vector.broadcast %63 : vector<256x1xi1> to vector<256x3xi1>
    %65 = vector.broadcast %cst_25 : f32 to vector<256x3xf32>
    %66 = arith.select %64, %65, %62 : vector<256x3xi1>, vector<256x3xf32>
    %67 = arith.addf %58, %66 : vector<256x3xf32>
    %68 = vector.extract_strided_slice %47 {offsets = [0, 3], sizes = [256, 3], strides = [1, 1]} : vector<256x12xf32> to vector<256x3xf32>
    %69 = vector.extract_strided_slice %47 {offsets = [0, 9], sizes = [256, 3], strides = [1, 1]} : vector<256x12xf32> to vector<256x3xf32>
    %c0_i32_26 = arith.constant 0 : i32
    %70 = vector.broadcast %c0_i32_26 : i32 to vector<256x1xi32>
    %71 = arith.cmpi eq, %12, %70 : vector<256x1xi32>
    %c1_i32_27 = arith.constant 1 : i32
    %72 = tpu.dynamic_rotate %69 by %c1_i32_27 dim 0 : vector<256x3xf32>, i32 -> vector<256x3xf32>
    %cst_28 = arith.constant 0.000000e+00 : f32
    %73 = vector.shape_cast %71 : vector<256x1xi1> to vector<256x1xi1>
    %74 = vector.broadcast %73 : vector<256x1xi1> to vector<256x3xi1>
    %75 = vector.broadcast %cst_28 : f32 to vector<256x3xf32>
    %76 = arith.select %74, %75, %72 : vector<256x3xi1>, vector<256x3xf32>
    %77 = arith.addf %68, %76 : vector<256x3xf32>
    %78 = vector.extract_strided_slice %47 {offsets = [0, 6], sizes = [256, 3], strides = [1, 1]} : vector<256x12xf32> to vector<256x3xf32>
    %79 = vector.extract_strided_slice %47 {offsets = [0, 0], sizes = [256, 3], strides = [1, 1]} : vector<256x12xf32> to vector<256x3xf32>
    %c15_i32_29 = arith.constant 15 : i32
    %80 = vector.broadcast %c15_i32_29 : i32 to vector<256x1xi32>
    %81 = arith.cmpi eq, %12, %80 : vector<256x1xi32>
    %c255_i32_30 = arith.constant 255 : i32
    %82 = tpu.dynamic_rotate %79 by %c255_i32_30 dim 0 : vector<256x3xf32>, i32 -> vector<256x3xf32>
    %cst_31 = arith.constant 0.000000e+00 : f32
    %83 = vector.shape_cast %81 : vector<256x1xi1> to vector<256x1xi1>
    %84 = vector.broadcast %83 : vector<256x1xi1> to vector<256x3xi1>
    %85 = vector.broadcast %cst_31 : f32 to vector<256x3xf32>
    %86 = arith.select %84, %85, %82 : vector<256x3xi1>, vector<256x3xf32>
    %87 = arith.addf %78, %86 : vector<256x3xf32>
    %c0_32 = arith.constant 0 : index
    %c0_33 = arith.constant 0 : index
    %88 = vector.load %arg5[%c0_32, %c0_33] : memref<1x3xf32, #tpu.memory_space<vmem>>, vector<1x3xf32>
    %89 = vector.broadcast %88 : vector<1x3xf32> to vector<256x3xf32>
    %90 = arith.addf %57, %89 : vector<256x3xf32>
    %91 = vector.broadcast %88 : vector<1x3xf32> to vector<256x3xf32>
    %92 = arith.addf %67, %91 : vector<256x3xf32>
    %93 = vector.broadcast %88 : vector<1x3xf32> to vector<256x3xf32>
    %94 = arith.addf %77, %93 : vector<256x3xf32>
    %95 = vector.broadcast %88 : vector<1x3xf32> to vector<256x3xf32>
    %96 = arith.addf %87, %95 : vector<256x3xf32>
    %cst_34 = arith.constant 0.000000e+00 : f32
    %97 = vector.broadcast %cst_34 : f32 to vector<256x3xf32>
    %98 = arith.subf %97, %90 : vector<256x3xf32>
    %99 = math.exp %98 : vector<256x3xf32>
    %cst_35 = arith.constant 1.000000e+00 : f32
    %100 = vector.broadcast %cst_35 : f32 to vector<256x3xf32>
    %101 = arith.addf %100, %99 : vector<256x3xf32>
    %102 = tpu.reciprocal %101 {approx = true} : vector<256x3xf32> -> vector<256x3xf32>
    %cst_36 = arith.constant 0.000000e+00 : f32
    %cst_37 = arith.constant 1.000000e+00 : f32
    %103 = vector.broadcast %cst_36 : f32 to vector<256x3xf32>
    %104 = arith.maximumf %103, %102 : vector<256x3xf32>
    %105 = vector.broadcast %cst_37 : f32 to vector<256x3xf32>
    %106 = arith.minimumf %105, %104 : vector<256x3xf32>
    %cst_38 = arith.constant 0.000000e+00 : f32
    %107 = vector.broadcast %cst_38 : f32 to vector<256x3xf32>
    %108 = arith.subf %107, %92 : vector<256x3xf32>
    %109 = math.exp %108 : vector<256x3xf32>
    %cst_39 = arith.constant 1.000000e+00 : f32
    %110 = vector.broadcast %cst_39 : f32 to vector<256x3xf32>
    %111 = arith.addf %110, %109 : vector<256x3xf32>
    %112 = tpu.reciprocal %111 {approx = true} : vector<256x3xf32> -> vector<256x3xf32>
    %cst_40 = arith.constant 0.000000e+00 : f32
    %cst_41 = arith.constant 1.000000e+00 : f32
    %113 = vector.broadcast %cst_40 : f32 to vector<256x3xf32>
    %114 = arith.maximumf %113, %112 : vector<256x3xf32>
    %115 = vector.broadcast %cst_41 : f32 to vector<256x3xf32>
    %116 = arith.minimumf %115, %114 : vector<256x3xf32>
    %cst_42 = arith.constant 0.000000e+00 : f32
    %117 = vector.broadcast %cst_42 : f32 to vector<256x3xf32>
    %118 = arith.subf %117, %94 : vector<256x3xf32>
    %119 = math.exp %118 : vector<256x3xf32>
    %cst_43 = arith.constant 1.000000e+00 : f32
    %120 = vector.broadcast %cst_43 : f32 to vector<256x3xf32>
    %121 = arith.addf %120, %119 : vector<256x3xf32>
    %122 = tpu.reciprocal %121 {approx = true} : vector<256x3xf32> -> vector<256x3xf32>
    %cst_44 = arith.constant 0.000000e+00 : f32
    %cst_45 = arith.constant 1.000000e+00 : f32
    %123 = vector.broadcast %cst_44 : f32 to vector<256x3xf32>
    %124 = arith.maximumf %123, %122 : vector<256x3xf32>
    %125 = vector.broadcast %cst_45 : f32 to vector<256x3xf32>
    %126 = arith.minimumf %125, %124 : vector<256x3xf32>
    %cst_46 = arith.constant 0.000000e+00 : f32
    %127 = vector.broadcast %cst_46 : f32 to vector<256x3xf32>
    %128 = arith.subf %127, %96 : vector<256x3xf32>
    %129 = math.exp %128 : vector<256x3xf32>
    %cst_47 = arith.constant 1.000000e+00 : f32
    %130 = vector.broadcast %cst_47 : f32 to vector<256x3xf32>
    %131 = arith.addf %130, %129 : vector<256x3xf32>
    %132 = tpu.reciprocal %131 {approx = true} : vector<256x3xf32> -> vector<256x3xf32>
    %cst_48 = arith.constant 0.000000e+00 : f32
    %cst_49 = arith.constant 1.000000e+00 : f32
    %133 = vector.broadcast %cst_48 : f32 to vector<256x3xf32>
    %134 = arith.maximumf %133, %132 : vector<256x3xf32>
    %135 = vector.broadcast %cst_49 : f32 to vector<256x3xf32>
    %136 = arith.minimumf %135, %134 : vector<256x3xf32>
    %137 = arith.truncf %106 : vector<256x3xf32> to vector<256x3xbf16>
    %c0_50 = arith.constant 0 : index
    %c0_51 = arith.constant 0 : index
    %c0_52 = arith.constant 0 : index
    %138 = vector.load %arg6[%c0_50, %c0_51, %c0_52] : memref<1x256x12xbf16, #tpu.memory_space<vmem>>, vector<1x256x3xbf16>
    %139 = vector.shape_cast %138 : vector<1x256x3xbf16> to vector<256x3xbf16>
    %140 = vector.shape_cast %137 : vector<256x3xbf16> to vector<1x256x3xbf16>
    tpu.vector_store %arg6[%c0_50, %c0_51, %c0_52], %140 {strides = array<i32>} : memref<1x256x12xbf16, #tpu.memory_space<vmem>>, vector<1x256x3xbf16>,
    %141 = arith.truncf %116 : vector<256x3xf32> to vector<256x3xbf16>
    %c0_53 = arith.constant 0 : index
    %c0_54 = arith.constant 0 : index
    %c3_55 = arith.constant 3 : index
    %142 = vector.load %arg6[%c0_53, %c0_54, %c3_55] : memref<1x256x12xbf16, #tpu.memory_space<vmem>>, vector<1x256x3xbf16>
    %143 = vector.shape_cast %142 : vector<1x256x3xbf16> to vector<256x3xbf16>
    %144 = vector.shape_cast %141 : vector<256x3xbf16> to vector<1x256x3xbf16>
    tpu.vector_store %arg6[%c0_53, %c0_54, %c3_55], %144 {strides = array<i32>} : memref<1x256x12xbf16, #tpu.memory_space<vmem>>, vector<1x256x3xbf16>,
    %145 = arith.truncf %126 : vector<256x3xf32> to vector<256x3xbf16>
    %c0_56 = arith.constant 0 : index
    %c0_57 = arith.constant 0 : index
    %c6 = arith.constant 6 : index
    %146 = vector.load %arg6[%c0_56, %c0_57, %c6] : memref<1x256x12xbf16, #tpu.memory_space<vmem>>, vector<1x256x3xbf16>
    %147 = vector.shape_cast %146 : vector<1x256x3xbf16> to vector<256x3xbf16>
    %148 = vector.shape_cast %145 : vector<256x3xbf16> to vector<1x256x3xbf16>
    tpu.vector_store %arg6[%c0_56, %c0_57, %c6], %148 {strides = array<i32>} : memref<1x256x12xbf16, #tpu.memory_space<vmem>>, vector<1x256x3xbf16>,
    %149 = arith.truncf %136 : vector<256x3xf32> to vector<256x3xbf16>
    %c0_58 = arith.constant 0 : index
    %c0_59 = arith.constant 0 : index
    %c9 = arith.constant 9 : index
    %150 = vector.load %arg6[%c0_58, %c0_59, %c9] : memref<1x256x12xbf16, #tpu.memory_space<vmem>>, vector<1x256x3xbf16>
    %151 = vector.shape_cast %150 : vector<1x256x3xbf16> to vector<256x3xbf16>
    %152 = vector.shape_cast %149 : vector<256x3xbf16> to vector<1x256x3xbf16>
    tpu.vector_store %arg6[%c0_58, %c0_59, %c9], %152 {strides = array<i32>} : memref<1x256x12xbf16, #tpu.memory_space<vmem>>, vector<1x256x3xbf16>,
    return
  }
  func.func @transform_0(%arg0: i32) -> (i32, i32) {
    %c0_i32 = arith.constant 0 : i32
    %c0_i32_0 = arith.constant 0 : i32
    return %arg0, %c0_i32 : i32, i32
  }
  func.func @transform_1(%arg0: i32) -> (i32, i32, i32) {
    %c0_i32 = arith.constant 0 : i32
    %c0_i32_0 = arith.constant 0 : i32
    %c0_i32_1 = arith.constant 0 : i32
    %c0_i32_2 = arith.constant 0 : i32
    return %c0_i32, %c0_i32_0, %c0_i32_1 : i32, i32, i32
  }
  func.func @transform_2(%arg0: i32) -> (i32, i32) {
    %c0_i32 = arith.constant 0 : i32
    %c0_i32_0 = arith.constant 0 : i32
    %c0_i32_1 = arith.constant 0 : i32
    return %c0_i32, %c0_i32_0 : i32, i32
  }
  func.func @transform_3(%arg0: i32) -> (i32, i32) {
    %c0_i32 = arith.constant 0 : i32
    %c0_i32_0 = arith.constant 0 : i32
    %c0_i32_1 = arith.constant 0 : i32
    return %c0_i32, %c0_i32_0 : i32, i32
  }
  func.func @transform_4(%arg0: i32) -> (i32, i32) {
    %c0_i32 = arith.constant 0 : i32
    %c0_i32_0 = arith.constant 0 : i32
    %c0_i32_1 = arith.constant 0 : i32
    return %c0_i32, %c0_i32_0 : i32, i32
  }
  func.func @transform_5(%arg0: i32) -> (i32, i32, i32) {
    %c0_i32 = arith.constant 0 : i32
    %c0_i32_0 = arith.constant 0 : i32
    %c0_i32_1 = arith.constant 0 : i32
    return %arg0, %c0_i32, %c0_i32_0 : i32, i32, i32
  }
}

</mosaic_0001>

<bundles_post_ra>
// kernel: decoder_forward.5
= control target key start
LH: loop header
LB: loop body
LE: loop exit
PB: predicated region body
PF: predicated region fallthrough
CT: control target
= control target key end

     0   :  { %12 = vsyncpa [#allocation3], 0  ;;  %s387_s0 = inlined_call_operand.hbm [shape: f32[2,16], index: 0, kind: input, shape index: {}]   ;;  %s388_s1 = inlined_call_operand.vmem [shape: bf16[16,8], index: 1, kind: input, shape index: {}]   ;;  %s389_s2 = inlined_call_operand.hbm [shape: f32[1,8], index: 2, kind: input, shape index: {}]   ;;  %s390_s3 = inlined_call_operand.hbm [shape: bf16[8,64], index: 3, kind: input, shape index: {}]   ;;  %s391_s4 = inlined_call_operand.vmem [shape: bf16[2,64], index: 4, kind: output, shape index: {0}]   ;;  %s392_s5 = inlined_call_operand.vmem [shape: f32[1,16], index: 5, kind: output, shape index: {1}]   ;;  %s393_s6 = inlined_call_operand.vmem [shape: f32[1,16], index: 6, kind: output, shape index: {2}]  }
   0x1   :  { %13 = vsyncpa [#allocation5], 0  ;;  %s323_s21 = smov [#allocation4]   ;;  %s324_s23 = smov [#allocation2]  }
   0x2   :  { %s32_s22 = sshll.u32 %s323_s21, 4  ;;  %s20_s24 = sshll.u32 %s324_s23, 4  ;;  %s33_s22 = int_to_ptr.vmem [resolvable:$true] %s32_s22  ;;  %s21_s24 = int_to_ptr.vmem [resolvable:$true] %s20_s24 }
   0x3   :  { %s267_s25 = scalar_lea.vmem %s33_s22, 16  ;;  %s271_s26 = scalar_lea.vmem %s33_s22, 32 }
   0x4   :  { %p268_p0 = scmp.ne.s32.totalorder %s33_s22, %s267_s25  ;;  %p272_p1 = scmp.lt.s32.totalorder %s33_s22, %s33_s22 }
   0x5   :  { %p273_p2 = scmp.lt.s32.totalorder %s271_s26, %s267_s25 }
   0x7   :  { %p274_p3 = por %p273_p2, %p272_p1 }
   0x9   :  { %p275_p4 = pnand %p274_p3, %p268_p0 }
   0xb   :  { %278 = shalt.err (!%p275_p4)
}
   0xc   :  { %35 = dma.hbm_to_vmem [thread:$0]  %s389_s2, 16, %s33_s22, [#allocation5]  }
   0xd   :  { %s287_s29 = scalar_lea.vmem %s21_s24, 32  ;;  %p292_p6 = scmp.lt.s32.totalorder %s21_s24, %s21_s24 }
   0xe   :  { %p288_p5 = scmp.ne.s32.totalorder %s21_s24, %s287_s29  ;;  %p293_p7 = scmp.lt.s32.totalorder %s287_s29, %s287_s29 }
  0x10   :  { %p294_p8 = por %p293_p7, %p292_p6 }
  0x12   :  { %p295_p9 = pnand %p294_p8, %p288_p5 }
  0x14   :  { %298 = shalt.err (!%p295_p9)
}
  0x15   :  { %23 = dma.hbm_to_vmem [thread:$0]  %s387_s0, 32, %s21_s24, [#allocation3]  }
  0x16   :  { %s325_s8 = smov [#allocation6]  }
  0x17   :  { %s42_s9 = sshll.u32 %s325_s8, 4  ;;  %s43_s9 = int_to_ptr.vmem [resolvable:$true] %s42_s9 }
  0x18   :  { %s307_s10 = scalar_lea.vmem %s43_s9, 64  ;;  %p312_p11 = scmp.lt.s32.totalorder %s43_s9, %s43_s9 }
  0x19   :  { %p308_p10 = scmp.ne.s32.totalorder %s43_s9, %s307_s10  ;;  %p313_p12 = scmp.lt.s32.totalorder %s307_s10, %s307_s10 }
  0x1b   :  { %p314_p13 = por %p313_p12, %p312_p11 }
  0x1d   :  { %p315_p0 = pnand %p314_p13, %p308_p10 }
  0x1f   :  { %318 = shalt.err (!%p315_p0)
}
  0x20   :  { %45 = dma.hbm_to_vmem [thread:$0]  %s390_s3, 64, %s43_s9, [#allocation5]  }
  0x21   :  { %319 = dma.done.wait [#allocation3], 32  }
  0x22   :  { %320 = vsyncadd [#allocation3], 4294967264 }
  0x23   :  { %321 = dma.done.wait [#allocation5], 80  }
  0x24   :  { %322 = vsyncadd [#allocation5], 4294967216  ;;  %v326_v0 = vmov 0.0   ;;  %vm327_vm0 = vmmov 0   ;;  %v258_v1 = vld [vmem:[%s388_s1] sm:$0xff]   ;;  %vm73_vm1 = vcmask 130048  }
  0x25   :  { %238 = vmatprep.subr.bf16.mxu0 %v326_v0  ;;  %240 = vmatprep.mubr.msk.bf16.mxu0 %vm327_vm0, %v326_v0  ;;  %v56_v2 = vld [vmem:[#allocation2] sm:$0x3]  ;;  %v119_v4 = vld [vmem:[#allocation6] sm:$0xf]  ;;  %vm124_vm2 = vcmask 1043456   ;;  %vm120_vm3 = vcmask 64512  }
  0x26   :  { %244 = vmatprep.subr.bf16.mxu1 %v326_v0  ;;  %246 = vmatprep.mubr.msk.bf16.mxu1 %vm327_vm0, %v326_v0  ;;  %v57_v3 = vpack.c.bf16 %v56_v2, %v56_v2  ;;  %v126_v5 = vsel %vm124_vm2, %v119_v4, 0  ;;  %v230_v6 = vld [vmem:[#allocation4] ss:$0 sm:$0xff]  ;;  %vm169_vm4 = vcmask 516096   ;;  %s328_s1 = smov 96   ;;  %s329_s3 = smov 112  }
  0x27   :  { %239 = vmatpush3.bf16.msra.mxu0 %v258_v1  ;;  %245 = vmatpush3.bf16.msra.mxu1 %v126_v5  ;;  %s330_s15 = smov 80   ;;  %vm198_vm5 = vcmask 123904   ;;  %vm206_vm6 = vcmask 122880  }
  0x2a   :  { %241 = vmatmul.mubr.msk.bf16.vlgmr.msra.gmra.mxu0 %vm73_vm1, %v57_v3 }
  0xea   :  { %v111_v7 = vpop.f32.mrf.mxu0 }
  0xeb   :  { %v112_v8 = vadd.f32 %v230_v6, %v111_v7 }
  0xec   :  { %v242_v9 = vpop.f32.mrf.mxu0 }
  0xed   :  { %v117_v10 = vmax.f32 %v112_v8, 0.0 }
  0xee   :  { %v114_v11 = vpop.f32.mrf.mxu0 }
  0xef   :  { %v118_v12 = vpack.c.bf16 %v117_v10, %v117_v10 }
  0xf0   :  { %v243_v13 = vpop.f32.mrf.mxu0 }
  0xf1   :  { %247 = vmatmul.mubr.msk.bf16.vlgmr.msra.gmra.mxu1 %vm120_vm3, %v118_v12 }
 0x1b1   :  { %v162_v14 = vpop.f32.mrf.mxu1 }
 0x1b2   :  { %v168_v15 = vpack.c.bf16 %v162_v14, %v162_v14  ;;  %177 = vrot.lane.b32.xlu1 %v162_v14, %s328_s1  ;;  %173 = vrot.lane.b32.xlu0 %v162_v14, %s329_s3  ;;  %v171_v17 = vmul.f32 %v162_v14, %v162_v14 }
 0x1b3   :  { %v248_v16 = vpop.f32.mrf.mxu1 }
 0x1b4   :  { %170 = vst.msk [vmem:[%s391_s4] sm:$0x1] %vm169_vm4, %v168_v15 }
 0x1b5   :  { %v165_v18 = vpop.f32.mrf.mxu1 }
 0x1b6   :  { %190 = vrot.lane.b32.xlu1 %v171_v17, %s328_s1  ;;  %186 = vrot.lane.b32.xlu0 %v171_v17, %s329_s3 }
 0x1b7   :  { %v249_v19 = vpop.f32.mrf.mxu1 }
 0x1ba   :  { %194 = vrot.lane.b32.xlu1 %v171_v17, %s330_s15  ;;  %181 = vrot.lane.b32.xlu0 %v162_v14, %s330_s15 }
 0x224   :  { %v178_v20 = vpop.permute.xlu1 %177  ;;  %v174_v21 = vpop.permute.xlu0 %173 }
 0x225   :  { %v176_v22 = vadd.f32 %v174_v21, %v162_v14 }
 0x227   :  { %v180_v27 = vadd.f32 %v178_v20, %v176_v22 }
 0x228   :  { %v191_v23 = vpop.permute.xlu1 %190  ;;  %v187_v24 = vpop.permute.xlu0 %186 }
 0x229   :  { %v189_v25 = vadd.f32 %v187_v24, %v171_v17 }
 0x22b   :  { %v193_v26 = vadd.f32 %v191_v23, %v189_v25 }
 0x22c   :  { %v195_v28 = vpop.permute.xlu1 %194  ;;  %v182_v29 = vpop.permute.xlu0 %181 }
 0x22d   :  { %v197_v30 = vadd.f32 %v195_v28, %v193_v26  ;;  %v184_v31 = vadd.f32 %v182_v29, %v180_v27 }
 0x22f   :  { %v208_v32 = vsel %vm198_vm5, %v197_v30, 0.0  ;;  %v199_v33 = vsel %vm198_vm5, %v184_v31, 0.0 }
 0x230   :  { %v209_v34 = vrot.slane %v208_v32, 4  ;;  %v200_v35 = vrot.slane %v199_v33, 4 }
 0x232   :  { %v210_v36 = vadd.f32 %v209_v34, %v208_v32  ;;  %v201_v37 = vadd.f32 %v200_v35, %v199_v33 }
 0x234   :  { %v211_v38 = vrot.slane %v210_v36, 2  ;;  %v202_v39 = vrot.slane %v201_v37, 2 }
 0x236   :  { %v212_v40 = vadd.f32 %v211_v38, %v210_v36  ;;  %v203_v41 = vadd.f32 %v202_v39, %v201_v37 }
 0x238   :  { %v213_v42 = vrot.slane %v212_v40, 1  ;;  %v204_v43 = vrot.slane %v203_v41, 1 }
 0x23a   :  { %v214_v44 = vadd.f32 %v213_v42, %v212_v40  ;;  %v205_v45 = vadd.f32 %v204_v43, %v203_v41 }
 0x23c   :  { %215 = vst.msk [vmem:[%s393_s6] sm:$0x1] %vm206_vm6, %v214_v44  ;;  %207 = vst.msk [vmem:[%s392_s5] sm:$0x1] %vm206_vm6, %v205_v45 }
 0x23d   :  { %228 = vsyncpa [#allocation3], 1 }
 0x23e   :  { %229 = vsyncpa [#allocation5], 1 }

// kernel: decoder_forward.6
= control target key start
LH: loop header
LB: loop body
LE: loop exit
PB: predicated region body
PF: predicated region fallthrough
CT: control target
= control target key end

     0   :  { %12 = vsyncpa [#allocation3], 0  ;;  %s491_s21 = smov [#allocation2]   ;;  %s583_s0 = inlined_call_operand.vmem [shape: bf16[8,16], index: 0, kind: input, shape index: {}]   ;;  %s584_s1 = inlined_call_operand.hbm [shape: bf16[4,16,256], index: 1, kind: input, shape index: {}]   ;;  %s585_s2 = inlined_call_operand.vmem [shape: f32[1,16], index: 2, kind: input, shape index: {}]   ;;  %s586_s3 = inlined_call_operand.vmem [shape: f32[1,16], index: 3, kind: input, shape index: {}]   ;;  %s587_s4 = inlined_call_operand.vmem [shape: bf16[1,8,256], index: 4, kind: output, shape index: {0}]   ;;  %s588_s5 = inlined_call_operand.vmem [shape: f32[1,1,64], index: 5, kind: output, shape index: {1}]   ;;  %s589_s6 = inlined_call_operand.vmem [shape: f32[1,1,64], index: 6, kind: output, shape index: {2}]  }
   0x1   :  { %s20_s22 = sshll.u32 %s491_s21, 4  ;;  %s21_s22 = int_to_ptr.vmem [resolvable:$true] %s20_s22 }
   0x2   :  { %s477_s23 = scalar_lea.vmem %s21_s22, 1024  ;;  %p482_p1 = scmp.lt.s32.totalorder %s21_s22, %s21_s22 }
   0x3   :  { %p478_p0 = scmp.ne.s32.totalorder %s21_s22, %s477_s23  ;;  %p483_p2 = scmp.lt.s32.totalorder %s477_s23, %s477_s23 }
   0x5   :  { %p484_p3 = por %p483_p2, %p482_p1 }
   0x7   :  { %p485_p4 = pnand %p484_p3, %p478_p0 }
   0x9   :  { %488 = shalt.err (!%p485_p4)
}
   0xa   :  { %s492_s24 = smov 128   ;;  %s493_s25 = smov 8  }
   0xb   :  { %26 = dma.hbm_to_vmem [thread:$0]  %s584_s1, 1024, %s21_s22, [#allocation3], %s492_s24, %s492_s24, %s493_s25  }
   0xc   :  { %489 = dma.done.wait [#allocation3], 1024  }
   0xd   :  { %490 = vsyncadd [#allocation3], 4294966272  ;;  %v54_v0 = vlaneseq  ;;  %v494_v1 = vmov 0   ;;  %v457_v3 = vld [vmem:[#allocation2 + $0x14] ss:$8 sps:$4 sm:$0xff]   ;;  %vm88_vm0 = vcmask 130048  }
   0xe   :  { %178 = vmatprep.mubr.bf16.mxu1 %v494_v1  ;;  %124 = vmatprep.mubr.bf16.mxu0 %v494_v1  ;;  %v459_v4 = vld [vmem:[#allocation2 + $0x10] ss:$8 sps:$4 sm:$0xff]   ;;  %v460_v6 = vld [vmem:[#allocation2 + $0x34] ss:$8 sps:$4 sm:$0xff]   ;;  %v35_v8 = vld [vmem:[%s583_s0] sm:$0xf] }
   0xf   :  { %v534_v2 = vshrl.u32 %v54_v0, 7  ;;  %160 = vmatprep.subr.bf16.mxu1 %v457_v3  ;;  %v462_v7 = vld [vmem:[#allocation2 + $0x30] ss:$8 sps:$4 sm:$0xff]   ;;  %v36_v9 = vunpack.c.l.bf16 %v35_v8  ;;  %v430_v10 = vld [vmem:[%s585_s2] ss:$0 sm:$0xff]  ;;  %106 = vmatprep.subr.bf16.mxu0 %v460_v6  ;;  %s495_s0 = smov 64  }
  0x10   :  { %161 = vmatpush1.bf16.msra.mxu1 %v459_v4  ;;  %v431_v11 = vld [vmem:[%s586_s3] ss:$0 sm:$0xff]  ;;  %v465_v12 = vld [vmem:[#allocation2 + $0x4] ss:$8 sps:$4 sm:$0xff]   ;;  %107 = vmatpush1.bf16.msra.mxu0 %v462_v7  ;;  %vm342_vm5 = vcmask 1048064   ;;  %vm390_vm6 = vcmask 519168  }
  0x11   :  { %v57_v5 = vshra.s32 %v534_v2, 1  ;;  %v44_v13 = vmul.f32 %v430_v10, %v36_v9  ;;  %219 = vmatprep.subr.bf16.mxu0 %v465_v12  ;;  %v468_v14 = vld [vmem:[#allocation2 + $0x24] ss:$8 sps:$4 sm:$0xff]   ;;  %v466_v18 = vld [vmem:[#allocation2 + $0x20] ss:$8 sps:$4 sm:$0xff]   ;;  %v56_v36 = vand.u32 1, %v534_v2 }
  0x12   :  { %270 = vmatprep.subr.bf16.mxu1 %v468_v14  ;;  %v463_v21 = vld [vmem:[#allocation2] ss:$8 sps:$4 sm:$0xff]   ;;  %vm354_vm7 = vcmask 516096   ;;  %vm399_vm8 = vcmask 1043968  }
  0x13   :  { %v58_v15 = vand.u32 1, %v57_v5  ;;  %v52_v16 = vadd.f32 %v431_v11, %v44_v13  ;;  %vm311_vm3 = vcmp.eq.s32.totalorder %v56_v36, 1  ;;  %vm297_vm4 = vcmp.eq.s32.totalorder %v56_v36, 0 }
  0x15   :  { %v53_v17 = vmax.f32 %v52_v16, 0.0  ;;  %vm60_vm1 = vcmp.eq.s32.totalorder %v58_v15, 0  ;;  %vm66_vm2 = vcmp.eq.s32.totalorder %v58_v15, 1 }
  0x17   :  { %v59_v19 = vpack.c.bf16 %v53_v17, %v53_v17  ;;  %v61_v20 = vrot.slane %v53_v17, 6  ;;  %v67_v23 = vrot.slane %v53_v17, 2 }
  0x19   :  { %437 = vmatmul.mubr.msk.bf16.vlgmr.msra.gmra.mxu1 %vm88_vm0, %v59_v19  ;;  %v64_v22 = vsel %vm60_vm1, 0.0, %v61_v20  ;;  %v70_v25 = vsel %vm66_vm2, 0.0, %v67_v23 }
  0x1a   :  { %v65_v24 = vpack.c.bf16 %v64_v22, %v64_v22  ;;  %271 = vmatpush1.bf16.msra.mxu1 %v466_v18  ;;  %288 = vmatprep.mubr.bf16.mxu1 %v494_v1  ;;  %v71_v26 = vpack.c.bf16 %v70_v25, %v70_v25 }
  0x1c   :  { %434 = vmatmul.mubr.msk.bf16.vlgmr.msra.gmra.mxu0 %vm88_vm0, %v65_v24 }
  0x1d   :  { %220 = vmatpush1.bf16.msra.mxu0 %v463_v21  ;;  %237 = vmatprep.mubr.bf16.mxu0 %v494_v1 }
  0x21   :  { %443 = vmatmul.mubr.msk.bf16.vlgmr.msra.gmra.mxu1 %vm88_vm0, %v59_v19 }
  0x24   :  { %440 = vmatmul.mubr.msk.bf16.vlgmr.msra.gmra.mxu0 %vm88_vm0, %v71_v26 }
  0xd9   :  { %v180_v27 = vpop.f32.mrf.mxu1 }
  0xdb   :  { %v182_v28 = vpop.f32.mrf.mxu1 }
  0xdc   :  { %v126_v29 = vpop.f32.mrf.mxu0 }
  0xdd   :  { %v184_v30 = vpop.f32.mrf.mxu1  ;;  %v181_v34 = vadd.f32 %v180_v27, %v126_v29 }
  0xde   :  { %v128_v31 = vpop.f32.mrf.mxu0 }
  0xdf   :  { %v183_v32 = vadd.f32 %v182_v28, %v128_v31  ;;  %v185_v33 = vpop.f32.mrf.mxu1  ;;  %v312_v40 = vrot.slane %v181_v34, 1 }
  0xe0   :  { %v130_v35 = vpop.f32.mrf.mxu0 }
  0xe1   :  { %v290_v37 = vpop.f32.mrf.mxu1  ;;  %299 = vrot.lane.b32.xlu0 %v183_v32, %s495_s0  ;;  %v315_v47 = vsel %vm311_vm3, 0.0, %v312_v40 }
  0xe2   :  { %v131_v38 = vpop.f32.mrf.mxu0  ;;  %v316_v51 = vadd.f32 %v315_v47, %v183_v32 }
  0xe3   :  { %v292_v39 = vpop.f32.mrf.mxu1 }
  0xe4   :  { %v239_v41 = vpop.f32.mrf.mxu0  ;;  %v357_v60 = vmul.f32 %v316_v51, %v316_v51  ;;  %v449_v30 = vpack.c.bf16 %v316_v51, %v316_v51 }
  0xe5   :  { %v291_v42 = vadd.f32 %v290_v37, %v239_v41  ;;  %v294_v43 = vpop.f32.mrf.mxu1 }
  0xe6   :  { %v241_v44 = vpop.f32.mrf.mxu0 }
  0xe7   :  { %v293_v45 = vadd.f32 %v292_v39, %v241_v44  ;;  %v295_v46 = vpop.f32.mrf.mxu1  ;;  %v328_v48 = vrot.slane %v291_v42, 1 }
  0xe8   :  { %v243_v49 = vpop.f32.mrf.mxu0 }
  0xe9   :  { %318 = vrot.lane.b32.xlu0 %v293_v45, %s495_s0  ;;  %v329_v52 = vsel %vm311_vm3, 0.0, %v328_v48 }
  0xea   :  { %v244_v50 = vpop.f32.mrf.mxu0  ;;  %v330_v53 = vadd.f32 %v329_v52, %v293_v45 }
  0xec   :  { %v365_v61 = vmul.f32 %v330_v53, %v330_v53  ;;  %v451_v31 = vpack.c.bf16 %v330_v53, %v330_v53 }
  0xed   :  { %332 = vrot.lane.b32.xlu0 %v316_v51, %s495_s0 }
  0xf1   :  { %338 = vrot.lane.b32.xlu0 %v330_v53, %s495_s0 }
 0x153   :  { %v300_v54 = vpop.permute.xlu0 %299 }
 0x154   :  { %v302_v55 = vrot.slane %v300_v54, 7 }
 0x156   :  { %v305_v56 = vsel %vm297_vm4, 0.0, %v302_v55 }
 0x157   :  { %307 = vrot.lane.b32.xlu1 %v305_v56, %s495_s0 }
 0x15b   :  { %v319_v57 = vpop.permute.xlu0 %318 }
 0x15c   :  { %v321_v58 = vrot.slane %v319_v57, 7 }
 0x15e   :  { %v322_v59 = vsel %vm297_vm4, 0.0, %v321_v58 }
 0x15f   :  { %324 = vrot.lane.b32.xlu1 %v322_v59, %s495_s0  ;;  %v333_v1 = vpop.permute.xlu0 %332 }
 0x163   :  { %359 = vrot.lane.b32.xlu1 %v357_v60, %s495_s0  ;;  %v339_v8 = vpop.permute.xlu0 %338 }
 0x167   :  { %367 = vrot.lane.b32.xlu1 %v365_v61, %s495_s0 }
 0x1c9   :  { %v308_v62 = vpop.permute.xlu1 %307 }
 0x1ca   :  { %v310_v63 = vadd.f32 %v308_v62, %v181_v34 }
 0x1cc   :  { %v448_v0 = vpack.c.bf16 %v310_v63, %v310_v63  ;;  %v335_v3 = vadd.f32 %v333_v1, %v310_v63  ;;  %v356_v6 = vmul.f32 %v310_v63, %v310_v63 }
 0x1ce   :  { %387 = vrot.lane.b32.xlu0 %v448_v0, %s495_s0 }
 0x1d1   :  { %v325_v2 = vpop.permute.xlu1 %324 }
 0x1d2   :  { %v327_v4 = vadd.f32 %v325_v2, %v291_v42 }
 0x1d4   :  { %v336_v5 = vadd.f32 %v335_v3, %v327_v4  ;;  %v450_v7 = vpack.c.bf16 %v327_v4, %v327_v4  ;;  %v363_v11 = vmul.f32 %v327_v4, %v327_v4 }
 0x1d5   :  { %v360_v9 = vpop.permute.xlu1 %359 }
 0x1d6   :  { %v362_v10 = vadd.f32 %v360_v9, %v356_v6  ;;  %405 = vrot.lane.b32.xlu1 %v450_v7, %s495_s0  ;;  %v341_v12 = vadd.f32 %v339_v8, %v336_v5 }
 0x1d8   :  { %v343_v13 = vsel %vm342_vm5, %v341_v12, 0.0  ;;  %v364_v14 = vadd.f32 %v363_v11, %v362_v10 }
 0x1d9   :  { %v368_v15 = vpop.permute.xlu1 %367  ;;  %v344_v16 = vrot.slane %v343_v13, 4 }
 0x1da   :  { %v370_v17 = vadd.f32 %v368_v15, %v364_v14 }
 0x1db   :  { %v345_v18 = vadd.f32 %v344_v16, %v343_v13 }
 0x1dc   :  { %v371_v19 = vsel %vm342_vm5, %v370_v17, 0.0 }
 0x1dd   :  { %v346_v20 = vrot.slane %v345_v18, 2  ;;  %v372_v21 = vrot.slane %v371_v19, 4 }
 0x1df   :  { %v373_v22 = vadd.f32 %v372_v21, %v371_v19  ;;  %v347_v23 = vadd.f32 %v346_v20, %v345_v18 }
 0x1e1   :  { %v374_v24 = vrot.slane %v373_v22, 2  ;;  %v348_v25 = vrot.slane %v347_v23, 1 }
 0x1e3   :  { %v375_v26 = vadd.f32 %v374_v24, %v373_v22  ;;  %v349_v27 = vadd.f32 %v348_v25, %v347_v23 }
 0x1e5   :  { %351 = vrot.lane.b32.xlu0 %v349_v27, %s495_s0  ;;  %v376_v28 = vrot.slane %v375_v26, 1 }
 0x1e7   :  { %v377_v29 = vadd.f32 %v376_v28, %v375_v26 }
 0x1e9   :  { %379 = vrot.lane.b32.xlu1 %v377_v29, %s495_s0  ;;  %396 = vrot.lane.b32.xlu0 %v449_v30, %s495_s0 }
 0x1ed   :  { %413 = vrot.lane.b32.xlu1 %v451_v31, %s495_s0 }
 0x240   :  { %v388_v32 = vpop.permute.xlu0 %387 }
 0x241   :  { %391 = vst.msk [vmem:[%s587_s4] sm:$0xf] %vm390_vm6, %v388_v32 }
 0x248   :  { %v406_v33 = vpop.permute.xlu1 %405 }
 0x249   :  { %408 = vst.msk [vmem:[%s587_s4 + $0x4] sm:$0xf] %vm390_vm6, %v406_v33 }
 0x257   :  { %v352_v34 = vpop.permute.xlu0 %351 }
 0x258   :  { %355 = vst.msk [vmem:[%s588_s5] sm:$0x1] %vm354_vm7, %v352_v34 }
 0x25b   :  { %v380_v35 = vpop.permute.xlu1 %379  ;;  %v397_v36 = vpop.permute.xlu0 %396 }
 0x25c   :  { %382 = vst.msk [vmem:[%s589_s6] sm:$0x1] %vm354_vm7, %v380_v35 }
 0x25d   :  { %400 = vst.msk [vmem:[%s587_s4] sm:$0xf] %vm399_vm8, %v397_v36 }
 0x25f   :  { %v414_v37 = vpop.permute.xlu1 %413 }
 0x260   :  { %416 = vst.msk [vmem:[%s587_s4 + $0x4] sm:$0xf] %vm399_vm8, %v414_v37 }
 0x261   :  { %429 = vsyncpa [#allocation3], 1 }

// kernel: decoder_forward.7
= control target key start
LH: loop header
LB: loop body
LE: loop exit
PB: predicated region body
PF: predicated region fallthrough
CT: control target
= control target key end

     0   :  { %12 = vsyncpa [#allocation3], 0  ;;  %s1249_s21 = smov 0   ;;  %s1449_s0 = inlined_call_operand.vmem [shape: bf16[32,64], index: 0, kind: input, shape index: {}]   ;;  %s1450_s1 = inlined_call_operand.hbm [shape: bf16[4,64,128], index: 1, kind: input, shape index: {}]   ;;  %s1451_s2 = inlined_call_operand.vmem [shape: f32[1,64], index: 2, kind: input, shape index: {}]   ;;  %s1452_s3 = inlined_call_operand.vmem [shape: f32[1,64], index: 3, kind: input, shape index: {}]   ;;  %s1453_s4 = inlined_call_operand.vmem [shape: bf16[2,16,128], index: 4, kind: output, shape index: {0}]   ;;  %s1454_s5 = inlined_call_operand.vmem [shape: f32[2,1,32], index: 5, kind: output, shape index: {1}]   ;;  %s1455_s6 = inlined_call_operand.vmem [shape: f32[2,1,32], index: 6, kind: output, shape index: {2}]  }
   0x1 LB: > { %s1255_s22 = sadd.s32 4294967295, %s1204_s21   ;;  %p1004_p0 = scmp.ge.s32.totalorder %s1204_s21, 1  ;;  %s1204_s21 = sphi %s1249_s21, %s18_s21  }
   0x2   : > { %p190_p1 = scmp.lt.s32.totalorder %s1204_s21, 3  ;;  %s1206_s23 = smov [#allocation2]  }
   0x3   : > { %s202_s24 = sshll.u32 %s1206_s23, 4  ;;  %p1134_p3 = scmp.eq.s32.totalorder %s1255_s22, 0  ;;  %s203_s24 = int_to_ptr.vmem [resolvable:$true] %s202_s24 }
   0x4   : > { %p1259_p2 = pnand %p1004_p0, %p190_p1  ;;  %s1179_s26 = scalar_lea.vmem %s203_s24, 2048 }
   0x5   : > { %p1180_p7 = scmp.ne.s32.totalorder %s203_s24, %s1179_s26  ;;  %p1187_p10 = scmp.lt.s32.totalorder %s203_s24, %s203_s24 }
   0x6   : > { %p1130_p4 = pneg %p1259_p2  ;;  %p1188_p11 = scmp.lt.s32.totalorder %s1179_s26, %s1179_s26 }
   0x8   : > { %p1131_p5 = pnand %p1134_p3, %p1130_p4  ;;  %p1189_p12 = por %p1188_p11, %p1187_p10 }
   0xa   : > { %p1170_p6 = pneg %p1131_p5 }
   0xc   : > { %p1182_p8 = pnand %p1180_p7, %p1170_p6 }
   0xe   : > { %p1183_p9 = pneg %p1182_p8 }
  0x10   : > { %p1190_p13 = pnand %p1189_p12, %p1183_p9 }
  0x12   : > { %1193 = shalt.err (!%p1190_p13)
}
  0x13   : > { %s1207_s27 = smov 64   ;;  %s1208_s28 = smov 4  }
  0x14   : > { %1133 = dma.hbm_to_vmem [thread:$0]  (!%p1131_p5), %s1450_s1, 2048, %s203_s24, [#allocation3], %s1207_s27, %s1207_s27, %s1208_s28  }
  0x15   : > { %233 = sbr.rel (%p1259_p2) target bundleno = 652 (0x28c), region = 36 }
  0x1a   : > { %1199 = dma.done.wait (%p1134_p3), [#allocation3], 2048  }
  0x1b   : > { %1201 = vsyncadd (%p1134_p3), [#allocation3], 4294965248  ;;  %s1009_s7 = sshll.u32 %s1255_s22, 1  ;;  %v1209_v0 = vmov 0.0   ;;  %vm1210_vm0 = vmmov 0   ;;  %v311_v1 = vlaneseq  ;;  %v1152_v2 = vld [vmem:[#allocation2 + $0x78] sm:$0xff]  }
  0x1c   : > { %1078 = vmatprep.subr.bf16.mxu0 %v1209_v0  ;;  %1090 = vmatprep.subr.bf16.mxu1 %v1209_v0  ;;  %p270_p0 = scmp.lt.s32.totalorder %s1009_s7, 3  ;;  %v1153_v3 = vld [vmem:[#allocation2 + $0x38] sm:$0xff]   ;;  %v1154_v5 = vld [vmem:[#allocation2 + $0x70] sm:$0xff]   ;;  %v1156_v8 = vld [vmem:[#allocation2 + $0x68] sm:$0xff]   ;;  %vm386_vm2 = vcmask 523264   ;;  %s1211_s16 = smov 32  }
  0x1d   : > { %1086 = vmatprep.mubr.msk.bf16.mxu0 %vm1210_vm0, %v1209_v0  ;;  %1098 = vmatprep.mubr.msk.bf16.mxu1 %vm1210_vm0, %v1209_v0  ;;  %v1284_v4 = vshrl.u32 %v311_v1, 7  ;;  %v1155_v6 = vld [vmem:[#allocation2 + $0x30] sm:$0xff]   ;;  %v1157_v9 = vld [vmem:[#allocation2 + $0x28] sm:$0xff]   ;;  %v1013_v11 = vld [vmem:[%s1451_s2] ss:$0 sm:$0xff]  ;;  %s1212_s17 = smov 64  }
  0x1e   : > { %s1464_s7 = smov (!%p270_p0, %s1009_s7), 3  ;;  %1079 = vmatpush3.bf16.msra.mxu0 %v1152_v2  ;;  %1091 = vmatpush3.bf16.msra.mxu1 %v1153_v3  ;;  %v1158_v13 = vld [vmem:[#allocation2 + $0x60] sm:$0xff]   ;;  %v1161_v27 = vld [vmem:[#allocation2 + $0x58] sm:$0xff]   ;;  %v1163_v36 = vld [vmem:[#allocation2 + $0x50] sm:$0xff]   ;;  %s1213_s18 = smov 96   ;;  %vm765_vm13 = vcmask 523520  }
  0x1f   : > { %s1010_s8 = sshll.u32 %s1464_s7, 2  ;;  %1080 = vmatprep.subr.bf16.mxu0 %v1209_v0  ;;  %1092 = vmatprep.subr.bf16.mxu1 %v1209_v0  ;;  %v1292_v7 = vadd.s32 8, %v1284_v4  ;;  %v316_v12 = vshra.s32 %v1284_v4, 2  ;;  %v1014_v17 = vld [vmem:[%s1452_s3] ss:$0 sm:$0xff]  ;;  %vm325_vm1 = vcmp.lt.s32.totalorder %v1284_v4, 4 }
  0x20   : > { %s273_s11 = scalar_lea.vmem %s1449_s0, %s1010_s8  ;;  %v1159_v18 = vld [vmem:[#allocation2 + $0x20] sm:$0xff]   ;;  %v1160_v35 = vld [vmem:[#allocation2 + $0x18] sm:$0xff]   ;;  %v1162_v38 = vld [vmem:[#allocation2 + $0x10] sm:$0xff]   ;;  %v314_v53 = vand.u32 3, %v1284_v4  ;;  %vm684_vm7 = vcmp.lt.s32.totalorder %v1284_v4, 7  ;;  %vm661_vm10 = vcmp.lt.s32.totalorder %v1284_v4, 1 }
  0x21   : > { %v1055_v10 = vld [vmem:[%s273_s11] sm:$0xff]   ;;  %v317_v16 = vshra.s32 %v1292_v7, 2  ;;  %v318_v21 = vand.u32 3, %v316_v12  ;;  %v1165_v39 = vld [vmem:[#allocation2 + $0x48] sm:$0xff]   ;;  %p275_p1 = scmp.lt.s32.totalorder %s1255_s22, 1  ;;  %vm837_vm14 = vcmask 257024  }
  0x22   : > { %1081 = vmatpush3.bf16.msra.mxu0 %v1154_v5  ;;  %1093 = vmatpush3.bf16.msra.mxu1 %v1155_v6  ;;  %v1056_v14 = vunpack.c.l.bf16 %v1055_v10  ;;  %v1057_v15 = vunpack.c.h.bf16 %v1055_v10  ;;  %v1164_v40 = vld [vmem:[#allocation2 + $0x8] sm:$0xff]   ;;  %v1167_v41 = vld [vmem:[#allocation2 + $0x40] sm:$0xff]   ;;  %vm1333_vm8 = vcmp.eq.s32.totalorder %v314_v53, 3  ;;  %v315_v6 = vand.u32 3, %v1292_v7 }
  0x23   : > { %1082 = vmatprep.subr.bf16.mxu0 %v1209_v0  ;;  %1094 = vmatprep.subr.bf16.mxu1 %v1209_v0  ;;  %v319_v24 = vand.u32 3, %v317_v16  ;;  %vm321_vm3 = vcmp.eq.s32.totalorder %v318_v21, 0  ;;  %vm335_vm5 = vcmp.eq.s32.totalorder %v318_v21, 3  ;;  %v1166_v44 = vld [vmem:[#allocation2] sm:$0xff]   ;;  %vm1367_vm12 = vcmp.eq.s32.totalorder %v314_v53, 0  ;;  %s1466_s22 = smov (!%p275_p1, %s1255_s22), 1 }
  0x24   : > { %v298_v19 = vmul.f32 %v1056_v14, %v1013_v11  ;;  %v299_v20 = vmul.f32 %v1057_v15, %v1013_v11  ;;  %vm681_vm9 = vcmp.eq.s32.totalorder %v315_v6, 3  ;;  %vm1363_vm11 = vcmp.eq.s32.totalorder %v315_v6, 0  ;;  %s1045_s19 = sshll.u32 %s1466_s22, 3  ;;  %s282_s27 = scalar_lea.vmem %s1454_s5, %s1466_s22 }
  0x25   : > { %vm322_vm4 = vcmp.eq.s32.totalorder %v319_v24, 0  ;;  %vm336_vm6 = vcmp.eq.s32.totalorder %v319_v24, 3  ;;  %s279_s24 = scalar_lea.vmem %s1453_s4, %s1045_s19  ;;  %vm852_vm15 = vcmask 519424   ;;  %s285_s30 = scalar_lea.vmem %s1455_s6, %s1466_s22 }
  0x26   : > { %1083 = vmatpush3.bf16.msra.mxu0 %v1156_v8  ;;  %1095 = vmatpush3.bf16.msra.mxu1 %v1157_v9  ;;  %v307_v22 = vadd.f32 %v1014_v17, %v298_v19  ;;  %v308_v23 = vadd.f32 %v1014_v17, %v299_v20 }
  0x27   : > { %1084 = vmatprep.subr.bf16.mxu0 %v1209_v0  ;;  %1096 = vmatprep.subr.bf16.mxu1 %v1209_v0 }
  0x28   : > { %v309_v25 = vmax.f32 %v307_v22, 0.0  ;;  %v310_v26 = vmax.f32 %v308_v23, 0.0 }
  0x2a   : > { %1085 = vmatpush3.bf16.msra.mxu0 %v1158_v13  ;;  %1097 = vmatpush3.bf16.msra.mxu1 %v1159_v18  ;;  %v323_v28 = vrot.slane %v309_v25, 4  ;;  %v324_v29 = vrot.slane %v310_v26, 4  ;;  %v320_v30 = vpack.c.bf16 %v310_v26, %v309_v25 }
  0x2b   : > { %1102 = vmatprep.subr.bf16.mxu0 %v1209_v0  ;;  %1114 = vmatprep.subr.bf16.mxu1 %v1209_v0 }
  0x2c   : > { %v326_v31 = vsel %vm325_vm1, %v323_v28, %v324_v29  ;;  %v327_v32 = vsel %vm325_vm1, %v324_v29, %v323_v28  ;;  %vm779_vm1 = vcmask 253952  }
  0x2d   : > { %1099 = vmatmul.mubr.msk.bf16.vlgmr.msra.gmra.mxu1 %vm386_vm2, %v320_v30  ;;  %v332_v33 = vsel %vm321_vm3, 0.0, %v327_v32  ;;  %v333_v34 = vsel %vm322_vm4, 0.0, %v326_v31  ;;  %v341_v42 = vsel %vm335_vm5, 0.0, %v326_v31  ;;  %v342_v43 = vsel %vm336_vm6, 0.0, %v327_v32 }
  0x2e   : > { %1115 = vmatpush3.bf16.msra.mxu1 %v1161_v27  ;;  %1122 = vmatprep.mubr.msk.bf16.mxu1 %vm1210_vm0, %v1209_v0  ;;  %v334_v37 = vpack.c.bf16 %v333_v34, %v332_v33  ;;  %v343_v45 = vpack.c.bf16 %v342_v43, %v341_v42 }
  0x2f   : > { %1116 = vmatprep.subr.bf16.mxu1 %v1209_v0 }
  0x30   : > { %1087 = vmatmul.mubr.msk.bf16.vlgmr.msra.gmra.mxu0 %vm386_vm2, %v334_v37 }
  0x31   : > { %1103 = vmatpush3.bf16.msra.mxu0 %v1160_v35  ;;  %1110 = vmatprep.mubr.msk.bf16.mxu0 %vm1210_vm0, %v1209_v0  ;;  %vm867_vm0 = vcmask 781824  }
  0x32   : > { %1117 = vmatpush3.bf16.msra.mxu1 %v1163_v36  ;;  %1104 = vmatprep.subr.bf16.mxu0 %v1209_v0 }
  0x33   : > { %1118 = vmatprep.subr.bf16.mxu1 %v1209_v0 }
  0x35   : > { %1105 = vmatpush3.bf16.msra.mxu0 %v1162_v38 }
  0x36   : > { %1119 = vmatpush3.bf16.msra.mxu1 %v1165_v39  ;;  %1106 = vmatprep.subr.bf16.mxu0 %v1209_v0 }
  0x37   : > { %1120 = vmatprep.subr.bf16.mxu1 %v1209_v0 }
  0x39   : > { %1107 = vmatpush3.bf16.msra.mxu0 %v1164_v40 }
  0x3a   : > { %1121 = vmatpush3.bf16.msra.mxu1 %v1167_v41  ;;  %1108 = vmatprep.subr.bf16.mxu0 %v1209_v0 }
  0x3d   : > { %1123 = vmatmul.mubr.msk.bf16.vlgmr.msra.gmra.mxu1 %vm386_vm2, %v320_v30  ;;  %1109 = vmatpush3.bf16.msra.mxu0 %v1166_v44 }
  0x40   : > { %1111 = vmatmul.mubr.msk.bf16.vlgmr.msra.gmra.mxu0 %vm386_vm2, %v343_v45  ;;  %vm882_vm2 = vcmask 1044224  }
  0xed   : > { %v492_v46 = vpop.f32.mrf.mxu1 }
  0xef   : > { %v1100_v47 = vpop.f32.mrf.mxu1 }
  0xf0   : > { %v424_v48 = vpop.f32.mrf.mxu0 }
  0xf1   : > { %v495_v49 = vpop.f32.mrf.mxu1  ;;  %v1323_v50 = vadd.f32 %v492_v46, %v424_v48 }
  0xf2   : > { %v1088_v51 = vpop.f32.mrf.mxu0 }
  0xf3   : > { %v1101_v52 = vpop.f32.mrf.mxu1  ;;  %653 = vrot.lane.b32.xlu0 %v1323_v50, %s1211_s16  ;;  %v682_v58 = vrot.slane %v1323_v50, 1 }
  0xf4   : > { %v427_v54 = vpop.f32.mrf.mxu0 }
  0xf5   : > { %v1328_v55 = vadd.f32 %v495_v49, %v427_v54 }
  0xf6   : > { %v1089_v56 = vpop.f32.mrf.mxu0 }
  0xf7   : > { %655 = vrot.lane.b32.xlu0 %v1328_v55, %s1211_s16  ;;  %v683_v59 = vrot.slane %v1328_v55, 1 }
  0xf9   : > { %v685_v60 = vsel %vm684_vm7, %v682_v58, %v683_v59  ;;  %v686_v11 = vsel %vm684_vm7, %v683_v59, %v682_v58 }
  0xfa   : > { %v691_v61 = vsel %vm1333_vm8, 0.0, %v685_v60  ;;  %v692_v15 = vsel %vm681_vm9, 0.0, %v686_v11 }
  0xfb   : > { %695 = vrot.lane.b32.xlu0 %v691_v61, %s1212_s17 }
  0xfd   : > { %v642_v62 = vpop.f32.mrf.mxu1 }
  0xff   : > { %v1124_v63 = vpop.f32.mrf.mxu1 }
 0x100   : > { %v577_v0 = vpop.f32.mrf.mxu0 }
 0x101   : > { %v645_v1 = vpop.f32.mrf.mxu1  ;;  %v1343_v2 = vadd.f32 %v642_v62, %v577_v0 }
 0x102   : > { %v1112_v3 = vpop.f32.mrf.mxu0 }
 0x103   : > { %v1125_v5 = vpop.f32.mrf.mxu1  ;;  %705 = vrot.lane.b32.xlu1 %v1343_v2, %s1211_s16  ;;  %v727_v12 = vrot.slane %v1343_v2, 1 }
 0x104   : > { %v580_v8 = vpop.f32.mrf.mxu0 }
 0x105   : > { %v1348_v9 = vadd.f32 %v645_v1, %v580_v8 }
 0x106   : > { %v1113_v10 = vpop.f32.mrf.mxu0 }
 0x107   : > { %707 = vrot.lane.b32.xlu1 %v1348_v9, %s1211_s16  ;;  %v728_v13 = vrot.slane %v1348_v9, 1 }
 0x109   : > { %v729_v14 = vsel %vm684_vm7, %v727_v12, %v728_v13  ;;  %v730_v16 = vsel %vm684_vm7, %v728_v13, %v727_v12 }
 0x10a   : > { %v731_v7 = vsel %vm1333_vm8, 0.0, %v729_v14  ;;  %v732_v17 = vsel %vm681_vm9, 0.0, %v730_v16 }
 0x10b   : > { %697 = vrot.lane.b32.xlu1 %v692_v15, %s1212_s17  ;;  %735 = vrot.lane.b32.xlu0 %v731_v7, %s1212_s17 }
 0x10f   : > { %737 = vrot.lane.b32.xlu1 %v732_v17, %s1212_s17 }
 0x165   : > { %v654_v18 = vpop.permute.xlu0 %653 }
 0x166   : > { %v659_v20 = vrot.slane %v654_v18, 7 }
 0x169   : > { %v656_v19 = vpop.permute.xlu0 %655 }
 0x16a   : > { %v660_v21 = vrot.slane %v656_v19, 7 }
 0x16c   : > { %v662_v24 = vsel %vm661_vm10, %v659_v20, %v660_v21  ;;  %v663_v25 = vsel %vm661_vm10, %v660_v21, %v659_v20 }
 0x16d   : > { %v696_v26 = vpop.permute.xlu0 %695  ;;  %v669_v27 = vsel %vm1363_vm11, 0.0, %v662_v24  ;;  %v668_v28 = vsel %vm1367_vm12, 0.0, %v663_v25 }
 0x16e   : > { %674 = vrot.lane.b32.xlu1 %v669_v27, %s1211_s16  ;;  %672 = vrot.lane.b32.xlu0 %v668_v28, %s1211_s16  ;;  %v701_v29 = vadd.f32 %v696_v26, %v1323_v50 }
 0x170   : > { %v783_v30 = vmul.f32 %v701_v29, %v701_v29  ;;  %v1048_v46 = vpack.c.bf16 %v701_v29, %v701_v29 }
 0x172   : > { %745 = vrot.lane.b32.xlu0 %v701_v29, %s1213_s18 }
 0x175   : > { %v706_v31 = vpop.permute.xlu1 %705 }
 0x176   : > { %787 = vrot.lane.b32.xlu0 %v783_v30, %s1213_s18  ;;  %v711_v33 = vrot.slane %v706_v31, 7 }
 0x179   : > { %v708_v32 = vpop.permute.xlu1 %707 }
 0x17a   : > { %v712_v34 = vrot.slane %v708_v32, 7 }
 0x17c   : > { %v714_v35 = vsel %vm661_vm10, %v712_v34, %v711_v33  ;;  %v713_v43 = vsel %vm661_vm10, %v711_v33, %v712_v34 }
 0x17d   : > { %v698_v36 = vpop.permute.xlu1 %697  ;;  %v736_v37 = vpop.permute.xlu0 %735  ;;  %v715_v38 = vsel %vm1367_vm12, 0.0, %v714_v35  ;;  %v716_v45 = vsel %vm1363_vm11, 0.0, %v713_v43 }
 0x17e   : > { %v702_v39 = vadd.f32 %v698_v36, %v1328_v55  ;;  %719 = vrot.lane.b32.xlu0 %v715_v38, %s1211_s16  ;;  %v1391_v40 = vadd.f32 %v736_v37, %v1343_v2 }
 0x180   : > { %747 = vrot.lane.b32.xlu1 %v702_v39, %s1213_s18  ;;  %v784_v41 = vmul.f32 %v702_v39, %v702_v39  ;;  %v799_v42 = vmul.f32 %v1391_v40, %v1391_v40  ;;  %v1049_v48 = vpack.c.bf16 %v702_v39, %v702_v39  ;;  %v1052_v39 = vpack.c.bf16 %v1391_v40, %v1391_v40 }
 0x181   : > { %v738_v44 = vpop.permute.xlu1 %737 }
 0x182   : > { %757 = vrot.lane.b32.xlu0 %v1391_v40, %s1213_s18  ;;  %v1406_v47 = vadd.f32 %v738_v44, %v1348_v9 }
 0x184   : > { %789 = vrot.lane.b32.xlu1 %v784_v41, %s1213_s18  ;;  %v800_v4 = vmul.f32 %v1406_v47, %v1406_v47 }
 0x186   : > { %803 = vrot.lane.b32.xlu0 %v799_v42, %s1213_s18  ;;  %v1053_v42 = vpack.c.bf16 %v1406_v47, %v1406_v47 }
 0x188   : > { %721 = vrot.lane.b32.xlu1 %v716_v45, %s1211_s16 }
 0x18a   : > { %846 = vrot.lane.b32.xlu0 %v1048_v46, %s1213_s18 }
 0x18c   : > { %759 = vrot.lane.b32.xlu1 %v1406_v47, %s1213_s18 }
 0x190   : > { %805 = vrot.lane.b32.xlu1 %v800_v4, %s1213_s18 }
 0x194   : > { %848 = vrot.lane.b32.xlu1 %v1049_v48, %s1213_s18 }
 0x1e0   : > { %v675_v49 = vpop.permute.xlu1 %674  ;;  %v673_v51 = vpop.permute.xlu0 %672 }
 0x1e1   : > { %v679_v52 = vadd.f32 %v675_v49, %v1328_v55  ;;  %v678_v53 = vadd.f32 %v673_v51, %v1323_v50 }
 0x1e3   : > { %v1047_v54 = vpack.c.bf16 %v679_v52, %v679_v52  ;;  %v1046_v56 = vpack.c.bf16 %v678_v53, %v678_v53  ;;  %v781_v50 = vmul.f32 %v678_v53, %v678_v53  ;;  %v782_v11 = vmul.f32 %v679_v52, %v679_v52 }
 0x1e4   : > { %v746_v57 = vpop.permute.xlu0 %745 }
 0x1e5   : > { %833 = vrot.lane.b32.xlu1 %v1047_v54, %s1213_s18  ;;  %831 = vrot.lane.b32.xlu0 %v1046_v56, %s1213_s18  ;;  %v751_v0 = vadd.f32 %v746_v57, %v678_v53 }
 0x1e8   : > { %v788_v58 = vpop.permute.xlu0 %787 }
 0x1e9   : > { %v793_v10 = vadd.f32 %v788_v58, %v781_v50 }
 0x1f0   : > { %v720_v59 = vpop.permute.xlu0 %719 }
 0x1f1   : > { %v725_v60 = vadd.f32 %v720_v59, %v1343_v2 }
 0x1f2   : > { %v748_v61 = vpop.permute.xlu1 %747 }
 0x1f3   : > { %v1050_v62 = vpack.c.bf16 %v725_v60, %v725_v60  ;;  %v753_v1 = vadd.f32 %v751_v0, %v725_v60  ;;  %v752_v5 = vadd.f32 %v748_v61, %v679_v52  ;;  %v795_v6 = vmul.f32 %v725_v60, %v725_v60 }
 0x1f4   : > { %v758_v55 = vpop.permute.xlu0 %757 }
 0x1f5   : > { %861 = vrot.lane.b32.xlu0 %v1050_v62, %s1211_s16  ;;  %v763_v12 = vadd.f32 %v758_v55, %v753_v1  ;;  %v797_v17 = vadd.f32 %v795_v6, %v793_v10 }
 0x1f6   : > { %v790_v63 = vpop.permute.xlu1 %789 }
 0x1f7   : > { %v794_v16 = vadd.f32 %v790_v63, %v782_v11  ;;  %v766_v19 = vsel %vm765_vm13, %v763_v12, 0.0 }
 0x1f8   : > { %v804_v15 = vpop.permute.xlu0 %803 }
 0x1f9   : > { %v809_v20 = vadd.f32 %v804_v15, %v797_v17 }
 0x1fa   : > { %v722_v3 = vpop.permute.xlu1 %721 }
 0x1fb   : > { %v726_v8 = vadd.f32 %v722_v3, %v1348_v9  ;;  %v811_v26 = vsel %vm765_vm13, %v809_v20, 0.0 }
 0x1fc   : > { %v847_v43 = vpop.permute.xlu0 %846 }
 0x1fd   : > { %v754_v13 = vadd.f32 %v752_v5, %v726_v8  ;;  %v1051_v14 = vpack.c.bf16 %v726_v8, %v726_v8  ;;  %v796_v2 = vmul.f32 %v726_v8, %v726_v8 }
 0x1fe   : > { %v760_v7 = vpop.permute.xlu1 %759 }
 0x1ff   : > { %v764_v18 = vadd.f32 %v760_v7, %v754_v13  ;;  %863 = vrot.lane.b32.xlu1 %v1051_v14, %s1211_s16  ;;  %v798_v9 = vadd.f32 %v796_v2, %v794_v16 }
 0x201   : > { %v767_v21 = vsel %vm765_vm13, %v764_v18, 0.0 }
 0x202   : > { %v768_v22 = vadd.f32 %v767_v21, %v766_v19  ;;  %v806_v23 = vpop.permute.xlu1 %805 }
 0x203   : > { %v810_v24 = vadd.f32 %v806_v23, %v798_v9 }
 0x204   : > { %v769_v25 = vrot.slane %v768_v22, 4 }
 0x205   : > { %v812_v27 = vsel %vm765_vm13, %v810_v24, 0.0 }
 0x206   : > { %v770_v28 = vadd.f32 %v769_v25, %v768_v22  ;;  %v813_v29 = vadd.f32 %v812_v27, %v811_v26  ;;  %v849_v44 = vpop.permute.xlu1 %848 }
 0x208   : > { %v771_v30 = vrot.slane %v770_v28, 2  ;;  %v814_v31 = vrot.slane %v813_v29, 4 }
 0x20a   : > { %v815_v32 = vadd.f32 %v814_v31, %v813_v29  ;;  %v772_v33 = vadd.f32 %v771_v30, %v770_v28 }
 0x20c   : > { %v816_v34 = vrot.slane %v815_v32, 2  ;;  %v773_v35 = vrot.slane %v772_v33, 1 }
 0x20e   : > { %v774_v36 = vadd.f32 %v773_v35, %v772_v33  ;;  %v817_v37 = vadd.f32 %v816_v34, %v815_v32 }
 0x210   : > { %776 = vrot.lane.b32.xlu0 %v774_v36, %s1213_s18  ;;  %v818_v38 = vrot.slane %v817_v37, 1 }
 0x212   : > { %v819_v41 = vadd.f32 %v818_v38, %v817_v37 }
 0x214   : > { %876 = vrot.lane.b32.xlu0 %v1052_v39, %s1211_s16  ;;  %821 = vrot.lane.b32.xlu1 %v819_v41, %s1213_s18 }
 0x218   : > { %878 = vrot.lane.b32.xlu1 %v1053_v42, %s1211_s16 }
 0x257   : > { %v834_v40 = vpop.permute.xlu1 %833  ;;  %v832_v45 = vpop.permute.xlu0 %831 }
 0x258   : > { %839 = vst.msk [vmem:[%s279_s24 + $0x4] sm:$0xf] %vm837_vm14, %v834_v40  ;;  %838 = vst.msk [vmem:[%s279_s24] sm:$0xf] %vm837_vm14, %v832_v45 }
 0x259   : > { %854 = vst.msk [vmem:[%s279_s24 + $0x4] sm:$0xf] %vm852_vm15, %v849_v44  ;;  %853 = vst.msk [vmem:[%s279_s24] sm:$0xf] %vm852_vm15, %v847_v43 }
 0x267   : > { %v862_v46 = vpop.permute.xlu0 %861 }
 0x268   : > { %868 = vst.msk [vmem:[%s279_s24] sm:$0xf] %vm867_vm0, %v862_v46 }
 0x271   : > { %v864_v47 = vpop.permute.xlu1 %863 }
 0x272   : > { %869 = vst.msk [vmem:[%s279_s24 + $0x4] sm:$0xf] %vm867_vm0, %v864_v47 }
 0x282   : > { %v777_v4 = vpop.permute.xlu0 %776 }
 0x283   : > { %780 = vst.msk [vmem:[%s282_s27] sm:$0x1] %vm779_vm1, %v777_v4 }
 0x286   : > { %v822_v48 = vpop.permute.xlu1 %821  ;;  %v877_v49 = vpop.permute.xlu0 %876 }
 0x287   : > { %824 = vst.msk [vmem:[%s285_s30] sm:$0x1] %vm779_vm1, %v822_v48 }
 0x288   : > { %883 = vst.msk [vmem:[%s279_s24] sm:$0xf] %vm882_vm2, %v877_v49 }
 0x28a   : > { %v879_v51 = vpop.permute.xlu1 %878 }
 0x28b   : > { %884 = vst.msk [vmem:[%s279_s24 + $0x4] sm:$0xf] %vm882_vm2, %v879_v51 }
 0x28c PF: > { %s18_s21 = sadd.s32 1, %s1204_s21  }
 0x28d   : > { %p15_p2 = scmp.ge.s32.totalorder %s18_s21, 4  }
 0x28f   :  { %17 = sbr.rel (!%p15_p2) target bundleno = 1 (0x1), region = 98 }
 0x294   :  { %930 = vsyncpa [#allocation3], 1 }
 0x295   :  { %932 = vsyncpa [#allocation3 + $0x1], 1 }

// kernel: decoder_forward.8
= control target key start
LH: loop header
LB: loop body
LE: loop exit
PB: predicated region body
PF: predicated region fallthrough
CT: control target
= control target key end

     0   :  { %12 = vsyncpa [#allocation3], 0  ;;  %s2099_s21 = smov 0   ;;  %s2987_s0 = inlined_call_operand.vmem [shape: bf16[128,32], index: 0, kind: input, shape index: {}]   ;;  %s2988_s1 = inlined_call_operand.hbm [shape: bf16[4,32,32], index: 1, kind: input, shape index: {}]   ;;  %s2989_s2 = inlined_call_operand.vmem [shape: f32[1,32], index: 2, kind: input, shape index: {}]   ;;  %s2990_s3 = inlined_call_operand.vmem [shape: f32[1,32], index: 3, kind: input, shape index: {}]   ;;  %s2991_s4 = inlined_call_operand.vmem [shape: bf16[2,64,32], index: 4, kind: output, shape index: {0}]   ;;  %s2992_s5 = inlined_call_operand.vmem [shape: f32[2,1,8], index: 5, kind: output, shape index: {1}]   ;;  %s2993_s6 = inlined_call_operand.vmem [shape: f32[2,1,8], index: 6, kind: output, shape index: {2}]  }
   0x1 LB: > { %s2105_s22 = sadd.s32 4294967295, %s2055_s21   ;;  %p1793_p0 = scmp.ge.s32.totalorder %s2055_s21, 1  ;;  %s2055_s21 = sphi %s2099_s21, %s18_s21  }
   0x2   : > { %p190_p1 = scmp.lt.s32.totalorder %s2055_s21, 3  ;;  %s2057_s23 = smov [#allocation2]  }
   0x3   : > { %s202_s24 = sshll.u32 %s2057_s23, 4  ;;  %p1994_p3 = scmp.eq.s32.totalorder %s2105_s22, 0  ;;  %s203_s24 = int_to_ptr.vmem [resolvable:$true] %s202_s24 }
   0x4   : > { %p2109_p2 = pnand %p1793_p0, %p190_p1  ;;  %s2030_s26 = scalar_lea.vmem %s203_s24, 1024 }
   0x5   : > { %p2031_p7 = scmp.ne.s32.totalorder %s203_s24, %s2030_s26  ;;  %p2038_p10 = scmp.lt.s32.totalorder %s203_s24, %s203_s24 }
   0x6   : > { %p1990_p4 = pneg %p2109_p2  ;;  %p2039_p11 = scmp.lt.s32.totalorder %s2030_s26, %s2030_s26 }
   0x8   : > { %p1991_p5 = pnand %p1994_p3, %p1990_p4  ;;  %p2040_p12 = por %p2039_p11, %p2038_p10 }
   0xa   : > { %p2021_p6 = pneg %p1991_p5 }
   0xc   : > { %p2033_p8 = pnand %p2031_p7, %p2021_p6 }
   0xe   : > { %p2034_p9 = pneg %p2033_p8 }
  0x10   : > { %p2041_p13 = pnand %p2040_p12, %p2034_p9 }
  0x12   : > { %2044 = shalt.err (!%p2041_p13)
}
  0x13   : > { %s2058_s27 = smov 64   ;;  %s2059_s28 = smov 4  }
  0x14   : > { %1993 = dma.hbm_to_vmem [thread:$0]  (!%p1991_p5), %s2988_s1, 1024, %s203_s24, [#allocation3], %s2058_s27, %s2058_s27, %s2059_s28  }
  0x15   : > { %233 = sbr.rel (%p2109_p2) target bundleno = 713 (0x2c9), region = 36 }
  0x1a   : > { %2050 = dma.done.wait (%p1994_p3), [#allocation3], 1024  }
  0x1b   : > { %2052 = vsyncadd (%p1994_p3), [#allocation3], 4294966272  ;;  %s1798_s7 = sshll.u32 %s2105_s22, 3  ;;  %v341_v0 = vlaneseq  ;;  %v2011_v9 = vld [vmem:[#allocation2 + $0x18] sm:$0xff]   ;;  %v2013_v13 = vld [vmem:[#allocation2 + $0x10] sm:$0xff]   ;;  %vm472_vm0 = vcmask 261120  }
  0x1c   : > { %p270_p0 = scmp.lt.s32.totalorder %s1798_s7, 15  ;;  %v2012_v11 = vld [vmem:[#allocation2 + $0x38] sm:$0xff]   ;;  %1950 = vmatprep.subr.bf16.mxu1 %v2011_v9  ;;  %v2014_v15 = vld [vmem:[#allocation2 + $0x30] sm:$0xff]   ;;  %v2162_v18 = vld [vmem:[%s2989_s2] ss:$0 sm:$0xff]  ;;  %s2060_s16 = smov 104  }
  0x1d   : > { %v2128_v1 = vshrl.u32 %v341_v0, 7  ;;  %1938 = vmatprep.subr.bf16.mxu0 %v2012_v11  ;;  %1951 = vmatpush3.bf16.msra.mxu1 %v2011_v9  ;;  %v2174_v24 = vld [vmem:[%s2990_s3] ss:$0 sm:$0xff]  ;;  %v2182_v31 = vld [vmem:[#allocation2 + $0x8] sm:$0xff]   ;;  %s2061_s17 = smov 16   ;;  %s2062_s18 = smov 8  }
  0x1e   : > { %s3028_s7 = smov (!%p270_p0, %s1798_s7), 15  ;;  %1939 = vmatpush3.bf16.msra.mxu0 %v2012_v11  ;;  %1952 = vmatprep.subr.bf16.mxu1 %v2013_v13  ;;  %v2016_v40 = vld [vmem:[#allocation2 + $0x28] sm:$0xff]   ;;  %v2018_v62 = vld [vmem:[#allocation2 + $0x20] sm:$0xff]   ;;  %s2063_s19 = smov 120  }
  0x1f   : > { %v2131_v2 = vadd.s32 8, %v2128_v1  ;;  %v358_v3 = vshra.s32 %v2128_v1, 3  ;;  %v2135_v4 = vadd.s32 16, %v2128_v1  ;;  %s1799_s8 = sshll.u32 %s3028_s7, 2  ;;  %v2139_v6 = vadd.s32 24, %v2128_v1  ;;  %1940 = vmatprep.subr.bf16.mxu0 %v2014_v15  ;;  %p275_p1 = scmp.lt.s32.totalorder %s2105_s22, 1 }
  0x20   : > { %v2142_v7 = vadd.s32 32, %v2128_v1  ;;  %v2145_v8 = vadd.s32 40, %v2128_v1  ;;  %s2152_s11 = scalar_lea.vmem %s2987_s0, %s1799_s8  ;;  %v2166_v20 = vadd.s32 48, %v2128_v1  ;;  %v2169_v21 = vadd.s32 56, %v2128_v1 }
  0x21   : > { %v359_v5 = vshra.s32 %v2131_v2, 3  ;;  %v2147_v10 = vand.u32 7, %v358_v3  ;;  %v360_v12 = vshra.s32 %v2135_v4, 3  ;;  %v361_v16 = vshra.s32 %v2139_v6, 3  ;;  %v1896_v17 = vld [vmem:[%s2152_s11] sm:$0xff]   ;;  %v1913_v25 = vld [vmem:[%s2152_s11 + $0x18] sm:$0xff]   ;;  %1953 = vmatpush3.bf16.msra.mxu1 %v2013_v13 }
  0x22   : > { %v362_v19 = vshra.s32 %v2142_v7, 3  ;;  %v1897_v22 = vunpack.c.l.bf16 %v1896_v17  ;;  %v1898_v23 = vunpack.c.h.bf16 %v1896_v17  ;;  %v1911_v26 = vld [vmem:[%s2152_s11 + $0x8] sm:$0xff]   ;;  %v1910_v28 = vunpack.c.h.bf16 %v1913_v25  ;;  %v1912_v35 = vld [vmem:[%s2152_s11 + $0x10] sm:$0xff]   ;;  %1941 = vmatpush3.bf16.msra.mxu0 %v2014_v15  ;;  %1974 = vmatprep.subr.bf16.mxu1 %v2016_v40  ;;  %v2017_v15 = vld [vmem:[#allocation2] sm:$0xff]   ;;  %s3030_s22 = smov (!%p275_p1, %s2105_s22), 1 }
  0x23   : > { %v2155_v14 = vand.u32 7, %v359_v5  ;;  %vm378_vm1 = vcmp.eq.s32.totalorder %v2147_v10, 0  ;;  %v2179_v27 = vand.u32 7, %v360_v12  ;;  %v1901_v29 = vunpack.c.l.bf16 %v1911_v26  ;;  %1962 = vmatprep.subr.bf16.mxu0 %v2182_v31  ;;  %s1862_s20 = sshll.u32 %s3030_s22, 5  ;;  %s282_s28 = scalar_lea.vmem %s2992_s5, %s3030_s22 }
  0x24   : > { %v1902_v30 = vunpack.c.h.bf16 %v1911_v26  ;;  %v310_v32 = vmul.f32 %v1897_v22, %v2162_v18  ;;  %v311_v33 = vmul.f32 %v1898_v23, %v2162_v18  ;;  %v2186_v34 = vand.u32 7, %v361_v16  ;;  %s2910_s25 = scalar_lea.vmem %s2991_s4, %s1862_s20  ;;  %s285_s7 = scalar_lea.vmem %s2993_s6, %s3030_s22 }
  0x25   : > { %vm379_vm2 = vcmp.eq.s32.totalorder %v2155_v14, 0  ;;  %v1909_v36 = vunpack.c.l.bf16 %v1913_v25  ;;  %v317_v37 = vmul.f32 %v1910_v28, %v2162_v18  ;;  %v312_v38 = vmul.f32 %v1901_v29, %v2162_v18 }
  0x26   : > { %v313_v39 = vmul.f32 %v1902_v30, %v2162_v18  ;;  %v325_v41 = vadd.f32 %v2174_v24, %v310_v32  ;;  %v326_v42 = vadd.f32 %v2174_v24, %v311_v33  ;;  %vm380_vm3 = vcmp.eq.s32.totalorder %v2179_v27, 0 }
  0x27   : > { %vm381_vm4 = vcmp.eq.s32.totalorder %v2186_v34, 0  ;;  %v332_v43 = vadd.f32 %v2174_v24, %v317_v37  ;;  %v327_v44 = vadd.f32 %v2174_v24, %v312_v38  ;;  %v1905_v46 = vunpack.c.l.bf16 %v1912_v35 }
  0x28   : > { %v328_v45 = vadd.f32 %v2174_v24, %v313_v39  ;;  %v2200_v47 = vmax.f32 %v325_v41, 0.0  ;;  %v334_v48 = vmax.f32 %v326_v42, 0.0  ;;  %v1906_v49 = vunpack.c.h.bf16 %v1912_v35 }
  0x29   : > { %v363_v50 = vshra.s32 %v2145_v8, 3  ;;  %v2203_v51 = vmax.f32 %v332_v43, 0.0  ;;  %v335_v52 = vmax.f32 %v327_v44, 0.0  ;;  %v314_v54 = vmul.f32 %v1905_v46, %v2162_v18 }
  0x2a   : > { %v336_v53 = vmax.f32 %v328_v45, 0.0  ;;  %v374_v55 = vpack.c.bf16 %v334_v48, %v2200_v47  ;;  %v403_v56 = vsel %vm379_vm2, 0.0, %v2200_v47  ;;  %v404_v57 = vsel %vm380_vm3, 0.0, %v334_v48 }
  0x2b   : > { %v315_v58 = vmul.f32 %v1906_v49, %v2162_v18  ;;  %v402_v59 = vsel %vm378_vm1, 0.0, %v2203_v51  ;;  %vm414_vm5 = vcmp.eq.s32.totalorder %v2147_v10, 7  ;;  %v405_v61 = vsel %vm381_vm4, 0.0, %v335_v52 }
  0x2c   : > { %v375_v60 = vpack.c.bf16 %v336_v53, %v335_v52  ;;  %1954 = vmatprep.mubr.msk.bf16.mxu1 %vm472_vm0, %v374_v55  ;;  %v410_v63 = vpack.c.bf16 %v403_v56, %v402_v59  ;;  %v411_v0 = vpack.c.bf16 %v405_v61, %v404_v57  ;;  %v329_v3 = vadd.f32 %v2174_v24, %v314_v54 }
  0x2d   : > { %v330_v5 = vadd.f32 %v2174_v24, %v315_v58  ;;  %v370_v9 = vand.u32 7, %v362_v19  ;;  %v371_v11 = vand.u32 7, %v363_v50  ;;  %v316_v12 = vmul.f32 %v1909_v36, %v2162_v18 }
  0x2e   : > { %1955 = vmatmul.mubr.msk.bf16.vlgmr.msra.gmra.mxu1 %vm472_vm0, %v375_v60  ;;  %v364_v13 = vshra.s32 %v2166_v20, 3  ;;  %vm415_vm6 = vcmp.eq.s32.totalorder %v2155_v14, 7  ;;  %1942 = vmatprep.mubr.msk.bf16.mxu0 %vm472_vm0, %v410_v63  ;;  %v337_v16 = vmax.f32 %v329_v3, 0.0  ;;  %v365_v22 = vshra.s32 %v2169_v21, 3 }
  0x2f   : > { %v338_v17 = vmax.f32 %v330_v5, 0.0  ;;  %1975 = vmatpush3.bf16.msra.mxu1 %v2016_v40  ;;  %1943 = vmatmul.mubr.msk.bf16.vlgmr.msra.gmra.mxu0 %vm472_vm0, %v411_v0  ;;  %vm382_vm7 = vcmp.eq.s32.totalorder %v370_v9, 0  ;;  %vm383_vm8 = vcmp.eq.s32.totalorder %v371_v11, 0  ;;  %v331_v19 = vadd.f32 %v2174_v24, %v316_v12 }
  0x30   : > { %v372_v23 = vand.u32 7, %v364_v13  ;;  %1976 = vmatprep.subr.bf16.mxu1 %v2018_v62  ;;  %v406_v25 = vsel %vm382_vm7, 0.0, %v336_v53  ;;  %v407_v26 = vsel %vm383_vm8, 0.0, %v337_v16  ;;  %1963 = vmatpush3.bf16.msra.mxu0 %v2182_v31  ;;  %v438_v28 = vsel %vm414_vm5, 0.0, %v334_v48 }
  0x31   : > { %v376_v18 = vpack.c.bf16 %v338_v17, %v337_v16  ;;  %v412_v29 = vpack.c.bf16 %v407_v26, %v406_v25  ;;  %v339_v30 = vmax.f32 %v331_v19, 0.0  ;;  %v373_v32 = vand.u32 7, %v365_v22  ;;  %1964 = vmatprep.subr.bf16.mxu0 %v2017_v15 }
  0x32   : > { %vm384_vm9 = vcmp.eq.s32.totalorder %v372_v23, 0  ;;  %v439_v24 = vsel %vm415_vm6, 0.0, %v335_v52  ;;  %vm416_vm11 = vcmp.eq.s32.totalorder %v2179_v27, 7  ;;  %vm417_vm12 = vcmp.eq.s32.totalorder %v2186_v34, 7 }
  0x33   : > { %1958 = vmatprep.mubr.msk.bf16.mxu1 %vm472_vm0, %v376_v18  ;;  %v408_v33 = vsel %vm384_vm9, 0.0, %v338_v17  ;;  %1977 = vmatpush3.bf16.msra.mxu1 %v2018_v62  ;;  %v377_v35 = vpack.c.bf16 %v2203_v51, %v339_v30  ;;  %vm385_vm10 = vcmp.eq.s32.totalorder %v373_v32, 0  ;;  %v446_v10 = vpack.c.bf16 %v439_v24, %v438_v28 }
  0x34   : > { %1946 = vmatprep.mubr.msk.bf16.mxu0 %vm472_vm0, %v412_v29  ;;  %v409_v31 = vsel %vm385_vm10, 0.0, %v339_v30  ;;  %1965 = vmatpush3.bf16.msra.mxu0 %v2017_v15  ;;  %vm418_vm13 = vcmp.eq.s32.totalorder %v370_v9, 7  ;;  %vm419_vm14 = vcmp.eq.s32.totalorder %v371_v11, 7  ;;  %v440_v14 = vsel %vm416_vm11, 0.0, %v336_v53 }
  0x35   : > { %v413_v36 = vpack.c.bf16 %v409_v31, %v408_v33  ;;  %v441_v37 = vsel %vm417_vm12, 0.0, %v337_v16  ;;  %v442_v38 = vsel %vm418_vm13, 0.0, %v338_v17  ;;  %v443_v39 = vsel %vm419_vm14, 0.0, %v339_v30 }
  0x36   : > { %1959 = vmatmul.mubr.msk.bf16.gmra.mxu1 %vm472_vm0, %v377_v35  ;;  %v447_v40 = vpack.c.bf16 %v441_v37, %v440_v14  ;;  %v448_v41 = vpack.c.bf16 %v443_v39, %v442_v38  ;;  %vm420_vm15 = vcmp.eq.s32.totalorder %v372_v23, 7  ;;  %vm421_vm1 = vcmp.eq.s32.totalorder %v373_v32, 7 }
  0x37   : > { %1978 = vmatprep.mubr.msk.bf16.mxu1 %vm472_vm0, %v374_v55  ;;  %1947 = vmatmul.mubr.msk.bf16.gmra.mxu0 %vm472_vm0, %v413_v36  ;;  %v444_v27 = vsel %vm420_vm15, 0.0, %v2203_v51  ;;  %v445_v34 = vsel %vm421_vm1, 0.0, %v2200_v47  ;;  %v350_v52 = vand.u32 7, %v2128_v1  ;;  %vm951_vm2 = vcmp.lt.s32.totalorder %v2128_v1, 7 }
  0x38   : > { %1966 = vmatprep.mubr.msk.bf16.mxu0 %vm472_vm0, %v446_v10  ;;  %v449_v42 = vpack.c.bf16 %v445_v34, %v444_v27  ;;  %v353_v24 = vand.u32 7, %v2139_v6  ;;  %v356_v27 = vand.u32 7, %v2166_v20  ;;  %vm862_vm10 = vcmp.lt.s32.totalorder %v2128_v1, 1 }
  0x39   : > { %vm2545_vm15 = vcmp.eq.s32.totalorder %v350_v52, 0 }
  0x3a   : > { %vm2335_vm5 = vcmp.eq.s32.totalorder %v353_v24, 7  ;;  %vm2364_vm7 = vcmp.eq.s32.totalorder %v356_v27, 7  ;;  %vm2476_vm11 = vcmp.eq.s32.totalorder %v353_v24, 0 }
  0x3e   : > { %1979 = vmatmul.mubr.msk.bf16.vlgmr.msra.gmra.mxu1 %vm472_vm0, %v375_v60  ;;  %v352_v60 = vand.u32 7, %v2135_v4 }
  0x3f   : > { %1982 = vmatprep.mubr.msk.bf16.mxu1 %vm472_vm0, %v376_v18  ;;  %1967 = vmatmul.mubr.msk.bf16.vlgmr.msra.gmra.mxu0 %vm472_vm0, %v447_v40  ;;  %v351_v18 = vand.u32 7, %v2131_v2 }
  0x40   : > { %1970 = vmatprep.mubr.msk.bf16.mxu0 %vm472_vm0, %v448_v41  ;;  %vm2294_vm3 = vcmp.eq.s32.totalorder %v352_v60, 7  ;;  %vm2484_vm12 = vcmp.eq.s32.totalorder %v352_v60, 0 }
  0x41   : > { %vm2314_vm4 = vcmp.eq.s32.totalorder %v351_v18, 7  ;;  %vm2495_vm13 = vcmp.eq.s32.totalorder %v351_v18, 0 }
  0x46   : > { %1983 = vmatmul.mubr.msk.bf16.gmra.mxu1 %vm472_vm0, %v377_v35  ;;  %v355_v35 = vand.u32 7, %v2145_v8 }
  0x47   : > { %1971 = vmatmul.mubr.msk.bf16.gmra.mxu0 %vm472_vm0, %v449_v42  ;;  %vm2269_vm0 = vcmp.eq.s32.totalorder %v350_v52, 7 }
  0x48   : > { %vm2347_vm6 = vcmp.eq.s32.totalorder %v355_v35, 7 }
  0xee   : > { %v1956_v43 = vpop.f32.mrf.mxu1 }
  0xef   : > { %v1944_v44 = vpop.f32.mrf.mxu0 }
  0xf0   : > { %v608_v45 = vpop.f32.mrf.mxu1  ;;  %v2252_v46 = vadd.f32 %v1956_v43, %v1944_v44 }
  0xf1   : > { %v519_v48 = vpop.f32.mrf.mxu0 }
  0xf2   : > { %v1957_v49 = vpop.f32.mrf.mxu1  ;;  %v2254_v50 = vadd.f32 %v608_v45, %v519_v48  ;;  %834 = vrot.lane.b32.xlu1 %v2252_v46, %s2060_s16  ;;  %v945_v11 = vrot.slane %v2252_v46, 1 }
  0xf3   : > { %v1945_v51 = vpop.f32.mrf.mxu0 }
  0xf4   : > { %v611_v47 = vpop.f32.mrf.mxu1  ;;  %v2259_v53 = vadd.f32 %v1957_v49, %v1945_v51  ;;  %830 = vrot.lane.b32.xlu0 %v2254_v50, %s2060_s16  ;;  %v943_v62 = vrot.slane %v2254_v50, 1 }
  0xf5   : > { %v522_v54 = vpop.f32.mrf.mxu0 }
  0xf6   : > { %v1960_v55 = vpop.f32.mrf.mxu1  ;;  %v2263_v56 = vadd.f32 %v611_v47, %v522_v54  ;;  %836 = vrot.lane.b32.xlu1 %v2259_v53, %s2060_s16  ;;  %v946_v0 = vrot.slane %v2259_v53, 1 }
  0xf7   : > { %v1948_v57 = vpop.f32.mrf.mxu0 }
  0xf8   : > { %v624_v58 = vpop.f32.mrf.mxu1  ;;  %v2274_v61 = vadd.f32 %v1960_v55, %v1948_v57  ;;  %832 = vrot.lane.b32.xlu0 %v2263_v56, %s2060_s16  ;;  %v944_v63 = vrot.slane %v2263_v56, 1  ;;  %v956_v16 = vsel %vm951_vm2, %v945_v11, %v946_v0  ;;  %v357_v57 = vand.u32 7, %v2169_v21 }
  0xf9   : > { %v535_v3 = vpop.f32.mrf.mxu0  ;;  %v978_v23 = vsel %vm2294_vm3, 0.0, %v956_v16  ;;  %v354_v16 = vand.u32 7, %v2142_v7 }
  0xfa   : > { %v1961_v5 = vpop.f32.mrf.mxu1  ;;  %v958_v9 = vsel %vm951_vm2, %v943_v62, %v944_v63  ;;  %v2305_v25 = vadd.f32 %v624_v58, %v535_v3  ;;  %v957_v10 = vsel %vm951_vm2, %v944_v63, %v945_v11  ;;  %v949_v37 = vrot.slane %v2274_v61, 1 }
  0xfb   : > { %v1949_v12 = vpop.f32.mrf.mxu0  ;;  %v976_v13 = vsel %vm2269_vm0, 0.0, %v958_v9  ;;  %v977_v38 = vsel %vm2314_vm4, 0.0, %v957_v10  ;;  %vm2380_vm8 = vcmp.eq.s32.totalorder %v357_v57, 7  ;;  %vm2406_vm9 = vcmp.eq.s32.totalorder %v354_v16, 7 }
  0xfc   : > { %842 = vrot.lane.b32.xlu0 %v2274_v61, %s2060_s16  ;;  %992 = vrot.lane.b32.xlu1 %v976_v13, %s2061_s17  ;;  %v627_v17 = vpop.f32.mrf.mxu1  ;;  %v2300_v19 = vadd.f32 %v1961_v5, %v1949_v12  ;;  %v947_v36 = vrot.slane %v2305_v25, 1  ;;  %vm2522_vm14 = vcmp.eq.s32.totalorder %v354_v16, 0  ;;  %vm2554_vm1 = vcmp.eq.s32.totalorder %v357_v57, 0 }
  0xfd   : > { %v538_v22 = vpop.f32.mrf.mxu0 }
  0xfe   : > { %v2307_v26 = vadd.f32 %v627_v17, %v538_v22  ;;  %v1980_v29 = vpop.f32.mrf.mxu1  ;;  %v955_v34 = vsel %vm951_vm2, %v946_v0, %v947_v36  ;;  %v950_v44 = vrot.slane %v2300_v19, 1 }
  0xff   : > { %v1968_v28 = vpop.f32.mrf.mxu0  ;;  %v979_v45 = vsel %vm2335_vm5, 0.0, %v955_v34 }
 0x100   : > { %996 = vrot.lane.b32.xlu0 %v978_v23, %s2061_s17  ;;  %844 = vrot.lane.b32.xlu1 %v2300_v19, %s2060_s16  ;;  %v783_v33 = vpop.f32.mrf.mxu1  ;;  %v2324_v31 = vadd.f32 %v1980_v29, %v1968_v28  ;;  %v948_v14 = vrot.slane %v2307_v26, 1  ;;  %v952_v55 = vsel %vm951_vm2, %v949_v37, %v950_v44  ;;  %v959_v9 = vsel %vm951_vm2, %v950_v44, %v943_v62 }
 0x101   : > { %v706_v32 = vpop.f32.mrf.mxu0  ;;  %v982_v0 = vsel %vm2364_vm7, 0.0, %v952_v55  ;;  %v983_v13 = vsel %vm2380_vm8, 0.0, %v959_v9 }
 0x102   : > { %v1981_v40 = vpop.f32.mrf.mxu1  ;;  %v953_v43 = vsel %vm951_vm2, %v948_v14, %v949_v37  ;;  %v1122_v22 = vrot.slane %v2324_v31, 1  ;;  %v2396_v23 = vadd.f32 %v783_v33, %v706_v32  ;;  %v954_v32 = vsel %vm951_vm2, %v947_v36, %v948_v14 }
 0x103   : > { %v1969_v39 = vpop.f32.mrf.mxu0  ;;  %v981_v48 = vsel %vm2347_vm6, 0.0, %v953_v43 }
 0x104   : > { %838 = vrot.lane.b32.xlu0 %v2305_v25, %s2060_s16  ;;  %840 = vrot.lane.b32.xlu1 %v2307_v26, %s2060_s16  ;;  %v786_v51 = vpop.f32.mrf.mxu1  ;;  %v2358_v47 = vadd.f32 %v1981_v40, %v1969_v39  ;;  %v980_v40 = vsel %vm2406_vm9, 0.0, %v954_v32 }
 0x105   : > { %v709_v49 = vpop.f32.mrf.mxu0 }
 0x106   : > { %v1984_v63 = vpop.f32.mrf.mxu1  ;;  %v2373_v3 = vadd.f32 %v786_v51, %v709_v49  ;;  %v1123_v37 = vrot.slane %v2358_v47, 1  ;;  %v1120_v49 = vrot.slane %v2396_v23, 1 }
 0x107   : > { %v1972_v58 = vpop.f32.mrf.mxu0 }
 0x108   : > { %994 = vrot.lane.b32.xlu0 %v977_v38, %s2061_s17  ;;  %1036 = vrot.lane.b32.xlu1 %v2324_v31, %s2060_s16  ;;  %v799_v12 = vpop.f32.mrf.mxu1  ;;  %v1121_v17 = vrot.slane %v2373_v3, 1  ;;  %v1132_v14 = vsel %vm951_vm2, %v1122_v22, %v1123_v37 }
 0x109   : > { %v722_v11 = vpop.f32.mrf.mxu0 }
 0x10a   : > { %v2398_v28 = vadd.f32 %v799_v12, %v722_v11  ;;  %v1985_v29 = vpop.f32.mrf.mxu1  ;;  %v1133_v33 = vsel %vm951_vm2, %v1121_v17, %v1122_v22 }
 0x10b   : > { %v1973_v62 = vpop.f32.mrf.mxu0  ;;  %v1137_v34 = vsel %vm2314_vm4, 0.0, %v1133_v33  ;;  %vm1494_vm4 = vcmask 60416  }
 0x10c   : > { %998 = vrot.lane.b32.xlu0 %v979_v45, %s2061_s17  ;;  %1002 = vrot.lane.b32.xlu1 %v981_v48, %s2061_s17  ;;  %v802_v39 = vpop.f32.mrf.mxu1  ;;  %v2419_v43 = vadd.f32 %v1985_v29, %v1973_v62  ;;  %v1124_v44 = vrot.slane %v2398_v28, 1  ;;  %v1138_v45 = vsel %vm2294_vm3, 0.0, %v1132_v14  ;;  %v2430_v48 = vadd.f32 %v1984_v63, %v1972_v58 }
 0x10d   : > { %v725_v38 = vpop.f32.mrf.mxu0  ;;  %v1134_v58 = vsel %vm951_vm2, %v1120_v49, %v1121_v17  ;;  %vm1272_vm3 = vcmask 130112  }
 0x10e   : > { %v2423_v36 = vadd.f32 %v802_v39, %v725_v38  ;;  %v1131_v30 = vsel %vm951_vm2, %v1123_v37, %v1124_v44  ;;  %v1127_v51 = vrot.slane %v2419_v43, 1  ;;  %v1126_v9 = vrot.slane %v2430_v48, 1 }
 0x10f   : > { %v1139_v15 = vsel %vm2335_vm5, 0.0, %v1131_v30  ;;  %v1136_v41 = vsel %vm2269_vm0, 0.0, %v1134_v58  ;;  %vm2571_vm0 = vcmp.eq.s32.totalorder %v355_v35, 0  ;;  %vm1551_vm5 = vcmask 126016  }
 0x110   : > { %1004 = vrot.lane.b32.xlu0 %v982_v0, %s2061_s17  ;;  %1038 = vrot.lane.b32.xlu1 %v2358_v47, %s2060_s16  ;;  %v1125_v55 = vrot.slane %v2423_v36, 1  ;;  %v1135_v63 = vsel %vm951_vm2, %v1127_v51, %v1120_v49 }
 0x111   : > { %v1143_v11 = vsel %vm2380_vm8, 0.0, %v1135_v63  ;;  %vm1298_vm8 = vcmask 57344  }
 0x112   : > { %v1130_v0 = vsel %vm951_vm2, %v1124_v44, %v1125_v55  ;;  %v1129_v17 = vsel %vm951_vm2, %v1125_v55, %v1126_v9 }
 0x113   : > { %v1140_v12 = vsel %vm2406_vm9, 0.0, %v1130_v0  ;;  %v1141_v5 = vsel %vm2347_vm6, 0.0, %v1129_v17  ;;  %vm1608_vm6 = vcmask 191616  }
 0x114   : > { %1006 = vrot.lane.b32.xlu0 %v983_v13, %s2061_s17  ;;  %1034 = vrot.lane.b32.xlu1 %v2373_v3, %s2060_s16  ;;  %v1128_v13 = vsel %vm951_vm2, %v1126_v9, %v1127_v51  ;;  %vm2581_vm2 = vcmp.eq.s32.totalorder %v356_v27, 0 }
 0x115   : > { %v1142_v59 = vsel %vm2364_vm7, 0.0, %v1128_v13  ;;  %vm1665_vm7 = vcmask 257216  }
 0x118   : > { %1032 = vrot.lane.b32.xlu0 %v2396_v23, %s2060_s16  ;;  %1040 = vrot.lane.b32.xlu1 %v2398_v28, %s2060_s16 }
 0x11c   : > { %1000 = vrot.lane.b32.xlu0 %v980_v40, %s2061_s17  ;;  %1154 = vrot.lane.b32.xlu1 %v1137_v34, %s2061_s17 }
 0x120   : > { %1156 = vrot.lane.b32.xlu0 %v1138_v45, %s2061_s17  ;;  %1042 = vrot.lane.b32.xlu1 %v2423_v36, %s2060_s16 }
 0x124   : > { %1044 = vrot.lane.b32.xlu0 %v2430_v48, %s2060_s16  ;;  %1158 = vrot.lane.b32.xlu1 %v1139_v15, %s2061_s17 }
 0x128   : > { %1152 = vrot.lane.b32.xlu0 %v1136_v41, %s2061_s17  ;;  %1166 = vrot.lane.b32.xlu1 %v1143_v11, %s2061_s17 }
 0x12c   : > { %1046 = vrot.lane.b32.xlu0 %v2419_v43, %s2060_s16  ;;  %1160 = vrot.lane.b32.xlu1 %v1140_v12, %s2061_s17 }
 0x130   : > { %1164 = vrot.lane.b32.xlu0 %v1142_v59, %s2061_s17  ;;  %1162 = vrot.lane.b32.xlu1 %v1141_v5, %s2061_s17 }
 0x164   : > { %v835_v22 = vpop.permute.xlu1 %834 }
 0x165   : > { %v856_v10 = vrot.slane %v835_v22, 7 }
 0x166   : > { %v831_v62 = vpop.permute.xlu0 %830 }
 0x167   : > { %v854_v42 = vrot.slane %v831_v62, 7 }
 0x168   : > { %v837_v29 = vpop.permute.xlu1 %836 }
 0x169   : > { %v857_v32 = vrot.slane %v837_v29, 7 }
 0x16a   : > { %v833_v54 = vpop.permute.xlu0 %832 }
 0x16b   : > { %v855_v37 = vrot.slane %v833_v54, 7  ;;  %v867_v38 = vsel %vm862_vm10, %v856_v10, %v857_v32 }
 0x16c   : > { %v890_v40 = vsel %vm2476_vm11, 0.0, %v867_v38 }
 0x16d   : > { %909 = vrot.lane.b32.xlu1 %v890_v40, %s2062_s18  ;;  %v868_v6 = vsel %vm862_vm10, %v855_v37, %v856_v10  ;;  %v869_v4 = vsel %vm862_vm10, %v854_v42, %v855_v37 }
 0x16e   : > { %v843_v60 = vpop.permute.xlu0 %842  ;;  %v993_v34 = vpop.permute.xlu1 %992  ;;  %v889_v14 = vsel %vm2484_vm12, 0.0, %v868_v6  ;;  %v888_v44 = vsel %vm2495_vm13, 0.0, %v869_v4 }
 0x16f   : > { %907 = vrot.lane.b32.xlu0 %v889_v14, %s2062_s18  ;;  %v2507_v45 = vadd.f32 %v993_v34, %v2254_v50  ;;  %v860_v13 = vrot.slane %v843_v60, 7 }
 0x171   : > { %905 = vrot.lane.b32.xlu1 %v888_v44, %s2062_s18  ;;  %v1308_v7 = vmul.f32 %v2507_v45, %v2507_v45 }
 0x172   : > { %v997_v2 = vpop.permute.xlu0 %996  ;;  %v845_v18 = vpop.permute.xlu1 %844 }
 0x173   : > { %v2511_v30 = vadd.f32 %v997_v2, %v2252_v46  ;;  %1192 = vrot.lane.b32.xlu0 %v2507_v45, %s2063_s19  ;;  %v861_v41 = vrot.slane %v845_v18, 7 }
 0x175   : > { %1196 = vrot.lane.b32.xlu1 %v2511_v30, %s2063_s19  ;;  %v1310_v49 = vmul.f32 %v2511_v30, %v2511_v30  ;;  %v870_v5 = vsel %vm862_vm10, %v861_v41, %v854_v42  ;;  %v863_v29 = vsel %vm862_vm10, %v860_v13, %v861_v41 }
 0x176   : > { %v839_v51 = vpop.permute.xlu0 %838  ;;  %v841_v55 = vpop.permute.xlu1 %840  ;;  %v894_v54 = vsel %vm2554_vm1, 0.0, %v863_v29 }
 0x177   : > { %v858_v15 = vrot.slane %v839_v51, 7  ;;  %1328 = vrot.lane.b32.xlu0 %v1310_v49, %s2063_s19  ;;  %v859_v22 = vrot.slane %v841_v55, 7 }
 0x179   : > { %v866_v63 = vsel %vm862_vm10, %v857_v32, %v858_v15  ;;  %v887_v32 = vsel %vm2545_vm15, 0.0, %v870_v5  ;;  %v865_v57 = vsel %vm862_vm10, %v858_v15, %v859_v22  ;;  %v864_v8 = vsel %vm862_vm10, %v859_v22, %v860_v13 }
 0x17a   : > { %v995_v0 = vpop.permute.xlu0 %994  ;;  %v891_v9 = vsel %vm2522_vm14, 0.0, %v866_v63  ;;  %v2534_v12 = vpop.permute.xlu1 %1036  ;;  %v892_v40 = vsel %vm2571_vm0, 0.0, %v865_v57  ;;  %v893_v4 = vsel %vm2581_vm2, 0.0, %v864_v8 }
 0x17b   : > { %v2531_v11 = vadd.f32 %v995_v0, %v2263_v56  ;;  %911 = vrot.lane.b32.xlu0 %v891_v9, %s2062_s18  ;;  %v1058_v55 = vrot.slane %v2534_v12, 7 }
 0x17d   : > { %1194 = vrot.lane.b32.xlu1 %v2531_v11, %s2063_s19  ;;  %v1309_v17 = vmul.f32 %v2531_v11, %v2531_v11 }
 0x17e   : > { %v999_v16 = vpop.permute.xlu0 %998  ;;  %v1003_v10 = vpop.permute.xlu1 %1002 }
 0x17f   : > { %1324 = vrot.lane.b32.xlu0 %v1308_v7, %s2063_s19  ;;  %v2566_v42 = vadd.f32 %v999_v16, %v2259_v53  ;;  %v2610_v2 = vadd.f32 %v1003_v10, %v2307_v26 }
 0x181   : > { %1326 = vrot.lane.b32.xlu1 %v1309_v17, %s2063_s19  ;;  %v1311_v20 = vmul.f32 %v2566_v42, %v2566_v42  ;;  %v1313_v12 = vmul.f32 %v2610_v2, %v2610_v2 }
 0x182   : > { %v1005_v52 = vpop.permute.xlu0 %1004  ;;  %v1039_v35 = vpop.permute.xlu1 %1038 }
 0x183   : > { %903 = vrot.lane.b32.xlu0 %v887_v32, %s2062_s18  ;;  %v2596_v27 = vadd.f32 %v1005_v52, %v2274_v61  ;;  %v1059_v15 = vrot.slane %v1039_v35, 7 }
 0x185   : > { %917 = vrot.lane.b32.xlu1 %v894_v54, %s2062_s18  ;;  %v1314_v51 = vmul.f32 %v2596_v27, %v2596_v27  ;;  %v1068_v13 = vsel %vm862_vm10, %v1058_v55, %v1059_v15 }
 0x186   : > { %v1007_v37 = vpop.permute.xlu0 %1006  ;;  %v1035_v60 = vpop.permute.xlu1 %1034  ;;  %v1075_v5 = vsel %vm2476_vm11, 0.0, %v1068_v13 }
 0x187   : > { %1198 = vrot.lane.b32.xlu0 %v2566_v42, %s2063_s19  ;;  %v2605_v44 = vadd.f32 %v1007_v37, %v2300_v19  ;;  %v1057_v0 = vrot.slane %v1035_v60, 7 }
 0x189   : > { %913 = vrot.lane.b32.xlu1 %v892_v40, %s2062_s18  ;;  %v1315_v9 = vmul.f32 %v2605_v44, %v2605_v44  ;;  %v1069_v17 = vsel %vm862_vm10, %v1057_v0, %v1058_v55 }
 0x18a   : > { %v1033_v6 = vpop.permute.xlu0 %1032  ;;  %v1041_v18 = vpop.permute.xlu1 %1040  ;;  %v1074_v52 = vsel %vm2484_vm12, 0.0, %v1069_v17 }
 0x18b   : > { %915 = vrot.lane.b32.xlu0 %v893_v4, %s2062_s18  ;;  %v1056_v16 = vrot.slane %v1033_v6, 7  ;;  %v1060_v32 = vrot.slane %v1041_v18, 7 }
 0x18d   : > { %1330 = vrot.lane.b32.xlu1 %v1311_v20, %s2063_s19  ;;  %v1070_v22 = vsel %vm862_vm10, %v1056_v16, %v1057_v0  ;;  %v1067_v39 = vsel %vm862_vm10, %v1059_v15, %v1060_v32 }
 0x18e   : > { %v1001_v34 = vpop.permute.xlu0 %1000  ;;  %v1155_v41 = vpop.permute.xlu1 %1154  ;;  %v1073_v54 = vsel %vm2495_vm13, 0.0, %v1070_v22  ;;  %v1076_v24 = vsel %vm2522_vm14, 0.0, %v1067_v39 }
 0x18f   : > { %v2600_v14 = vadd.f32 %v1001_v34, %v2305_v25  ;;  %1204 = vrot.lane.b32.xlu0 %v2596_v27, %s2063_s19  ;;  %v2655_v35 = vadd.f32 %v1155_v41, %v2373_v3 }
 0x191   : > { %1200 = vrot.lane.b32.xlu1 %v2600_v14, %s2063_s19  ;;  %v1312_v63 = vmul.f32 %v2600_v14, %v2600_v14  ;;  %v1373_v6 = vmul.f32 %v2655_v35, %v2655_v35 }
 0x192   : > { %v1157_v49 = vpop.permute.xlu0 %1156  ;;  %v1043_v29 = vpop.permute.xlu1 %1042 }
 0x193   : > { %1206 = vrot.lane.b32.xlu0 %v2605_v44, %s2063_s19  ;;  %v2648_v33 = vadd.f32 %v1157_v49, %v2324_v31  ;;  %v1061_v55 = vrot.slane %v1043_v29, 7  ;;  %v1871_v29 = vpack.c.bf16 %v2507_v45, %v2507_v45  ;;  %v1875_v45 = vpack.c.bf16 %v2600_v14, %v2600_v14 }
 0x195   : > { %1202 = vrot.lane.b32.xlu1 %v2610_v2, %s2063_s19  ;;  %v1374_v60 = vmul.f32 %v2648_v33, %v2648_v33  ;;  %v1066_v0 = vsel %vm862_vm10, %v1060_v32, %v1061_v55  ;;  %v1874_v32 = vpack.c.bf16 %v2566_v42, %v2566_v42  ;;  %v1878_v42 = vpack.c.bf16 %v2605_v44, %v2605_v44 }
 0x196   : > { %v1045_v7 = vpop.permute.xlu0 %1044  ;;  %v1159_v37 = vpop.permute.xlu1 %1158 }
 0x197   : > { %1336 = vrot.lane.b32.xlu0 %v1314_v51, %s2063_s19  ;;  %v1062_v20 = vrot.slane %v1045_v7, 7  ;;  %v1077_v7 = vsel %vm2571_vm0, 0.0, %v1066_v0 }
 0x199   : > { %1332 = vrot.lane.b32.xlu1 %v1312_v63, %s2063_s19  ;;  %v1179_v63 = vadd.f32 %v1159_v37, %v2358_v47 }
 0x19a   : > { %v1153_v10 = vpop.permute.xlu0 %1152  ;;  %v1167_v4 = vpop.permute.xlu1 %1166 }
 0x19b   : > { %1338 = vrot.lane.b32.xlu0 %v1315_v9, %s2063_s19  ;;  %v2644_v57 = vadd.f32 %v1153_v10, %v2396_v23  ;;  %v1375_v17 = vmul.f32 %v1179_v63, %v1179_v63  ;;  %v2708_v1 = vadd.f32 %v1167_v4, %v2419_v43  ;;  %v1872_v10 = vpack.c.bf16 %v2531_v11, %v2531_v11 }
 0x19c   : > { %v1876_v11 = vpack.c.bf16 %v2610_v2, %v2610_v2  ;;  %v1888_v2 = vpack.c.bf16 %v2655_v35, %v2655_v35  ;;  %v1890_v37 = vpack.c.bf16 %v1179_v63, %v1179_v63 }
 0x19d   : > { %1334 = vrot.lane.b32.xlu1 %v1313_v12, %s2063_s19  ;;  %v1372_v18 = vmul.f32 %v2644_v57, %v2644_v57  ;;  %v1065_v12 = vsel %vm862_vm10, %v1061_v55, %v1062_v20  ;;  %v1379_v22 = vmul.f32 %v2708_v1, %v2708_v1  ;;  %v1887_v14 = vpack.c.bf16 %v2644_v57, %v2644_v57 }
 0x19e   : > { %v1047_v8 = vpop.permute.xlu0 %1046  ;;  %v1161_v51 = vpop.permute.xlu1 %1160  ;;  %v1078_v13 = vsel %vm2581_vm2, 0.0, %v1065_v12 }
 0x19f   : > { %1094 = vrot.lane.b32.xlu0 %v1075_v5, %s2062_s18  ;;  %v1063_v40 = vrot.slane %v1047_v8, 7  ;;  %v1180_v59 = vadd.f32 %v1161_v51, %v2398_v28 }
 0x1a1   : > { %1092 = vrot.lane.b32.xlu1 %v1074_v52, %s2062_s18  ;;  %v1071_v58 = vsel %vm862_vm10, %v1063_v40, %v1056_v16  ;;  %v1064_v49 = vsel %vm862_vm10, %v1062_v20, %v1063_v40  ;;  %v1376_v5 = vmul.f32 %v1180_v59, %v1180_v59  ;;  %v1873_v52 = vpack.c.bf16 %v2511_v30, %v2511_v30 }
 0x1a2   : > { %v1072_v34 = vsel %vm2545_vm15, 0.0, %v1071_v58  ;;  %v1079_v15 = vsel %vm2554_vm1, 0.0, %v1064_v49  ;;  %v1165_v9 = vpop.permute.xlu0 %1164  ;;  %v1163_v41 = vpop.permute.xlu1 %1162  ;;  %v1877_v30 = vpack.c.bf16 %v2596_v27, %v2596_v27  ;;  %v1889_v27 = vpack.c.bf16 %v2648_v33, %v2648_v33 }
 0x1a3   : > { %1090 = vrot.lane.b32.xlu0 %v1073_v54, %s2062_s18  ;;  %v2692_v62 = vadd.f32 %v1165_v9, %v2430_v48  ;;  %v1181_v16 = vadd.f32 %v1163_v41, %v2423_v36 }
 0x1a5   : > { %1240 = vrot.lane.b32.xlu1 %v2644_v57, %s2063_s19  ;;  %v1378_v21 = vmul.f32 %v2692_v62, %v2692_v62  ;;  %v1377_v38 = vmul.f32 %v1181_v16, %v1181_v16  ;;  %v1891_v57 = vpack.c.bf16 %v1180_v59, %v1180_v59 }
 0x1a7   : > { %1244 = vrot.lane.b32.xlu0 %v2648_v33, %s2063_s19 }
 0x1a9   : > { %1096 = vrot.lane.b32.xlu1 %v1076_v24, %s2062_s18 }
 0x1ab   : > { %1242 = vrot.lane.b32.xlu0 %v2655_v35, %s2063_s19 }
 0x1ad   : > { %1390 = vrot.lane.b32.xlu1 %v1373_v6, %s2063_s19  ;;  %v1892_v6 = vpack.c.bf16 %v1181_v16, %v1181_v16 }
 0x1af   : > { %1392 = vrot.lane.b32.xlu0 %v1374_v60, %s2063_s19 }
 0x1b1   : > { %1088 = vrot.lane.b32.xlu1 %v1072_v34, %s2062_s18 }
 0x1b3   : > { %1388 = vrot.lane.b32.xlu0 %v1372_v18, %s2063_s19 }
 0x1b5   : > { %1102 = vrot.lane.b32.xlu1 %v1079_v15, %s2062_s18 }
 0x1b7   : > { %1246 = vrot.lane.b32.xlu0 %v1179_v63, %s2063_s19 }
 0x1b9   : > { %1248 = vrot.lane.b32.xlu1 %v1180_v59, %s2063_s19 }
 0x1bb   : > { %1098 = vrot.lane.b32.xlu0 %v1077_v7, %s2062_s18 }
 0x1bd   : > { %1250 = vrot.lane.b32.xlu1 %v1181_v16, %s2063_s19 }
 0x1bf   : > { %1100 = vrot.lane.b32.xlu0 %v1078_v13, %s2062_s18 }
 0x1c1   : > { %1400 = vrot.lane.b32.xlu1 %v1378_v21, %s2063_s19 }
 0x1c3   : > { %1394 = vrot.lane.b32.xlu0 %v1375_v17, %s2063_s19 }
 0x1c5   : > { %1396 = vrot.lane.b32.xlu1 %v1376_v5, %s2063_s19 }
 0x1c7   : > { %1252 = vrot.lane.b32.xlu0 %v2692_v62, %s2063_s19 }
 0x1c9   : > { %1398 = vrot.lane.b32.xlu1 %v1377_v38, %s2063_s19 }
 0x1cb   : > { %1254 = vrot.lane.b32.xlu0 %v2708_v1, %s2063_s19 }
 0x1cd   : > { %1402 = vrot.lane.b32.xlu1 %v1379_v22, %s2063_s19 }
 0x1cf   : > { %1527 = vrot.lane.b32.xlu0 %v1871_v29, %s2063_s19 }
 0x1d1   : > { %1529 = vrot.lane.b32.xlu1 %v1872_v10, %s2063_s19 }
 0x1d3   : > { %1531 = vrot.lane.b32.xlu0 %v1873_v52, %s2063_s19 }
 0x1d5   : > { %1533 = vrot.lane.b32.xlu1 %v1874_v32, %s2063_s19 }
 0x1d7   : > { %1535 = vrot.lane.b32.xlu0 %v1875_v45, %s2063_s19 }
 0x1d9   : > { %1537 = vrot.lane.b32.xlu1 %v1876_v11, %s2063_s19 }
 0x1db   : > { %1539 = vrot.lane.b32.xlu0 %v1877_v30, %s2063_s19 }
 0x1dd   : > { %1541 = vrot.lane.b32.xlu1 %v1878_v42, %s2063_s19 }
 0x1df   : > { %1641 = vrot.lane.b32.xlu0 %v1887_v14, %s2062_s18  ;;  %v910_v54 = vpop.permute.xlu1 %909 }
 0x1e0   : > { %v2756_v40 = vadd.f32 %v910_v54, %v2259_v53 }
 0x1e1   : > { %v908_v39 = vpop.permute.xlu0 %907  ;;  %1643 = vrot.lane.b32.xlu1 %v1888_v2, %s2062_s18 }
 0x1e2   : > { %v929_v8 = vadd.f32 %v908_v39, %v2252_v46  ;;  %v1866_v53 = vpack.c.bf16 %v2756_v40, %v2756_v40 }
 0x1e3   : > { %1645 = vrot.lane.b32.xlu0 %v1889_v27, %s2062_s18  ;;  %v906_v44 = vpop.permute.xlu1 %905 }
 0x1e4   : > { %v1302_v33 = vmul.f32 %v929_v8, %v929_v8  ;;  %v1865_v60 = vpack.c.bf16 %v929_v8, %v929_v8  ;;  %v928_v58 = vadd.f32 %v906_v44, %v2263_v56 }
 0x1e5   : > { %v2752_v24 = vpop.permute.xlu0 %1192  ;;  %1647 = vrot.lane.b32.xlu1 %v1890_v37, %s2062_s18 }
 0x1e6   : > { %v1864_v51 = vpack.c.bf16 %v928_v58, %v928_v58 }
 0x1e7   : > { %1649 = vrot.lane.b32.xlu0 %v1891_v57, %s2062_s18  ;;  %v1197_v35 = vpop.permute.xlu1 %1196 }
 0x1e8   : > { %v2759_v4 = vadd.f32 %v1197_v35, %v929_v8 }
 0x1e9   : > { %v1329_v20 = vpop.permute.xlu0 %1328  ;;  %1651 = vrot.lane.b32.xlu1 %v1892_v6, %s2062_s18 }
 0x1ea   : > { %v2762_v46 = vadd.f32 %v1329_v20, %v1302_v33  ;;  %v1301_v33 = vmul.f32 %v928_v58, %v928_v58 }
 0x1eb   : > { %1474 = vrot.lane.b32.xlu0 %v1865_v60, %s2063_s19 }
 0x1ed   : > { %v912_v34 = vpop.permute.xlu0 %911  ;;  %1476 = vrot.lane.b32.xlu1 %v1866_v53, %s2063_s19 }
 0x1ee   : > { %v2770_v18 = vadd.f32 %v912_v34, %v2305_v25 }
 0x1ef   : > { %v1195_v49 = vpop.permute.xlu1 %1194 }
 0x1f0   : > { %v1867_v55 = vpack.c.bf16 %v2770_v18, %v2770_v18 }
 0x1f1   : > { %v2774_v15 = vpop.permute.xlu0 %1324  ;;  %1472 = vrot.lane.b32.xlu1 %v1864_v51, %s2063_s19 }
 0x1f2   : > { %1478 = vrot.lane.b32.xlu0 %v1867_v55, %s2063_s19 }
 0x1f3   : > { %v1327_v56 = vpop.permute.xlu1 %1326 }
 0x1f4   : > { %v1349_v51 = vadd.f32 %v1327_v56, %v1301_v33 }
 0x1f5   : > { %v904_v63 = vpop.permute.xlu0 %903 }
 0x1f6   : > { %v927_v59 = vadd.f32 %v904_v63, %v2254_v50 }
 0x1f7   : > { %v918_v0 = vpop.permute.xlu1 %917 }
 0x1f8   : > { %v1863_v9 = vpack.c.bf16 %v927_v59, %v927_v59  ;;  %v2780_v25 = vadd.f32 %v918_v0, %v2300_v19  ;;  %v1300_v35 = vmul.f32 %v927_v59, %v927_v59  ;;  %v1216_v55 = vadd.f32 %v2752_v24, %v927_v59 }
 0x1f9   : > { %v1199_v41 = vpop.permute.xlu0 %1198 }
 0x1fa   : > { %v1870_v7 = vpack.c.bf16 %v2780_v25, %v2780_v25  ;;  %1470 = vrot.lane.b32.xlu0 %v1863_v9, %s2063_s19  ;;  %v1219_v63 = vadd.f32 %v1199_v41, %v2756_v40 }
 0x1fb   : > { %v914_v16 = vpop.permute.xlu1 %913 }
 0x1fc   : > { %v2786_v12 = vadd.f32 %v914_v16, %v2307_v26  ;;  %1484 = vrot.lane.b32.xlu1 %v1870_v7, %s2063_s19 }
 0x1fd   : > { %v916_v13 = vpop.permute.xlu0 %915 }
 0x1fe   : > { %v1868_v50 = vpack.c.bf16 %v2786_v12, %v2786_v12  ;;  %v2792_v21 = vadd.f32 %v916_v13, %v2274_v61 }
 0x1ff   : > { %v2794_v19 = vpop.permute.xlu1 %1330 }
 0x200   : > { %v1869_v17 = vpack.c.bf16 %v2792_v21, %v2792_v21  ;;  %1480 = vrot.lane.b32.xlu1 %v1868_v50, %s2063_s19 }
 0x201   : > { %v2799_v5 = vpop.permute.xlu0 %1204 }
 0x202   : > { %1482 = vrot.lane.b32.xlu0 %v1869_v17, %s2063_s19 }
 0x203   : > { %v1201_v26 = vpop.permute.xlu1 %1200 }
 0x204   : > { %v1220_v17 = vadd.f32 %v1201_v26, %v2770_v18 }
 0x205   : > { %v2802_v38 = vpop.permute.xlu0 %1206 }
 0x207   : > { %v2804_v22 = vpop.permute.xlu1 %1202 }
 0x209   : > { %v2806_v29 = vpop.permute.xlu0 %1336 }
 0x20b   : > { %v2808_v61 = vpop.permute.xlu1 %1332 }
 0x20d   : > { %v2810_v10 = vpop.permute.xlu0 %1338 }
 0x20f   : > { %v2812_v52 = vpop.permute.xlu1 %1334 }
 0x211   : > { %v1095_v32 = vpop.permute.xlu0 %1094 }
 0x212   : > { %v2815_v45 = vadd.f32 %v1095_v32, %v2358_v47 }
 0x213   : > { %v1093_v11 = vpop.permute.xlu1 %1092 }
 0x214   : > { %v1882_v30 = vpack.c.bf16 %v2815_v45, %v2815_v45  ;;  %v1114_v42 = vadd.f32 %v1093_v11, %v2324_v31 }
 0x215   : > { %v1091_v14 = vpop.permute.xlu0 %1090 }
 0x216   : > { %v1881_v54 = vpack.c.bf16 %v1114_v42, %v1114_v42  ;;  %v1113_v2 = vadd.f32 %v1091_v14, %v2373_v3  ;;  %1590 = vrot.lane.b32.xlu1 %v1882_v30, %s2062_s18  ;;  %v1217_v3 = vadd.f32 %v1195_v49, %v928_v58  ;;  %v1358_v53 = vmul.f32 %v1114_v42, %v1114_v42 }
 0x217   : > { %v1241_v39 = vpop.permute.xlu1 %1240  ;;  %v1226_v0 = vadd.f32 %v2759_v4, %v1114_v42  ;;  %v1348_v49 = vadd.f32 %v2774_v15, %v1300_v35 }
 0x218   : > { %v1880_v27 = vpack.c.bf16 %v1113_v2, %v1113_v2  ;;  %1588 = vrot.lane.b32.xlu0 %v1881_v54, %s2062_s18  ;;  %v1357_v20 = vmul.f32 %v1113_v2, %v1113_v2  ;;  %v1225_v60 = vadd.f32 %v1217_v3, %v1113_v2  ;;  %v1366_v24 = vadd.f32 %v1358_v53, %v2762_v46 }
 0x219   : > { %v1245_v44 = vpop.permute.xlu0 %1244 }
 0x21a   : > { %1586 = vrot.lane.b32.xlu1 %v1880_v27, %s2062_s18  ;;  %v1365_v16 = vadd.f32 %v1357_v20, %v1349_v51  ;;  %v1266_v56 = vadd.f32 %v1245_v44, %v1226_v0  ;;  %v1303_v20 = vmul.f32 %v2756_v40, %v2756_v40  ;;  %v1221_v51 = vadd.f32 %v2804_v22, %v2786_v12 }
 0x21b   : > { %v1097_v47 = vpop.permute.xlu1 %1096  ;;  %v1304_v0 = vmul.f32 %v2770_v18, %v2770_v18 }
 0x21c   : > { %v2825_v37 = vadd.f32 %v1097_v47, %v2398_v28 }
 0x21d   : > { %v1243_v8 = vpop.permute.xlu0 %1242 }
 0x21e   : > { %v1883_v31 = vpack.c.bf16 %v2825_v37, %v2825_v37  ;;  %v1265_v9 = vadd.f32 %v1243_v8, %v1225_v60  ;;  %v1228_v26 = vadd.f32 %v1220_v17, %v2825_v37  ;;  %v1360_v22 = vmul.f32 %v2825_v37, %v2825_v37 }
 0x21f   : > { %v1391_v57 = vpop.permute.xlu1 %1390 }
 0x220   : > { %1592 = vrot.lane.b32.xlu0 %v1883_v31, %s2062_s18  ;;  %v1413_v32 = vadd.f32 %v1391_v57, %v1365_v16  ;;  %v1274_v15 = vsel %vm1272_vm3, %v1265_v9, 0.0  ;;  %v1306_v16 = vmul.f32 %v2792_v21, %v2792_v21 }
 0x221   : > { %v1393_v6 = vpop.permute.xlu0 %1392 }
 0x222   : > { %v1414_v30 = vadd.f32 %v1393_v6, %v1366_v24  ;;  %v1421_v44 = vsel %vm1272_vm3, %v1413_v32, 0.0  ;;  %v1354_v17 = vadd.f32 %v2806_v29, %v1306_v16 }
 0x223   : > { %v1089_v34 = vpop.permute.xlu1 %1088 }
 0x224   : > { %v1112_v28 = vadd.f32 %v1089_v34, %v2396_v23  ;;  %v1227_v23 = vadd.f32 %v1219_v63, %v2815_v45  ;;  %v1423_v35 = vsel %vm1272_vm3, %v1414_v30, 0.0  ;;  %v1359_v63 = vmul.f32 %v2815_v45, %v2815_v45 }
 0x225   : > { %v1389_v7 = vpop.permute.xlu0 %1388  ;;  %v1352_v45 = vadd.f32 %v2808_v61, %v1304_v0 }
 0x226   : > { %v1224_v58 = vadd.f32 %v1216_v55, %v1112_v28  ;;  %v1879_v13 = vpack.c.bf16 %v1112_v28, %v1112_v28  ;;  %v1356_v50 = vmul.f32 %v1112_v28, %v1112_v28 }
 0x227   : > { %v1103_v59 = vpop.permute.xlu1 %1102 }
 0x228   : > { %v1264_v41 = vadd.f32 %v1241_v39, %v1224_v58  ;;  %v1364_v11 = vadd.f32 %v1356_v50, %v1348_v49  ;;  %v2839_v4 = vadd.f32 %v1103_v59, %v2419_v43  ;;  %1584 = vrot.lane.b32.xlu0 %v1879_v13, %s2062_s18  ;;  %v1276_v43 = vsel %vm1272_vm3, %v1266_v56, 0.0 }
 0x229   : > { %v1247_v42 = vpop.permute.xlu0 %1246  ;;  %v1351_v49 = vadd.f32 %v2794_v19, %v1303_v20  ;;  %v1222_v19 = vadd.f32 %v2799_v5, %v2792_v21  ;;  %v1368_v59 = vadd.f32 %v1360_v22, %v1352_v45  ;;  %v1223_v5 = vadd.f32 %v2802_v38, %v2780_v25 }
 0x22a   : > { %v1412_v14 = vadd.f32 %v1389_v7, %v1364_v11  ;;  %v1886_v46 = vpack.c.bf16 %v2839_v4, %v2839_v4  ;;  %v1267_v54 = vadd.f32 %v1247_v42, %v1227_v23  ;;  %v1273_v2 = vsel %vm1272_vm3, %v1264_v41, 0.0 }
 0x22b   : > { %v1275_v39 = vadd.f32 %v1274_v15, %v1273_v2  ;;  %v1249_v27 = vpop.permute.xlu1 %1248  ;;  %v1367_v50 = vadd.f32 %v1359_v63, %v1351_v49  ;;  %v1363_v42 = vmul.f32 %v2839_v4, %v2839_v4 }
 0x22c   : > { %v1420_v47 = vsel %vm1272_vm3, %v1412_v14, 0.0  ;;  %v1268_v8 = vadd.f32 %v1249_v27, %v1228_v26  ;;  %1598 = vrot.lane.b32.xlu1 %v1886_v46, %s2062_s18  ;;  %v1278_v6 = vsel %vm1272_vm3, %v1267_v54, 0.0 }
 0x22d   : > { %v1422_v31 = vadd.f32 %v1421_v44, %v1420_v47  ;;  %v1277_v57 = vadd.f32 %v1276_v43, %v1275_v39  ;;  %v1099_v3 = vpop.permute.xlu0 %1098 }
 0x22e   : > { %v1117_v33 = vadd.f32 %v1099_v3, %v2423_v36  ;;  %v1280_v55 = vsel %vm1272_vm3, %v1268_v8, 0.0 }
 0x22f   : > { %v1279_v60 = vadd.f32 %v1278_v6, %v1277_v57  ;;  %v1251_v53 = vpop.permute.xlu1 %1250  ;;  %v1424_v34 = vadd.f32 %v1423_v35, %v1422_v31 }
 0x230   : > { %v1884_v28 = vpack.c.bf16 %v1117_v33, %v1117_v33  ;;  %v1229_v40 = vadd.f32 %v1221_v51, %v1117_v33  ;;  %v1361_v23 = vmul.f32 %v1117_v33, %v1117_v33 }
 0x231   : > { %v1281_v9 = vadd.f32 %v1280_v55, %v1279_v60  ;;  %v1101_v36 = vpop.permute.xlu0 %1100 }
 0x232   : > { %v1118_v7 = vadd.f32 %v1101_v36, %v2430_v48  ;;  %1594 = vrot.lane.b32.xlu1 %v1884_v28, %s2062_s18  ;;  %v1305_v48 = vmul.f32 %v2786_v12, %v2786_v12  ;;  %v1269_v24 = vadd.f32 %v1251_v53, %v1229_v40  ;;  %v1307_v12 = vmul.f32 %v2780_v25, %v2780_v25 }
 0x233   : > { %v1401_v58 = vpop.permute.xlu1 %1400  ;;  %v1231_v25 = vadd.f32 %v1223_v5, %v2839_v4 }
 0x234   : > { %v1885_v13 = vpack.c.bf16 %v1118_v7, %v1118_v7  ;;  %v1362_v18 = vmul.f32 %v1118_v7, %v1118_v7  ;;  %v1353_v61 = vadd.f32 %v2812_v52, %v1305_v48  ;;  %v1230_v21 = vadd.f32 %v1222_v19, %v1118_v7 }
 0x235   : > { %v1395_v56 = vpop.permute.xlu0 %1394  ;;  %v1282_v26 = vsel %vm1272_vm3, %v1269_v24, 0.0  ;;  %v1355_v54 = vadd.f32 %v2810_v10, %v1307_v12 }
 0x236   : > { %v1415_v37 = vadd.f32 %v1395_v56, %v1367_v50  ;;  %1596 = vrot.lane.b32.xlu0 %v1885_v13, %s2062_s18  ;;  %v1370_v41 = vadd.f32 %v1362_v18, %v1354_v17  ;;  %v1369_v46 = vadd.f32 %v1361_v23, %v1353_v61  ;;  %v1283_v44 = vadd.f32 %v1282_v26, %v1281_v9 }
 0x237   : > { %v1397_v32 = vpop.permute.xlu1 %1396  ;;  %v1371_v57 = vadd.f32 %v1363_v42, %v1355_v54  ;;  %v1893_v56 = vpack.c.bf16 %v2692_v62, %v2692_v62 }
 0x238   : > { %v1425_v11 = vsel %vm1272_vm3, %v1415_v37, 0.0  ;;  %v1416_v15 = vadd.f32 %v1397_v32, %v1368_v59  ;;  %v1418_v27 = vadd.f32 %v1401_v58, %v1370_v41  ;;  %v1894_v37 = vpack.c.bf16 %v2708_v1, %v2708_v1 }
 0x239   : > { %v1426_v29 = vadd.f32 %v1425_v11, %v1424_v34  ;;  %v1253_v30 = vpop.permute.xlu0 %1252 }
 0x23a   : > { %v1427_v52 = vsel %vm1272_vm3, %v1416_v15, 0.0  ;;  %v1270_v14 = vadd.f32 %v1253_v30, %v1230_v21  ;;  %v1431_v33 = vsel %vm1272_vm3, %v1418_v27, 0.0 }
 0x23b   : > { %v1428_v2 = vadd.f32 %v1427_v52, %v1426_v29  ;;  %v1399_v39 = vpop.permute.xlu1 %1398 }
 0x23c   : > { %v1284_v38 = vsel %vm1272_vm3, %v1270_v14, 0.0  ;;  %v1417_v43 = vadd.f32 %v1399_v39, %v1369_v46 }
 0x23d   : > { %v1255_v47 = vpop.permute.xlu0 %1254  ;;  %v1285_v3 = vadd.f32 %v1284_v38, %v1283_v44 }
 0x23e   : > { %v1429_v8 = vsel %vm1272_vm3, %v1417_v43, 0.0  ;;  %v1271_v31 = vadd.f32 %v1255_v47, %v1231_v25 }
 0x23f   : > { %v1430_v35 = vadd.f32 %v1429_v8, %v1428_v2  ;;  %v1403_v6 = vpop.permute.xlu1 %1402 }
 0x240   : > { %v1286_v10 = vsel %vm1272_vm3, %v1271_v31, 0.0  ;;  %v1419_v20 = vadd.f32 %v1403_v6, %v1371_v57 }
 0x241   : > { %v1287_v60 = vadd.f32 %v1286_v10, %v1285_v3  ;;  %v1432_v53 = vadd.f32 %v1431_v33, %v1430_v35  ;;  %v1528_v34 = vpop.permute.xlu0 %1527 }
 0x242   : > { %v1433_v51 = vsel %vm1272_vm3, %v1419_v20, 0.0 }
 0x243   : > { %v1288_v4 = vrot.slane %v1287_v60, 4  ;;  %v1434_v55 = vadd.f32 %v1433_v51, %v1432_v53  ;;  %v1530_v28 = vpop.permute.xlu1 %1529 }
 0x245   : > { %v1289_v63 = vadd.f32 %v1288_v4, %v1287_v60  ;;  %v1435_v0 = vrot.slane %v1434_v55, 4  ;;  %v1532_v9 = vpop.permute.xlu0 %1531 }
 0x247   : > { %v1290_v36 = vrot.slane %v1289_v63, 2  ;;  %v1436_v49 = vadd.f32 %v1435_v0, %v1434_v55  ;;  %v1534_v40 = vpop.permute.xlu1 %1533 }
 0x249   : > { %v1291_v7 = vadd.f32 %v1290_v36, %v1289_v63  ;;  %v1437_v22 = vrot.slane %v1436_v49, 2  ;;  %v1536_v16 = vpop.permute.xlu0 %1535 }
 0x24b   : > { %v1438_v58 = vadd.f32 %v1437_v22, %v1436_v49  ;;  %v1538_v45 = vpop.permute.xlu1 %1537  ;;  %v1292_v13 = vrot.slane %v1291_v7, 1 }
 0x24d   : > { %v1540_v18 = vpop.permute.xlu0 %1539  ;;  %v1293_v50 = vadd.f32 %v1292_v13, %v1291_v7  ;;  %v1439_v19 = vrot.slane %v1438_v58, 1 }
 0x24f   : > { %1295 = vrot.lane.b32.xlu0 %v1293_v50, %s2063_s19  ;;  %v1542_v17 = vpop.permute.xlu1 %1541  ;;  %v1440_v48 = vadd.f32 %v1439_v19, %v1438_v58 }
 0x251   : > { %v1642_v24 = vpop.permute.xlu0 %1641  ;;  %1442 = vrot.lane.b32.xlu1 %v1440_v48, %s2063_s19 }
 0x253   : > { %1653 = vrot.lane.b32.xlu0 %v1893_v56, %s2062_s18  ;;  %v1644_v59 = vpop.permute.xlu1 %1643 }
 0x255   : > { %v1646_v23 = vpop.permute.xlu0 %1645  ;;  %1655 = vrot.lane.b32.xlu1 %v1894_v37, %s2062_s18 }
 0x257   : > { %v1648_v61 = vpop.permute.xlu1 %1647 }
 0x259   : > { %v1650_v32 = vpop.permute.xlu0 %1649 }
 0x25b   : > { %v1652_v41 = vpop.permute.xlu1 %1651 }
 0x25d   : > { %v1475_v62 = vpop.permute.xlu0 %1474 }
 0x25e   : > { %1497 = vst.msk [vmem:[%s2910_s25 + $0x8] sm:$0xf] %vm1494_vm4, %v1475_v62 }
 0x25f   : > { %1554 = vst.msk [vmem:[%s2910_s25 + $0x8] sm:$0xf] %vm1551_vm5, %v1532_v9  ;;  %v1477_v1 = vpop.permute.xlu1 %1476 }
 0x260   : > { %1498 = vst.msk [vmem:[%s2910_s25 + $0xc] sm:$0xf] %vm1494_vm4, %v1477_v1 }
 0x261   : > { %1555 = vst.msk [vmem:[%s2910_s25 + $0xc] sm:$0xf] %vm1551_vm5, %v1534_v40 }
 0x263   : > { %v1473_v11 = vpop.permute.xlu1 %1472 }
 0x264   : > { %1496 = vst.msk [vmem:[%s2910_s25 + $0x4] sm:$0xf] %vm1494_vm4, %v1473_v11  ;;  %v1479_v15 = vpop.permute.xlu0 %1478 }
 0x265   : > { %1553 = vst.msk [vmem:[%s2910_s25 + $0x4] sm:$0xf] %vm1551_vm5, %v1530_v28 }
 0x266   : > { %1499 = vst.msk [vmem:[%s2910_s25 + $0x10] sm:$0xf] %vm1494_vm4, %v1479_v15 }
 0x267   : > { %1556 = vst.msk [vmem:[%s2910_s25 + $0x10] sm:$0xf] %vm1551_vm5, %v1536_v16 }
 0x26c   : > { %v1471_v21 = vpop.permute.xlu0 %1470 }
 0x26d   : > { %1495 = vst.msk [vmem:[%s2910_s25] sm:$0xf] %vm1494_vm4, %v1471_v21 }
 0x26e   : > { %1552 = vst.msk [vmem:[%s2910_s25] sm:$0xf] %vm1551_vm5, %v1528_v34  ;;  %v1485_v5 = vpop.permute.xlu1 %1484 }
 0x26f   : > { %1502 = vst.msk [vmem:[%s2910_s25 + $0x1c] sm:$0xf] %vm1494_vm4, %v1485_v5 }
 0x270   : > { %1559 = vst.msk [vmem:[%s2910_s25 + $0x1c] sm:$0xf] %vm1551_vm5, %v1542_v17 }
 0x272   : > { %v1481_v12 = vpop.permute.xlu1 %1480 }
 0x273   : > { %1500 = vst.msk [vmem:[%s2910_s25 + $0x14] sm:$0xf] %vm1494_vm4, %v1481_v12 }
 0x274   : > { %1557 = vst.msk [vmem:[%s2910_s25 + $0x14] sm:$0xf] %vm1551_vm5, %v1538_v45  ;;  %v1483_v29 = vpop.permute.xlu0 %1482 }
 0x275   : > { %1501 = vst.msk [vmem:[%s2910_s25 + $0x18] sm:$0xf] %vm1494_vm4, %v1483_v29 }
 0x276   : > { %1558 = vst.msk [vmem:[%s2910_s25 + $0x18] sm:$0xf] %vm1551_vm5, %v1540_v18 }
 0x288   : > { %v1591_v30 = vpop.permute.xlu1 %1590 }
 0x289   : > { %1612 = vst.msk [vmem:[%s2910_s25 + $0xc] sm:$0xf] %vm1608_vm6, %v1591_v30 }
 0x28a   : > { %1669 = vst.msk [vmem:[%s2910_s25 + $0xc] sm:$0xf] %vm1665_vm7, %v1648_v61  ;;  %v1589_v42 = vpop.permute.xlu0 %1588 }
 0x28b   : > { %1611 = vst.msk [vmem:[%s2910_s25 + $0x8] sm:$0xf] %vm1608_vm6, %v1589_v42 }
 0x28c   : > { %1668 = vst.msk [vmem:[%s2910_s25 + $0x8] sm:$0xf] %vm1665_vm7, %v1646_v23  ;;  %v1587_v26 = vpop.permute.xlu1 %1586 }
 0x28d   : > { %1610 = vst.msk [vmem:[%s2910_s25 + $0x4] sm:$0xf] %vm1608_vm6, %v1587_v26 }
 0x28e   : > { %1667 = vst.msk [vmem:[%s2910_s25 + $0x4] sm:$0xf] %vm1665_vm7, %v1644_v59 }
 0x292   : > { %v1593_v52 = vpop.permute.xlu0 %1592 }
 0x293   : > { %1613 = vst.msk [vmem:[%s2910_s25 + $0x10] sm:$0xf] %vm1608_vm6, %v1593_v52 }
 0x294   : > { %1670 = vst.msk [vmem:[%s2910_s25 + $0x10] sm:$0xf] %vm1665_vm7, %v1650_v32 }
 0x29a   : > { %v1585_v14 = vpop.permute.xlu0 %1584 }
 0x29b   : > { %1609 = vst.msk [vmem:[%s2910_s25] sm:$0xf] %vm1608_vm6, %v1585_v14 }
 0x29c   : > { %1666 = vst.msk [vmem:[%s2910_s25] sm:$0xf] %vm1665_vm7, %v1642_v24 }
 0x29e   : > { %v1599_v46 = vpop.permute.xlu1 %1598 }
 0x29f   : > { %1616 = vst.msk [vmem:[%s2910_s25 + $0x1c] sm:$0xf] %vm1608_vm6, %v1599_v46 }
 0x2a4   : > { %v1595_v54 = vpop.permute.xlu1 %1594 }
 0x2a5   : > { %1614 = vst.msk [vmem:[%s2910_s25 + $0x14] sm:$0xf] %vm1608_vm6, %v1595_v54 }
 0x2a6   : > { %1671 = vst.msk [vmem:[%s2910_s25 + $0x14] sm:$0xf] %vm1665_vm7, %v1652_v41 }
 0x2a8   : > { %v1597_v2 = vpop.permute.xlu0 %1596 }
 0x2a9   : > { %1615 = vst.msk [vmem:[%s2910_s25 + $0x18] sm:$0xf] %vm1608_vm6, %v1597_v2 }
 0x2c1   : > { %v1296_v39 = vpop.permute.xlu0 %1295 }
 0x2c2   : > { %1299 = vst.msk [vmem:[%s282_s28] sm:$0x1] %vm1298_vm8, %v1296_v39 }
 0x2c3   : > { %v1443_v27 = vpop.permute.xlu1 %1442 }
 0x2c4   : > { %1445 = vst.msk [vmem:[%s285_s7] sm:$0x1] %vm1298_vm8, %v1443_v27 }
 0x2c5   : > { %v1654_v38 = vpop.permute.xlu0 %1653 }
 0x2c6   : > { %1672 = vst.msk [vmem:[%s2910_s25 + $0x18] sm:$0xf] %vm1665_vm7, %v1654_v38 }
 0x2c7   : > { %v1656_v43 = vpop.permute.xlu1 %1655 }
 0x2c8   : > { %1673 = vst.msk [vmem:[%s2910_s25 + $0x1c] sm:$0xf] %vm1665_vm7, %v1656_v43 }
 0x2c9 PF: > { %s18_s21 = sadd.s32 1, %s2055_s21  }
 0x2ca   : > { %p15_p2 = scmp.ge.s32.totalorder %s18_s21, 4  }
 0x2cc   :  { %17 = sbr.rel (!%p15_p2) target bundleno = 1 (0x1), region = 98 }
 0x2d1   :  { %1719 = vsyncpa [#allocation3], 1 }
 0x2d2   :  { %1721 = vsyncpa [#allocation3 + $0x1], 1 }

// kernel: decoder_forward.9
= control target key start
LH: loop header
LB: loop body
LE: loop exit
PB: predicated region body
PF: predicated region fallthrough
CT: control target
= control target key end

     0   :  { %10 = vsyncpa [#allocation3], 0  ;;  %s10549_s0 = inlined_call_operand.vmem [shape: bf16[512,8], index: 0, kind: input, shape index: {}]   ;;  %s10550_s1 = inlined_call_operand.hbm [shape: bf16[4,8,12], index: 1, kind: input, shape index: {}]   ;;  %s10551_s2 = inlined_call_operand.vmem [shape: f32[1,8], index: 2, kind: input, shape index: {}]   ;;  %s10552_s3 = inlined_call_operand.vmem [shape: f32[1,8], index: 3, kind: input, shape index: {}]   ;;  %s10553_s4 = inlined_call_operand.hbm [shape: f32[1,3], index: 4, kind: input, shape index: {}]   ;;  %s10554_s5 = inlined_call_operand.vmem [shape: bf16[2,256,12], index: 5, kind: output, shape index: {}]  }
   0x1   :  { %11 = vsyncpa [#allocation5], 0  ;;  %s6438_s18 = smov 0  }
   0x2 LB: > { %s6444_s19 = sadd.s32 4294967295, %s6398_s18   ;;  %p5161_p0 = scmp.ge.s32.totalorder %s6398_s18, 1  ;;  %s6398_s18 = sphi %s6438_s18, %s17_s18  }
   0x3   : > { %p158_p1 = scmp.lt.s32.totalorder %s6398_s18, 3  ;;  %s6400_s20 = smov [#allocation2]  }
   0x4   : > { %s170_s21 = sshll.u32 %s6400_s20, 4  ;;  %p5800_p3 = scmp.eq.s32.totalorder %s6444_s19, 0  ;;  %s171_s21 = int_to_ptr.vmem [resolvable:$true] %s170_s21 }
   0x5   : > { %p6448_p2 = pnand %p5161_p0, %p158_p1  ;;  %s6401_s23 = smov [#allocation4]  }
   0x6   : > { %s190_s24 = sshll.u32 %s6401_s23, 4  ;;  %s6343_s26 = scalar_lea.vmem %s171_s21, 256  ;;  %s191_s24 = int_to_ptr.vmem [resolvable:$true] %s190_s24 }
   0x7   : > { %p5793_p4 = pneg %p6448_p2  ;;  %p6344_p7 = scmp.ne.s32.totalorder %s171_s21, %s6343_s26 }
   0x8   : > { %p6351_p10 = scmp.lt.s32.totalorder %s171_s21, %s171_s21  ;;  %p6352_p11 = scmp.lt.s32.totalorder %s6343_s26, %s6343_s26 }
   0x9   : > { %p6457_p5 = pnand %p5800_p3, %p5793_p4 }
   0xa   : > { %p6353_p12 = por %p6352_p11, %p6351_p10 }
   0xb   : > { %p6334_p6 = pneg %p6457_p5 }
   0xd   : > { %p6346_p8 = pnand %p6344_p7, %p6334_p6 }
   0xf   : > { %p6347_p9 = pneg %p6346_p8 }
  0x11   : > { %p6354_p13 = pnand %p6353_p12, %p6347_p9 }
  0x13   : > { %6357 = shalt.err (!%p6354_p13)
}
  0x14   : > { %s6402_s27 = smov 64   ;;  %s6403_s28 = smov 4  }
  0x15   : > { %5796 = dma.hbm_to_vmem [thread:$0]  (!%p6457_p5), %s10550_s1, 256, %s171_s21, [#allocation3], %s6402_s27, %s6402_s27, %s6403_s28  }
  0x16   : > { %s6369_s6 = scalar_lea.vmem %s191_s24, 16  ;;  %s6376_s7 = scalar_lea.vmem %s191_s24, 32 }
  0x17   : > { %p6370_p0 = scmp.ne.s32.totalorder %s191_s24, %s6369_s6  ;;  %p6377_p7 = scmp.lt.s32.totalorder %s191_s24, %s191_s24 }
  0x18   : > { %p6378_p8 = scmp.lt.s32.totalorder %s6376_s7, %s6369_s6 }
  0x19   : > { %p6372_p1 = pnand %p6370_p0, %p6334_p6 }
  0x1a   : > { %p6379_p9 = por %p6378_p8, %p6377_p7 }
  0x1b   : > { %p6373_p4 = pneg %p6372_p1 }
  0x1d   : > { %p6380_p10 = pnand %p6379_p9, %p6373_p4 }
  0x1f   : > { %6383 = shalt.err (!%p6380_p10)
}
  0x20   : > { %5799 = dma.hbm_to_vmem [thread:$0]  (!%p6457_p5), %s10553_s4, 16, %s191_s24, [#allocation5]  }
  0x21   : > { %212 = sbr.rel (%p6448_p2) target bundleno = 1024 (0x400), region = 40 }
  0x26   : > { %6389 = dma.done.wait (%p5800_p3), [#allocation3], 256  }
  0x27   : > { %6391 = vsyncadd (%p5800_p3), [#allocation3], 4294967040 }
  0x28   : > { %6393 = dma.done.wait (%p5800_p3), [#allocation5], 16  }
  0x29   : > { %6395 = vsyncadd (%p5800_p3), [#allocation5], 4294967280  ;;  %s5168_s10 = sshll.u32 %s6444_s19, 5  ;;  %v430_v0 = vlaneseq  ;;  %vm916_vm0 = vcmask 1043456   ;;  %v864_v14 = vld [vmem:[#allocation2 + $0x4] sm:$0xf] }
  0x2a   : > { %p245_p6 = scmp.lt.s32.totalorder %s5168_s10, 63  ;;  %v866_v15 = vld [vmem:[#allocation2 + $0xc] sm:$0xf]  ;;  %vm867_vm1 = vcmask 64512   ;;  %5782 = vmatprep.subr.msk.bf16.mxu1 %vm916_vm0, %v864_v14  ;;  %v1130_v18 = vsel %vm916_vm0, %v864_v14, 0  ;;  %s6404_s21 = smov 6  }
  0x2b   : > { %v6490_v1 = vshrl.u32 %v430_v0, 7  ;;  %5781 = vmatprep.subr.msk.bf16.mxu0 %vm916_vm0, %v866_v15  ;;  %v918_v19 = vsel %vm916_vm0, %v866_v15, 0  ;;  %v6533_v22 = vld [vmem:[%s10551_s2] ss:$0 sm:$0xff]  ;;  %5680 = vmatpush3.bf16.msra.mxu1 %v1130_v18  ;;  %v6574_v49 = vld [vmem:[#allocation2 + $0x8] sm:$0xf] }
  0x2c   : > { %s11550_s10 = smov (!%p245_p6, %s5168_s10), 63  ;;  %5646 = vmatpush3.bf16.msra.mxu0 %v918_v19  ;;  %v6538_v23 = vld [vmem:[%s10552_s3] ss:$0 sm:$0xff]  ;;  %5784 = vmatprep.subr.msk.bf16.mxu1 %vm916_vm0, %v6574_v49  ;;  %s6405_s22 = smov 3  }
  0x2d   : > { %10818 = vst [vmem:[#allocation8_spill] sm:$0xff] %v6490_v1  ;;  %v6493_v2 = vadd.s32 8, %v6490_v1  ;;  %v495_v3 = vshra.s32 %v6490_v1, 4  ;;  %v6497_v4 = vadd.s32 16, %v6490_v1  ;;  %v6500_v5 = vadd.s32 24, %v6490_v1  ;;  %s5169_s11 = sshll.u32 %s11550_s10, 2 }
  0x2e   : > { %v6503_v6 = vadd.s32 32, %v6490_v1  ;;  %v6506_v7 = vadd.s32 40, %v6490_v1  ;;  %v6509_v8 = vadd.s32 48, %v6490_v1  ;;  %v6512_v9 = vadd.s32 56, %v6490_v1  ;;  %s6517_s14 = scalar_lea.vmem %s10549_s0, %s5169_s11  ;;  %v6565_v45 = vld [vmem:[#allocation2] sm:$0xf] }
  0x2f   : > { %10819 = vst [vmem:[#allocation9_spill] sm:$0xff] %v6493_v2  ;;  %10820 = vst [vmem:[#allocation10_spill] sm:$0xff] %v6497_v4  ;;  %v496_v10 = vshra.s32 %v6493_v2, 4  ;;  %v6520_v11 = vand.u32 15, %v495_v3  ;;  %v497_v12 = vshra.s32 %v6497_v4, 4  ;;  %v498_v13 = vshra.s32 %v6500_v5, 4  ;;  %5783 = vmatprep.subr.msk.bf16.mxu0 %vm916_vm0, %v6565_v45 }
  0x30   : > { %10821 = vst [vmem:[#allocation11_spill] sm:$0xff] %v6500_v5  ;;  %10822 = vst [vmem:[#allocation12_spill] sm:$0xff] %v6503_v6  ;;  %v5499_v16 = vld [vmem:[%s6517_s14] sm:$0xff]   ;;  %v499_v17 = vshra.s32 %v6503_v6, 4  ;;  %v5576_v24 = vld [vmem:[%s6517_s14 + $0x78] sm:$0xff]   ;;  %v500_v3 = vshra.s32 %v6506_v7, 4 }
  0x31   : > { %10823 = vst [vmem:[#allocation13_spill] sm:$0xff] %v6506_v7  ;;  %10824 = vst [vmem:[#allocation14_spill] sm:$0xff] %v6509_v8  ;;  %v5500_v20 = vunpack.c.l.bf16 %v5499_v16  ;;  %v5501_v21 = vunpack.c.h.bf16 %v5499_v16  ;;  %v6541_v25 = vand.u32 15, %v496_v10  ;;  %v5562_v26 = vld [vmem:[%s6517_s14 + $0x8] sm:$0xff]   ;;  %v6544_v27 = vand.u32 15, %v497_v12  ;;  %v5563_v48 = vld [vmem:[%s6517_s14 + $0x10] sm:$0xff]  }
  0x32   : > { %10825 = vst [vmem:[#allocation15_spill] sm:$0xff] %v6512_v9  ;;  %v5560_v30 = vunpack.c.l.bf16 %v5576_v24  ;;  %v5561_v31 = vunpack.c.h.bf16 %v5576_v24  ;;  %vm575_vm2 = vcmp.eq.s32.totalorder %v6520_v11, 0  ;;  %v5504_v32 = vunpack.c.l.bf16 %v5562_v26  ;;  %v5564_v57 = vld [vmem:[%s6517_s14 + $0x18] sm:$0xff]   ;;  %v5570_v4 = vld [vmem:[%s6517_s14 + $0x48] sm:$0xff]   ;;  %v5571_v2 = vld [vmem:[%s6517_s14 + $0x50] sm:$0xff]   ;;  %s6406_s23 = smov 119  }
  0x33   : > { %v327_v28 = vmul.f32 %v5500_v20, %v6533_v22  ;;  %v328_v29 = vmul.f32 %v5501_v21, %v6533_v22  ;;  %vm576_vm3 = vcmp.eq.s32.totalorder %v6541_v25, 0  ;;  %v5505_v33 = vunpack.c.h.bf16 %v5562_v26  ;;  %s6407_s24 = smov 125   ;;  %p250_p2 = scmp.lt.s32.totalorder %s6444_s19, 1 }
  0x34   : > { %v357_v36 = vmul.f32 %v5560_v30, %v6533_v22  ;;  %v358_v37 = vmul.f32 %v5561_v31, %v6533_v22  ;;  %v329_v38 = vmul.f32 %v5504_v32, %v6533_v22  ;;  %v6556_v40 = vand.u32 15, %v498_v13 }
  0x35   : > { %v366_v34 = vadd.f32 %v6538_v23, %v327_v28  ;;  %v367_v35 = vadd.f32 %v6538_v23, %v328_v29  ;;  %v330_v39 = vmul.f32 %v5505_v33, %v6533_v22  ;;  %vm577_vm4 = vcmp.eq.s32.totalorder %v6544_v27, 0  ;;  %s11552_s19 = smov (!%p250_p2, %s6444_s19), 1 }
  0x36   : > { %v396_v43 = vadd.f32 %v6538_v23, %v357_v36  ;;  %v397_v44 = vadd.f32 %v6538_v23, %v358_v37  ;;  %v368_v46 = vadd.f32 %v6538_v23, %v329_v38  ;;  %vm578_vm5 = vcmp.eq.s32.totalorder %v6556_v40, 0  ;;  %v5565_v36 = vld [vmem:[%s6517_s14 + $0x20] sm:$0xff]   ;;  %s5369_s25 = sshll.u32 %s11552_s19, 7 }
  0x37   : > { %v6559_v41 = vmax.f32 %v366_v34, 0.0  ;;  %v6561_v42 = vmax.f32 %v367_v35, 0.0  ;;  %v369_v47 = vadd.f32 %v6538_v23, %v330_v39  ;;  %vm721_vm6 = vcmp.eq.s32.totalorder %v6544_v27, 15  ;;  %s10214_s28 = scalar_lea.vmem %s10554_s5, %s5369_s25 }
  0x38   : > { %v6580_v51 = vmax.f32 %v396_v43, 0.0  ;;  %v6582_v52 = vmax.f32 %v397_v44, 0.0  ;;  %v6589_v54 = vmax.f32 %v368_v46, 0.0  ;;  %vm722_vm7 = vcmp.eq.s32.totalorder %v6556_v40, 15  ;;  %v5566_v44 = vld [vmem:[%s6517_s14 + $0x28] sm:$0xff]  }
  0x39   : > { %10826 = vst [vmem:[#allocation16_spill] sm:$0xff] %v6559_v41  ;;  %10827 = vst [vmem:[#allocation17_spill] sm:$0xff] %v6561_v42  ;;  %v6578_v50 = vpack.c.bf16 %v6561_v42, %v6559_v41  ;;  %v673_v53 = vsel %vm577_vm4, 0.0, %v6559_v41  ;;  %v6591_v55 = vmax.f32 %v369_v47, 0.0  ;;  %v674_v56 = vsel %vm578_vm5, 0.0, %v6561_v42 }
  0x3a   : > { %v671_v58 = vsel %vm575_vm2, 0.0, %v6580_v51  ;;  %v672_v59 = vsel %vm576_vm3, 0.0, %v6582_v52  ;;  %v704_v60 = vpack.c.bf16 %v674_v56, %v673_v53  ;;  %v5508_v61 = vunpack.c.l.bf16 %v5563_v48 }
  0x3b   : > { %5681 = vmatprep.mubr.msk.bf16.mxu1 %vm867_vm1, %v6578_v50  ;;  %v703_v62 = vpack.c.bf16 %v672_v59, %v671_v58  ;;  %v6606_v63 = vpack.c.bf16 %v6591_v55, %v6589_v54  ;;  %v5509_v0 = vunpack.c.h.bf16 %v5563_v48  ;;  %v6612_v12 = vand.u32 15, %v499_v17  ;;  %v6659_v48 = vld [vmem:[#allocation4] ss:$0 sm:$0xff] }
  0x3c   : > { %v331_v10 = vmul.f32 %v5508_v61, %v6533_v22  ;;  %v5512_v13 = vunpack.c.l.bf16 %v5564_v57  ;;  %v5513_v14 = vunpack.c.h.bf16 %v5564_v57  ;;  %v6618_v16 = vand.u32 15, %v500_v3  ;;  %3187 = vrot.lane.b32.xlu1 %v6659_v48, %s6404_s21  ;;  %3152 = vrot.lane.b32.xlu0 %v6659_v48, %s6405_s22 }
  0x3d   : > { %10828 = vst [vmem:[#allocation18_spill] sm:$0xff] %v6606_v63  ;;  %5647 = vmatprep.mubr.msk.bf16.mxu0 %vm867_vm1, %v703_v62  ;;  %5682 = vmatmul.mubr.msk.bf16.vlgmr.msra.gmra.mxu1 %vm867_vm1, %v6606_v63  ;;  %v332_v15 = vmul.f32 %v5509_v0, %v6533_v22  ;;  %v501_v18 = vshra.s32 %v6509_v8, 4  ;;  %v502_v19 = vshra.s32 %v6512_v9, 4  ;;  %vm579_vm8 = vcmp.eq.s32.totalorder %v6612_v12, 0  ;;  %v5573_v63 = vld [vmem:[%s6517_s14 + $0x60] sm:$0xff]  }
  0x3e   : > { %5648 = vmatmul.mubr.msk.bf16.vlgmr.msra.gmra.mxu0 %vm867_vm1, %v704_v60  ;;  %v370_v17 = vadd.f32 %v6538_v23, %v331_v10  ;;  %v333_v20 = vmul.f32 %v5512_v13, %v6533_v22  ;;  %v334_v21 = vmul.f32 %v5513_v14, %v6533_v22  ;;  %vm580_vm9 = vcmp.eq.s32.totalorder %v6618_v16, 0 }
  0x3f   : > { %v371_v24 = vadd.f32 %v6538_v23, %v332_v15  ;;  %v675_v26 = vsel %vm579_vm8, 0.0, %v6589_v54  ;;  %v6630_v28 = vand.u32 15, %v501_v18  ;;  %v676_v30 = vsel %vm580_vm9, 0.0, %v6591_v55 }
  0x40   : > { %v402_v29 = vmax.f32 %v370_v17, 0.0  ;;  %v372_v31 = vadd.f32 %v6538_v23, %v333_v20  ;;  %v373_v32 = vadd.f32 %v6538_v23, %v334_v21  ;;  %v705_v34 = vpack.c.bf16 %v676_v30, %v675_v26 }
  0x41   : > { %v403_v33 = vmax.f32 %v371_v24, 0.0  ;;  %v6635_v35 = vand.u32 15, %v502_v19  ;;  %vm581_vm10 = vcmp.eq.s32.totalorder %v6630_v28, 0  ;;  %v6657_v27 = vadd.s32 64, %v6490_v1 }
  0x42   : > { %v6641_v37 = vsel %vm721_vm6, 0.0, %v402_v29  ;;  %v6643_v38 = vmax.f32 %v372_v31, 0.0  ;;  %v6645_v39 = vmax.f32 %v373_v32, 0.0  ;;  %v677_v43 = vsel %vm581_vm10, 0.0, %v402_v29  ;;  %5651 = vmatprep.mubr.msk.bf16.mxu0 %vm867_vm1, %v705_v34 }
  0x43   : > { %v6648_v46 = vpack.c.bf16 %v403_v33, %v402_v29  ;;  %v6652_v47 = vsel %vm722_vm7, 0.0, %v403_v33  ;;  %vm582_vm11 = vcmp.eq.s32.totalorder %v6635_v35, 0  ;;  %10830 = vst [vmem:[#allocation20_spill] sm:$0xff] %v6657_v27  ;;  %v6666_v57 = vadd.s32 72, %v6490_v1 }
  0x44   : > { %v6663_v53 = vpack.c.bf16 %v6645_v39, %v6643_v38  ;;  %v678_v56 = vsel %vm582_vm11, 0.0, %v403_v33  ;;  %v5516_v40 = vunpack.c.l.bf16 %v5565_v36  ;;  %v503_v59 = vshra.s32 %v6657_v27, 4 }
  0x45   : > { %10829 = vst [vmem:[#allocation19_spill] sm:$0xff] %v6648_v46  ;;  %10832 = vst [vmem:[#allocation22_spill] sm:$0xff] %v6666_v57  ;;  %5685 = vmatprep.mubr.msk.bf16.mxu1 %vm867_vm1, %v6648_v46  ;;  %v706_v58 = vpack.c.bf16 %v678_v56, %v677_v43  ;;  %v5517_v60 = vunpack.c.h.bf16 %v5565_v36  ;;  %v6674_v61 = vadd.s32 80, %v6490_v1  ;;  %v504_v62 = vshra.s32 %v6666_v57, 4  ;;  %v5567_v43 = vld [vmem:[%s6517_s14 + $0x30] sm:$0xff]  }
  0x46   : > { %10831 = vst [vmem:[#allocation21_spill] sm:$0xff] %v6663_v53  ;;  %5686 = vmatmul.mubr.msk.bf16.gmra.mxu1 %vm867_vm1, %v6663_v53  ;;  %v335_v0 = vmul.f32 %v5516_v40, %v6533_v22  ;;  %v6681_v3 = vadd.s32 88, %v6490_v1  ;;  %v5520_v10 = vunpack.c.l.bf16 %v5566_v44  ;;  %v6684_v13 = vand.u32 15, %v503_v59 }
  0x47   : > { %10833 = vst [vmem:[#allocation23_spill] sm:$0xff] %v6674_v61  ;;  %5652 = vmatmul.mubr.msk.bf16.gmra.mxu0 %vm867_vm1, %v706_v58  ;;  %v336_v14 = vmul.f32 %v5517_v60, %v6533_v22  ;;  %v505_v15 = vshra.s32 %v6674_v61, 4  ;;  %v5521_v18 = vunpack.c.h.bf16 %v5566_v44  ;;  %v6688_v19 = vand.u32 15, %v504_v62 }
  0x48   : > { %10834 = vst [vmem:[#allocation24_spill] sm:$0xff] %v6681_v3  ;;  %v374_v17 = vadd.f32 %v6538_v23, %v335_v0  ;;  %v506_v20 = vshra.s32 %v6681_v3, 4  ;;  %v337_v21 = vmul.f32 %v5520_v10, %v6533_v22  ;;  %vm583_vm12 = vcmp.eq.s32.totalorder %v6684_v13, 0  ;;  %v5568_v0 = vld [vmem:[%s6517_s14 + $0x38] sm:$0xff]  }
  0x49   : > { %v375_v24 = vadd.f32 %v6538_v23, %v336_v14  ;;  %v6695_v26 = vand.u32 15, %v505_v15  ;;  %v338_v29 = vmul.f32 %v5521_v18, %v6533_v22  ;;  %vm584_vm13 = vcmp.eq.s32.totalorder %v6688_v19, 0 }
  0x4a   : > { %v679_v30 = vsel %vm583_vm12, 0.0, %v6643_v38  ;;  %v6700_v31 = vmax.f32 %v374_v17, 0.0  ;;  %v6702_v32 = vand.u32 15, %v506_v20  ;;  %v680_v33 = vsel %vm584_vm13, 0.0, %v6645_v39 }
  0x4b   : > { %v6705_v34 = vmax.f32 %v375_v24, 0.0  ;;  %vm585_vm14 = vcmp.eq.s32.totalorder %v6695_v26, 0  ;;  %v376_v36 = vadd.f32 %v6538_v23, %v337_v21  ;;  %v707_v44 = vpack.c.bf16 %v680_v33, %v679_v30 }
  0x4c   : > { %vm586_vm15 = vcmp.eq.s32.totalorder %v6702_v32, 0  ;;  %v681_v56 = vsel %vm585_vm14, 0.0, %v6700_v31  ;;  %v377_v40 = vadd.f32 %v6538_v23, %v338_v29  ;;  %v6721_v62 = vadd.s32 96, %v6490_v1 }
  0x4d   : > { %v6715_v58 = vpack.c.bf16 %v6705_v34, %v6700_v31  ;;  %v682_v59 = vsel %vm586_vm15, 0.0, %v6705_v34  ;;  %v6718_v60 = vmax.f32 %v376_v36, 0.0  ;;  %5655 = vmatprep.mubr.msk.bf16.mxu0 %vm867_vm1, %v707_v44  ;;  %v6728_v15 = vadd.s32 104, %v6490_v1 }
  0x4e   : > { %10836 = vst [vmem:[#allocation26_spill] sm:$0xff] %v6721_v62  ;;  %v708_v10 = vpack.c.bf16 %v682_v59, %v681_v56  ;;  %v6725_v14 = vmax.f32 %v377_v40, 0.0  ;;  %v5524_v18 = vunpack.c.l.bf16 %v5567_v43  ;;  %v507_v17 = vshra.s32 %v6721_v62, 4 }
  0x4f   : > { %10835 = vst [vmem:[#allocation25_spill] sm:$0xff] %v6715_v58  ;;  %10837 = vst [vmem:[#allocation27_spill] sm:$0xff] %v6728_v15  ;;  %5689 = vmatprep.mubr.msk.bf16.mxu1 %vm867_vm1, %v6715_v58  ;;  %v5525_v20 = vunpack.c.h.bf16 %v5567_v43  ;;  %v6734_v21 = vadd.s32 112, %v6490_v1  ;;  %v6737_v24 = vadd.s32 120, %v6490_v1  ;;  %v508_v30 = vshra.s32 %v6728_v15, 4 }
  0x50   : > { %5656 = vmatmul.mubr.msk.bf16.gmra.mxu0 %vm867_vm1, %v708_v10  ;;  %v6742_v29 = vpack.c.bf16 %v6725_v14, %v6718_v60  ;;  %v339_v33 = vmul.f32 %v5524_v18, %v6533_v22  ;;  %v5528_v36 = vunpack.c.l.bf16 %v5568_v0  ;;  %v6746_v44 = vand.u32 15, %v507_v17 }
  0x51   : > { %10838 = vst [vmem:[#allocation28_spill] sm:$0xff] %v6734_v21  ;;  %10839 = vst [vmem:[#allocation29_spill] sm:$0xff] %v6737_v24  ;;  %v340_v43 = vmul.f32 %v5525_v20, %v6533_v22  ;;  %v509_v56 = vshra.s32 %v6734_v21, 4  ;;  %v510_v40 = vshra.s32 %v6737_v24, 4  ;;  %v6753_v59 = vand.u32 15, %v508_v30 }
  0x52   : > { %10840 = vst [vmem:[#allocation30_spill] sm:$0xff] %v6742_v29  ;;  %5690 = vmatmul.mubr.msk.bf16.gmra.mxu1 %vm867_vm1, %v6742_v29  ;;  %v378_v10 = vadd.f32 %v6538_v23, %v339_v33  ;;  %v5529_v62 = vunpack.c.h.bf16 %v5568_v0  ;;  %v341_v18 = vmul.f32 %v5528_v36, %v6533_v22  ;;  %vm587_vm2 = vcmp.eq.s32.totalorder %v6746_v44, 0 }
  0x53   : > { %v379_v17 = vadd.f32 %v6538_v23, %v340_v43  ;;  %v6759_v20 = vand.u32 15, %v509_v56  ;;  %v6761_v21 = vand.u32 15, %v510_v40  ;;  %vm588_vm3 = vcmp.eq.s32.totalorder %v6753_v59, 0  ;;  %v5569_v43 = vld [vmem:[%s6517_s14 + $0x40] sm:$0xff]  }
  0x54   : > { %v683_v61 = vsel %vm587_vm2, 0.0, %v6718_v60  ;;  %v6765_v30 = vmax.f32 %v378_v10, 0.0  ;;  %v342_v33 = vmul.f32 %v5529_v62, %v6533_v22  ;;  %v684_v0 = vsel %vm588_vm3, 0.0, %v6725_v14 }
  0x55   : > { %v6769_v36 = vmax.f32 %v379_v17, 0.0  ;;  %vm589_vm4 = vcmp.eq.s32.totalorder %v6759_v20, 0  ;;  %vm590_vm5 = vcmp.eq.s32.totalorder %v6761_v21, 0  ;;  %v709_v56 = vpack.c.bf16 %v684_v0, %v683_v61 }
  0x56   : > { %v685_v40 = vsel %vm589_vm4, 0.0, %v6765_v30  ;;  %v380_v27 = vadd.f32 %v6538_v23, %v341_v18  ;;  %v381_v8 = vadd.f32 %v6538_v23, %v342_v33  ;;  %v6783_v17 = vadd.s32 128, %v6490_v1 }
  0x57   : > { %v6779_v10 = vpack.c.bf16 %v6769_v36, %v6765_v30  ;;  %v686_v62 = vsel %vm590_vm5, 0.0, %v6769_v36  ;;  %v6786_v6 = vadd.s32 136, %v6490_v1  ;;  %5659 = vmatprep.mubr.msk.bf16.mxu0 %vm867_vm1, %v709_v56  ;;  %v5532_v33 = vunpack.c.l.bf16 %v5569_v43 }
  0x58   : > { %10842 = vst [vmem:[#allocation32_spill] sm:$0xff] %v6783_v17  ;;  %v710_v61 = vpack.c.bf16 %v686_v62, %v685_v40  ;;  %v6790_v0 = vmax.f32 %v380_v27, 0.0  ;;  %v6792_v18 = vmax.f32 %v381_v8, 0.0  ;;  %v511_v24 = vshra.s32 %v6783_v17, 4 }
  0x59   : > { %10841 = vst [vmem:[#allocation31_spill] sm:$0xff] %v6779_v10  ;;  %10843 = vst [vmem:[#allocation33_spill] sm:$0xff] %v6786_v6  ;;  %5693 = vmatprep.mubr.msk.bf16.mxu1 %vm867_vm1, %v6779_v10  ;;  %v512_v15 = vshra.s32 %v6786_v6, 4  ;;  %v5533_v3 = vunpack.c.h.bf16 %v5569_v43  ;;  %v6799_v57 = vadd.s32 144, %v6490_v1  ;;  %v343_v8 = vmul.f32 %v5532_v33, %v6533_v22 }
  0x5a   : > { %5660 = vmatmul.mubr.msk.bf16.gmra.mxu0 %vm867_vm1, %v710_v61  ;;  %v6804_v27 = vpack.c.bf16 %v6792_v18, %v6790_v0  ;;  %v6808_v56 = vadd.s32 152, %v6490_v1  ;;  %v5536_v40 = vunpack.c.l.bf16 %v5570_v4  ;;  %v6810_v62 = vand.u32 15, %v511_v24 }
  0x5b   : > { %10844 = vst [vmem:[#allocation34_spill] sm:$0xff] %v6799_v57  ;;  %v6812_v17 = vand.u32 15, %v512_v15  ;;  %v344_v43 = vmul.f32 %v5533_v3, %v6533_v22  ;;  %v513_v6 = vshra.s32 %v6799_v57, 4  ;;  %v382_v61 = vadd.f32 %v6538_v23, %v343_v8 }
  0x5c   : > { %10845 = vst [vmem:[#allocation35_spill] sm:$0xff] %v6804_v27  ;;  %10846 = vst [vmem:[#allocation36_spill] sm:$0xff] %v6808_v56  ;;  %5694 = vmatmul.mubr.msk.bf16.gmra.mxu1 %vm867_vm1, %v6804_v27  ;;  %v514_v33 = vshra.s32 %v6808_v56, 4  ;;  %v5537_v9 = vunpack.c.h.bf16 %v5570_v4  ;;  %v345_v7 = vmul.f32 %v5536_v40, %v6533_v22  ;;  %vm591_vm6 = vcmp.eq.s32.totalorder %v6810_v62, 0 }
  0x5d   : > { %vm592_vm7 = vcmp.eq.s32.totalorder %v6812_v17, 0  ;;  %v383_v15 = vadd.f32 %v6538_v23, %v344_v43  ;;  %v6824_v3 = vand.u32 15, %v513_v6  ;;  %v687_v24 = vsel %vm591_vm6, 0.0, %v6790_v0 }
  0x5e   : > { %v688_v57 = vsel %vm592_vm7, 0.0, %v6792_v18  ;;  %v6828_v5 = vmax.f32 %v382_v61, 0.0  ;;  %v6830_v8 = vand.u32 15, %v514_v33  ;;  %v346_v40 = vmul.f32 %v5537_v9, %v6533_v22 }
  0x5f   : > { %v711_v4 = vpack.c.bf16 %v688_v57, %v687_v24  ;;  %v6832_v56 = vmax.f32 %v383_v15, 0.0  ;;  %vm593_vm8 = vcmp.eq.s32.totalorder %v6824_v3, 0  ;;  %v384_v43 = vadd.f32 %v6538_v23, %v345_v7  ;;  %v5572_v24 = vld [vmem:[%s6517_s14 + $0x58] sm:$0xff]  }
  0x60   : > { %vm594_vm9 = vcmp.eq.s32.totalorder %v6830_v8, 0  ;;  %v689_v6 = vsel %vm593_vm8, 0.0, %v6828_v5  ;;  %v6841_v61 = vadd.s32 160, %v6490_v1  ;;  %v385_v9 = vadd.f32 %v6538_v23, %v346_v40 }
  0x61   : > { %5663 = vmatprep.mubr.msk.bf16.mxu0 %vm867_vm1, %v711_v4  ;;  %v6846_v57 = vpack.c.bf16 %v6832_v56, %v6828_v5  ;;  %v690_v33 = vsel %vm594_vm9, 0.0, %v6832_v56  ;;  %v6851_v15 = vadd.s32 168, %v6490_v1  ;;  %v6854_v10 = vmax.f32 %v384_v43, 0.0 }
  0x62   : > { %10847 = vst [vmem:[#allocation37_spill] sm:$0xff] %v6841_v61  ;;  %v712_v27 = vpack.c.bf16 %v690_v33, %v689_v6  ;;  %v515_v7 = vshra.s32 %v6841_v61, 4  ;;  %v5540_v29 = vunpack.c.l.bf16 %v5571_v2  ;;  %v6859_v4 = vmax.f32 %v385_v9, 0.0 }
  0x63   : > { %10848 = vst [vmem:[#allocation38_spill] sm:$0xff] %v6846_v57  ;;  %10849 = vst [vmem:[#allocation39_spill] sm:$0xff] %v6851_v15  ;;  %5697 = vmatprep.mubr.msk.bf16.mxu1 %vm867_vm1, %v6846_v57  ;;  %v516_v58 = vshra.s32 %v6851_v15, 4  ;;  %v5541_v53 = vunpack.c.h.bf16 %v5571_v2  ;;  %v6863_v40 = vadd.s32 176, %v6490_v1  ;;  %v6870_v43 = vadd.s32 184, %v6490_v1 }
  0x64   : > { %5664 = vmatmul.mubr.msk.bf16.gmra.mxu0 %vm867_vm1, %v712_v27  ;;  %v6866_v42 = vand.u32 15, %v515_v7  ;;  %v347_v6 = vmul.f32 %v5540_v29, %v6533_v22  ;;  %v5544_v33 = vunpack.c.l.bf16 %v5572_v24  ;;  %v6874_v9 = vpack.c.bf16 %v6859_v4, %v6854_v10 }
  0x65   : > { %10850 = vst [vmem:[#allocation40_spill] sm:$0xff] %v6863_v40  ;;  %10852 = vst [vmem:[#allocation42_spill] sm:$0xff] %v6870_v43  ;;  %v6876_v61 = vand.u32 15, %v516_v58  ;;  %v348_v2 = vmul.f32 %v5541_v53, %v6533_v22  ;;  %v517_v15 = vshra.s32 %v6863_v40, 4  ;;  %v518_v29 = vshra.s32 %v6870_v43, 4 }
  0x66   : > { %10851 = vst [vmem:[#allocation41_spill] sm:$0xff] %v6866_v42  ;;  %10853 = vst [vmem:[#allocation43_spill] sm:$0xff] %v6874_v9  ;;  %vm595_vm10 = vcmp.eq.s32.totalorder %v6866_v42, 0  ;;  %v386_v27 = vadd.f32 %v6538_v23, %v347_v6  ;;  %v5545_v7 = vunpack.c.h.bf16 %v5572_v24  ;;  %5698 = vmatmul.mubr.msk.bf16.gmra.mxu1 %vm867_vm1, %v6874_v9  ;;  %v349_v24 = vmul.f32 %v5544_v33, %v6533_v22 }
  0x67   : > { %10854 = vst [vmem:[#allocation44_spill] sm:$0xff] %v6876_v61  ;;  %vm596_vm11 = vcmp.eq.s32.totalorder %v6876_v61, 0  ;;  %v691_v58 = vsel %vm595_vm10, 0.0, %v6854_v10  ;;  %v387_v57 = vadd.f32 %v6538_v23, %v348_v2  ;;  %v6888_v53 = vand.u32 15, %v517_v15 }
  0x68   : > { %v692_v40 = vsel %vm596_vm11, 0.0, %v6859_v4  ;;  %v6891_v41 = vmax.f32 %v386_v27, 0.0  ;;  %v6893_v6 = vand.u32 15, %v518_v29  ;;  %v350_v9 = vmul.f32 %v5545_v7, %v6533_v22  ;;  %v5574_v7 = vld [vmem:[%s6517_s14 + $0x68] sm:$0xff]  }
  0x69   : > { %10855 = vst [vmem:[#allocation45_spill] sm:$0xff] %v6888_v53  ;;  %v713_v43 = vpack.c.bf16 %v692_v40, %v691_v58  ;;  %v6896_v46 = vmax.f32 %v387_v57, 0.0  ;;  %vm597_vm12 = vcmp.eq.s32.totalorder %v6888_v53, 0  ;;  %v388_v2 = vadd.f32 %v6538_v23, %v349_v24 }
  0x6a   : > { %10856 = vst [vmem:[#allocation46_spill] sm:$0xff] %v6893_v6  ;;  %vm598_vm13 = vcmp.eq.s32.totalorder %v6893_v6, 0  ;;  %v693_v15 = vsel %vm597_vm12, 0.0, %v6891_v41  ;;  %v6905_v27 = vadd.s32 192, %v6490_v1  ;;  %v389_v33 = vadd.f32 %v6538_v23, %v350_v9 }
  0x6b   : > { %10857 = vst [vmem:[#allocation47_spill] sm:$0xff] %v6896_v46  ;;  %5667 = vmatprep.mubr.msk.bf16.mxu0 %vm867_vm1, %v713_v43  ;;  %v6910_v57 = vpack.c.bf16 %v6896_v46, %v6891_v41  ;;  %v694_v40 = vsel %vm598_vm13, 0.0, %v6896_v46  ;;  %v6915_v29 = vadd.s32 200, %v6490_v1  ;;  %v6918_v6 = vmax.f32 %v388_v2, 0.0 }
  0x6c   : > { %10858 = vst [vmem:[#allocation48_spill] sm:$0xff] %v6905_v27  ;;  %v714_v58 = vpack.c.bf16 %v694_v40, %v693_v15  ;;  %v519_v24 = vshra.s32 %v6905_v27, 4  ;;  %v5548_v53 = vunpack.c.l.bf16 %v5573_v63  ;;  %v6923_v43 = vmax.f32 %v389_v33, 0.0 }
  0x6d   : > { %10859 = vst [vmem:[#allocation49_spill] sm:$0xff] %v6910_v57  ;;  %10860 = vst [vmem:[#allocation50_spill] sm:$0xff] %v6915_v29  ;;  %5701 = vmatprep.mubr.msk.bf16.mxu1 %vm867_vm1, %v6910_v57  ;;  %v520_v61 = vshra.s32 %v6915_v29, 4  ;;  %v5549_v42 = vunpack.c.h.bf16 %v5573_v63  ;;  %v6927_v9 = vadd.s32 208, %v6490_v1  ;;  %v6934_v2 = vadd.s32 216, %v6490_v1 }
  0x6e   : > { %10861 = vst [vmem:[#allocation51_spill] sm:$0xff] %v6923_v43  ;;  %5668 = vmatmul.mubr.msk.bf16.gmra.mxu0 %vm867_vm1, %v714_v58  ;;  %v6930_v46 = vand.u32 15, %v519_v24  ;;  %v351_v15 = vmul.f32 %v5548_v53, %v6533_v22  ;;  %v5552_v40 = vunpack.c.l.bf16 %v5574_v7  ;;  %v6938_v33 = vpack.c.bf16 %v6923_v43, %v6918_v6 }
  0x6f   : > { %10862 = vst [vmem:[#allocation52_spill] sm:$0xff] %v6927_v9  ;;  %10864 = vst [vmem:[#allocation54_spill] sm:$0xff] %v6934_v2  ;;  %v6940_v27 = vand.u32 15, %v520_v61  ;;  %v352_v63 = vmul.f32 %v5549_v42, %v6533_v22  ;;  %v521_v29 = vshra.s32 %v6927_v9, 4  ;;  %v522_v53 = vshra.s32 %v6934_v2, 4 }
  0x70   : > { %10863 = vst [vmem:[#allocation53_spill] sm:$0xff] %v6930_v46  ;;  %10865 = vst [vmem:[#allocation55_spill] sm:$0xff] %v6938_v33  ;;  %vm599_vm14 = vcmp.eq.s32.totalorder %v6930_v46, 0  ;;  %v390_v58 = vadd.f32 %v6538_v23, %v351_v15  ;;  %v5553_v24 = vunpack.c.h.bf16 %v5574_v7  ;;  %5702 = vmatmul.mubr.msk.bf16.gmra.mxu1 %vm867_vm1, %v6938_v33  ;;  %vm719_vm2 = vcmp.eq.s32.totalorder %v6520_v11, 15 }
  0x71   : > { %10866 = vst [vmem:[#allocation56_spill] sm:$0xff] %v6940_v27  ;;  %vm600_vm15 = vcmp.eq.s32.totalorder %v6940_v27, 0  ;;  %v695_v61 = vsel %vm599_vm14, 0.0, %v6918_v6  ;;  %v391_v57 = vadd.f32 %v6538_v23, %v352_v63  ;;  %v6952_v42 = vand.u32 15, %v521_v29  ;;  %v5575_v63 = vld [vmem:[%s6517_s14 + $0x70] sm:$0xff]  }
  0x72   : > { %v696_v9 = vsel %vm600_vm15, 0.0, %v6923_v43  ;;  %v6956_v15 = vmax.f32 %v390_v58, 0.0  ;;  %v6958_v2 = vand.u32 15, %v522_v53  ;;  %v353_v7 = vmul.f32 %v5552_v40, %v6533_v22 }
  0x73   : > { %10867 = vst [vmem:[#allocation57_spill] sm:$0xff] %v6952_v42  ;;  %vm720_vm3 = vcmp.eq.s32.totalorder %v6541_v25, 15  ;;  %v715_v33 = vpack.c.bf16 %v696_v9, %v695_v61  ;;  %v6962_v27 = vmax.f32 %v391_v57, 0.0  ;;  %vm601_vm4 = vcmp.eq.s32.totalorder %v6952_v42, 0 }
  0x74   : > { %10868 = vst [vmem:[#allocation58_spill] sm:$0xff] %v6956_v15  ;;  %10869 = vst [vmem:[#allocation59_spill] sm:$0xff] %v6958_v2  ;;  %v354_v29 = vmul.f32 %v5553_v24, %v6533_v22  ;;  %vm602_vm5 = vcmp.eq.s32.totalorder %v6958_v2, 0  ;;  %v697_v46 = vsel %vm601_vm4, 0.0, %v6956_v15  ;;  %v392_v58 = vadd.f32 %v6538_v23, %v353_v7 }
  0x75   : > { %10870 = vst [vmem:[#allocation60_spill] sm:$0xff] %v6962_v27  ;;  %v6971_v53 = vadd.s32 224, %v6490_v1  ;;  %5671 = vmatprep.mubr.msk.bf16.mxu0 %vm867_vm1, %v715_v33  ;;  %v6976_v57 = vpack.c.bf16 %v6962_v27, %v6956_v15  ;;  %v698_v9 = vsel %vm602_vm5, 0.0, %v6962_v27  ;;  %v6981_v24 = vadd.s32 232, %v6490_v1 }
  0x76   : > { %v393_v40 = vadd.f32 %v6538_v23, %v354_v29  ;;  %v716_v61 = vpack.c.bf16 %v698_v9, %v697_v46  ;;  %v6983_v2 = vmax.f32 %v392_v58, 0.0  ;;  %v5556_v42 = vunpack.c.l.bf16 %v5575_v63 }
  0x77   : > { %10871 = vst [vmem:[#allocation61_spill] sm:$0xff] %v6971_v53  ;;  %10872 = vst [vmem:[#allocation62_spill] sm:$0xff] %v6981_v24  ;;  %v523_v7 = vshra.s32 %v6971_v53, 4  ;;  %5705 = vmatprep.mubr.msk.bf16.mxu1 %vm867_vm1, %v6976_v57  ;;  %v524_v15 = vshra.s32 %v6981_v24, 4  ;;  %v5557_v43 = vunpack.c.h.bf16 %v5575_v63  ;;  %v6992_v27 = vadd.s32 240, %v6490_v1 }
  0x78   : > { %v6988_v33 = vmax.f32 %v393_v40, 0.0  ;;  %5672 = vmatmul.mubr.msk.bf16.gmra.mxu0 %vm867_vm1, %v716_v61  ;;  %v355_v46 = vmul.f32 %v5556_v42, %v6533_v22  ;;  %v6999_v58 = vadd.s32 248, %v6490_v1  ;;  %v7003_v9 = vpack.c.bf16 %v6582_v52, %v6580_v51 }
  0x79   : > { %10873 = vst [vmem:[#allocation63_spill] sm:$0xff] %v6992_v27  ;;  %v6995_v29 = vand.u32 15, %v523_v7  ;;  %v7009_v63 = vand.u32 15, %v524_v15  ;;  %v356_v53 = vmul.f32 %v5557_v43, %v6533_v22  ;;  %v525_v61 = vshra.s32 %v6992_v27, 4 }
  0x7a   : > { %10874 = vst [vmem:[#allocation64_spill] sm:$0xff] %v6999_v58  ;;  %v7007_v40 = vpack.c.bf16 %v6988_v33, %v6983_v2  ;;  %v394_v42 = vadd.f32 %v6538_v23, %v355_v46  ;;  %v526_v7 = vshra.s32 %v6999_v58, 4  ;;  %v1345_v24 = vsel %vm916_vm0, %v6565_v45, 0 }
  0x7b   : > { %vm603_vm6 = vcmp.eq.s32.totalorder %v6995_v29, 0  ;;  %vm604_vm7 = vcmp.eq.s32.totalorder %v7009_v63, 0  ;;  %v395_v22 = vadd.f32 %v6538_v23, %v356_v53  ;;  %v7023_v43 = vand.u32 15, %v525_v61  ;;  %5714 = vmatpush3.bf16.msra.mxu0 %v1345_v24 }
  0x7c   : > { %10875 = vst [vmem:[#allocation65_spill] sm:$0xff] %v7007_v40  ;;  %5706 = vmatmul.mubr.msk.bf16.gmra.mxu1 %vm867_vm1, %v7007_v40  ;;  %v699_v15 = vsel %vm603_vm6, 0.0, %v6983_v2  ;;  %v700_v27 = vsel %vm604_vm7, 0.0, %v6988_v33  ;;  %v7026_v46 = vmax.f32 %v394_v42, 0.0  ;;  %v7028_v58 = vand.u32 15, %v526_v7  ;;  %v10886_v7 = vld [vmem:[#allocation57_spill] sm:$0xff] }
  0x7d   : > { %v1509_v45 = vsel %vm916_vm0, %v6574_v49, 0  ;;  %v717_v1 = vpack.c.bf16 %v700_v27, %v699_v15  ;;  %v7032_v40 = vmax.f32 %v395_v22, 0.0  ;;  %vm605_vm8 = vcmp.eq.s32.totalorder %v7023_v43, 0  ;;  %v10887_v15 = vld [vmem:[#allocation59_spill] sm:$0xff] }
  0x7e   : > { %5748 = vmatpush3.bf16.msra.mxu1 %v1509_v45  ;;  %v815_v23 = vsel %vm719_vm2, 0.0, %v6589_v54  ;;  %vm606_vm9 = vcmp.eq.s32.totalorder %v7028_v58, 0  ;;  %v701_v53 = vsel %vm605_vm8, 0.0, %v7026_v46  ;;  %v816_v24 = vsel %vm720_vm3, 0.0, %v6591_v55 }
  0x7f   : > { %v848_v49 = vpack.c.bf16 %v6652_v47, %v6641_v37  ;;  %5675 = vmatprep.mubr.msk.bf16.mxu0 %vm867_vm1, %v717_v1  ;;  %v7048_v27 = vpack.c.bf16 %v7032_v40, %v7026_v46  ;;  %v702_v11 = vsel %vm606_vm9, 0.0, %v7032_v40  ;;  %v847_v54 = vpack.c.bf16 %v816_v24, %v815_v23 }
  0x80   : > { %vm723_vm0 = vcmp.eq.s32.totalorder %v6612_v12, 15  ;;  %v718_v61 = vpack.c.bf16 %v702_v11, %v701_v53  ;;  %vm724_vm10 = vcmp.eq.s32.totalorder %v6618_v16, 15  ;;  %vm725_vm11 = vcmp.eq.s32.totalorder %v6630_v28, 15  ;;  %v10888_v53 = vld [vmem:[#allocation16_spill] sm:$0xff] }
  0x81   : > { %v819_v25 = vsel %vm723_vm0, 0.0, %v6643_v38  ;;  %5709 = vmatprep.mubr.msk.bf16.mxu1 %vm867_vm1, %v7048_v27  ;;  %v820_v1 = vsel %vm724_vm10, 0.0, %v6645_v39  ;;  %vm726_vm12 = vcmp.eq.s32.totalorder %v6635_v35, 15  ;;  %v821_v55 = vsel %vm725_vm11, 0.0, %v6700_v31 }
  0x82   : > { %vm727_vm13 = vcmp.eq.s32.totalorder %v6684_v13, 15  ;;  %5676 = vmatmul.mubr.msk.bf16.gmra.mxu0 %vm867_vm1, %v718_v61  ;;  %v849_v12 = vpack.c.bf16 %v820_v1, %v819_v25  ;;  %v822_v16 = vsel %vm726_vm12, 0.0, %v6705_v34  ;;  %vm728_vm14 = vcmp.eq.s32.totalorder %v6688_v19, 15  ;;  %v10890_v61 = vld [vmem:[#allocation21_spill] sm:$0xff]  ;;  %v10895_v25 = vld [vmem:[#allocation38_spill] sm:$0xff] }
  0x83   : > { %v823_v28 = vsel %vm727_vm13, 0.0, %v6718_v60  ;;  %5715 = vmatprep.mubr.msk.bf16.mxu0 %vm867_vm1, %v847_v54  ;;  %v850_v37 = vpack.c.bf16 %v822_v16, %v821_v55  ;;  %v824_v35 = vsel %vm728_vm14, 0.0, %v6725_v14  ;;  %vm729_vm15 = vcmp.eq.s32.totalorder %v6695_v26, 15  ;;  %v10896_v1 = vld [vmem:[#allocation53_spill] sm:$0xff]  ;;  %v10897_v55 = vld [vmem:[#allocation56_spill] sm:$0xff] }
  0x84   : > { %5710 = vmatmul.mubr.msk.bf16.gmra.mxu1 %vm867_vm1, %v7003_v9  ;;  %vm730_vm2 = vcmp.eq.s32.totalorder %v6702_v32, 15  ;;  %v851_v38 = vpack.c.bf16 %v824_v35, %v823_v28  ;;  %v825_v39 = vsel %vm729_vm15, 0.0, %v6765_v30  ;;  %vm731_vm3 = vcmp.eq.s32.totalorder %v6746_v44, 15  ;;  %v10878_v30 = vld [vmem:[#allocation44_spill] sm:$0xff]  ;;  %v10899_v16 = vld [vmem:[#allocation49_spill] sm:$0xff] }
  0x85   : > { %5749 = vmatprep.mubr.msk.bf16.mxu1 %vm867_vm1, %v6578_v50  ;;  %v826_v47 = vsel %vm730_vm2, 0.0, %v6769_v36  ;;  %vm732_vm4 = vcmp.eq.s32.totalorder %v6753_v59, 15  ;;  %v827_v13 = vsel %vm731_vm3, 0.0, %v6790_v0  ;;  %vm733_vm5 = vcmp.eq.s32.totalorder %v6759_v20, 15  ;;  %v10877_v59 = vld [vmem:[#allocation41_spill] sm:$0xff]  ;;  %v10881_v0 = vld [vmem:[#allocation51_spill] sm:$0xff] }
  0x86   : > { %v852_v48 = vpack.c.bf16 %v826_v47, %v825_v39  ;;  %v828_v19 = vsel %vm732_vm4, 0.0, %v6792_v18  ;;  %vm734_vm6 = vcmp.eq.s32.totalorder %v6761_v21, 15  ;;  %v829_v50 = vsel %vm733_vm5, 0.0, %v6828_v5  ;;  %v10876_v5 = vld [vmem:[#allocation47_spill] sm:$0xff]  ;;  %v10882_v18 = vld [vmem:[#allocation46_spill] sm:$0xff] }
  0x87   : > { %vm735_vm7 = vcmp.eq.s32.totalorder %v6810_v62, 15  ;;  %v853_v26 = vpack.c.bf16 %v828_v19, %v827_v13  ;;  %v830_v31 = vsel %vm734_vm6, 0.0, %v6832_v56  ;;  %vm736_vm8 = vcmp.eq.s32.totalorder %v6812_v17, 15  ;;  %v10880_v17 = vld [vmem:[#allocation18_spill] sm:$0xff] }
  0x88   : > { %v831_v32 = vsel %vm735_vm7, 0.0, %v6854_v10  ;;  %v854_v34 = vpack.c.bf16 %v830_v31, %v829_v50  ;;  %v832_v60 = vsel %vm736_vm8, 0.0, %v6859_v4  ;;  %vm737_vm9 = vcmp.eq.s32.totalorder %v6824_v3, 15  ;;  %v10879_v10 = vld [vmem:[#allocation45_spill] sm:$0xff]  ;;  %v10883_v56 = vld [vmem:[#allocation58_spill] sm:$0xff]  ;;  %v10884_v3 = vld [vmem:[#allocation19_spill] sm:$0xff] }
  0x89   : > { %vm738_vm0 = vcmp.eq.s32.totalorder %v6830_v8, 15  ;;  %v855_v14 = vpack.c.bf16 %v832_v60, %v831_v32  ;;  %v833_v21 = vsel %vm737_vm9, 0.0, %v6891_v41  ;;  %vm739_vm10 = vcmp.eq.s32.totalorder %v10877_v59, 15  ;;  %v10885_v4 = vld [vmem:[#allocation60_spill] sm:$0xff] }
  0x8a   : > { %v834_v44 = vsel %vm738_vm0, 0.0, %v10876_v5  ;;  %5716 = vmatmul.mubr.msk.bf16.vlgmr.msra.gmra.mxu0 %vm867_vm1, %v848_v49  ;;  %vm740_vm11 = vcmp.eq.s32.totalorder %v10878_v30, 15  ;;  %v835_v36 = vsel %vm739_vm10, 0.0, %v6918_v6  ;;  %vm741_vm12 = vcmp.eq.s32.totalorder %v10879_v10, 15  ;;  %v10889_v49 = vld [vmem:[#allocation17_spill] sm:$0xff]  ;;  %v10909_v59 = vld [vmem:[#allocation8_spill] sm:$0xff] }
  0x8b   : > { %v856_v20 = vpack.c.bf16 %v834_v44, %v833_v21  ;;  %5719 = vmatprep.mubr.msk.bf16.mxu0 %vm867_vm1, %v849_v12  ;;  %v836_v41 = vsel %vm740_vm11, 0.0, %v10881_v0  ;;  %vm742_vm13 = vcmp.eq.s32.totalorder %v10882_v18, 15  ;;  %v837_v62 = vsel %vm741_vm12, 0.0, %v10883_v56  ;;  %v10898_v12 = vld [vmem:[#allocation43_spill] sm:$0xff] }
  0x8c   : > { %5750 = vmatmul.mubr.msk.bf16.vlgmr.msra.gmra.mxu1 %vm867_vm1, %v10880_v17  ;;  %v857_v8 = vpack.c.bf16 %v836_v41, %v835_v36  ;;  %v838_v42 = vsel %vm742_vm13, 0.0, %v10885_v4  ;;  %vm745_vm14 = vcmp.eq.s32.totalorder %v10886_v7, 15  ;;  %vm746_vm15 = vcmp.eq.s32.totalorder %v10887_v15, 15  ;;  %v10913_v4 = vld [vmem:[#allocation11_spill] sm:$0xff] }
  0x8d   : > { %5753 = vmatprep.mubr.msk.bf16.mxu1 %vm867_vm1, %v10884_v3  ;;  %v858_v6 = vpack.c.bf16 %v838_v42, %v837_v62  ;;  %v841_v22 = vsel %vm745_vm14, 0.0, %v7026_v46  ;;  %v842_v45 = vsel %vm746_vm15, 0.0, %v7032_v40  ;;  %vm749_vm2 = vcmp.eq.s32.totalorder %v7023_v43, 15  ;;  %v10891_v46 = vld [vmem:[#allocation25_spill] sm:$0xff]  ;;  %v10892_v40 = vld [vmem:[#allocation30_spill] sm:$0xff]  ;;  %v10894_v43 = vld [vmem:[#allocation35_spill] sm:$0xff] }
  0x8e   : > { %v860_v23 = vpack.c.bf16 %v842_v45, %v841_v22  ;;  %vm750_vm3 = vcmp.eq.s32.totalorder %v7028_v58, 15  ;;  %v845_v24 = vsel %vm749_vm2, 0.0, %v10888_v53  ;;  %v10893_v58 = vld [vmem:[#allocation31_spill] sm:$0xff]  ;;  %vm743_vm4 = vcmp.eq.s32.totalorder %v10896_v1, 15 }
  0x8f   : > { %v846_v11 = vsel %vm750_vm3, 0.0, %v10889_v49  ;;  %vm744_vm5 = vcmp.eq.s32.totalorder %v10897_v55, 15  ;;  %v839_v28 = vsel %vm743_vm4, 0.0, %v6983_v2  ;;  %vm747_vm6 = vcmp.eq.s32.totalorder %v6995_v29, 15  ;;  %v10901_v29 = vld [vmem:[#allocation65_spill] sm:$0xff] }
  0x90   : > { %v862_v54 = vpack.c.bf16 %v846_v11, %v845_v24  ;;  %vm748_vm7 = vcmp.eq.s32.totalorder %v7009_v63, 15  ;;  %v843_v39 = vsel %vm747_vm6, 0.0, %v6580_v51  ;;  %vm2217_vm8 = vcmp.lt.s32.totalorder %v10909_v59, 7  ;;  %v10917_v11 = vld [vmem:[#allocation13_spill] sm:$0xff] }
  0x91   : > { %v844_v2 = vsel %vm748_vm7, 0.0, %v6582_v52  ;;  %v466_v42 = vand.u32 15, %v10913_v4 }
  0x92   : > { %5720 = vmatmul.mubr.msk.bf16.gmra.mxu0 %vm867_vm1, %v850_v37  ;;  %v840_v37 = vsel %vm744_vm5, 0.0, %v6988_v33  ;;  %v861_v33 = vpack.c.bf16 %v844_v2, %v843_v39 }
  0x93   : > { %5723 = vmatprep.mubr.msk.bf16.mxu0 %vm867_vm1, %v851_v38  ;;  %v859_v35 = vpack.c.bf16 %v840_v37, %v839_v28  ;;  %v10900_v38 = vld [vmem:[#allocation55_spill] sm:$0xff]  ;;  %vm7214_vm9 = vcmp.eq.s32.totalorder %v466_v42, 15 }
  0x94   : > { %5754 = vmatmul.mubr.msk.bf16.gmra.mxu1 %vm867_vm1, %v10890_v61 }
  0x95   : > { %5757 = vmatprep.mubr.msk.bf16.mxu1 %vm867_vm1, %v10891_v46 }
  0x9a   : > { %5724 = vmatmul.mubr.msk.bf16.gmra.mxu0 %vm867_vm1, %v852_v48 }
  0x9b   : > { %5727 = vmatprep.mubr.msk.bf16.mxu0 %vm867_vm1, %v853_v26 }
  0x9c   : > { %5758 = vmatmul.mubr.msk.bf16.gmra.mxu1 %vm867_vm1, %v10892_v40 }
  0x9d   : > { %5761 = vmatprep.mubr.msk.bf16.mxu1 %vm867_vm1, %v10893_v58 }
  0xa2   : > { %5728 = vmatmul.mubr.msk.bf16.gmra.mxu0 %vm867_vm1, %v854_v34 }
  0xa3   : > { %5731 = vmatprep.mubr.msk.bf16.mxu0 %vm867_vm1, %v855_v14 }
  0xa4   : > { %5762 = vmatmul.mubr.msk.bf16.gmra.mxu1 %vm867_vm1, %v10894_v43 }
  0xa5   : > { %5765 = vmatprep.mubr.msk.bf16.mxu1 %vm867_vm1, %v10895_v25 }
  0xaa   : > { %5732 = vmatmul.mubr.msk.bf16.gmra.mxu0 %vm867_vm1, %v856_v20 }
  0xab   : > { %5735 = vmatprep.mubr.msk.bf16.mxu0 %vm867_vm1, %v857_v8 }
  0xac   : > { %5766 = vmatmul.mubr.msk.bf16.gmra.mxu1 %vm867_vm1, %v10898_v12 }
  0xad   : > { %5769 = vmatprep.mubr.msk.bf16.mxu1 %vm867_vm1, %v10899_v16 }
  0xb2   : > { %5736 = vmatmul.mubr.msk.bf16.gmra.mxu0 %vm867_vm1, %v858_v6 }
  0xb3   : > { %5739 = vmatprep.mubr.msk.bf16.mxu0 %vm867_vm1, %v859_v35 }
  0xb4   : > { %5770 = vmatmul.mubr.msk.bf16.gmra.mxu1 %vm867_vm1, %v10900_v38 }
  0xb5   : > { %5773 = vmatprep.mubr.msk.bf16.mxu1 %vm867_vm1, %v6976_v57 }
  0xba   : > { %5740 = vmatmul.mubr.msk.bf16.gmra.mxu0 %vm867_vm1, %v860_v23 }
  0xbb   : > { %5743 = vmatprep.mubr.msk.bf16.mxu0 %vm867_vm1, %v861_v33 }
  0xbc   : > { %5774 = vmatmul.mubr.msk.bf16.gmra.mxu1 %vm867_vm1, %v10901_v29 }
  0xbd   : > { %5777 = vmatprep.mubr.msk.bf16.mxu1 %vm867_vm1, %v7048_v27 }
  0xc2   : > { %5744 = vmatmul.mubr.msk.bf16.gmra.mxu0 %vm867_vm1, %v862_v54  ;;  %v468_v54 = vand.u32 15, %v10917_v11 }
  0xc4   : > { %5778 = vmatmul.mubr.msk.bf16.gmra.mxu1 %vm867_vm1, %v7003_v9  ;;  %v10905_v9 = vld [vmem:[#allocation9_spill] sm:$0xff]  ;;  %vm7232_vm0 = vcmp.eq.s32.totalorder %v468_v54, 15 }
  0xc5   : > { %v464_v26 = vand.u32 15, %v10905_v9 }
  0xc7   : > { %vm7180_vm1 = vcmp.eq.s32.totalorder %v464_v26, 15 }
  0xfd   : > { %v5683_v57 = vpop.f32.mrf.mxu1 }
  0xfe   : > { %v5649_v51 = vpop.f32.mrf.mxu0 }
  0xff   : > { %v7162_v63 = vadd.f32 %v5683_v57, %v5649_v51  ;;  %v1166_v52 = vpop.f32.mrf.mxu1 }
 0x100   : > { %v954_v47 = vpop.f32.mrf.mxu0 }
 0x101   : > { %10902 = vst [vmem:[#allocation47_spill] sm:$0xff] %v7162_v63  ;;  %v7164_v48 = vadd.f32 %v1166_v52, %v954_v47  ;;  %1740 = vrot.lane.b32.xlu1 %v7162_v63, %s6406_s23  ;;  %v5684_v13 = vpop.f32.mrf.mxu1  ;;  %v2187_v44 = vrot.slane %v7162_v63, 1  ;;  %v10923_v47 = vld [vmem:[#allocation15_spill] sm:$0xff] }
 0x102   : > { %v5650_v19 = vpop.f32.mrf.mxu0 }
 0x103   : > { %10903 = vst [vmem:[#allocation41_spill] sm:$0xff] %v7164_v48  ;;  %v7168_v27 = vadd.f32 %v5684_v13, %v5650_v19  ;;  %v1169_v50 = vpop.f32.mrf.mxu1  ;;  %1736 = vrot.lane.b32.xlu0 %v7164_v48, %s6406_s23  ;;  %v10617_v22 = vrot.slane %v7164_v48, 1  ;;  %v470_v13 = vand.u32 15, %v10923_v47 }
 0x104   : > { %v957_v31 = vpop.f32.mrf.mxu0 }
 0x105   : > { %10904 = vst [vmem:[#allocation44_spill] sm:$0xff] %v7168_v27  ;;  %v7173_v32 = vadd.f32 %v1169_v50, %v957_v31  ;;  %1742 = vrot.lane.b32.xlu1 %v7168_v27, %s6406_s23  ;;  %v2188_v60 = vrot.slane %v7168_v27, 1  ;;  %vm7260_vm10 = vcmp.eq.s32.totalorder %v470_v13, 15 }
 0x106   : > { %v5687_v34 = vpop.f32.mrf.mxu1 }
 0x107   : > { %10906 = vst [vmem:[#allocation45_spill] sm:$0xff] %v7173_v32  ;;  %v5653_v14 = vpop.f32.mrf.mxu0  ;;  %1738 = vrot.lane.b32.xlu0 %v7173_v32, %s6406_s23  ;;  %v2186_v5 = vrot.slane %v7173_v32, 1  ;;  %v2246_v0 = vsel %vm2217_vm8, %v2187_v44, %v2188_v60 }
 0x108   : > { %v1182_v20 = vpop.f32.mrf.mxu1  ;;  %v7193_v41 = vadd.f32 %v5687_v34, %v5653_v14 }
 0x109   : > { %v970_v30 = vpop.f32.mrf.mxu0  ;;  %v2247_v36 = vsel %vm2217_vm8, %v2186_v5, %v2187_v44  ;;  %v2248_v53 = vsel %vm2217_vm8, %v10617_v22, %v2186_v5  ;;  %v10927_v5 = vld [vmem:[#allocation22_spill] sm:$0xff] }
 0x10a   : > { %v5688_v10 = vpop.f32.mrf.mxu1  ;;  %v2315_v17 = vsel %vm7180_vm1, 0.0, %v2247_v36  ;;  %10910 = vst [vmem:[#allocation18_spill] sm:$0xff] %v7193_v41  ;;  %v7195_v18 = vadd.f32 %v1182_v20, %v970_v30  ;;  %v2191_v46 = vrot.slane %v7193_v41, 1  ;;  %v472_v44 = vand.u32 15, %v10927_v5 }
 0x10b   : > { %v5654_v56 = vpop.f32.mrf.mxu0  ;;  %2380 = vrot.lane.b32.xlu1 %v2315_v17, %s6404_s21  ;;  %2382 = vrot.lane.b32.xlu0 %v2246_v0, %s6404_s21 }
 0x10c   : > { %10911 = vst [vmem:[#allocation51_spill] sm:$0xff] %v7195_v18  ;;  %v7199_v62 = vadd.f32 %v5688_v10, %v5654_v56  ;;  %v1185_v3 = vpop.f32.mrf.mxu1  ;;  %v2189_v7 = vrot.slane %v7195_v18, 1  ;;  %vm7278_vm11 = vcmp.eq.s32.totalorder %v472_v44, 15 }
 0x10d   : > { %v973_v8 = vpop.f32.mrf.mxu0 }
 0x10e   : > { %10912 = vst [vmem:[#allocation46_spill] sm:$0xff] %v7199_v62  ;;  %v7202_v6 = vadd.f32 %v1185_v3, %v973_v8  ;;  %v2245_v49 = vsel %vm2217_vm8, %v2188_v60, %v2189_v7  ;;  %v2192_v55 = vrot.slane %v7199_v62, 1 }
 0x10f   : > { %1750 = vrot.lane.b32.xlu1 %v7199_v62, %s6406_s23  ;;  %1748 = vrot.lane.b32.xlu0 %v7193_v41, %s6406_s23  ;;  %v2317_v1 = vsel %vm7214_vm9, 0.0, %v2245_v49  ;;  %v10972_v41 = vld [vmem:[#allocation50_spill] sm:$0xff] }
 0x110   : > { %10914 = vst [vmem:[#allocation58_spill] sm:$0xff] %v7202_v6  ;;  %v5657_v15 = vpop.f32.mrf.mxu0  ;;  %v2190_v61 = vrot.slane %v7202_v6, 1  ;;  %v2242_v38 = vsel %vm2217_vm8, %v2191_v46, %v2192_v55 }
 0x112   : > { %v5691_v45 = vpop.f32.mrf.mxu1  ;;  %v986_v23 = vpop.f32.mrf.mxu0  ;;  %v2243_v16 = vsel %vm2217_vm8, %v2190_v61, %v2191_v46  ;;  %v2244_v31 = vsel %vm2217_vm8, %v2189_v7, %v2190_v61  ;;  %v10933_v46 = vld [vmem:[#allocation24_spill] sm:$0xff] }
 0x113   : > { %1746 = vrot.lane.b32.xlu1 %v7202_v6, %s6406_s23  ;;  %2378 = vrot.lane.b32.xlu0 %v2248_v53, %s6404_s21  ;;  %v2319_v35 = vsel %vm7232_vm0, 0.0, %v2243_v16  ;;  %v7242_v39 = vadd.f32 %v5691_v45, %v5657_v15  ;;  %v488_v6 = vand.u32 15, %v10972_v41  ;;  %v10973_v41 = vmov 0 }
 0x114   : > { %v1198_v40 = vpop.f32.mrf.mxu1  ;;  %v5658_v58 = vpop.f32.mrf.mxu0 }
 0x115   : > { %10920 = vst [vmem:[#allocation19_spill] sm:$0xff] %v7242_v39  ;;  %v7244_v2 = vadd.f32 %v1198_v40, %v986_v23  ;;  %v2195_v30 = vrot.slane %v7242_v39, 1  ;;  %v474_v40 = vand.u32 15, %v10933_v46  ;;  %v10943_v46 = vld [vmem:[#allocation29_spill] sm:$0xff]  ;;  %vm7577_vm5 = vcmp.eq.s32.totalorder %v488_v6, 15 }
 0x116   : > { %v5692_v43 = vpop.f32.mrf.mxu1  ;;  %v989_v25 = vpop.f32.mrf.mxu0  ;;  %v10974_v41 = vsel %vm7577_vm5, 4294967295, %v10973_v41 }
 0x117   : > { %2384 = vrot.lane.b32.xlu1 %v2317_v1, %s6404_s21  ;;  %1744 = vrot.lane.b32.xlu0 %v7195_v18, %s6406_s23  ;;  %10921 = vst [vmem:[#allocation60_spill] sm:$0xff] %v7244_v2  ;;  %v7246_v33 = vadd.f32 %v5692_v43, %v5658_v58  ;;  %v2193_v50 = vrot.slane %v7244_v2, 1  ;;  %vm7314_vm12 = vcmp.eq.s32.totalorder %v474_v40, 15  ;;  %v478_v40 = vand.u32 15, %v10943_v46 }
 0x118   : > { %v1201_v28 = vpop.f32.mrf.mxu1 }
 0x119   : > { %10922 = vst [vmem:[#allocation57_spill] sm:$0xff] %v7246_v33  ;;  %v7251_v19 = vadd.f32 %v1201_v28, %v989_v25  ;;  %v2241_v14 = vsel %vm2217_vm8, %v2192_v55, %v2193_v50  ;;  %v2196_v0 = vrot.slane %v7246_v33, 1  ;;  %vm7380_vm14 = vcmp.eq.s32.totalorder %v478_v40, 15 }
 0x11a   : > { %v5661_v37 = vpop.f32.mrf.mxu0  ;;  %v2321_v17 = vsel %vm7260_vm10, 0.0, %v2241_v14 }
 0x11b   : > { %2388 = vrot.lane.b32.xlu1 %v2319_v35, %s6404_s21  ;;  %2390 = vrot.lane.b32.xlu0 %v2242_v38, %s6404_s21  ;;  %10924 = vst [vmem:[#allocation59_spill] sm:$0xff] %v7251_v19  ;;  %v2194_v20 = vrot.slane %v7251_v19, 1  ;;  %v2238_v45 = vsel %vm2217_vm8, %v2195_v30, %v2196_v0  ;;  %v10937_v38 = vld [vmem:[#allocation27_spill] sm:$0xff] }
 0x11c   : > { %v5695_v29 = vpop.f32.mrf.mxu1  ;;  %v1002_v57 = vpop.f32.mrf.mxu0  ;;  %10975 = vst [vmem:[#allocation27_spill] sm:$0xff] %v10974_v41 }
 0x11d   : > { %v2239_v8 = vsel %vm2217_vm8, %v2194_v20, %v2195_v30  ;;  %v7288_v23 = vadd.f32 %v5695_v29, %v5661_v37  ;;  %v2240_v16 = vsel %vm2217_vm8, %v2193_v50, %v2194_v20  ;;  %v476_v29 = vand.u32 15, %v10937_v38 }
 0x11e   : > { %v1214_v51 = vpop.f32.mrf.mxu1  ;;  %v5662_v52 = vpop.f32.mrf.mxu0  ;;  %v2323_v15 = vsel %vm7278_vm11, 0.0, %v2239_v8 }
 0x11f   : > { %1758 = vrot.lane.b32.xlu1 %v7246_v33, %s6406_s23  ;;  %1756 = vrot.lane.b32.xlu0 %v7242_v39, %s6406_s23  ;;  %10930 = vst [vmem:[#allocation16_spill] sm:$0xff] %v7288_v23  ;;  %v7290_v53 = vadd.f32 %v1214_v51, %v1002_v57  ;;  %v2199_v51 = vrot.slane %v7288_v23, 1  ;;  %vm7334_vm13 = vcmp.eq.s32.totalorder %v476_v29, 15 }
 0x120   : > { %v5696_v9 = vpop.f32.mrf.mxu1  ;;  %v1005_v26 = vpop.f32.mrf.mxu0 }
 0x121   : > { %10931 = vst [vmem:[#allocation17_spill] sm:$0xff] %v7290_v53  ;;  %v7292_v49 = vadd.f32 %v5696_v9, %v5662_v52  ;;  %v2197_v43 = vrot.slane %v7290_v53, 1 }
 0x122   : > { %v1217_v60 = vpop.f32.mrf.mxu1 }
 0x123   : > { %1754 = vrot.lane.b32.xlu1 %v7251_v19, %s6406_s23  ;;  %2386 = vrot.lane.b32.xlu0 %v2244_v31, %s6404_s21  ;;  %10932 = vst [vmem:[#allocation21_spill] sm:$0xff] %v7292_v49  ;;  %v7299_v58 = vadd.f32 %v1217_v60, %v1005_v26  ;;  %v2237_v35 = vsel %vm2217_vm8, %v2196_v0, %v2197_v43  ;;  %v2200_v50 = vrot.slane %v7292_v49, 1 }
 0x124   : > { %v5665_v36 = vpop.f32.mrf.mxu0  ;;  %v2325_v13 = vsel %vm7314_vm12, 0.0, %v2237_v35  ;;  %v10948_v35 = vld [vmem:[#allocation33_spill] sm:$0xff] }
 0x125   : > { %10934 = vst [vmem:[#allocation25_spill] sm:$0xff] %v7299_v58  ;;  %v2198_v57 = vrot.slane %v7299_v58, 1  ;;  %v2234_v44 = vsel %vm2217_vm8, %v2199_v51, %v2200_v50  ;;  %v480_v38 = vand.u32 15, %v10948_v35 }
 0x126   : > { %v1018_v10 = vpop.f32.mrf.mxu0  ;;  %v5699_v56 = vpop.f32.mrf.mxu1 }
 0x127   : > { %2392 = vrot.lane.b32.xlu1 %v2321_v17, %s6404_s21  ;;  %1752 = vrot.lane.b32.xlu0 %v7244_v2, %s6406_s23  ;;  %v2235_v31 = vsel %vm2217_vm8, %v2198_v57, %v2199_v51  ;;  %v7348_v20 = vadd.f32 %v5699_v56, %v5665_v36  ;;  %vm7408_vm15 = vcmp.eq.s32.totalorder %v480_v38, 15 }
 0x128   : > { %v5666_v4 = vpop.f32.mrf.mxu0  ;;  %v1230_v42 = vpop.f32.mrf.mxu1  ;;  %v2327_v5 = vsel %vm7334_vm13, 0.0, %v2235_v31 }
 0x129   : > { %10940 = vst [vmem:[#allocation30_spill] sm:$0xff] %v7348_v20  ;;  %v7350_v30 = vadd.f32 %v1230_v42, %v1018_v10 }
 0x12a   : > { %v1021_v7 = vpop.f32.mrf.mxu0  ;;  %v5700_v11 = vpop.f32.mrf.mxu1 }
 0x12b   : > { %2396 = vrot.lane.b32.xlu1 %v2323_v15, %s6404_s21  ;;  %2398 = vrot.lane.b32.xlu0 %v2238_v45, %s6404_s21  ;;  %10941 = vst [vmem:[#allocation31_spill] sm:$0xff] %v7350_v30  ;;  %v7352_v17 = vadd.f32 %v5700_v11, %v5666_v4  ;;  %v2201_v56 = vrot.slane %v7350_v30, 1  ;;  %v2236_v11 = vsel %vm2217_vm8, %v2197_v43, %v2198_v57  ;;  %v2203_v43 = vrot.slane %v7348_v20, 1 }
 0x12c   : > { %v1233_v54 = vpop.f32.mrf.mxu1 }
 0x12d   : > { %10942 = vst [vmem:[#allocation35_spill] sm:$0xff] %v7352_v17  ;;  %v7365_v36 = vadd.f32 %v1233_v54, %v1021_v7  ;;  %v10945_v7 = vmov 0 }
 0x12e   : > { %v7296_v61 = vpop.f32.mrf.mxu0  ;;  %v10946_v7 = vsel %vm7380_vm14, 4294967295, %v10945_v7 }
 0x12f   : > { %1766 = vrot.lane.b32.xlu1 %v7292_v49, %s6406_s23  ;;  %1764 = vrot.lane.b32.xlu0 %v7288_v23, %s6406_s23  ;;  %10944 = vst [vmem:[#allocation38_spill] sm:$0xff] %v7365_v36  ;;  %10947 = vst [vmem:[#allocation53_spill] sm:$0xff] %v10946_v7  ;;  %v2202_v29 = vrot.slane %v7365_v36, 1  ;;  %v10960_v49 = vld [vmem:[#allocation39_spill] sm:$0xff] }
 0x130   : > { %v7306_v25 = vpop.f32.mrf.mxu0  ;;  %v7308_v1 = vpop.f32.mrf.mxu1 }
 0x131   : > { %v2231_v46 = vsel %vm2217_vm8, %v2202_v29, %v2203_v43  ;;  %v7426_v38 = vadd.f32 %v7308_v1, %v7296_v61  ;;  %v10955_v61 = vld [vmem:[#allocation36_spill] sm:$0xff] }
 0x132   : > { %v7310_v55 = vpop.f32.mrf.mxu0  ;;  %v1246_v37 = vpop.f32.mrf.mxu1  ;;  %v2331_v35 = vsel %vm7408_vm15, 0.0, %v2231_v46  ;;  %v482_v1 = vand.u32 15, %v10955_v61 }
 0x133   : > { %1762 = vrot.lane.b32.xlu1 %v7299_v58, %s6406_s23  ;;  %2394 = vrot.lane.b32.xlu0 %v2240_v16, %s6404_s21  ;;  %v2233_v16 = vsel %vm2217_vm8, %v2200_v50, %v2201_v56  ;;  %v10949_v50 = vmov 0  ;;  %10952 = vst [vmem:[#allocation43_spill] sm:$0xff] %v7426_v38  ;;  %v7429_v22 = vadd.f32 %v1246_v37, %v7306_v25 }
 0x134   : > { %v7326_v52 = vpop.f32.mrf.mxu0  ;;  %v5704_v47 = vpop.f32.mrf.mxu1  ;;  %v2329_v31 = vsel %vm7380_vm14, 0.0, %v2233_v16  ;;  %v10950_v50 = vsel %vm7408_vm15, 4294967295, %v10949_v50  ;;  %vm7463_vm2 = vcmp.eq.s32.totalorder %v482_v1, 15 }
 0x135   : > { %10951 = vst [vmem:[#allocation56_spill] sm:$0xff] %v10950_v50  ;;  %10953 = vst [vmem:[#allocation49_spill] sm:$0xff] %v7429_v22 }
 0x136   : > { %v1249_v9 = vpop.f32.mrf.mxu1 }
 0x137   : > { %2400 = vrot.lane.b32.xlu1 %v2325_v13, %s6404_s21  ;;  %1760 = vrot.lane.b32.xlu0 %v7290_v53, %s6406_s23  ;;  %v7446_v25 = vadd.f32 %v1249_v9, %v7326_v52  ;;  %v2232_v52 = vsel %vm2217_vm8, %v2201_v56, %v2202_v29  ;;  %v10957_v9 = vmov 0  ;;  %v484_v53 = vand.u32 15, %v10960_v49 }
 0x138   : > { %v7340_v60 = vpop.f32.mrf.mxu0  ;;  %v10958_v9 = vsel %vm7463_vm2, 4294967295, %v10957_v9  ;;  %v2207_v56 = vrot.slane %v7426_v38, 1  ;;  %v10961_v49 = vmov 0 }
 0x139   : > { %10956 = vst [vmem:[#allocation65_spill] sm:$0xff] %v7446_v25  ;;  %10959 = vst [vmem:[#allocation9_spill] sm:$0xff] %v10958_v9  ;;  %v2206_v23 = vrot.slane %v7446_v25, 1  ;;  %vm7491_vm3 = vcmp.eq.s32.totalorder %v484_v53, 15 }
 0x13a   : > { %v7342_v14 = vpop.f32.mrf.mxu0  ;;  %v10962_v49 = vsel %vm7491_vm3, 4294967295, %v10961_v49 }
 0x13b   : > { %2404 = vrot.lane.b32.xlu1 %v2327_v5, %s6404_s21  ;;  %2406 = vrot.lane.b32.xlu0 %v2234_v44, %s6404_s21  ;;  %v2204_v5 = vrot.slane %v7352_v17, 1  ;;  %10963 = vst [vmem:[#allocation8_spill] sm:$0xff] %v10962_v49 }
 0x13c   : > { %v7354_v0 = vpop.f32.mrf.mxu1  ;;  %v7358_v8 = vpop.f32.mrf.mxu0 }
 0x13d   : > { %v7509_v53 = vadd.f32 %v7354_v0, %v7340_v60  ;;  %v10967_v0 = vld [vmem:[#allocation42_spill] sm:$0xff] }
 0x13e   : > { %v7360_v15 = vpop.f32.mrf.mxu1  ;;  %v7362_v45 = vpop.f32.mrf.mxu0  ;;  %v486_v62 = vand.u32 15, %v10967_v0 }
 0x13f   : > { %1774 = vrot.lane.b32.xlu1 %v7352_v17, %s6406_s23  ;;  %1772 = vrot.lane.b32.xlu0 %v7348_v20, %s6406_s23  ;;  %v7432_v17 = vadd.f32 %v5704_v47, %v7310_v55  ;;  %v2205_v55 = vrot.slane %v7429_v22, 1  ;;  %10964 = vst [vmem:[#allocation11_spill] sm:$0xff] %v7509_v53 }
 0x140   : > { %v7367_v10 = vpop.f32.mrf.mxu1  ;;  %vm7549_vm4 = vcmp.eq.s32.totalorder %v486_v62, 15 }
 0x141   : > { %10954 = vst [vmem:[#allocation55_spill] sm:$0xff] %v7432_v17  ;;  %v2229_v20 = vsel %vm2217_vm8, %v2204_v5, %v2205_v55  ;;  %v7517_v39 = vadd.f32 %v7367_v10, %v7358_v8 }
 0x142   : > { %v7374_v4 = vpop.f32.mrf.mxu1  ;;  %v7376_v42 = vpop.f32.mrf.mxu0  ;;  %v2333_v33 = vsel %vm7463_vm2, 0.0, %v2229_v20 }
 0x143   : > { %1770 = vrot.lane.b32.xlu1 %v7365_v36, %s6406_s23  ;;  %2402 = vrot.lane.b32.xlu0 %v2236_v11, %s6404_s21  ;;  %10966 = vst [vmem:[#allocation15_spill] sm:$0xff] %v7517_v39 }
 0x144   : > { %v7384_v54 = vpop.f32.mrf.mxu1  ;;  %v7394_v57 = vpop.f32.mrf.mxu0 }
 0x145   : > { %v7595_v6 = vadd.f32 %v7384_v54, %v7376_v42  ;;  %v7613_v42 = vpop.permute.xlu1 %3187 }
 0x146   : > { %v7396_v51 = vpop.f32.mrf.mxu1  ;;  %v7398_v13 = vpop.f32.mrf.mxu0  ;;  %10979 = vst [vmem:[#allocation39_spill] sm:$0xff] %v7613_v42 }
 0x147   : > { %2408 = vrot.lane.b32.xlu1 %v2329_v31, %s6404_s21  ;;  %1768 = vrot.lane.b32.xlu0 %v7350_v30, %s6406_s23  ;;  %v2230_v31 = vsel %vm2217_vm8, %v2203_v43, %v2204_v5  ;;  %v2227_v5 = vsel %vm2217_vm8, %v2206_v23, %v2207_v56  ;;  %10976 = vst [vmem:[#allocation29_spill] sm:$0xff] %v7595_v6 }
 0x148   : > { %v7403_v44 = vpop.f32.mrf.mxu1  ;;  %v7414_v40 = vpop.f32.mrf.mxu0 }
 0x14a   : > { %v7416_v11 = vpop.f32.mrf.mxu1  ;;  %v7418_v16 = vpop.f32.mrf.mxu0 }
 0x14b   : > { %2412 = vrot.lane.b32.xlu1 %v2331_v35, %s6404_s21  ;;  %2414 = vrot.lane.b32.xlu0 %v2230_v31, %s6404_s21  ;;  %v7631_v41 = vadd.f32 %v7416_v11, %v7414_v40  ;;  %v10992_v11 = vld [vmem:[#allocation64_spill] sm:$0xff] }
 0x14c   : > { %v7434_v30 = vpop.f32.mrf.mxu1  ;;  %v7438_v46 = vpop.f32.mrf.mxu0 }
 0x14d   : > { %10984 = vst [vmem:[#allocation66_spill] sm:$0xff] %v7631_v41 }
 0x14e   : > { %v7440_v36 = vpop.f32.mrf.mxu1  ;;  %v7442_v43 = vpop.f32.mrf.mxu0 }
 0x14f   : > { %1782 = vrot.lane.b32.xlu1 %v7432_v17, %s6406_s23  ;;  %1780 = vrot.lane.b32.xlu0 %v7426_v38, %s6406_s23 }
 0x150   : > { %v7448_v37 = vpop.f32.mrf.mxu1  ;;  %v7455_v47 = vpop.f32.mrf.mxu0 }
 0x152   : > { %v7457_v35 = vpop.f32.mrf.mxu1  ;;  %v7459_v31 = vpop.f32.mrf.mxu0 }
 0x153   : > { %1778 = vrot.lane.b32.xlu1 %v7446_v25, %s6406_s23  ;;  %2410 = vrot.lane.b32.xlu0 %v2232_v52, %s6404_s21  ;;  %v2208_v52 = vrot.slane %v7432_v17, 1  ;;  %v2335_v17 = vsel %vm7491_vm3, 0.0, %v2227_v5 }
 0x154   : > { %v7467_v61 = vpop.f32.mrf.mxu1  ;;  %v7477_v29 = vpop.f32.mrf.mxu0 }
 0x156   : > { %v7479_v1 = vpop.f32.mrf.mxu1  ;;  %v7481_v58 = vpop.f32.mrf.mxu0 }
 0x157   : > { %2416 = vrot.lane.b32.xlu1 %v2333_v33, %s6404_s21  ;;  %1776 = vrot.lane.b32.xlu0 %v7429_v22, %s6406_s23  ;;  %v2226_v33 = vsel %vm2217_vm8, %v2207_v56, %v2208_v52  ;;  %v7513_v22 = vadd.f32 %v7360_v15, %v7342_v14  ;;  %v7532_v14 = vadd.f32 %v7374_v4, %v7362_v45  ;;  %v10969_v4 = vmov 0 }
 0x158   : > { %v7486_v2 = vpop.f32.mrf.mxu1  ;;  %v7497_v38 = vpop.f32.mrf.mxu0  ;;  %v2228_v45 = vsel %vm2217_vm8, %v2205_v55, %v2206_v23  ;;  %v10970_v4 = vsel %vm7549_vm4, 4294967295, %v10969_v4  ;;  %v2211_v23 = vrot.slane %v7509_v53, 1 }
 0x159   : > { %10965 = vst [vmem:[#allocation13_spill] sm:$0xff] %v7513_v22  ;;  %10968 = vst [vmem:[#allocation22_spill] sm:$0xff] %v7532_v14  ;;  %v2210_v27 = vrot.slane %v7532_v14, 1 }
 0x15a   : > { %v7499_v25 = vpop.f32.mrf.mxu1  ;;  %v7501_v20 = vpop.f32.mrf.mxu0  ;;  %10971 = vst [vmem:[#allocation24_spill] sm:$0xff] %v10970_v4 }
 0x15b   : > { %2420 = vrot.lane.b32.xlu1 %v2335_v17, %s6404_s21  ;;  %2422 = vrot.lane.b32.xlu0 %v2226_v33, %s6404_s21  ;;  %v2209_v17 = vrot.slane %v7513_v22, 1 }
 0x15c   : > { %v7519_v19 = vpop.f32.mrf.mxu1  ;;  %v7523_v5 = vpop.f32.mrf.mxu0 }
 0x15d   : > { %v2225_v18 = vsel %vm2217_vm8, %v2208_v52, %v2209_v17  ;;  %v2223_v52 = vsel %vm2217_vm8, %v2210_v27, %v2211_v23  ;;  %v2224_v7 = vsel %vm2217_vm8, %v2209_v17, %v2210_v27 }
 0x15e   : > { %v7525_v56 = vpop.f32.mrf.mxu1  ;;  %v7527_v60 = vpop.f32.mrf.mxu0  ;;  %v2337_v32 = vsel %vm7549_vm4, 0.0, %v2225_v18 }
 0x15f   : > { %1790 = vrot.lane.b32.xlu1 %v7517_v39, %s6406_s23  ;;  %1788 = vrot.lane.b32.xlu0 %v7509_v53, %s6406_s23 }
 0x160   : > { %v7534_v8 = vpop.f32.mrf.mxu1  ;;  %v7541_v15 = vpop.f32.mrf.mxu0 }
 0x162   : > { %v7543_v10 = vpop.f32.mrf.mxu1  ;;  %v7545_v33 = vpop.f32.mrf.mxu0 }
 0x163   : > { %1786 = vrot.lane.b32.xlu1 %v7532_v14, %s6406_s23  ;;  %2418 = vrot.lane.b32.xlu0 %v2228_v45, %s6404_s21  ;;  %v2212_v45 = vrot.slane %v7517_v39, 1  ;;  %v2339_v39 = vsel %vm7577_vm5, 0.0, %v2223_v52  ;;  %v7609_v52 = vadd.f32 %v7403_v44, %v7398_v13 }
 0x164   : > { %v7553_v0 = vpop.f32.mrf.mxu1  ;;  %v7563_v62 = vpop.f32.mrf.mxu0 }
 0x165   : > { %10978 = vst [vmem:[#allocation36_spill] sm:$0xff] %v7609_v52  ;;  %v2216_v27 = vrot.slane %v7609_v52, 1 }
 0x166   : > { %v7565_v55 = vpop.f32.mrf.mxu1  ;;  %v7567_v63 = vpop.f32.mrf.mxu0 }
 0x167   : > { %2424 = vrot.lane.b32.xlu1 %v2337_v32, %s6404_s21  ;;  %1784 = vrot.lane.b32.xlu0 %v7513_v22, %s6406_s23  ;;  %v2222_v32 = vsel %vm2217_vm8, %v2211_v23, %v2212_v45  ;;  %v7599_v22 = vadd.f32 %v7396_v51, %v7394_v57  ;;  %v10982_v51 = vld [vmem:[#allocation54_spill] sm:$0xff] }
 0x168   : > { %v7572_v49 = vpop.f32.mrf.mxu1  ;;  %v7583_v53 = vpop.f32.mrf.mxu0 }
 0x169   : > { %10977 = vst [vmem:[#allocation33_spill] sm:$0xff] %v7599_v22  ;;  %v2213_v13 = vrot.slane %v7599_v22, 1 }
 0x16a   : > { %v7585_v14 = vpop.f32.mrf.mxu1  ;;  %v7587_v18 = vpop.f32.mrf.mxu0 }
 0x16b   : > { %2428 = vrot.lane.b32.xlu1 %v2339_v39, %s6404_s21  ;;  %2430 = vrot.lane.b32.xlu0 %v2222_v32, %s6404_s21  ;;  %v7623_v39 = vpop.permute.xlu0 %3152  ;;  %v490_v32 = vand.u32 15, %v10982_v51  ;;  %v10989_v51 = vmov 0  ;;  %v2221_v40 = vsel %vm2217_vm8, %v2212_v45, %v2213_v13  ;;  %v11128_v45 = vld [vmem:[#allocation20_spill] sm:$0xff] }
 0x16c   : > { %v7601_v4 = vpop.f32.mrf.mxu1  ;;  %v7605_v9 = vpop.f32.mrf.mxu0  ;;  %10981 = vst [vmem:[#allocation50_spill] sm:$0xff] %v7623_v39 }
 0x16d   : > { %vm7646_vm6 = vcmp.eq.s32.totalorder %v490_v32, 15  ;;  %v2215_v32 = vrot.slane %v7595_v6, 1 }
 0x16e   : > { %v7611_v23 = vpop.f32.mrf.mxu1  ;;  %v7615_v54 = vpop.f32.mrf.mxu0  ;;  %v10990_v51 = vsel %vm7646_vm6, 4294967295, %v10989_v51 }
 0x16f   : > { %1798 = vrot.lane.b32.xlu1 %v7609_v52, %s6406_s23  ;;  %1796 = vrot.lane.b32.xlu0 %v7595_v6, %s6406_s23  ;;  %10991 = vst [vmem:[#allocation71_spill] sm:$0xff] %v10990_v51  ;;  %v10998_v51 = vld [vmem:[#allocation62_spill] sm:$0xff]  ;;  %v2214_v6 = vrot.slane %v7631_v41, 1 }
 0x170   : > { %v7617_v57 = vpop.f32.mrf.mxu1  ;;  %v7627_v44 = vpop.f32.mrf.mxu0 }
 0x171   : > { %10980 = vst [vmem:[#allocation42_spill] sm:$0xff] %v7617_v57  ;;  %10983 = vst [vmem:[#allocation54_spill] sm:$0xff] %v7627_v44 }
 0x172   : > { %v7633_v42 = vpop.f32.mrf.mxu1  ;;  %v7635_v50 = vpop.f32.mrf.mxu0 }
 0x173   : > { %10985 = vst [vmem:[#allocation67_spill] sm:$0xff] %v7633_v42  ;;  %10986 = vst [vmem:[#allocation68_spill] sm:$0xff] %v7635_v50  ;;  %v7641_v39 = vpop.permute.xlu1 %1740  ;;  %1794 = vrot.lane.b32.xlu1 %v7631_v41, %s6406_s23  ;;  %2426 = vrot.lane.b32.xlu0 %v2224_v7, %s6404_s21  ;;  %v494_v50 = vand.u32 15, %v10992_v11  ;;  %v2341_v7 = vsel %vm7646_vm6, 0.0, %v2221_v40  ;;  %v10997_v11 = vrot.slane %v7164_v48, 1  ;;  %v492_v40 = vand.u32 15, %v10998_v51 }
 0x174   : > { %v7639_v57 = vpop.f32.mrf.mxu1  ;;  %10988 = vst [vmem:[#allocation70_spill] sm:$0xff] %v7641_v39  ;;  %v7654_v17 = vpop.f32.mrf.mxu0  ;;  %v7696_v51 = vadd.f32 %v7434_v30, %v7418_v16 }
 0x175   : > { %10987 = vst [vmem:[#allocation69_spill] sm:$0xff] %v7639_v57  ;;  %v7658_v39 = vpop.permute.xlu0 %1736  ;;  %vm7670_vm7 = vcmp.eq.s32.totalorder %v494_v50, 15  ;;  %v2249_v52 = vsel %vm2217_vm8, %v2216_v27, %v10997_v11  ;;  %v2218_v11 = vsel %vm2217_vm8, %v2215_v32, %v2216_v27  ;;  %vm7702_vm6 = vcmp.eq.s32.totalorder %v492_v40, 15 }
 0x176   : > { %v7656_v57 = vpop.f32.mrf.mxu1  ;;  %10993 = vst [vmem:[#allocation64_spill] sm:$0xff] %v7658_v39  ;;  %v7660_v42 = vpop.f32.mrf.mxu0  ;;  %v2345_v48 = vsel %vm7670_vm7, 0.0, %v2249_v52  ;;  %11002 = vst [vmem:[#allocation75_spill] sm:$0xff] %v7696_v51  ;;  %v2219_v52 = vsel %vm2217_vm8, %v2214_v6, %v2215_v32  ;;  %v7722_v40 = vadd.f32 %v7457_v35, %v7455_v47  ;;  %v2220_v35 = vsel %vm2217_vm8, %v2213_v13, %v2214_v6 }
 0x177   : > { %2432 = vrot.lane.b32.xlu1 %v2341_v7, %s6404_s21  ;;  %1792 = vrot.lane.b32.xlu0 %v7599_v22, %s6406_s23 }
 0x178   : > { %v7665_v44 = vpop.f32.mrf.mxu1  ;;  %v7680_v39 = vpop.f32.mrf.mxu0  ;;  %11008 = vst [vmem:[#allocation79_spill] sm:$0xff] %v7722_v40 }
 0x179   : > { %10994 = vst [vmem:[#allocation72_spill] sm:$0xff] %v7665_v44  ;;  %v7682_v44 = vpop.permute.xlu1 %1742  ;;  %v7686_v22 = vpop.permute.xlu0 %1738 }
 0x17a   : > { %10999 = vst [vmem:[#allocation62_spill] sm:$0xff] %v7682_v44  ;;  %v7684_v7 = vpop.f32.mrf.mxu1  ;;  %11000 = vst [vmem:[#allocation73_spill] sm:$0xff] %v7686_v22  ;;  %v7688_v50 = vpop.f32.mrf.mxu0  ;;  %v11003_v22 = vmov 0 }
 0x17b   : > { %11001 = vst [vmem:[#allocation74_spill] sm:$0xff] %v7688_v50  ;;  %2440 = vrot.lane.b32.xlu1 %v2345_v48, %s6404_s21  ;;  %2438 = vrot.lane.b32.xlu0 %v2218_v11, %s6404_s21  ;;  %v11004_v22 = vsel %vm7702_vm6, 4294967295, %v11003_v22  ;;  %v2343_v48 = vsel %vm7702_vm6, 0.0, %v2219_v52 }
 0x17c   : > { %v7698_v41 = vpop.f32.mrf.mxu1  ;;  %11005 = vst [vmem:[#allocation76_spill] sm:$0xff] %v11004_v22  ;;  %v7708_v44 = vpop.f32.mrf.mxu0 }
 0x17d   : > { %v7712_v50 = vpop.permute.xlu1 %2380  ;;  %v7716_v16 = vpop.permute.xlu0 %2382 }
 0x17e   : > { %v7710_v27 = vpop.f32.mrf.mxu1  ;;  %11006 = vst [vmem:[#allocation77_spill] sm:$0xff] %v7712_v50  ;;  %v7714_v30 = vpop.f32.mrf.mxu0  ;;  %11007 = vst [vmem:[#allocation78_spill] sm:$0xff] %v7716_v16  ;;  %v7733_v50 = vadd.f32 %v7448_v37, %v7442_v43  ;;  %v2891_v43 = vrot.slane %v7722_v40, 1  ;;  %v2892_v37 = vrot.slane %v7696_v51, 1 }
 0x17f   : > { %2436 = vrot.lane.b32.xlu1 %v2343_v48, %s6404_s21  ;;  %2542 = vrot.lane.b32.xlu0 %v7696_v51, %s6406_s23 }
 0x180   : > { %v7724_v11 = vpop.f32.mrf.mxu1  ;;  %v7729_v32 = vpop.f32.mrf.mxu0  ;;  %11009 = vst [vmem:[#allocation80_spill] sm:$0xff] %v7733_v50 }
 0x181   : > { %v7737_v52 = vpop.permute.xlu1 %1750  ;;  %v7741_v47 = vpop.permute.xlu0 %1748 }
 0x182   : > { %v7735_v16 = vpop.f32.mrf.mxu1  ;;  %11011 = vst [vmem:[#allocation82_spill] sm:$0xff] %v7737_v52  ;;  %v7739_v22 = vpop.f32.mrf.mxu0  ;;  %11013 = vst [vmem:[#allocation84_spill] sm:$0xff] %v7741_v47  ;;  %v7754_v52 = vadd.f32 %v7440_v36, %v7438_v46  ;;  %v2951_v36 = vsel %vm2217_vm8, %v2891_v43, %v2892_v37 }
 0x183   : > { %11010 = vst [vmem:[#allocation81_spill] sm:$0xff] %v7735_v16  ;;  %11012 = vst [vmem:[#allocation83_spill] sm:$0xff] %v7739_v22  ;;  %2544 = vrot.lane.b32.xlu1 %v7733_v50, %s6406_s23  ;;  %2434 = vrot.lane.b32.xlu0 %v2220_v35, %s6404_s21  ;;  %v2893_v16 = vrot.slane %v7733_v50, 1  ;;  %v2955_v50 = vsel %vm7180_vm1, 0.0, %v2951_v36  ;;  %vm1864_vm1 = vcmp.lt.s32.totalorder %v10909_v59, 1 }
 0x184   : > { %v7745_v48 = vpop.f32.mrf.mxu1  ;;  %11015 = vst [vmem:[#allocation86_spill] sm:$0xff] %v7754_v52  ;;  %v7756_v22 = vpop.f32.mrf.mxu0  ;;  %v2890_v51 = vrot.slane %v7754_v52, 1 }
 0x185   : > { %11014 = vst [vmem:[#allocation85_spill] sm:$0xff] %v7745_v48  ;;  %11016 = vst [vmem:[#allocation87_spill] sm:$0xff] %v7756_v22  ;;  %v7760_v6 = vpop.permute.xlu1 %1746  ;;  %v7762_v48 = vpop.permute.xlu0 %2378 }
 0x186   : > { %v7758_v47 = vpop.f32.mrf.mxu1  ;;  %11018 = vst [vmem:[#allocation89_spill] sm:$0xff] %v7760_v6  ;;  %v5746_v13 = vpop.f32.mrf.mxu0  ;;  %11019 = vst [vmem:[#allocation90_spill] sm:$0xff] %v7762_v48  ;;  %v7785_v48 = vadd.f32 %v7467_v61, %v7459_v31 }
 0x187   : > { %11017 = vst [vmem:[#allocation88_spill] sm:$0xff] %v7758_v47  ;;  %2540 = vrot.lane.b32.xlu1 %v7722_v40, %s6406_s23  ;;  %2538 = vrot.lane.b32.xlu0 %v7754_v52, %s6406_s23  ;;  %v2950_v40 = vsel %vm2217_vm8, %v2892_v37, %v2893_v16 }
 0x188   : > { %v5780_v35 = vpop.f32.mrf.mxu1  ;;  %11021 = vst [vmem:[#allocation92_spill] sm:$0xff] %v7785_v48  ;;  %v2896_v37 = vrot.slane %v7785_v48, 1 }
 0x189   : > { %v7771_v46 = vadd.f32 %v5780_v35, %v5746_v13  ;;  %v7774_v6 = vpop.permute.xlu1 %2384  ;;  %v7776_v47 = vpop.permute.xlu0 %1744  ;;  %v7789_v13 = vadd.f32 %v7479_v1, %v7477_v29  ;;  %v7793_v35 = vadd.f32 %v7486_v2, %v7481_v58  ;;  %v7812_v2 = vadd.f32 %v7499_v25, %v7497_v38 }
 0x18b   : > { %11020 = vst [vmem:[#allocation91_spill] sm:$0xff] %v7771_v46  ;;  %v10702_v22 = vrot.slane %v7771_v46, 1  ;;  %11022 = vst [vmem:[#allocation93_spill] sm:$0xff] %v7789_v13  ;;  %3020 = vrot.lane.b32.xlu1 %v2955_v50, %s6404_s21  ;;  %3022 = vrot.lane.b32.xlu0 %v2950_v40, %s6404_s21  ;;  %v2894_v58 = vrot.slane %v7789_v13, 1  ;;  %v2952_v40 = vsel %vm2217_vm8, %v2890_v51, %v2891_v43  ;;  %v2895_v25 = vrot.slane %v7812_v2, 1 }
 0x18c   : > { %11023 = vst [vmem:[#allocation94_spill] sm:$0xff] %v7793_v35  ;;  %11024 = vst [vmem:[#allocation95_spill] sm:$0xff] %v7812_v2 }
 0x18d   : > { %v7801_v21 = vsel %vm2217_vm8, %v10702_v22, %v2890_v51  ;;  %v7803_v31 = vpop.permute.xlu1 %2388  ;;  %v7808_v29 = vpop.permute.xlu0 %2390  ;;  %v2949_v38 = vsel %vm2217_vm8, %v2893_v16, %v2894_v58  ;;  %v2897_v51 = vrot.slane %v7793_v35, 1  ;;  %v2947_v16 = vsel %vm2217_vm8, %v2895_v25, %v2896_v37 }
 0x18e   : > { %v2957_v22 = vsel %vm7214_vm9, 0.0, %v2949_v38  ;;  %v7854_v38 = vadd.f32 %v7519_v19, %v7501_v20  ;;  %v7872_v19 = vadd.f32 %v7543_v10, %v7541_v15 }
 0x18f   : > { %2552 = vrot.lane.b32.xlu1 %v7793_v35, %s6406_s23  ;;  %2550 = vrot.lane.b32.xlu0 %v7785_v48, %s6406_s23  ;;  %v2959_v48 = vsel %vm7232_vm0, 0.0, %v2947_v16  ;;  %v2946_v24 = vsel %vm2217_vm8, %v2896_v37, %v2897_v51  ;;  %v7862_v35 = vadd.f32 %v7534_v8, %v7527_v60  ;;  %v2948_v60 = vsel %vm2217_vm8, %v2894_v58, %v2895_v25 }
 0x190   : > { %11025 = vst [vmem:[#allocation96_spill] sm:$0xff] %v7854_v38  ;;  %11028 = vst [vmem:[#allocation99_spill] sm:$0xff] %v7872_v19  ;;  %v2899_v15 = vrot.slane %v7872_v19, 1  ;;  %v2900_v10 = vrot.slane %v7854_v38, 1 }
 0x191   : > { %v7819_v1 = vpop.permute.xlu1 %1758  ;;  %v7821_v50 = vpop.permute.xlu0 %1756  ;;  %11027 = vst [vmem:[#allocation98_spill] sm:$0xff] %v7862_v35  ;;  %v2901_v58 = vrot.slane %v7862_v35, 1 }
 0x192   : > { %v2943_v25 = vsel %vm2217_vm8, %v2899_v15, %v2900_v10 }
 0x193   : > { %2548 = vrot.lane.b32.xlu1 %v7812_v2, %s6406_s23  ;;  %3018 = vrot.lane.b32.xlu0 %v2952_v40, %s6404_s21  ;;  %v2942_v34 = vsel %vm2217_vm8, %v2900_v10, %v2901_v58 }
 0x195   : > { %v7832_v36 = vpop.permute.xlu1 %1754  ;;  %v7834_v61 = vpop.permute.xlu0 %2386 }
 0x197   : > { %3024 = vrot.lane.b32.xlu1 %v2957_v22, %s6404_s21  ;;  %2546 = vrot.lane.b32.xlu0 %v7789_v13, %s6406_s23  ;;  %v7858_v22 = vadd.f32 %v7525_v56, %v7523_v5 }
 0x199   : > { %v7844_v43 = vpop.permute.xlu1 %2392  ;;  %v7846_v40 = vpop.permute.xlu0 %1752  ;;  %11026 = vst [vmem:[#allocation97_spill] sm:$0xff] %v7858_v22  ;;  %v2898_v20 = vrot.slane %v7858_v22, 1 }
 0x19b   : > { %3028 = vrot.lane.b32.xlu1 %v2959_v48, %s6404_s21  ;;  %3030 = vrot.lane.b32.xlu0 %v2946_v24, %s6404_s21  ;;  %v2945_v8 = vsel %vm2217_vm8, %v2897_v51, %v2898_v20 }
 0x19c   : > { %v2961_v24 = vsel %vm7260_vm10, 0.0, %v2945_v8  ;;  %v7914_v8 = vadd.f32 %v7553_v0, %v7545_v33  ;;  %v7932_v33 = vadd.f32 %v7585_v14, %v7583_v53 }
 0x19d   : > { %v7866_v12 = vpop.permute.xlu1 %2396  ;;  %v7868_v16 = vpop.permute.xlu0 %2398 }
 0x19e   : > { %11029 = vst [vmem:[#allocation100_spill] sm:$0xff] %v7914_v8  ;;  %11032 = vst [vmem:[#allocation103_spill] sm:$0xff] %v7932_v33  ;;  %v2903_v14 = vrot.slane %v7932_v33, 1 }
 0x19f   : > { %2560 = vrot.lane.b32.xlu1 %v7862_v35, %s6406_s23  ;;  %2558 = vrot.lane.b32.xlu0 %v7854_v38, %s6406_s23  ;;  %v2963_v38 = vsel %vm7278_vm11, 0.0, %v2943_v25  ;;  %v7922_v35 = vadd.f32 %v7572_v49, %v7567_v63 }
 0x1a1   : > { %v7879_v5 = vpop.permute.xlu1 %1766  ;;  %v7881_v56 = vpop.permute.xlu0 %1764  ;;  %11031 = vst [vmem:[#allocation102_spill] sm:$0xff] %v7922_v35 }
 0x1a3   : > { %2556 = vrot.lane.b32.xlu1 %v7872_v19, %s6406_s23  ;;  %3026 = vrot.lane.b32.xlu0 %v2948_v60, %s6404_s21 }
 0x1a5   : > { %v7892_v48 = vpop.permute.xlu1 %1762  ;;  %v7894_v37 = vpop.permute.xlu0 %2394 }
 0x1a7   : > { %3032 = vrot.lane.b32.xlu1 %v2961_v24, %s6404_s21  ;;  %2554 = vrot.lane.b32.xlu0 %v7858_v22, %s6406_s23  ;;  %v7918_v24 = vadd.f32 %v7565_v55, %v7563_v62  ;;  %v2944_v62 = vsel %vm2217_vm8, %v2898_v20, %v2899_v15  ;;  %v2904_v55 = vrot.slane %v7914_v8, 1  ;;  %v2905_v20 = vrot.slane %v7922_v35, 1 }
 0x1a9   : > { %v7904_v51 = vpop.permute.xlu1 %2400  ;;  %v7906_v60 = vpop.permute.xlu0 %1760  ;;  %11030 = vst [vmem:[#allocation101_spill] sm:$0xff] %v7918_v24  ;;  %v2902_v63 = vrot.slane %v7918_v24, 1  ;;  %v2939_v15 = vsel %vm2217_vm8, %v2903_v14, %v2904_v55  ;;  %v2938_v28 = vsel %vm2217_vm8, %v2904_v55, %v2905_v20 }
 0x1ab   : > { %3036 = vrot.lane.b32.xlu1 %v2963_v38, %s6404_s21  ;;  %3038 = vrot.lane.b32.xlu0 %v2942_v34, %s6404_s21  ;;  %v2941_v53 = vsel %vm2217_vm8, %v2901_v58, %v2902_v63 }
 0x1ac   : > { %v2965_v34 = vsel %vm7314_vm12, 0.0, %v2941_v53  ;;  %v7974_v53 = vadd.f32 %v7601_v4, %v7587_v18  ;;  %v11037_v4 = vld [vmem:[#allocation54_spill] sm:$0xff]  ;;  %v11038_v18 = vld [vmem:[#allocation67_spill] sm:$0xff] }
 0x1ad   : > { %v7926_v3 = vpop.permute.xlu1 %2404  ;;  %v7928_v25 = vpop.permute.xlu0 %2406 }
 0x1ae   : > { %11033 = vst [vmem:[#allocation104_spill] sm:$0xff] %v7974_v53 }
 0x1af   : > { %2568 = vrot.lane.b32.xlu1 %v7922_v35, %s6406_s23  ;;  %2566 = vrot.lane.b32.xlu0 %v7914_v8, %s6406_s23  ;;  %v2967_v8 = vsel %vm7334_vm13, 0.0, %v2939_v15  ;;  %v11035_v35 = vld [vmem:[#allocation42_spill] sm:$0xff] }
 0x1b1   : > { %v7939_v49 = vpop.permute.xlu1 %1774  ;;  %v7941_v0 = vpop.permute.xlu0 %1772 }
 0x1b3   : > { %2564 = vrot.lane.b32.xlu1 %v7932_v33, %s6406_s23  ;;  %3034 = vrot.lane.b32.xlu0 %v2944_v62, %s6404_s21  ;;  %v7993_v33 = vadd.f32 %v11038_v18, %v11037_v4 }
 0x1b5   : > { %v7952_v38 = vpop.permute.xlu1 %1770  ;;  %v7954_v10 = vpop.permute.xlu0 %2402  ;;  %11039 = vst [vmem:[#allocation54_spill] sm:$0xff] %v7993_v33 }
 0x1b7   : > { %3040 = vrot.lane.b32.xlu1 %v2965_v34, %s6404_s21  ;;  %2562 = vrot.lane.b32.xlu0 %v7918_v24, %s6406_s23  ;;  %v7978_v34 = vadd.f32 %v7611_v23, %v7605_v9  ;;  %v7982_v24 = vadd.f32 %v11035_v35, %v7615_v54  ;;  %v2940_v54 = vsel %vm2217_vm8, %v2902_v63, %v2903_v14  ;;  %v2908_v35 = vrot.slane %v7974_v53, 1 }
 0x1b9   : > { %v7964_v58 = vpop.permute.xlu1 %2408  ;;  %v7966_v62 = vpop.permute.xlu0 %1768  ;;  %11034 = vst [vmem:[#allocation105_spill] sm:$0xff] %v7978_v34  ;;  %11036 = vst [vmem:[#allocation42_spill] sm:$0xff] %v7982_v24  ;;  %v2906_v55 = vrot.slane %v7978_v34, 1  ;;  %v2909_v63 = vrot.slane %v7982_v24, 1 }
 0x1bb   : > { %3044 = vrot.lane.b32.xlu1 %v2967_v8, %s6404_s21  ;;  %3046 = vrot.lane.b32.xlu0 %v2938_v28, %s6404_s21  ;;  %v2907_v8 = vrot.slane %v7993_v33, 1  ;;  %v2937_v28 = vsel %vm2217_vm8, %v2905_v20, %v2906_v55  ;;  %v2934_v22 = vsel %vm2217_vm8, %v2908_v35, %v2909_v63 }
 0x1bc   : > { %v2969_v19 = vsel %vm7380_vm14, 0.0, %v2937_v28  ;;  %v11042_v28 = vld [vmem:[#allocation68_spill] sm:$0xff] }
 0x1bd   : > { %v7986_v26 = vpop.permute.xlu1 %2412  ;;  %v7988_v15 = vpop.permute.xlu0 %2414  ;;  %v2935_v14 = vsel %vm2217_vm8, %v2907_v8, %v2908_v35 }
 0x1bf   : > { %2576 = vrot.lane.b32.xlu1 %v7982_v24, %s6406_s23  ;;  %2574 = vrot.lane.b32.xlu0 %v7974_v53, %s6406_s23  ;;  %v11043_v24 = vld [vmem:[#allocation69_spill] sm:$0xff] }
 0x1c0   : > { %v8034_v13 = vadd.f32 %v11043_v24, %v11042_v28  ;;  %v8053_v24 = vadd.f32 %v7684_v7, %v7680_v39  ;;  %v11057_v28 = vld [vmem:[#allocation74_spill] sm:$0xff] }
 0x1c1   : > { %v7999_v9 = vpop.permute.xlu1 %1782  ;;  %v8001_v23 = vpop.permute.xlu0 %1780 }
 0x1c2   : > { %11044 = vst [vmem:[#allocation67_spill] sm:$0xff] %v8034_v13  ;;  %11049 = vst [vmem:[#allocation69_spill] sm:$0xff] %v8053_v24 }
 0x1c3   : > { %2572 = vrot.lane.b32.xlu1 %v7993_v33, %s6406_s23  ;;  %3042 = vrot.lane.b32.xlu0 %v2940_v54, %s6404_s21  ;;  %v2971_v33 = vsel %vm7408_vm15, 0.0, %v2935_v14 }
 0x1c5   : > { %v8012_v4 = vpop.permute.xlu1 %1778  ;;  %v8014_v18 = vpop.permute.xlu0 %2410 }
 0x1c7   : > { %3048 = vrot.lane.b32.xlu1 %v2969_v19, %s6404_s21  ;;  %2570 = vrot.lane.b32.xlu0 %v7978_v34, %s6406_s23  ;;  %v8038_v19 = vadd.f32 %v7656_v57, %v7654_v17  ;;  %v11046_v34 = vld [vmem:[#allocation72_spill] sm:$0xff]  ;;  %v2936_v17 = vsel %vm2217_vm8, %v2906_v55, %v2907_v8 }
 0x1c8   : > { %v8042_v2 = vadd.f32 %v11046_v34, %v7660_v42  ;;  %v2911_v34 = vrot.slane %v8053_v24, 1 }
 0x1c9   : > { %v8024_v54 = vpop.permute.xlu1 %2416  ;;  %v8026_v20 = vpop.permute.xlu0 %1776  ;;  %11045 = vst [vmem:[#allocation53_spill] sm:$0xff] %v8038_v19  ;;  %v2910_v35 = vrot.slane %v8038_v19, 1 }
 0x1ca   : > { %11047 = vst [vmem:[#allocation56_spill] sm:$0xff] %v8042_v2  ;;  %v2913_v55 = vrot.slane %v8042_v2, 1 }
 0x1cb   : > { %3052 = vrot.lane.b32.xlu1 %v2971_v33, %s6404_s21  ;;  %3054 = vrot.lane.b32.xlu0 %v2934_v22, %s6404_s21  ;;  %v2912_v33 = vrot.slane %v8034_v13, 1  ;;  %v2933_v39 = vsel %vm2217_vm8, %v2909_v63, %v2910_v35 }
 0x1cc   : > { %v2973_v52 = vsel %vm7463_vm2, 0.0, %v2933_v39 }
 0x1cd   : > { %v8046_v53 = vpop.permute.xlu1 %2420  ;;  %v8048_v14 = vpop.permute.xlu0 %2422  ;;  %v2931_v8 = vsel %vm2217_vm8, %v2911_v34, %v2912_v33  ;;  %v2930_v39 = vsel %vm2217_vm8, %v2912_v33, %v2913_v55 }
 0x1ce   : > { %11048 = vst [vmem:[#allocation68_spill] sm:$0xff] %v8048_v14  ;;  %v11089_v14 = vld [vmem:[#allocation44_spill] sm:$0xff] }
 0x1cf   : > { %2584 = vrot.lane.b32.xlu1 %v8042_v2, %s6406_s23  ;;  %2582 = vrot.lane.b32.xlu0 %v8034_v13, %s6406_s23  ;;  %v8094_v2 = vadd.f32 %v7698_v41, %v11057_v28  ;;  %v11063_v41 = vld [vmem:[#allocation81_spill] sm:$0xff]  ;;  %v11068_v28 = vld [vmem:[#allocation62_spill] sm:$0xff] }
 0x1d1   : > { %v8059_v42 = vpop.permute.xlu1 %1790  ;;  %v8061_v57 = vpop.permute.xlu0 %1788  ;;  %11058 = vst [vmem:[#allocation8_spill] sm:$0xff] %v8094_v2 }
 0x1d2   : > { %11050 = vst [vmem:[#allocation72_spill] sm:$0xff] %v8059_v42  ;;  %11051 = vst [vmem:[#allocation106_spill] sm:$0xff] %v8061_v57  ;;  %v11085_v57 = vld [vmem:[#allocation41_spill] sm:$0xff]  ;;  %v11086_v42 = vld [vmem:[#allocation90_spill] sm:$0xff] }
 0x1d3   : > { %2580 = vrot.lane.b32.xlu1 %v8053_v24, %s6406_s23  ;;  %3050 = vrot.lane.b32.xlu0 %v2936_v17, %s6404_s21  ;;  %v2975_v24 = vsel %vm7491_vm3, 0.0, %v2931_v8 }
 0x1d5   : > { %v8072_v7 = vpop.permute.xlu1 %1786  ;;  %v8074_v22 = vpop.permute.xlu0 %2418 }
 0x1d6   : > { %11052 = vst [vmem:[#allocation107_spill] sm:$0xff] %v8072_v7  ;;  %11053 = vst [vmem:[#allocation108_spill] sm:$0xff] %v8074_v22  ;;  %v11084_v22 = vld [vmem:[#allocation73_spill] sm:$0xff] }
 0x1d7   : > { %3056 = vrot.lane.b32.xlu1 %v2973_v52, %s6404_s21  ;;  %2578 = vrot.lane.b32.xlu0 %v8038_v19, %s6406_s23  ;;  %v8098_v52 = vadd.f32 %v7710_v27, %v7708_v44  ;;  %v8102_v19 = vadd.f32 %v7724_v11, %v7714_v30  ;;  %v8117_v44 = vadd.f32 %v11063_v41, %v7729_v32  ;;  %v11072_v32 = vld [vmem:[#allocation45_spill] sm:$0xff]  ;;  %v1833_v7 = vrot.slane %v11084_v22, 7 }
 0x1d8   : > { %v2932_v11 = vsel %vm2217_vm8, %v2910_v35, %v2911_v34 }
 0x1d9   : > { %v8084_v17 = vpop.permute.xlu1 %2424  ;;  %v8086_v63 = vpop.permute.xlu0 %1784  ;;  %11059 = vst [vmem:[#allocation74_spill] sm:$0xff] %v8098_v52  ;;  %11060 = vst [vmem:[#allocation109_spill] sm:$0xff] %v8102_v19  ;;  %v2914_v33 = vrot.slane %v8098_v52, 1  ;;  %v2917_v35 = vrot.slane %v8102_v19, 1  ;;  %v2915_v34 = vrot.slane %v8117_v44, 1 }
 0x1da   : > { %11055 = vst [vmem:[#allocation9_spill] sm:$0xff] %v8084_v17  ;;  %11064 = vst [vmem:[#allocation81_spill] sm:$0xff] %v8117_v44 }
 0x1db   : > { %3060 = vrot.lane.b32.xlu1 %v2975_v24, %s6404_s21  ;;  %3062 = vrot.lane.b32.xlu0 %v2930_v39, %s6404_s21  ;;  %v2929_v24 = vsel %vm2217_vm8, %v2913_v55, %v2914_v33  ;;  %v11071_v55 = vld [vmem:[#allocation70_spill] sm:$0xff] }
 0x1dd   : > { %v8106_v13 = vpop.permute.xlu1 %2428  ;;  %v8108_v8 = vpop.permute.xlu0 %2430 }
 0x1de   : > { %11061 = vst [vmem:[#allocation110_spill] sm:$0xff] %v8106_v13  ;;  %11062 = vst [vmem:[#allocation111_spill] sm:$0xff] %v8108_v8  ;;  %v2916_v8 = vrot.slane %v8094_v2, 1 }
 0x1df   : > { %2592 = vrot.lane.b32.xlu1 %v8102_v19, %s6406_s23  ;;  %2590 = vrot.lane.b32.xlu0 %v8094_v2, %s6406_s23  ;;  %v11076_v19 = vrot.slane %v11068_v28, 7  ;;  %v11078_v2 = vld [vmem:[#allocation85_spill] sm:$0xff] }
 0x1e1   : > { %v8119_v27 = vpop.permute.xlu1 %1798  ;;  %v8121_v30 = vpop.permute.xlu0 %1796 }
 0x1e2   : > { %11065 = vst [vmem:[#allocation112_spill] sm:$0xff] %v8119_v27  ;;  %11066 = vst [vmem:[#allocation113_spill] sm:$0xff] %v8121_v30  ;;  %v2977_v30 = vsel %vm7549_vm4, 0.0, %v2929_v24 }
 0x1e3   : > { %2588 = vrot.lane.b32.xlu1 %v8117_v44, %s6406_s23  ;;  %3058 = vrot.lane.b32.xlu0 %v2932_v11, %s6404_s21  ;;  %v1834_v11 = vrot.slane %v11071_v55, 7  ;;  %v11080_v55 = vld [vmem:[#allocation47_spill] sm:$0xff] }
 0x1e5   : > { %v8130_v39 = vpop.permute.xlu1 %1794  ;;  %v8133_v41 = vpop.permute.xlu0 %2426  ;;  %v1893_v44 = vsel %vm1864_vm1, %v1834_v11, %v11076_v19 }
 0x1e6   : > { %11067 = vst [vmem:[#allocation114_spill] sm:$0xff] %v8130_v39  ;;  %11069 = vst [vmem:[#allocation62_spill] sm:$0xff] %v8133_v41  ;;  %v11073_v39 = vld [vmem:[#allocation77_spill] sm:$0xff] }
 0x1e7   : > { %3064 = vrot.lane.b32.xlu1 %v2977_v30, %s6404_s21  ;;  %2586 = vrot.lane.b32.xlu0 %v8098_v52, %s6406_s23  ;;  %v2475_v41 = vadd.f32 %v11073_v39, %v11072_v32  ;;  %v2926_v30 = vsel %vm2217_vm8, %v2916_v8, %v2917_v35  ;;  %v11077_v52 = vld [vmem:[#allocation83_spill] sm:$0xff]  ;;  %v2927_v39 = vsel %vm2217_vm8, %v2915_v34, %v2916_v8  ;;  %v11081_v32 = vld [vmem:[#allocation78_spill] sm:$0xff] }
 0x1e8   : > { %v8159_v13 = vadd.f32 %v11078_v2, %v11077_v52  ;;  %v2474_v2 = vadd.f32 %v11086_v42, %v11085_v57  ;;  %v2477_v8 = vadd.f32 %v7774_v6, %v11089_v14 }
 0x1e9   : > { %v8147_v27 = vpop.permute.xlu1 %2432  ;;  %v8149_v24 = vpop.permute.xlu0 %1792 }
 0x1ea   : > { %11074 = vst [vmem:[#allocation24_spill] sm:$0xff] %v8147_v27  ;;  %11075 = vst [vmem:[#allocation70_spill] sm:$0xff] %v8149_v24  ;;  %v2476_v24 = vadd.f32 %v11081_v32, %v11080_v55  ;;  %v11082_v27 = vld [vmem:[#allocation39_spill] sm:$0xff]  ;;  %v11090_v32 = vld [vmem:[#allocation64_spill] sm:$0xff] }
 0x1eb   : > { %11079 = vst [vmem:[#allocation77_spill] sm:$0xff] %v8159_v13  ;;  %2031 = vrot.lane.b32.xlu1 %v1893_v44, %s6405_s22  ;;  %3070 = vrot.lane.b32.xlu0 %v2926_v30, %s6404_s21  ;;  %v3191_v17 = vadd.f32 %v11082_v27, %v2475_v41  ;;  %v2979_v30 = vsel %vm7577_vm5, 0.0, %v2927_v39  ;;  %v10756_v41 = vrot.slane %v11090_v32, 7  ;;  %v11091_v55 = vld [vmem:[#allocation87_spill] sm:$0xff]  ;;  %v11095_v39 = vld [vmem:[#allocation10_spill] sm:$0xff]  ;;  %v3190_v6 = vadd.f32 %v11082_v27, %v2474_v2  ;;  %v1496_v32 = vpop.f32.mrf.mxu0 }
 0x1ec   : > { %v3192_v22 = vadd.f32 %v11082_v27, %v2476_v24  ;;  %v465_v44 = vand.u32 15, %v11095_v39  ;;  %v2928_v24 = vsel %vm2217_vm8, %v2914_v33, %v2915_v34  ;;  %v1894_v33 = vsel %vm1864_vm1, %v1833_v7, %v1834_v11  ;;  %v11104_v39 = vld [vmem:[#allocation51_spill] sm:$0xff] }
 0x1ed   : > { %v8168_v19 = vpop.permute.xlu1 %2440  ;;  %v8173_v52 = vpop.permute.xlu0 %2438  ;;  %v3511_v57 = vsub.f32 0.0, %v3191_v17  ;;  %v3510_v34 = vsub.f32 0.0, %v3190_v6 }
 0x1ee   : > { %11083 = vst [vmem:[#allocation83_spill] sm:$0xff] %v8168_v19  ;;  %11087 = vst [vmem:[#allocation85_spill] sm:$0xff] %v8173_v52  ;;  %v11092_v19 = vld [vmem:[#allocation88_spill] sm:$0xff]  ;;  %v3512_v2 = vsub.f32 0.0, %v3192_v22  ;;  %vm8208_vm9 = vcmp.eq.s32.totalorder %v465_v44, 0 }
 0x1ef   : > { %3068 = vrot.lane.b32.xlu1 %v2979_v30, %s6404_s21  ;;  %2598 = vrot.lane.b32.xlu0 %v8159_v13, %s6406_s23  ;;  %v8186_v42 = vadd.f32 %v11092_v19, %v11091_v55  ;;  %v1895_v30 = vsel %vm1864_vm1, %v10756_v41, %v1833_v7  ;;  %v3193_v55 = vadd.f32 %v11082_v27, %v2477_v8  ;;  %v11097_v19 = vld [vmem:[#allocation58_spill] sm:$0xff]  ;;  %v11099_v41 = vmov 0 }
 0x1f0   : > { %v2479_v17 = vadd.f32 %v7803_v31, %v11097_v19  ;;  %v11100_v41 = vsel %vm8208_vm9, 4294967295, %v11099_v41  ;;  %v11102_v31 = vld [vmem:[#allocation18_spill] sm:$0xff]  ;;  %v2478_v19 = vadd.f32 %v7834_v61, %v11104_v39  ;;  %v3546_v7 = vmul.f32 1.442695, %v3512_v2 }
 0x1f1   : > { %11093 = vst [vmem:[#allocation78_spill] sm:$0xff] %v8186_v42  ;;  %v8188_v52 = vpop.permute.xlu1 %2436  ;;  %v8192_v14 = vpop.permute.xlu0 %2542  ;;  %11101 = vst [vmem:[#allocation27_spill] sm:$0xff] %v11100_v41  ;;  %v2480_v8 = vadd.f32 %v7808_v29, %v11102_v31  ;;  %v3513_v22 = vsub.f32 0.0, %v3193_v55  ;;  %v1963_v11 = vsel %vm8208_vm9, 0.0, %v1894_v33  ;;  %v11105_v29 = vld [vmem:[#allocation12_spill] sm:$0xff]  ;;  %v2920_v31 = vrot.slane %v8159_v13, 1 }
 0x1f2   : > { %11094 = vst [vmem:[#allocation39_spill] sm:$0xff] %v8188_v52  ;;  %11096 = vst [vmem:[#allocation73_spill] sm:$0xff] %v8192_v14  ;;  %v3544_v14 = vmul.f32 1.442695, %v3511_v57  ;;  %v3195_v57 = vadd.f32 %v11082_v27, %v2479_v17  ;;  %v467_v44 = vand.u32 15, %v11105_v29  ;;  %v11108_v17 = vrot.slane %v8186_v42, 1 }
 0x1f3   : > { %2027 = vrot.lane.b32.xlu1 %v1895_v30, %s6405_s22  ;;  %3066 = vrot.lane.b32.xlu0 %v2928_v24, %s6404_s21  ;;  %v1660_v30 = vpop.f32.mrf.mxu1  ;;  %v3542_v39 = vmul.f32 1.442695, %v3510_v34  ;;  %v10763_v2 = vrot.slane %v7776_v47, 7  ;;  %v3196_v41 = vadd.f32 %v11082_v27, %v2480_v8  ;;  %v11109_v33 = vld [vmem:[#allocation46_spill] sm:$0xff]  ;;  %v11112_v34 = vld [vmem:[#allocation71_spill] sm:$0xff]  ;;  %v11114_v8 = vrot.slane %v7771_v46, 1 }
 0x1f4   : > { %5820 = vpow2.f32 %v3544_v14  ;;  %v8228_v6 = vadd.f32 %v1660_v30, %v1496_v32  ;;  %v2925_v61 = vsel %vm2217_vm8, %v2917_v35, %v11108_v17  ;;  %v2481_v29 = vadd.f32 %v7844_v43, %v11109_v33  ;;  %v11120_v13 = vld [vmem:[#allocation84_spill] sm:$0xff]  ;;  %v11122_v33 = vld [vmem:[#allocation19_spill] sm:$0xff] }
 0x1f5   : > { %v8206_v52 = vpop.permute.xlu1 %2544  ;;  %v8216_v24 = vpop.permute.xlu0 %2434  ;;  %v3548_v32 = vmul.f32 1.442695, %v3513_v22  ;;  %v3515_v30 = vsub.f32 0.0, %v3195_v57  ;;  %5822 = vpow2.f32 %v3546_v7  ;;  %vm11113_vm0 = vnez %v11112_v34 }
 0x1f6   : > { %11098 = vst [vmem:[#allocation90_spill] sm:$0xff] %v8206_v52  ;;  %11103 = vst [vmem:[#allocation87_spill] sm:$0xff] %v8216_v24  ;;  %v11111_v52 = vld [vmem:[#allocation59_spill] sm:$0xff]  ;;  %v2981_v43 = vsel %vm11113_vm0, 0.0, %v2925_v61  ;;  %v2922_v22 = vsel %vm2217_vm8, %v2920_v31, %v11114_v8  ;;  %vm8257_vm10 = vcmp.eq.s32.totalorder %v467_v44, 0  ;;  %5824 = vpow2.f32 %v3542_v39 }
 0x1f7   : > { %2600 = vrot.lane.b32.xlu1 %v7771_v46, %s6406_s23  ;;  %2594 = vrot.lane.b32.xlu0 %v8186_v42, %s6406_s23  ;;  %11106 = vst [vmem:[#allocation88_spill] sm:$0xff] %v8228_v6  ;;  %v2483_v24 = vadd.f32 %v7866_v12, %v11111_v52  ;;  %v3516_v12 = vsub.f32 0.0, %v3196_v41  ;;  %v3197_v57 = vadd.f32 %v11082_v27, %v2481_v29  ;;  %v11117_v7 = vrot.slane %v11068_v28, 7  ;;  %v11118_v41 = vld [vmem:[#allocation14_spill] sm:$0xff]  ;;  %v11121_v52 = vld [vmem:[#allocation89_spill] sm:$0xff] }
 0x1f8   : > { %5826 = vpow2.f32 %v3548_v32  ;;  %v3552_v61 = vmul.f32 1.442695, %v3515_v30  ;;  %v469_v39 = vand.u32 15, %v11118_v41  ;;  %v11119_v29 = vld [vmem:[#allocation82_spill] sm:$0xff]  ;;  %v1838_v46 = vrot.slane %v11120_v13, 7 }
 0x1f9   : > { %v8230_v55 = vpop.permute.xlu1 %2540  ;;  %v8241_v14 = vpop.permute.xlu0 %2538  ;;  %v1892_v17 = vsel %vm1864_vm1, %v11117_v7, %v10763_v2  ;;  %v3199_v44 = vadd.f32 %v11082_v27, %v2483_v24  ;;  %v1839_v8 = vrot.slane %v11119_v29, 7  ;;  %v10768_v28 = vrot.slane %v11121_v52, 7 }
 0x1fa   : > { %11107 = vst [vmem:[#allocation10_spill] sm:$0xff] %v8230_v55  ;;  %11110 = vst [vmem:[#allocation12_spill] sm:$0xff] %v8241_v14  ;;  %v3194_v55 = vadd.f32 %v11082_v27, %v2478_v19  ;;  %v2484_v7 = vadd.f32 %v7868_v16, %v11122_v33  ;;  %v3517_v30 = vsub.f32 0.0, %v3197_v57  ;;  %5828 = vpow2.f32 %v3552_v61  ;;  %v11124_v16 = vld [vmem:[#allocation60_spill] sm:$0xff] }
 0x1fb   : > { %2596 = vrot.lane.b32.xlu1 %v8228_v6, %s6406_s23  ;;  %2029 = vrot.lane.b32.xlu0 %v1963_v11, %s6405_s22  ;;  %v3519_v29 = vsub.f32 0.0, %v3199_v44  ;;  %v11123_v13 = vsel %vm7670_vm7, 0.0, %v7801_v21  ;;  %vm8299_vm11 = vcmp.eq.s32.totalorder %v469_v39, 0  ;;  %v11125_v61 = vmov 0 }
 0x1fc   : > { %v3514_v34 = vsub.f32 0.0, %v3194_v55  ;;  %v3554_v55 = vmul.f32 1.442695, %v3516_v12  ;;  %v2482_v12 = vadd.f32 %v7894_v37, %v11124_v16  ;;  %v3200_v57 = vadd.f32 %v11082_v27, %v2484_v7 }
 0x1fd   : > { %v8249_v35 = vpop.permute.xlu1 %3020  ;;  %v8262_v11 = vpop.permute.xlu0 %3022  ;;  %v11126_v61 = vsel %vm8299_vm11, 4294967295, %v11125_v61  ;;  %v3556_v44 = vmul.f32 1.442695, %v3517_v30  ;;  %v11129_v37 = vrot.slane %v8186_v42, 1  ;;  %v1890_v39 = vsel %vm1864_vm1, %v10768_v28, %v1838_v46 }
 0x1fe   : > { %v3550_v41 = vmul.f32 1.442695, %v3514_v34  ;;  %11127 = vst [vmem:[#allocation71_spill] sm:$0xff] %v11126_v61  ;;  %v471_v34 = vand.u32 15, %v11128_v45  ;;  %5830 = vpow2.f32 %v3554_v55  ;;  %v3198_v30 = vadd.f32 %v11082_v27, %v2482_v12  ;;  %v11130_v45 = vld [vmem:[#allocation23_spill] sm:$0xff]  ;;  %v11136_v12 = vld [vmem:[#allocation28_spill] sm:$0xff] }
 0x1ff   : > { %3072 = vrot.lane.b32.xlu1 %v2981_v43, %s6404_s21  ;;  %3078 = vrot.lane.b32.xlu0 %v2922_v22, %s6404_s21  ;;  %v1965_v43 = vsel %vm8257_vm10, 0.0, %v1892_v17  ;;  %v2919_v22 = vrot.slane %v8228_v6, 1  ;;  %v1889_v17 = vsel %vm1864_vm1, %v1838_v46, %v1839_v8  ;;  %v3560_v6 = vmul.f32 1.442695, %v3519_v29 }
 0x200   : > { %5832 = vpow2.f32 %v3550_v41  ;;  %v3520_v33 = vsub.f32 0.0, %v3200_v57  ;;  %vm8323_vm12 = vcmp.eq.s32.totalorder %v471_v34, 0  ;;  %v11131_v46 = vmov 0  ;;  %v11134_v41 = vld [vmem:[#allocation26_spill] sm:$0xff] }
 0x201   : > { %v8279_v32 = vpop.permute.xlu1 %2552  ;;  %v8281_v24 = vpop.permute.xlu0 %2550  ;;  %v2924_v7 = vsel %vm2217_vm8, %v11129_v37, %v2919_v22  ;;  %v2923_v55 = vsel %vm2217_vm8, %v2919_v22, %v2920_v31  ;;  %v473_v37 = vand.u32 15, %v11130_v45  ;;  %v11132_v46 = vsel %vm8323_vm12, 4294967295, %v11131_v46 }
 0x202   : > { %v5821_v21 = vpop.eup %5820  ;;  %11133 = vst [vmem:[#allocation14_spill] sm:$0xff] %v11132_v46  ;;  %v475_v29 = vand.u32 15, %v11134_v41  ;;  %5834 = vpow2.f32 %v3556_v44  ;;  %v2983_v31 = vsel %vm7702_vm6, 0.0, %v2923_v55  ;;  %v1967_v22 = vsel %vm8299_vm11, 0.0, %v1890_v39  ;;  %v11137_v39 = vld [vmem:[#allocation57_spill] sm:$0xff] }
 0x203   : > { %3080 = vrot.lane.b32.xlu1 %v11123_v13, %s6404_s21  ;;  %2033 = vrot.lane.b32.xlu0 %v1965_v43, %s6405_s22  ;;  %v10770_v13 = vrot.slane %v7846_v40, 7  ;;  %v5823_v42 = vpop.eup %5822  ;;  %v477_v45 = vand.u32 15, %v11136_v12  ;;  %v3607_v28 = vadd.f32 1.0, %v5821_v21  ;;  %v1841_v34 = vrot.slane %v7832_v36, 7 }
 0x204   : > { %v5825_v57 = vpop.eup %5824  ;;  %5836 = vpow2.f32 %v3560_v6  ;;  %v3608_v41 = vadd.f32 1.0, %v5823_v42  ;;  %v2485_v12 = vadd.f32 %v7904_v51, %v11137_v39  ;;  %vm8344_vm8 = vcmp.eq.s32.totalorder %v473_v37, 0 }
 0x205   : > { %v8295_v2 = vpop.permute.xlu1 %2548  ;;  %v8304_v43 = vpop.permute.xlu0 %3018  ;;  %v1888_v44 = vsel %vm1864_vm1, %v1839_v8, %v10770_v13  ;;  %v11138_v21 = vmov 0  ;;  %v1842_v36 = vrot.slane %v7821_v50, 7  ;;  %v3562_v6 = vmul.f32 1.442695, %v3520_v33 }
 0x206   : > { %v5827_v55 = vpop.eup %5826  ;;  %v11139_v21 = vsel %vm8344_vm8, 4294967295, %v11138_v21  ;;  %vm8353_vm13 = vcmp.eq.s32.totalorder %v475_v29, 0  ;;  %v11142_v8 = vmov 0  ;;  %v3606_v42 = vadd.f32 1.0, %v5825_v57 }
 0x207   : > { %2039 = vrot.lane.b32.xlu1 %v1889_v17, %s6405_s22  ;;  %3074 = vrot.lane.b32.xlu0 %v2924_v7, %s6404_s21  ;;  %v3518_v7 = vsub.f32 0.0, %v3198_v30  ;;  %11140 = vst [vmem:[#allocation82_spill] sm:$0xff] %v11139_v21  ;;  %v11143_v8 = vsel %vm8353_vm13, 4294967295, %v11142_v8  ;;  %v1843_v30 = vrot.slane %v7819_v1, 7  ;;  %v11145_v37 = vrot.slane %v11121_v52, 7 }
 0x208   : > { %11144 = vst [vmem:[#allocation84_spill] sm:$0xff] %v11143_v8  ;;  %v11146_v13 = vrot.slane %v7776_v47, 7  ;;  %5838 = vrcp.f32 %v3607_v28  ;;  %v3609_v33 = vadd.f32 1.0, %v5827_v55  ;;  %v1886_v1 = vsel %vm1864_vm1, %v1841_v34, %v1842_v36  ;;  %v5829_v47 = vpop.eup %5828  ;;  %v11150_v28 = vld [vmem:[#allocation16_spill] sm:$0xff] }
 0x209   : > { %v8321_v16 = vpop.permute.xlu1 %3024  ;;  %v8328_v17 = vpop.permute.xlu0 %2546  ;;  %vm8373_vm14 = vcmp.eq.s32.totalorder %v477_v45, 0  ;;  %v11147_v52 = vmov 0  ;;  %5840 = vrcp.f32 %v3608_v41  ;;  %v3201_v57 = vadd.f32 %v11082_v27, %v2485_v12  ;;  %v11152_v45 = vld [vmem:[#allocation34_spill] sm:$0xff] }
 0x20a   : > { %v1891_v50 = vsel %vm1864_vm1, %v11146_v13, %v11145_v37  ;;  %v11148_v52 = vsel %vm8373_vm14, 4294967295, %v11147_v52  ;;  %v3558_v13 = vmul.f32 1.442695, %v3518_v7  ;;  %5842 = vpow2.f32 %v3562_v6  ;;  %v11151_v37 = vld [vmem:[#allocation17_spill] sm:$0xff] }
 0x20b   : > { %3076 = vrot.lane.b32.xlu1 %v2983_v31, %s6404_s21  ;;  %2037 = vrot.lane.b32.xlu0 %v1967_v22, %s6405_s22  ;;  %v11141_v31 = vld [vmem:[#allocation25_spill] sm:$0xff]  ;;  %11149 = vst [vmem:[#allocation89_spill] sm:$0xff] %v11148_v52  ;;  %5844 = vrcp.f32 %v3606_v42  ;;  %v1885_v41 = vsel %vm1864_vm1, %v1842_v36, %v1843_v30  ;;  %v1971_v7 = vsel %vm8344_vm8, 0.0, %v1886_v1  ;;  %v5831_v6 = vpop.eup %5830  ;;  %v11154_v42 = vrot.slane %v7906_v60, 7 }
 0x20c   : > { %v2487_v22 = vadd.f32 %v7926_v3, %v11141_v31  ;;  %v1969_v3 = vsel %vm8323_vm12, 0.0, %v1888_v44  ;;  %v2488_v44 = vadd.f32 %v7928_v25, %v11150_v28  ;;  %v11153_v25 = vld [vmem:[#allocation32_spill] sm:$0xff]  ;;  %5846 = vrcp.f32 %v3609_v33 }
 0x20d   : > { %v8351_v61 = vpop.permute.xlu1 %3028  ;;  %v8358_v51 = vpop.permute.xlu0 %3030  ;;  %v479_v12 = vand.u32 15, %v11153_v25  ;;  %v1884_v29 = vsel %vm1864_vm1, %v1843_v30, %v11154_v42  ;;  %5848 = vpow2.f32 %v3558_v13  ;;  %v3521_v28 = vsub.f32 0.0, %v3201_v57  ;;  %v11155_v25 = vld [vmem:[#allocation21_spill] sm:$0xff] }
 0x20e   : > { %v3203_v55 = vadd.f32 %v11082_v27, %v2487_v22  ;;  %v3611_v22 = vadd.f32 1.0, %v5829_v47  ;;  %v5833_v36 = vpop.eup %5832  ;;  %v3204_v1 = vadd.f32 %v11082_v27, %v2488_v44  ;;  %v2489_v33 = vadd.f32 %v7964_v58, %v11155_v25  ;;  %v11163_v25 = vld [vmem:[#allocation38_spill] sm:$0xff] }
 0x20f   : > { %2035 = vrot.lane.b32.xlu1 %v1891_v50, %s6405_s22  ;;  %2041 = vrot.lane.b32.xlu0 %v1969_v3, %s6405_s22  ;;  %v2486_v50 = vadd.f32 %v7954_v10, %v11151_v37  ;;  %v1845_v10 = vrot.slane %v7892_v48, 7  ;;  %v1847_v47 = vrot.slane %v7879_v5, 7  ;;  %v1846_v48 = vrot.slane %v7881_v56, 7  ;;  %v5835_v56 = vpop.eup %5834 }
 0x210   : > { %v3612_v39 = vadd.f32 1.0, %v5831_v6  ;;  %v11157_v30 = vrot.slane %v7846_v40, 7  ;;  %v1973_v58 = vsel %vm8353_vm13, 0.0, %v1884_v29  ;;  %vm8416_vm15 = vcmp.eq.s32.totalorder %v479_v12, 0  ;;  %v11161_v12 = vld [vmem:[#allocation37_spill] sm:$0xff] }
 0x211   : > { %v8383_v3 = vpop.permute.xlu1 %2560  ;;  %v8386_v31 = vpop.permute.xlu0 %2558  ;;  %v11158_v5 = vmov 0  ;;  %5850 = vrcp.f32 %v3611_v22  ;;  %v3610_v57 = vadd.f32 1.0, %v5833_v36  ;;  %v1882_v40 = vsel %vm1864_vm1, %v1845_v10, %v1846_v48  ;;  %v11162_v22 = vld [vmem:[#allocation30_spill] sm:$0xff] }
 0x212   : > { %v1887_v13 = vsel %vm1864_vm1, %v11157_v30, %v1841_v34  ;;  %v11159_v5 = vsel %vm8416_vm15, 4294967295, %v11158_v5  ;;  %v5837_v34 = vpop.eup %5836  ;;  %v3205_v29 = vadd.f32 %v11082_v27, %v2489_v33  ;;  %v483_v6 = vand.u32 15, %v11161_v12 }
 0x213   : > { %2047 = vrot.lane.b32.xlu1 %v1885_v41, %s6405_s22  ;;  %2045 = vrot.lane.b32.xlu0 %v1971_v7, %s6405_s22  ;;  %v3523_v41 = vsub.f32 0.0, %v3203_v55  ;;  %v3202_v7 = vadd.f32 %v11082_v27, %v2486_v50  ;;  %11160 = vst [vmem:[#allocation23_spill] sm:$0xff] %v11159_v5  ;;  %v3564_v55 = vmul.f32 1.442695, %v3521_v28  ;;  %v3524_v50 = vsub.f32 0.0, %v3204_v1  ;;  %v11190_v5 = vld [vmem:[#allocation65_spill] sm:$0xff] }
 0x214   : > { %v2492_v36 = vadd.f32 %v7988_v15, %v11162_v22  ;;  %5852 = vrcp.f32 %v3612_v39  ;;  %v2491_v28 = vadd.f32 %v7986_v26, %v11163_v25  ;;  %v1975_v33 = vsel %vm8373_vm14, 0.0, %v1882_v40 }
 0x215   : > { %v8406_v37 = vpop.permute.xlu1 %2556  ;;  %v8408_v21 = vpop.permute.xlu0 %3026  ;;  %v3568_v42 = vmul.f32 1.442695, %v3523_v41  ;;  %v3522_v30 = vsub.f32 0.0, %v3202_v7  ;;  %5854 = vrcp.f32 %v3610_v57  ;;  %v3615_v41 = vadd.f32 1.0, %v5837_v34 }
 0x216   : > { %11156 = vst [vmem:[#allocation20_spill] sm:$0xff] %v8406_v37  ;;  %v11164_v15 = vrot.slane %v7966_v62, 7  ;;  %5856 = vpow2.f32 %v3564_v55  ;;  %v3570_v26 = vmul.f32 1.442695, %v3524_v50  ;;  %v11165_v40 = vrot.slane %v7906_v60, 7 }
 0x217   : > { %2043 = vrot.lane.b32.xlu1 %v1887_v13, %s6405_s22  ;;  %2049 = vrot.lane.b32.xlu0 %v1973_v58, %s6405_s22  ;;  %v1881_v13 = vsel %vm1864_vm1, %v1846_v48, %v1847_v47  ;;  %v3613_v58 = vadd.f32 1.0, %v5835_v56  ;;  %v8446_v48 = vpop.eup %5838  ;;  %v3525_v56 = vsub.f32 0.0, %v3205_v29  ;;  %5858 = vpow2.f32 %v3568_v42 }
 0x218   : > { %v1880_v39 = vsel %vm1864_vm1, %v1847_v47, %v11164_v15  ;;  %v1883_v57 = vsel %vm1864_vm1, %v11165_v40, %v1845_v10  ;;  %v8452_v34 = vpop.eup %5840  ;;  %v1850_v12 = vrot.slane %v7941_v0, 7  ;;  %v1851_v55 = vrot.slane %v7939_v49, 7  ;;  %v11176_v0 = vld [vmem:[#allocation31_spill] sm:$0xff] }
 0x219   : > { %v8429_v44 = vpop.permute.xlu1 %3032  ;;  %v8435_v1 = vpop.permute.xlu0 %2554  ;;  %5860 = vrcp.f32 %v3613_v58  ;;  %v3207_v50 = vadd.f32 %v11082_v27, %v2491_v28  ;;  %v1977_v10 = vsel %vm8416_vm15, 0.0, %v1880_v39  ;;  %v11166_v42 = vand.u32 15, %v11152_v45 }
 0x21a   : > { %v5843_v47 = vpop.eup %5842  ;;  %5862 = vrcp.f32 %v3615_v41  ;;  %v11170_v49 = vrot.slane %v7952_v38, 7  ;;  %v3572_v28 = vmul.f32 1.442695, %v3525_v56  ;;  %v11171_v41 = vld [vmem:[#allocation40_spill] sm:$0xff]  ;;  %vm8480_vm3 = vcmp.eq.s32.totalorder %v483_v6, 0 }
 0x21b   : > { %2055 = vrot.lane.b32.xlu1 %v1881_v13, %s6405_s22  ;;  %2053 = vrot.lane.b32.xlu0 %v1975_v33, %s6405_s22  ;;  %v3566_v13 = vmul.f32 1.442695, %v3522_v30  ;;  %v3208_v33 = vadd.f32 %v11082_v27, %v2492_v36  ;;  %v5845_v29 = vpop.eup %5844  ;;  %vm8469_vm2 = vcmp.eq.s32.totalorder %v11166_v42, 0  ;;  %v11167_v30 = vmov 0 }
 0x21c   : > { %v11168_v30 = vsel %vm8469_vm2, 4294967295, %v11167_v30  ;;  %v1878_v36 = vsel %vm1864_vm1, %v11170_v49, %v1850_v12  ;;  %v5847_v58 = vpop.eup %5846  ;;  %5864 = vpow2.f32 %v3570_v26  ;;  %v485_v15 = vand.u32 15, %v11171_v41 }
 0x21d   : > { %v8456_v7 = vpop.permute.xlu1 %3036  ;;  %v8460_v60 = vpop.permute.xlu0 %3038  ;;  %11169 = vst [vmem:[#allocation26_spill] sm:$0xff] %v11168_v30  ;;  %v3616_v40 = vadd.f32 1.0, %v5843_v47  ;;  %5866 = vpow2.f32 %v3566_v13  ;;  %v11173_v45 = vmov 0  ;;  %v3527_v42 = vsub.f32 0.0, %v3207_v50 }
 0x21e   : > { %v5849_v39 = vpop.eup %5848  ;;  %v11174_v45 = vsel %vm8480_vm3, 4294967295, %v11173_v45  ;;  %v2490_v25 = vadd.f32 %v8014_v18, %v11176_v0  ;;  %v1877_v26 = vsel %vm1864_vm1, %v1850_v12, %v1851_v55  ;;  %v1979_v56 = vsel %vm8469_vm2, 0.0, %v1878_v36 }
 0x21f   : > { %2051 = vrot.lane.b32.xlu1 %v1883_v57, %s6405_s22  ;;  %2057 = vrot.lane.b32.xlu0 %v1977_v10, %s6405_s22  ;;  %v3528_v57 = vsub.f32 0.0, %v3208_v33  ;;  %11175 = vst [vmem:[#allocation28_spill] sm:$0xff] %v11174_v45  ;;  %v11178_v6 = vrot.slane %v8026_v20, 7  ;;  %v3672_v18 = vmax.f32 %v8452_v34, 0.0  ;;  %v3671_v47 = vmax.f32 %v8446_v48, 0.0  ;;  %v5851_v50 = vpop.eup %5850 }
 0x220   : > { %v3614_v12 = vadd.f32 1.0, %v5849_v39  ;;  %5868 = vpow2.f32 %v3572_v28  ;;  %v3670_v41 = vmax.f32 %v5845_v29, 0.0  ;;  %v3673_v36 = vmax.f32 %v5847_v58, 0.0 }
 0x221   : > { %v8478_v10 = vpop.permute.xlu1 %2568  ;;  %v8486_v49 = vpop.permute.xlu0 %2566  ;;  %v1876_v33 = vsel %vm1864_vm1, %v1851_v55, %v11178_v6  ;;  %5870 = vrcp.f32 %v3616_v40  ;;  %v3578_v13 = vmul.f32 1.442695, %v3528_v57  ;;  %v3576_v0 = vmul.f32 1.442695, %v3527_v42 }
 0x222   : > { %11172 = vst [vmem:[#allocation76_spill] sm:$0xff] %v8478_v10  ;;  %11177 = vst [vmem:[#allocation34_spill] sm:$0xff] %v8486_v49  ;;  %v3206_v55 = vadd.f32 %v11082_v27, %v2490_v25  ;;  %v11180_v48 = vrot.slane %v7952_v38, 7  ;;  %v11181_v34 = vrot.slane %v7966_v62, 7  ;;  %v1981_v58 = vsel %vm8480_vm3, 0.0, %v1876_v33  ;;  %v5853_v28 = vpop.eup %5852  ;;  %v11186_v62 = vld [vmem:[#allocation48_spill] sm:$0xff] }
 0x223   : > { %2063 = vrot.lane.b32.xlu1 %v1877_v26, %s6405_s22  ;;  %2061 = vrot.lane.b32.xlu0 %v1979_v56, %s6405_s22  ;;  %v10776_v26 = vrot.slane %v7999_v9, 7  ;;  %v1854_v56 = vrot.slane %v8001_v23, 7  ;;  %vm8518_vm4 = vcmp.eq.s32.totalorder %v485_v15, 0  ;;  %v11182_v23 = vmov 0  ;;  %v8527_v57 = vpop.eup %5854  ;;  %v11204_v49 = vld [vmem:[#allocation72_spill] sm:$0xff] }
 0x224   : > { %v1879_v29 = vsel %vm1864_vm1, %v11181_v34, %v11180_v48  ;;  %v11183_v23 = vsel %vm8518_vm4, 4294967295, %v11182_v23  ;;  %v11185_v25 = vrot.slane %v8012_v4, 7  ;;  %v487_v39 = vand.u32 15, %v11186_v62  ;;  %v11187_v48 = vld [vmem:[#allocation52_spill] sm:$0xff]  ;;  %v5857_v15 = vpop.eup %5856 }
 0x225   : > { %v8503_v22 = vpop.permute.xlu1 %2564  ;;  %v8506_v6 = vpop.permute.xlu0 %3034  ;;  %11184 = vst [vmem:[#allocation37_spill] sm:$0xff] %v11183_v23  ;;  %v3675_v40 = vmax.f32 %v5851_v50, 0.0  ;;  %5872 = vrcp.f32 %v3614_v12  ;;  %v3704_v42 = vmin.f32 %v3672_v18, 1.0  ;;  %v8529_v33 = vmin.f32 %v3671_v47, 1.0  ;;  %v11188_v18 = vld [vmem:[#allocation35_spill] sm:$0xff] }
 0x226   : > { %11179 = vst [vmem:[#allocation32_spill] sm:$0xff] %v8503_v22  ;;  %v1874_v38 = vsel %vm1864_vm1, %v11185_v25, %v1854_v56  ;;  %v489_v34 = vand.u32 15, %v11187_v48  ;;  %5874 = vpow2.f32 %v3578_v13  ;;  %v3702_v25 = vmin.f32 %v3670_v41, 1.0  ;;  %v5859_v50 = vpop.eup %5858 }
 0x227   : > { %2059 = vrot.lane.b32.xlu1 %v1879_v29, %s6405_s22  ;;  %2065 = vrot.lane.b32.xlu0 %v1981_v58, %s6405_s22  ;;  %v1873_v58 = vsel %vm1864_vm1, %v1854_v56, %v10776_v26  ;;  %v8538_v62 = vmin.f32 %v3673_v36, 1.0  ;;  %5876 = vpow2.f32 %v3576_v0  ;;  %v3526_v12 = vsub.f32 0.0, %v3206_v55  ;;  %v5861_v48 = vpop.eup %5860  ;;  %v11194_v55 = vld [vmem:[#allocation61_spill] sm:$0xff] }
 0x228   : > { %v2493_v47 = vadd.f32 %v8024_v54, %v11188_v18  ;;  %v1983_v13 = vsel %vm8518_vm4, 0.0, %v1874_v38  ;;  %v2495_v30 = vadd.f32 %v8046_v53, %v11190_v5  ;;  %vm8550_vm5 = vcmp.eq.s32.totalorder %v487_v39, 0  ;;  %v8556_v54 = vpop.eup %5862  ;;  %v11195_v18 = vld [vmem:[#allocation63_spill] sm:$0xff] }
 0x229   : > { %v8532_v29 = vpop.permute.xlu1 %3040  ;;  %v8542_v45 = vpop.permute.xlu0 %2562  ;;  %v11191_v41 = vmov 0  ;;  %v3676_v0 = vmax.f32 %v5853_v28, 0.0  ;;  %v8554_v36 = vmin.f32 %v3675_v40, 1.0  ;;  %v3617_v56 = vadd.f32 1.0, %v5857_v15 }
 0x22a   : > { %11189 = vst [vmem:[#allocation40_spill] sm:$0xff] %v8542_v45  ;;  %v11192_v41 = vsel %vm8550_vm5, 4294967295, %v11191_v41  ;;  %v5865_v5 = vpop.eup %5864  ;;  %v5404_v39 = vpack.c.bf16 %v3704_v42, %v3704_v42  ;;  %v5402_v28 = vpack.c.bf16 %v3702_v25, %v3702_v25  ;;  %v3574_v52 = vmul.f32 1.442695, %v3526_v12  ;;  %v11201_v12 = vld [vmem:[#allocation43_spill] sm:$0xff]  ;;  %v11208_v45 = vld [vmem:[#allocation49_spill] sm:$0xff] }
 0x22b   : > { %2071 = vrot.lane.b32.xlu1 %v1873_v58, %s6405_s22  ;;  %2069 = vrot.lane.b32.xlu0 %v1983_v13, %s6405_s22  ;;  %11193 = vst [vmem:[#allocation48_spill] sm:$0xff] %v11192_v41  ;;  %v3619_v58 = vadd.f32 1.0, %v5859_v50  ;;  %v5403_v13 = vpack.c.bf16 %v8529_v33, %v8529_v33  ;;  %v5867_v40 = vpop.eup %5866  ;;  %v3209_v8 = vadd.f32 %v11082_v27, %v2493_v47  ;;  %v11196_v38 = vrot.slane %v8012_v4, 7  ;;  %v11221_v41 = vld [vmem:[#allocation62_spill] sm:$0xff] }
 0x22c   : > { %v11197_v26 = vrot.slane %v8026_v20, 7  ;;  %v3211_v53 = vadd.f32 %v11082_v27, %v2495_v30  ;;  %vm8580_vm6 = vcmp.eq.s32.totalorder %v489_v34, 0  ;;  %v11198_v25 = vmov 0  ;;  %v11202_v30 = vld [vmem:[#allocation68_spill] sm:$0xff] }
 0x22d   : > { %v8561_v23 = vpop.permute.xlu1 %3044  ;;  %v8566_v15 = vpop.permute.xlu0 %3046  ;;  %v11199_v25 = vsel %vm8580_vm6, 4294967295, %v11198_v25  ;;  %v8584_v4 = vmin.f32 %v3676_v0, 1.0  ;;  %5878 = vrcp.f32 %v3617_v56  ;;  %v2496_v47 = vadd.f32 %v11202_v30, %v11201_v12  ;;  %v11205_v56 = vld [vmem:[#allocation106_spill] sm:$0xff]  ;;  %v11207_v12 = vld [vmem:[#allocation107_spill] sm:$0xff] }
 0x22e   : > { %v1875_v50 = vsel %vm1864_vm1, %v11197_v26, %v11196_v38  ;;  %11200 = vst [vmem:[#allocation52_spill] sm:$0xff] %v11199_v25  ;;  %v3620_v26 = vadd.f32 1.0, %v5865_v5  ;;  %v3674_v38 = vmax.f32 %v8527_v57, 0.0  ;;  %5880 = vrcp.f32 %v3619_v58  ;;  %v11209_v58 = vld [vmem:[#allocation108_spill] sm:$0xff] }
 0x22f   : > { %2067 = vrot.lane.b32.xlu1 %v1875_v50, %s6405_s22  ;;  %4507 = vrot.lane.b32.xlu0 %v5404_v39, %s6407_s24  ;;  %v5869_v50 = vpop.eup %5868  ;;  %v3618_v42 = vadd.f32 1.0, %v5867_v40  ;;  %v3677_v34 = vmax.f32 %v5861_v48, 0.0  ;;  %v3679_v33 = vmax.f32 %v8556_v54, 0.0  ;;  %5882 = vpow2.f32 %v3574_v52 }
 0x230   : > { %v5871_v0 = vpop.eup %5870  ;;  %v3529_v22 = vsub.f32 0.0, %v3209_v8  ;;  %v1858_v5 = vrot.slane %v11205_v56, 7  ;;  %v3531_v30 = vsub.f32 0.0, %v3211_v53  ;;  %v1857_v57 = vrot.slane %v11207_v12, 7  ;;  %v11212_v56 = vld [vmem:[#allocation55_spill] sm:$0xff]  ;;  %v11213_v12 = vld [vmem:[#allocation9_spill] sm:$0xff] }
 0x231   : > { %v8591_v39 = vpop.permute.xlu1 %2576  ;;  %v8596_v10 = vpop.permute.xlu0 %2574  ;;  %v2494_v40 = vadd.f32 %v11209_v58, %v11208_v45  ;;  %v11210_v48 = vrot.slane %v8086_v63, 7  ;;  %v11211_v8 = vrot.slane %v7999_v9, 7  ;;  %5884 = vrcp.f32 %v3620_v26  ;;  %v11214_v58 = vld [vmem:[#allocation22_spill] sm:$0xff] }
 0x232   : > { %11203 = vst [vmem:[#allocation61_spill] sm:$0xff] %v8591_v39  ;;  %11206 = vst [vmem:[#allocation63_spill] sm:$0xff] %v8596_v10  ;;  %v3621_v54 = vadd.f32 1.0, %v5869_v50  ;;  %v3212_v53 = vadd.f32 %v11082_v27, %v2496_v47  ;;  %v2497_v20 = vadd.f32 %v11213_v12, %v11212_v56  ;;  %v5873_v10 = vpop.eup %5872  ;;  %v11215_v45 = vld [vmem:[#allocation110_spill] sm:$0xff]  ;;  %v8618_v46 = vmin.f32 %v3677_v34, 1.0  ;;  %v11218_v34 = vld [vmem:[#allocation11_spill] sm:$0xff] }
 0x233   : > { %4505 = vrot.lane.b32.xlu1 %v5403_v13, %s6407_s24  ;;  %4503 = vrot.lane.b32.xlu0 %v5402_v28, %s6407_s24  ;;  %v1872_v52 = vsel %vm1864_vm1, %v11211_v8, %v11210_v48  ;;  %v2499_v13 = vadd.f32 %v11215_v45, %v11214_v58  ;;  %v8616_v28 = vmin.f32 %v3674_v38, 1.0  ;;  %v3680_v9 = vmax.f32 %v5871_v0, 0.0  ;;  %v5875_v37 = vpop.eup %5874  ;;  %v11219_v58 = vld [vmem:[#allocation111_spill] sm:$0xff] }
 0x234   : > { %5886 = vrcp.f32 %v3618_v42  ;;  %v3580_v26 = vmul.f32 1.442695, %v3529_v22  ;;  %v11217_v47 = vrot.slane %v11204_v49, 7  ;;  %v1985_v45 = vsel %vm8550_vm5, 0.0, %v1872_v52  ;;  %v5877_v8 = vpop.eup %5876 }
 0x235   : > { %v8614_v39 = vpop.permute.xlu1 %2572  ;;  %v8620_v50 = vpop.permute.xlu0 %3042  ;;  %v3584_v12 = vmul.f32 1.442695, %v3531_v30  ;;  %v3210_v38 = vadd.f32 %v11082_v27, %v2494_v40  ;;  %v2500_v0 = vadd.f32 %v11219_v58, %v11218_v34  ;;  %v1870_v22 = vsel %vm1864_vm1, %v1857_v57, %v1858_v5  ;;  %v11220_v40 = vld [vmem:[#allocation13_spill] sm:$0xff] }
 0x236   : > { %11216 = vst [vmem:[#allocation68_spill] sm:$0xff] %v8614_v39  ;;  %v1869_v48 = vsel %vm1864_vm1, %v1858_v5, %v11217_v47  ;;  %5888 = vrcp.f32 %v3621_v54  ;;  %v3532_v42 = vsub.f32 0.0, %v3212_v53  ;;  %v3213_v47 = vadd.f32 %v11082_v27, %v2497_v20  ;;  %v11226_v53 = vld [vmem:[#allocation24_spill] sm:$0xff] }
 0x237   : > { %2079 = vrot.lane.b32.xlu1 %v1869_v48, %s6405_s22  ;;  %2073 = vrot.lane.b32.xlu0 %v1985_v45, %s6405_s22  ;;  %v8636_v56 = vmin.f32 %v3679_v33, 1.0  ;;  %v3624_v52 = vadd.f32 1.0, %v5875_v37  ;;  %v3215_v30 = vadd.f32 %v11082_v27, %v2499_v13  ;;  %v2498_v39 = vadd.f32 %v11221_v41, %v11220_v40  ;;  %v11225_v41 = vld [vmem:[#allocation15_spill] sm:$0xff] }
 0x238   : > { %v3678_v48 = vmax.f32 %v5873_v10, 0.0  ;;  %v3623_v34 = vadd.f32 1.0, %v5877_v8  ;;  %5890 = vpow2.f32 %v3580_v26  ;;  %v11224_v5 = vrot.slane %v8086_v63, 7 }
 0x239   : > { %v8641_v58 = vpop.permute.xlu1 %3048  ;;  %v8643_v45 = vpop.permute.xlu0 %2570  ;;  %v1987_v37 = vsel %vm8580_vm6, 0.0, %v1870_v22  ;;  %5892 = vpow2.f32 %v3584_v12  ;;  %v3530_v33 = vsub.f32 0.0, %v3210_v38  ;;  %v3216_v54 = vadd.f32 %v11082_v27, %v2500_v0 }
 0x23a   : > { %11222 = vst [vmem:[#allocation72_spill] sm:$0xff] %v8641_v58  ;;  %11223 = vst [vmem:[#allocation106_spill] sm:$0xff] %v8643_v45  ;;  %v1871_v20 = vsel %vm1864_vm1, %v11224_v5, %v1857_v57  ;;  %v2501_v13 = vadd.f32 %v11226_v53, %v11225_v41  ;;  %v11227_v10 = vand.u32 15, %v11194_v55  ;;  %v11228_v63 = vmov 0  ;;  %v8666_v38 = vpop.eup %5878  ;;  %v11233_v53 = vld [vmem:[#allocation70_spill] sm:$0xff]  ;;  %v11242_v41 = vld [vmem:[#allocation85_spill] sm:$0xff] }
 0x23b   : > { %2075 = vrot.lane.b32.xlu1 %v1871_v20, %s6405_s22  ;;  %2077 = vrot.lane.b32.xlu0 %v1987_v37, %s6405_s22  ;;  %v3586_v57 = vmul.f32 1.442695, %v3532_v42  ;;  %v3533_v26 = vsub.f32 0.0, %v3213_v47  ;;  %v5408_v8 = vpack.c.bf16 %v8584_v4, %v8584_v4  ;;  %v8664_v12 = vmin.f32 %v3680_v9, 1.0  ;;  %v5881_v20 = vpop.eup %5880 }
 0x23c   : > { %vm8658_vm7 = vcmp.eq.s32.totalorder %v11227_v10, 0  ;;  %5894 = vrcp.f32 %v3624_v52  ;;  %v3535_v0 = vsub.f32 0.0, %v3215_v30  ;;  %v3214_v22 = vadd.f32 %v11082_v27, %v2498_v39  ;;  %v5883_v52 = vpop.eup %5882 }
 0x23d   : > { %v11229_v63 = vsel %vm8658_vm7, 4294967295, %v11228_v63  ;;  %v8669_v5 = vpop.permute.xlu1 %3052  ;;  %v5406_v55 = vpack.c.bf16 %v8616_v28, %v8616_v28  ;;  %5896 = vrcp.f32 %v3623_v34  ;;  %v8673_v42 = vpop.permute.xlu0 %3054  ;;  %v8679_v47 = vmin.f32 %v3678_v48, 1.0 }
 0x23e   : > { %11230 = vst [vmem:[#allocation107_spill] sm:$0xff] %v11229_v63  ;;  %11231 = vst [vmem:[#allocation108_spill] sm:$0xff] %v8669_v5  ;;  %v3582_v30 = vmul.f32 1.442695, %v3530_v33  ;;  %v3536_v39 = vsub.f32 0.0, %v3216_v54  ;;  %v3217_v37 = vadd.f32 %v11082_v27, %v2501_v13  ;;  %v11234_v28 = vpack.c.bf16 %v8538_v62, %v8538_v62  ;;  %v11239_v33 = vld [vmem:[#allocation36_spill] sm:$0xff]  ;;  %v5885_v10 = vpop.eup %5884 }
 0x23f   : > { %11232 = vst [vmem:[#allocation9_spill] sm:$0xff] %v8673_v42  ;;  %4515 = vrot.lane.b32.xlu0 %v5408_v8, %s6407_s24  ;;  %v11235_v34 = vand.u32 15, %v10909_v59  ;;  %v11236_v9 = vmov 0  ;;  %5898 = vpow2.f32 %v3586_v57  ;;  %v3588_v48 = vmul.f32 1.442695, %v3533_v26  ;;  %v11240_v54 = vld [vmem:[#allocation83_spill] sm:$0xff] }
 0x240   : > { %4509 = vrot.lane.b32.xlu1 %v11234_v28, %s6407_s24  ;;  %v2505_v13 = vadd.f32 %v11240_v54, %v11239_v33  ;;  %v3592_v40 = vmul.f32 1.442695, %v3535_v0  ;;  %v3534_v62 = vsub.f32 0.0, %v3214_v22  ;;  %v11241_v28 = vld [vmem:[#allocation29_spill] sm:$0xff]  ;;  %v3622_v45 = vadd.f32 1.0, %v5883_v52  ;;  %v11244_v42 = vld [vmem:[#allocation112_spill] sm:$0xff] }
 0x241   : > { %vm8690_vm0 = vcmp.eq.s32.totalorder %v11235_v34, 0  ;;  %v2504_v8 = vadd.f32 %v11242_v41, %v11241_v28  ;;  %v8700_v25 = vpop.permute.xlu1 %2584  ;;  %v3681_v34 = vmax.f32 %v8666_v38, 0.0  ;;  %v1863_v57 = vrot.slane %v11244_v42, 7  ;;  %v11245_v26 = vld [vmem:[#allocation113_spill] sm:$0xff]  ;;  %v8705_v58 = vpop.permute.xlu0 %2582  ;;  %v11255_v28 = vld [vmem:[#allocation39_spill] sm:$0xff] }
 0x242   : > { %v11237_v9 = vsel %vm8690_vm0, 4294967295, %v11236_v9  ;;  %11243 = vst [vmem:[#allocation111_spill] sm:$0xff] %v8700_v25  ;;  %v1862_v5 = vrot.slane %v11245_v26, 7  ;;  %11246 = vst [vmem:[#allocation62_spill] sm:$0xff] %v8705_v58  ;;  %v5887_v4 = vpop.eup %5886  ;;  %5900 = vpow2.f32 %v3582_v30  ;;  %v3594_v0 = vmul.f32 1.442695, %v3536_v39 }
 0x243   : > { %11238 = vst [vmem:[#allocation110_spill] sm:$0xff] %v11237_v9  ;;  %v3537_v22 = vsub.f32 0.0, %v3217_v37  ;;  %v11247_v41 = vpack.c.bf16 %v8554_v36, %v8554_v36  ;;  %4511 = vrot.lane.b32.xlu0 %v5406_v55, %s6407_s24  ;;  %v11248_v38 = vrot.slane %v11233_v53, 7  ;;  %v11249_v42 = vrot.slane %v11204_v49, 7  ;;  %v11254_v49 = vld [vmem:[#allocation66_spill] sm:$0xff]  ;;  %v11259_v63 = vld [vmem:[#allocation33_spill] sm:$0xff] }
 0x244   : > { %v11250_v26 = vand.u32 15, %v11195_v18  ;;  %v11251_v30 = vmov 0  ;;  %5902 = vpow2.f32 %v3588_v48  ;;  %v3221_v39 = vadd.f32 %v11082_v27, %v2505_v13  ;;  %v11260_v25 = vld [vmem:[#allocation87_spill] sm:$0xff] }
 0x245   : > { %4513 = vrot.lane.b32.xlu1 %v11247_v41, %s6407_s24  ;;  %v1868_v52 = vsel %vm1864_vm1, %v11249_v42, %v11248_v38  ;;  %v3684_v36 = vmax.f32 %v5885_v10, 0.0  ;;  %v3683_v37 = vmax.f32 %v5881_v20, 0.0  ;;  %v5889_v41 = vpop.eup %5888  ;;  %5904 = vpow2.f32 %v3592_v40  ;;  %v8730_v38 = vpop.permute.xlu1 %2580  ;;  %v11256_v40 = vld [vmem:[#allocation114_spill] sm:$0xff] }
 0x246   : > { %vm8722_vm5 = vcmp.eq.s32.totalorder %v11250_v26, 0  ;;  %v3590_v55 = vmul.f32 1.442695, %v3534_v62  ;;  %v3220_v54 = vadd.f32 %v11082_v27, %v2504_v8  ;;  %v2503_v33 = vadd.f32 %v11255_v28, %v11254_v49  ;;  %v8732_v18 = vpop.permute.xlu0 %3050  ;;  %v5891_v13 = vpop.eup %5890  ;;  %v11257_v28 = vld [vmem:[#allocation64_spill] sm:$0xff] }
 0x247   : > { %v11252_v30 = vsel %vm8722_vm5, 4294967295, %v11251_v30  ;;  %5906 = vrcp.f32 %v3622_v45  ;;  %v1865_v48 = vsel %vm1864_vm1, %v1862_v5, %v1863_v57  ;;  %v1989_v10 = vsel %vm8658_vm7, 0.0, %v1868_v52  ;;  %v5893_v26 = vpop.eup %5892 }
 0x248   : > { %11253 = vst [vmem:[#allocation24_spill] sm:$0xff] %v11252_v30  ;;  %v3682_v20 = vmax.f32 %v5887_v4, 0.0  ;;  %5908 = vpow2.f32 %v3594_v0  ;;  %v1861_v62 = vrot.slane %v11256_v40, 7  ;;  %v3596_v8 = vmul.f32 1.442695, %v3537_v22  ;;  %2081 = vrot.lane.b32.xlu0 %v1989_v10, %s6405_s22 }
 0x249   : > { %2087 = vrot.lane.b32.xlu1 %v1865_v48, %s6405_s22  ;;  %v11258_v45 = vrot.slane %v11257_v28, 7  ;;  %v3541_v49 = vsub.f32 0.0, %v3221_v39  ;;  %v8745_v58 = vmin.f32 %v3681_v34, 1.0  ;;  %v8747_v52 = vmin.f32 %v3683_v37, 1.0  ;;  %v8750_v40 = vpop.permute.xlu1 %3056  ;;  %v5895_v10 = vpop.eup %5894 }
 0x24a   : > { %v3685_v4 = vmax.f32 %v5889_v41, 0.0  ;;  %5910 = vpow2.f32 %v3590_v55  ;;  %v3540_v0 = vsub.f32 0.0, %v3220_v54  ;;  %v3219_v22 = vadd.f32 %v11082_v27, %v2503_v33  ;;  %v5897_v33 = vpop.eup %5896 }
 0x24b   : > { %v1896_v42 = vsel %vm1864_vm1, %v1863_v57, %v11258_v45  ;;  %v8752_v48 = vmin.f32 %v3684_v36, 1.0  ;;  %v3625_v28 = vadd.f32 1.0, %v5891_v13  ;;  %v2502_v57 = vadd.f32 %v11260_v25, %v11259_v63  ;;  %v8756_v45 = vpop.permute.xlu0 %2578 }
 0x24c   : > { %v11261_v34 = vrot.slane %v11233_v53, 7  ;;  %v1961_v54 = vsel %vm8690_vm0, 0.0, %v1896_v42  ;;  %v3627_v37 = vadd.f32 1.0, %v5893_v26  ;;  %5912 = vpow2.f32 %v3596_v8  ;;  %v11262_v53 = vld [vmem:[#allocation79_spill] sm:$0xff]  ;;  %v5899_v26 = vpop.eup %5898 }
 0x24d   : > { %2025 = vrot.lane.b32.xlu0 %v1961_v54, %s6405_s22  ;;  %v1866_v25 = vsel %vm1864_vm1, %v1861_v62, %v1862_v5  ;;  %v8768_v36 = vmin.f32 %v3682_v20, 1.0  ;;  %v3604_v41 = vmul.f32 1.442695, %v3541_v49  ;;  %v3115_v55 = vadd.f32 %v8249_v35, %v11262_v53  ;;  %v11263_v20 = vld [vmem:[#allocation75_spill] sm:$0xff] }
 0x24e   : > { %v1867_v39 = vsel %vm1864_vm1, %v11261_v34, %v1861_v62  ;;  %v8774_v42 = vmin.f32 %v3685_v4, 1.0  ;;  %v3602_v8 = vmul.f32 1.442695, %v3540_v0  ;;  %v3539_v34 = vsub.f32 0.0, %v3219_v22 }
 0x24f   : > { %2083 = vrot.lane.b32.xlu1 %v1867_v39, %s6405_s22  ;;  %v8776_v39 = vpop.permute.xlu1 %3060  ;;  %v3688_v5 = vmax.f32 %v5895_v10, 0.0  ;;  %5914 = vrcp.f32 %v3625_v28  ;;  %v3218_v49 = vadd.f32 %v11082_v27, %v2502_v57  ;;  %v3116_v35 = vadd.f32 %v8262_v11, %v11263_v20  ;;  %v8783_v62 = vpop.permute.xlu0 %3062 }
 0x250   : > { %v1991_v4 = vsel %vm8722_vm5, 0.0, %v1866_v25  ;;  %5916 = vrcp.f32 %v3627_v37  ;;  %v11264_v0 = vpack.c.bf16 %v8618_v46, %v8618_v46  ;;  %v3687_v11 = vmax.f32 %v5897_v33, 0.0  ;;  %v5901_v28 = vpop.eup %5900  ;;  %v11266_v33 = vld [vmem:[#allocation10_spill] sm:$0xff] }
 0x251   : > { %2085 = vrot.lane.b32.xlu0 %v1991_v4, %s6405_s22  ;;  %v3628_v57 = vadd.f32 1.0, %v5899_v26  ;;  %5918 = vpow2.f32 %v3604_v41  ;;  %v3255_v25 = vadd.f32 %v11082_v27, %v3115_v55  ;;  %v5903_v54 = vpop.eup %5902  ;;  %v3600_v46 = vmul.f32 1.442695, %v3539_v34  ;;  %v11267_v26 = vld [vmem:[#allocation86_spill] sm:$0xff]  ;;  %v11269_v34 = vld [vmem:[#allocation73_spill] sm:$0xff]  ;;  %v11270_v4 = vld [vmem:[#allocation80_spill] sm:$0xff] }
 0x252   : > { %5920 = vpow2.f32 %v3602_v8  ;;  %v8802_v22 = vmin.f32 %v3688_v5, 1.0  ;;  %v5905_v53 = vpop.eup %5904  ;;  %v3538_v10 = vsub.f32 0.0, %v3218_v49  ;;  %v2635_v20 = vrot.slane %v11266_v33, 7 }
 0x253   : > { %4517 = vrot.lane.b32.xlu1 %v11264_v0, %s6407_s24  ;;  %v11265_v0 = vld [vmem:[#allocation90_spill] sm:$0xff]  ;;  %v8800_v13 = vpop.permute.xlu1 %2592  ;;  %v3256_v41 = vadd.f32 %v11082_v27, %v3116_v35  ;;  %v3114_v55 = vadd.f32 %v8304_v43, %v11267_v26  ;;  %v8808_v63 = vpop.permute.xlu0 %2590  ;;  %v3626_v8 = vadd.f32 1.0, %v5901_v28  ;;  %v2636_v30 = vrot.slane %v11269_v34, 7  ;;  %v11273_v34 = vld [vmem:[#allocation95_spill] sm:$0xff] }
 0x254   : > { %11268 = vst [vmem:[#allocation70_spill] sm:$0xff] %v8808_v63  ;;  %v5907_v37 = vpop.eup %5906  ;;  %v3117_v9 = vadd.f32 %v8321_v16, %v11270_v4  ;;  %v11271_v5 = vpack.c.bf16 %v8636_v56, %v8636_v56  ;;  %v11272_v49 = vpack.c.bf16 %v8664_v12, %v8664_v12  ;;  %v8821_v43 = vmin.f32 %v3687_v11, 1.0  ;;  %v11276_v4 = vld [vmem:[#allocation92_spill] sm:$0xff] }
 0x255   : > { %v5909_v35 = vpop.eup %5908  ;;  %5922 = vrcp.f32 %v3628_v57  ;;  %v3629_v28 = vadd.f32 1.0, %v5903_v54  ;;  %v3959_v33 = vsub.f32 0.0, %v3255_v25  ;;  %v3119_v26 = vadd.f32 %v8351_v61, %v11273_v34 }
 0x256   : > { %4523 = vrot.lane.b32.xlu0 %v11272_v49, %s6407_s24  ;;  %v3631_v16 = vadd.f32 1.0, %v5905_v53  ;;  %5924 = vpow2.f32 %v3600_v46  ;;  %v3598_v49 = vmul.f32 1.442695, %v3538_v10  ;;  %v3960_v63 = vsub.f32 0.0, %v3256_v41 }
 0x257   : > { %4521 = vrot.lane.b32.xlu1 %v11271_v5, %s6407_s24  ;;  %v8826_v56 = vpop.permute.xlu1 %2588  ;;  %v11274_v5 = vrot.slane %v11265_v0, 7  ;;  %v5911_v11 = vpop.eup %5910  ;;  %v3254_v54 = vadd.f32 %v11082_v27, %v3114_v55  ;;  %v2695_v61 = vsel %vm1864_vm1, %v2635_v20, %v2636_v30  ;;  %5926 = vrcp.f32 %v3626_v8 }
 0x258   : > { %v8833_v57 = vpop.permute.xlu0 %3058  ;;  %v3632_v53 = vadd.f32 1.0, %v5909_v35  ;;  %v3257_v25 = vadd.f32 %v11082_v27, %v3117_v9  ;;  %v11275_v46 = vpack.c.bf16 %v8679_v47, %v8679_v47  ;;  %v3686_v10 = vmax.f32 %v5907_v37, 0.0 }
 0x259   : > { %v2694_v12 = vsel %vm1864_vm1, %v2636_v30, %v11274_v5  ;;  %v5913_v41 = vpop.eup %5912  ;;  %5928 = vrcp.f32 %v3629_v28  ;;  %v3992_v55 = vmul.f32 1.442695, %v3959_v33  ;;  %v3259_v5 = vadd.f32 %v11082_v27, %v3119_v26 }
 0x25a   : > { %4519 = vrot.lane.b32.xlu0 %v11275_v46, %s6407_s24  ;;  %v3120_v30 = vadd.f32 %v8358_v51, %v11276_v4  ;;  %5930 = vrcp.f32 %v3631_v16  ;;  %v3630_v8 = vadd.f32 1.0, %v5911_v11  ;;  %v11277_v9 = vrot.slane %v8241_v14, 7  ;;  %v11279_v46 = vld [vmem:[#allocation93_spill] sm:$0xff]  ;;  %v11280_v4 = vld [vmem:[#allocation94_spill] sm:$0xff] }
 0x25b   : > { %2768 = vrot.lane.b32.xlu1 %v2694_v12, %s6405_s22  ;;  %v8846_v35 = vpop.permute.xlu1 %3064  ;;  %v2700_v37 = vsel %vm8208_vm9, 0.0, %v2695_v61  ;;  %5932 = vpow2.f32 %v3598_v49  ;;  %v3994_v28 = vmul.f32 1.442695, %v3960_v63  ;;  %v3958_v33 = vsub.f32 0.0, %v3254_v54  ;;  %v11281_v49 = vld [vmem:[#allocation99_spill] sm:$0xff] }
 0x25c   : > { %v2696_v12 = vsel %vm1864_vm1, %v11277_v9, %v2635_v20  ;;  %v3118_v26 = vadd.f32 %v8408_v21, %v11279_v46  ;;  %v8856_v34 = vpop.permute.xlu0 %2586  ;;  %v8858_v51 = vpop.eup %5914  ;;  %5934 = vrcp.f32 %v3632_v53  ;;  %v3633_v16 = vadd.f32 1.0, %v5913_v41  ;;  %v11282_v53 = vld [vmem:[#allocation96_spill] sm:$0xff] }
 0x25d   : > { %v3961_v11 = vsub.f32 0.0, %v3257_v25  ;;  %v3121_v14 = vadd.f32 %v8429_v44, %v11280_v4  ;;  %v8864_v20 = vpop.eup %5916  ;;  %5936 = vpow2.f32 %v3992_v55  ;;  %v3963_v63 = vsub.f32 0.0, %v3259_v5 }
 0x25e   : > { %2766 = vrot.lane.b32.xlu0 %v2700_v37, %s6405_s22  ;;  %v3260_v21 = vadd.f32 %v11082_v27, %v3120_v30  ;;  %v3123_v54 = vadd.f32 %v8456_v7, %v11281_v49  ;;  %v5919_v61 = vpop.eup %5918  ;;  %5938 = vrcp.f32 %v3630_v8  ;;  %v3124_v25 = vadd.f32 %v8460_v60, %v11282_v53  ;;  %v11283_v37 = vld [vmem:[#allocation97_spill] sm:$0xff] }
 0x25f   : > { %2764 = vrot.lane.b32.xlu1 %v2696_v12, %s6405_s22  ;;  %v8871_v41 = vpop.permute.xlu1 %2031  ;;  %v8875_v9 = vmin.f32 %v3686_v10, 1.0  ;;  %v5921_v12 = vpop.eup %5920  ;;  %5940 = vpow2.f32 %v3994_v28  ;;  %v3990_v55 = vmul.f32 1.442695, %v3958_v33  ;;  %v3258_v5 = vadd.f32 %v11082_v27, %v3118_v26 }
 0x260   : > { %v8878_v30 = vpop.permute.xlu0 %3070  ;;  %v3689_v7 = vmax.f32 %v8858_v51, 0.0  ;;  %v3996_v8 = vmul.f32 1.442695, %v3961_v11  ;;  %v3261_v60 = vadd.f32 %v11082_v27, %v3121_v14  ;;  %v3122_v49 = vadd.f32 %v8506_v6, %v11283_v37 }
 0x261   : > { %v11284_v10 = vpack.c.bf16 %v8745_v58, %v8745_v58  ;;  %v11285_v28 = vpack.c.bf16 %v8752_v48, %v8752_v48  ;;  %5942 = vrcp.f32 %v3633_v16  ;;  %v4000_v33 = vmul.f32 1.442695, %v3963_v63 }
 0x262   : > { %v3964_v26 = vsub.f32 0.0, %v3260_v21  ;;  %v3263_v51 = vadd.f32 %v11082_v27, %v3123_v54  ;;  %v8894_v11 = vpop.eup %5922  ;;  %v3637_v14 = vadd.f32 1.0, %v5919_v61  ;;  %v10795_v6 = vrot.slane %v8279_v32, 7 }
 0x263   : > { %4525 = vrot.lane.b32.xlu1 %v11284_v10, %s6407_s24  ;;  %4531 = vrot.lane.b32.xlu0 %v11285_v28, %s6407_s24  ;;  %v2640_v44 = vrot.slane %v8281_v24, 7  ;;  %v3264_v58 = vadd.f32 %v11082_v27, %v3124_v25  ;;  %v8899_v10 = vpop.permute.xlu1 %3068  ;;  %v5925_v47 = vpop.eup %5924  ;;  %v3636_v53 = vadd.f32 1.0, %v5921_v12  ;;  %v2639_v48 = vrot.slane %v8295_v2, 7 }
 0x264   : > { %5944 = vpow2.f32 %v3990_v55  ;;  %v3962_v16 = vsub.f32 0.0, %v3258_v5  ;;  %v8902_v63 = vpop.permute.xlu0 %2598  ;;  %v3965_v21 = vsub.f32 0.0, %v3261_v60  ;;  %v3262_v54 = vadd.f32 %v11082_v27, %v3122_v49  ;;  %v8919_v55 = vpop.eup %5926 }
 0x265   : > { %11286 = vst [vmem:[#allocation83_spill] sm:$0xff] %v8902_v63  ;;  %5946 = vpow2.f32 %v3996_v8  ;;  %v11287_v24 = vpack.c.bf16 %v8747_v52, %v8747_v52  ;;  %v11288_v61 = vpack.c.bf16 %v8768_v36, %v8768_v36  ;;  %v11289_v2 = vrot.slane %v8328_v17, 7  ;;  %v11291_v36 = vld [vmem:[#allocation98_spill] sm:$0xff] }
 0x266   : > { %v11290_v25 = vrot.slane %v11265_v0, 7  ;;  %5948 = vpow2.f32 %v4000_v33  ;;  %v4002_v49 = vmul.f32 1.442695, %v3964_v26  ;;  %v3967_v5 = vsub.f32 0.0, %v3263_v51  ;;  %v8922_v8 = vpop.eup %5928 }
 0x267   : > { %4529 = vrot.lane.b32.xlu1 %v11287_v24, %s6407_s24  ;;  %4527 = vrot.lane.b32.xlu0 %v11288_v61, %s6407_s24  ;;  %v3691_v52 = vmax.f32 %v8864_v20, 0.0  ;;  %v3635_v60 = vadd.f32 1.0, %v5925_v47  ;;  %v3968_v28 = vsub.f32 0.0, %v3264_v58  ;;  %v3125_v24 = vadd.f32 %v8532_v29, %v11291_v36  ;;  %v8926_v61 = vpop.permute.xlu1 %2027 }
 0x268   : > { %v2693_v12 = vsel %vm1864_vm1, %v11290_v25, %v11289_v2  ;;  %v2690_v0 = vsel %vm1864_vm1, %v2640_v44, %v10795_v6  ;;  %v8932_v2 = vpop.eup %5930  ;;  %5950 = vrcp.f32 %v3637_v14  ;;  %v3998_v33 = vmul.f32 1.442695, %v3962_v16  ;;  %v8934_v26 = vpop.permute.xlu0 %3066 }
 0x269   : > { %11292 = vst [vmem:[#allocation85_spill] sm:$0xff] %v8934_v26  ;;  %v2702_v20 = vsel %vm8257_vm10, 0.0, %v2693_v12  ;;  %v2691_v47 = vsel %vm1864_vm1, %v2639_v48, %v2640_v44  ;;  %v5933_v29 = vpop.eup %5932  ;;  %5952 = vrcp.f32 %v3636_v53  ;;  %v4004_v51 = vmul.f32 1.442695, %v3965_v21  ;;  %v11337_v26 = vld [vmem:[#allocation63_spill] sm:$0xff] }
 0x26a   : > { %v3966_v58 = vsub.f32 0.0, %v3262_v54  ;;  %v8942_v25 = vmin.f32 %v3689_v7, 1.0  ;;  %v8944_v14 = vpop.eup %5934  ;;  %5954 = vpow2.f32 %v4002_v49  ;;  %v4008_v16 = vmul.f32 1.442695, %v3967_v5  ;;  %v11295_v49 = vld [vmem:[#allocation103_spill] sm:$0xff] }
 0x26b   : > { %2776 = vrot.lane.b32.xlu1 %v2690_v0, %s6405_s22  ;;  %2770 = vrot.lane.b32.xlu0 %v2702_v20, %s6405_s22  ;;  %v3692_v19 = vmax.f32 %v8894_v11, 0.0  ;;  %v8947_v12 = vmin.f32 %v3691_v52, 1.0  ;;  %v5937_v6 = vpop.eup %5936  ;;  %5956 = vrcp.f32 %v3635_v60  ;;  %v4010_v44 = vmul.f32 1.442695, %v3968_v28  ;;  %v8950_v21 = vpop.permute.xlu1 %2600 }
 0x26c   : > { %v3265_v53 = vadd.f32 %v11082_v27, %v3125_v24  ;;  %11293 = vst [vmem:[#allocation112_spill] sm:$0xff] %v8950_v21  ;;  %v2704_v0 = vsel %vm8299_vm11, 0.0, %v2691_v47  ;;  %v8954_v7 = vpop.eup %5938  ;;  %v3634_v20 = vadd.f32 1.0, %v5933_v29  ;;  %5958 = vpow2.f32 %v3998_v33  ;;  %v8958_v11 = vpop.permute.xlu0 %2594 }
 0x26d   : > { %v3127_v5 = vadd.f32 %v8561_v23, %v11295_v49  ;;  %11296 = vst [vmem:[#allocation113_spill] sm:$0xff] %v8958_v11  ;;  %v11297_v52 = vrot.slane %v8328_v17, 7  ;;  %v5941_v28 = vpop.eup %5940  ;;  %5960 = vpow2.f32 %v4004_v51  ;;  %v4006_v24 = vmul.f32 1.442695, %v3966_v58  ;;  %v11298_v58 = vld [vmem:[#allocation100_spill] sm:$0xff] }
 0x26e   : > { %v5419_v33 = vpack.c.bf16 %v8821_v43, %v8821_v43  ;;  %v3690_v47 = vmax.f32 %v8919_v55, 0.0  ;;  %v4055_v23 = vadd.f32 1.0, %v5937_v6  ;;  %5962 = vpow2.f32 %v4008_v16 }
 0x26f   : > { %v2692_v60 = vsel %vm1864_vm1, %v11297_v52, %v2639_v48  ;;  %2774 = vrot.lane.b32.xlu0 %v2704_v0, %s6405_s22  ;;  %v5418_v17 = vpack.c.bf16 %v8875_v9, %v8875_v9  ;;  %v3693_v29 = vmax.f32 %v8922_v8, 0.0  ;;  %v8972_v48 = vpop.eup %5942  ;;  %5964 = vpow2.f32 %v4010_v44  ;;  %v8976_v0 = vpop.permute.xlu1 %2596 }
 0x270   : > { %2772 = vrot.lane.b32.xlu1 %v2692_v60, %s6405_s22  ;;  %v3969_v51 = vsub.f32 0.0, %v3265_v53  ;;  %v3128_v54 = vadd.f32 %v8566_v15, %v11298_v58  ;;  %11299 = vst [vmem:[#allocation39_spill] sm:$0xff] %v8976_v0  ;;  %5966 = vrcp.f32 %v3634_v20  ;;  %v3267_v6 = vadd.f32 %v11082_v27, %v3127_v5  ;;  %v8981_v55 = vpop.permute.xlu0 %2029 }
 0x271   : > { %v8983_v9 = vmin.f32 %v3692_v19, 1.0  ;;  %v5945_v16 = vpop.eup %5944  ;;  %v4056_v44 = vadd.f32 1.0, %v5941_v28  ;;  %v2642_v53 = vrot.slane %v8435_v1, 7  ;;  %5968 = vpow2.f32 %v4006_v24 }
 0x272   : > { %v11300_v15 = vpack.c.bf16 %v8774_v42, %v8774_v42  ;;  %v11301_v20 = vpack.c.bf16 %v8802_v22, %v8802_v22  ;;  %v8996_v19 = vmin.f32 %v3690_v47, 1.0  ;;  %v5947_v5 = vpop.eup %5946  ;;  %5970 = vrcp.f32 %v4055_v23  ;;  %v11302_v42 = vld [vmem:[#allocation20_spill] sm:$0xff] }
 0x273   : > { %v8999_v60 = vmin.f32 %v3693_v29, 1.0  ;;  %v3695_v1 = vmax.f32 %v8932_v2, 0.0  ;;  %v5949_v28 = vpop.eup %5948  ;;  %v2644_v24 = vrot.slane %v8386_v31, 7  ;;  %v4012_v8 = vmul.f32 1.442695, %v3969_v51  ;;  %v9005_v22 = vpop.permute.xlu1 %3072 }
 0x274   : > { %4533 = vrot.lane.b32.xlu1 %v11300_v15, %s6407_s24  ;;  %4539 = vrot.lane.b32.xlu0 %v11301_v20, %s6407_s24  ;;  %v2643_v15 = vrot.slane %v11302_v42, 7  ;;  %v3268_v43 = vadd.f32 %v11082_v27, %v3128_v54  ;;  %11303 = vst [vmem:[#allocation114_spill] sm:$0xff] %v9005_v22  ;;  %v4054_v47 = vadd.f32 1.0, %v5945_v16  ;;  %v3971_v20 = vsub.f32 0.0, %v3267_v6  ;;  %v9007_v49 = vpop.permute.xlu0 %3078 }
 0x275   : > { %11304 = vst [vmem:[#allocation64_spill] sm:$0xff] %v9007_v49  ;;  %v3696_v29 = vmax.f32 %v8944_v14, 0.0  ;;  %v5951_v2 = vpop.eup %5950  ;;  %5972 = vrcp.f32 %v4056_v44  ;;  %v4057_v52 = vadd.f32 1.0, %v5947_v5  ;;  %v11305_v31 = vrot.slane %v8279_v32, 7  ;;  %v11308_v44 = vld [vmem:[#allocation101_spill] sm:$0xff] }
 0x276   : > { %v3694_v54 = vmax.f32 %v8954_v7, 0.0  ;;  %v9019_v6 = vpop.eup %5952  ;;  %v4059_v16 = vadd.f32 1.0, %v5949_v28  ;;  %v9025_v5 = vmin.f32 %v3695_v1, 1.0  ;;  %5974 = vpow2.f32 %v4012_v8 }
 0x277   : > { %v2689_v51 = vsel %vm1864_vm1, %v11305_v31, %v2642_v53  ;;  %v9027_v32 = vpop.permute.xlu1 %3080  ;;  %v11307_v42 = vrot.slane %v8383_v3, 7  ;;  %v2687_v28 = vsel %vm1864_vm1, %v2643_v15, %v2644_v24  ;;  %5976 = vrcp.f32 %v4054_v47 }
 0x278   : > { %4537 = vrot.lane.b32.xlu1 %v5419_v33, %s6407_s24  ;;  %4535 = vrot.lane.b32.xlu0 %v5418_v17, %s6407_s24  ;;  %v5955_v33 = vpop.eup %5954  ;;  %v3972_v17 = vsub.f32 0.0, %v3268_v43  ;;  %11306 = vst [vmem:[#allocation87_spill] sm:$0xff] %v9027_v32  ;;  %v4016_v14 = vmul.f32 1.442695, %v3971_v20  ;;  %v3126_v1 = vadd.f32 %v8620_v50, %v11308_v44  ;;  %v9039_v23 = vpop.permute.xlu0 %2033  ;;  %v2706_v8 = vsel %vm8323_vm12, 0.0, %v2689_v51  ;;  %v11312_v32 = vld [vmem:[#allocation72_spill] sm:$0xff] }
 0x279   : > { %v2686_v7 = vsel %vm1864_vm1, %v2644_v24, %v11307_v42  ;;  %v9035_v31 = vpop.eup %5956  ;;  %5978 = vrcp.f32 %v4057_v52  ;;  %v9045_v42 = vmin.f32 %v3696_v29, 1.0  ;;  %v9047_v24 = vmin.f32 %v3694_v54, 1.0 }
 0x27a   : > { %v5959_v49 = vpop.eup %5958  ;;  %v3697_v47 = vmax.f32 %v8972_v48, 0.0  ;;  %5980 = vrcp.f32 %v4059_v16  ;;  %v4060_v50 = vadd.f32 1.0, %v5955_v33  ;;  %v3701_v43 = vmax.f32 %v5951_v2, 0.0  ;;  %v11311_v33 = vld [vmem:[#allocation102_spill] sm:$0xff] }
 0x27b   : > { %v5961_v20 = vpop.eup %5960  ;;  %v4018_v58 = vmul.f32 1.442695, %v3972_v17  ;;  %v9052_v52 = vpop.permute.xlu1 %2039  ;;  %v2708_v54 = vsel %vm8344_vm8, 0.0, %v2687_v28  ;;  %v4058_v44 = vadd.f32 1.0, %v5959_v49  ;;  %5982 = vpow2.f32 %v4016_v14  ;;  %v11315_v28 = vld [vmem:[#allocation108_spill] sm:$0xff] }
 0x27c   : > { %2784 = vrot.lane.b32.xlu1 %v2686_v7, %s6405_s22  ;;  %2778 = vrot.lane.b32.xlu0 %v2706_v8, %s6405_s22  ;;  %v5963_v51 = vpop.eup %5962  ;;  %v2688_v7 = vsel %vm1864_vm1, %v2642_v53, %v2643_v15  ;;  %v3700_v8 = vmax.f32 %v9019_v6, 0.0  ;;  %v3266_v16 = vadd.f32 %v11082_v27, %v3126_v1  ;;  %v3129_v2 = vadd.f32 %v11312_v32, %v11311_v33  ;;  %v9062_v37 = vpop.permute.xlu0 %3074  ;;  %v11314_v32 = vld [vmem:[#allocation54_spill] sm:$0xff] }
 0x27d   : > { %v5965_v48 = vpop.eup %5964  ;;  %11313 = vst [vmem:[#allocation90_spill] sm:$0xff] %v9062_v37  ;;  %v4061_v36 = vadd.f32 1.0, %v5961_v20  ;;  %v9070_v15 = vmin.f32 %v3697_v47, 1.0  ;;  %5984 = vrcp.f32 %v4060_v50  ;;  %v4063_v14 = vadd.f32 1.0, %v5963_v51  ;;  %v11317_v37 = vld [vmem:[#allocation9_spill] sm:$0xff] }
 0x27e   : > { %v5967_v17 = vpop.eup %5966  ;;  %v3131_v1 = vadd.f32 %v11315_v28, %v11314_v32  ;;  %v9074_v29 = vmin.f32 %v3701_v43, 1.0  ;;  %5986 = vpow2.f32 %v4018_v58  ;;  %v3699_v49 = vmax.f32 %v9035_v31, 0.0  ;;  %v11319_v28 = vld [vmem:[#allocation40_spill] sm:$0xff] }
 0x27f   : > { %v5969_v6 = vpop.eup %5968  ;;  %v9078_v53 = vpop.permute.xlu1 %3076  ;;  %5988 = vrcp.f32 %v4058_v44  ;;  %v3970_v47 = vsub.f32 0.0, %v3266_v16  ;;  %v3269_v50 = vadd.f32 %v11082_v27, %v3129_v2  ;;  %v9084_v46 = vmin.f32 %v3700_v8, 1.0  ;;  %v11322_v16 = vld [vmem:[#allocation76_spill] sm:$0xff] }
 0x280   : > { %2780 = vrot.lane.b32.xlu1 %v2688_v7, %s6405_s22  ;;  %2782 = vrot.lane.b32.xlu0 %v2708_v54, %s6405_s22  ;;  %v5971_v20 = vpop.eup %5970  ;;  %v4064_v7 = vadd.f32 1.0, %v5965_v48  ;;  %v11316_v54 = vld [vmem:[#allocation104_spill] sm:$0xff]  ;;  %11318 = vst [vmem:[#allocation10_spill] sm:$0xff] %v9078_v53  ;;  %v9082_v51 = vpop.permute.xlu0 %2037  ;;  %5990 = vrcp.f32 %v4061_v36  ;;  %v4062_v43 = vadd.f32 1.0, %v5969_v6  ;;  %v11321_v58 = vpack.c.bf16 %v8983_v9, %v8983_v9  ;;  %v11323_v6 = vld [vmem:[#allocation34_spill] sm:$0xff] }
 0x281   : > { %v3132_v33 = vadd.f32 %v11317_v37, %v11316_v54  ;;  %v11320_v37 = vpack.c.bf16 %v8942_v25, %v8942_v25  ;;  %v3698_v44 = vmax.f32 %v5967_v17, 0.0  ;;  %5992 = vrcp.f32 %v4063_v14  ;;  %v11324_v53 = vld [vmem:[#allocation32_spill] sm:$0xff] }
 0x282   : > { %v5973_v31 = vpop.eup %5972  ;;  %v3271_v36 = vadd.f32 %v11082_v27, %v3131_v1  ;;  %v4119_v2 = vmax.f32 %v5971_v20, 0.0  ;;  %5994 = vrcp.f32 %v4064_v7  ;;  %v2648_v48 = vrot.slane %v11323_v6, 7 }
 0x283   : > { %v2647_v54 = vrot.slane %v11324_v53, 7  ;;  %v3272_v25 = vadd.f32 %v11082_v27, %v3132_v33  ;;  %v5975_v32 = vpop.eup %5974  ;;  %v4014_v9 = vmul.f32 1.442695, %v3970_v47  ;;  %v9106_v8 = vmin.f32 %v3699_v49, 1.0 }
 0x284   : > { %4541 = vrot.lane.b32.xlu1 %v11320_v37, %s6407_s24  ;;  %4547 = vrot.lane.b32.xlu0 %v11321_v58, %s6407_s24  ;;  %v9100_v37 = vpop.permute.xlu1 %2035  ;;  %v3973_v58 = vsub.f32 0.0, %v3269_v50  ;;  %v9102_v17 = vpop.permute.xlu0 %2041  ;;  %5996 = vrcp.f32 %v4062_v43  ;;  %v11325_v53 = vpack.c.bf16 %v8947_v12, %v8947_v12  ;;  %v11326_v33 = vpack.c.bf16 %v8996_v19, %v8996_v19 }
 0x285   : > { %v5977_v1 = vpop.eup %5976  ;;  %v11327_v20 = vrot.slane %v11319_v28, 7  ;;  %v11328_v7 = vrot.slane %v8383_v3, 7  ;;  %v9122_v47 = vmin.f32 %v3698_v44, 1.0  ;;  %v4120_v50 = vmax.f32 %v5973_v31, 0.0 }
 0x286   : > { %v5979_v43 = vpop.eup %5978  ;;  %v3975_v6 = vsub.f32 0.0, %v3271_v36  ;;  %v9128_v19 = vmin.f32 %v4119_v2, 1.0  ;;  %v4065_v14 = vadd.f32 1.0, %v5975_v32  ;;  %v3976_v4 = vsub.f32 0.0, %v3272_v25  ;;  %v11333_v25 = vld [vmem:[#allocation105_spill] sm:$0xff] }
 0x287   : > { %v2685_v49 = vsel %vm1864_vm1, %v11328_v7, %v11327_v20  ;;  %v11329_v20 = vrot.slane %v11322_v16, 7  ;;  %v2683_v31 = vsel %vm1864_vm1, %v2647_v54, %v2648_v48  ;;  %5998 = vpow2.f32 %v4014_v9 }
 0x288   : > { %4545 = vrot.lane.b32.xlu1 %v11325_v53, %s6407_s24  ;;  %4543 = vrot.lane.b32.xlu0 %v11326_v33, %s6407_s24  ;;  %v5981_v33 = vpop.eup %5980  ;;  %v9130_v3 = vpop.permute.xlu1 %2047  ;;  %v4020_v36 = vmul.f32 1.442695, %v3973_v58  ;;  %v2710_v2 = vsel %vm8353_vm13, 0.0, %v2685_v49  ;;  %v4118_v12 = vmax.f32 %v5977_v1, 0.0  ;;  %v4121_v9 = vmax.f32 %v5979_v43, 0.0  ;;  %v11336_v1 = vld [vmem:[#allocation61_spill] sm:$0xff] }
 0x289   : > { %v2682_v44 = vsel %vm1864_vm1, %v2648_v48, %v11329_v20  ;;  %v9138_v7 = vpop.permute.xlu0 %2045  ;;  %v5983_v32 = vpop.eup %5982  ;;  %v9148_v48 = vmin.f32 %v4120_v50, 1.0  ;;  %v4024_v58 = vmul.f32 1.442695, %v3975_v6  ;;  %v2712_v53 = vsel %vm8373_vm14, 0.0, %v2683_v31 }
 0x28a   : > { %v4123_v49 = vmax.f32 %v5981_v33, 0.0  ;;  %6000 = vrcp.f32 %v4065_v14  ;;  %v4026_v0 = vmul.f32 1.442695, %v3976_v4  ;;  %v3130_v11 = vadd.f32 %v8732_v18, %v11333_v25  ;;  %v11338_v18 = vld [vmem:[#allocation42_spill] sm:$0xff] }
 0x28b   : > { %v4067_v43 = vadd.f32 1.0, %v5983_v32  ;;  %6002 = vpow2.f32 %v4020_v36  ;;  %v11334_v22 = vrot.slane %v11319_v28, 7  ;;  %v9165_v31 = vmin.f32 %v4118_v12, 1.0 }
 0x28c   : > { %2792 = vrot.lane.b32.xlu1 %v2682_v44, %s6405_s22  ;;  %2786 = vrot.lane.b32.xlu0 %v2710_v2, %s6405_s22  ;;  %v5985_v44 = vpop.eup %5984  ;;  %v11332_v2 = vld [vmem:[#allocation68_spill] sm:$0xff]  ;;  %v9157_v20 = vpop.permute.xlu1 %2043  ;;  %v2652_v21 = vrot.slane %v11337_v26, 7  ;;  %v3133_v25 = vadd.f32 %v8750_v40, %v11338_v18  ;;  %v9173_v36 = vmin.f32 %v4121_v9, 1.0  ;;  %6004 = vpow2.f32 %v4024_v58 }
 0x28d   : > { %v5987_v50 = vpop.eup %5986  ;;  %v9159_v6 = vpop.permute.xlu0 %2049  ;;  %v2684_v33 = vsel %vm1864_vm1, %v11334_v22, %v2647_v54  ;;  %11335 = vst [vmem:[#allocation73_spill] sm:$0xff] %v9165_v31  ;;  %v9177_v12 = vmin.f32 %v4123_v49, 1.0  ;;  %v4124_v32 = vmax.f32 %v5985_v44, 0.0  ;;  %6006 = vpow2.f32 %v4026_v0 }
 0x28e   : > { %v5989_v14 = vpop.eup %5988  ;;  %11339 = vst [vmem:[#allocation27_spill] sm:$0xff] %v9173_v36  ;;  %v4068_v4 = vadd.f32 1.0, %v5987_v50  ;;  %v3270_v26 = vadd.f32 %v11082_v27, %v3130_v11  ;;  %6008 = vrcp.f32 %v4067_v43  ;;  %v3273_v11 = vadd.f32 %v11082_v27, %v3133_v25  ;;  %v11351_v36 = vld [vmem:[#allocation62_spill] sm:$0xff] }
 0x28f   : > { %v5991_v28 = vpop.eup %5990  ;;  %11340 = vst [vmem:[#allocation71_spill] sm:$0xff] %v9177_v12  ;;  %v4122_v0 = vmax.f32 %v5989_v14, 0.0  ;;  %v11345_v50 = vpack.c.bf16 %v8999_v60, %v8999_v60  ;;  %v11347_v43 = vrot.slane %v11336_v1, 7  ;;  %v11350_v14 = vld [vmem:[#allocation111_spill] sm:$0xff]  ;;  %v2656_v63 = vrot.slane %v11351_v36, 7 }
 0x290   : > { %2788 = vrot.lane.b32.xlu1 %v2684_v33, %s6405_s22  ;;  %2790 = vrot.lane.b32.xlu0 %v2712_v53, %s6405_s22  ;;  %v5993_v22 = vpop.eup %5992  ;;  %v9180_v40 = vpop.permute.xlu1 %2055  ;;  %v11342_v33 = vrot.slane %v11332_v2, 7  ;;  %v11343_v53 = vld [vmem:[#allocation106_spill] sm:$0xff]  ;;  %v4125_v44 = vmax.f32 %v5991_v28, 0.0  ;;  %6010 = vrcp.f32 %v4068_v4  ;;  %v11352_v18 = vrot.slane %v11322_v16, 7 }
 0x291   : > { %11341 = vst [vmem:[#allocation20_spill] sm:$0xff] %v9180_v40  ;;  %v5995_v58 = vpop.eup %5994  ;;  %v2650_v54 = vrot.slane %v11343_v53, 7  ;;  %v9189_v49 = vpop.permute.xlu0 %2053  ;;  %v2678_v53 = vsel %vm1864_vm1, %v2652_v21, %v11347_v43  ;;  %v3974_v40 = vsub.f32 0.0, %v3270_v26  ;;  %v11355_v36 = vpack.c.bf16 %v9047_v24, %v9047_v24 }
 0x292   : > { %v9186_v9 = vsel %vm1864_vm1, %v11342_v33, %v2652_v21  ;;  %11344 = vst [vmem:[#allocation14_spill] sm:$0xff] %v9189_v49  ;;  %v11346_v33 = vpack.c.bf16 %v9045_v42, %v9045_v42  ;;  %v5997_v25 = vpop.eup %5996  ;;  %v9213_v49 = vmin.f32 %v4124_v32, 1.0  ;;  %v4127_v42 = vmax.f32 %v5993_v22, 0.0 }
 0x293   : > { %v2716_v60 = vsel %vm8469_vm2, 0.0, %v9186_v9  ;;  %v4128_v43 = vmax.f32 %v5995_v58, 0.0  ;;  %v2681_v32 = vsel %vm1864_vm1, %v11352_v18, %v2650_v54  ;;  %v9226_v9 = vmin.f32 %v4122_v0, 1.0 }
 0x294   : > { %4549 = vrot.lane.b32.xlu1 %v11345_v50, %s6407_s24  ;;  %4555 = vrot.lane.b32.xlu0 %v11346_v33, %s6407_s24  ;;  %11349 = vst [vmem:[#allocation82_spill] sm:$0xff] %v9213_v49  ;;  %v2655_v33 = vrot.slane %v8730_v38, 7  ;;  %v9216_v21 = vpop.permute.xlu1 %2051  ;;  %v5999_v4 = vpop.eup %5998  ;;  %v3977_v22 = vsub.f32 0.0, %v3273_v11  ;;  %v11353_v38 = vld [vmem:[#allocation69_spill] sm:$0xff]  ;;  %v11354_v58 = vpack.c.bf16 %v9025_v5, %v9025_v5  ;;  %v9238_v16 = vmin.f32 %v4125_v44, 1.0  ;;  %v11357_v50 = vld [vmem:[#allocation67_spill] sm:$0xff] }
 0x295   : > { %v9220_v31 = vpop.permute.xlu0 %2057  ;;  %v3135_v26 = vadd.f32 %v8776_v39, %v11353_v38  ;;  %v4126_v18 = vmax.f32 %v5997_v25, 0.0  ;;  %v2654_v0 = vrot.slane %v8756_v45, 7  ;;  %v3136_v11 = vadd.f32 %v8783_v62, %v11357_v50 }
 0x296   : > { %11356 = vst [vmem:[#allocation72_spill] sm:$0xff] %v9238_v16  ;;  %v11358_v39 = vrot.slane %v11332_v2, 7  ;;  %v9253_v24 = vsel %vm1864_vm1, %v2655_v33, %v2656_v63  ;;  %v9255_v44 = vmin.f32 %v4127_v42, 1.0  ;;  %v9257_v45 = vmin.f32 %v4128_v43, 1.0 }
 0x297   : > { %v6001_v62 = vpop.eup %6000  ;;  %v4066_v25 = vadd.f32 1.0, %v5999_v4  ;;  %v4028_v50 = vmul.f32 1.442695, %v3977_v22  ;;  %v3275_v43 = vadd.f32 %v11082_v27, %v3135_v26  ;;  %v9276_v4 = vmin.f32 %v4126_v18, 1.0 }
 0x298   : > { %4553 = vrot.lane.b32.xlu1 %v11354_v58, %s6407_s24  ;;  %4551 = vrot.lane.b32.xlu0 %v11355_v36, %s6407_s24  ;;  %v2680_v28 = vsel %vm1864_vm1, %v2650_v54, %v11358_v39  ;;  %v4022_v58 = vmul.f32 1.442695, %v3974_v40  ;;  %v9249_v38 = vpop.permute.xlu1 %2063  ;;  %11359 = vst [vmem:[#allocation108_spill] sm:$0xff] %v9255_v44  ;;  %11360 = vst [vmem:[#allocation9_spill] sm:$0xff] %v9257_v45  ;;  %v2714_v54 = vsel %vm8416_vm15, 0.0, %v2681_v32  ;;  %v11362_v39 = vrot.slane %v11350_v14, 7  ;;  %v6003_v42 = vpop.eup %6002 }
 0x299   : > { %v9259_v2 = vpop.permute.xlu0 %2061  ;;  %11363 = vst [vmem:[#allocation40_spill] sm:$0xff] %v9276_v4  ;;  %v3276_v36 = vadd.f32 %v11082_v27, %v3136_v11  ;;  %v11365_v5 = vrot.slane %v11336_v1, 7  ;;  %v4129_v11 = vmax.f32 %v6001_v62, 0.0  ;;  %v3979_v12 = vsub.f32 0.0, %v3275_v43  ;;  %v11373_v43 = vld [vmem:[#allocation53_spill] sm:$0xff] }
 0x29a   : > { %v9267_v40 = vsel %vm1864_vm1, %v2656_v63, %v11362_v39  ;;  %v11364_v63 = vld [vmem:[#allocation44_spill] sm:$0xff]  ;;  %6012 = vpow2.f32 %v4022_v58  ;;  %v9302_v58 = vsel %vm1864_vm1, %v2654_v0, %v2655_v33  ;;  %v11370_v33 = vld [vmem:[#allocation47_spill] sm:$0xff]  ;;  %v3134_v4 = vadd.f32 %v8833_v57, %v11373_v43 }
 0x29b   : > { %v2124_v39 = vadd.f32 %v8871_v41, %v11364_v63  ;;  %v9285_v22 = vsel %vm1864_vm1, %v11365_v5, %v2654_v0  ;;  %6014 = vrcp.f32 %v4066_v25  ;;  %v4069_v63 = vadd.f32 1.0, %v6003_v42  ;;  %v11367_v5 = vld [vmem:[#allocation45_spill] sm:$0xff]  ;;  %v11369_v41 = vld [vmem:[#allocation50_spill] sm:$0xff] }
 0x29c   : > { %2800 = vrot.lane.b32.xlu1 %v2678_v53, %s6405_s22  ;;  %2794 = vrot.lane.b32.xlu0 %v2714_v54, %s6405_s22  ;;  %v6005_v54 = vpop.eup %6004  ;;  %v9290_v32 = vpop.permute.xlu1 %2059  ;;  %v2122_v49 = vadd.f32 %v8926_v61, %v11367_v5  ;;  %6016 = vpow2.f32 %v4028_v50  ;;  %v3980_v5 = vsub.f32 0.0, %v3276_v36  ;;  %v2123_v0 = vadd.f32 %v8981_v55, %v11370_v33 }
 0x29d   : > { %v6007_v1 = vpop.eup %6006  ;;  %v9298_v16 = vpop.permute.xlu0 %2065  ;;  %v4071_v42 = vadd.f32 1.0, %v6005_v54  ;;  %v3158_v18 = vadd.f32 %v11369_v41, %v2124_v39  ;;  %v9319_v44 = vmin.f32 %v4129_v11, 1.0  ;;  %6018 = vrcp.f32 %v4069_v63 }
 0x29e   : > { %v6009_v26 = vpop.eup %6008  ;;  %v4072_v50 = vadd.f32 1.0, %v6007_v1  ;;  %v3156_v36 = vadd.f32 %v11369_v41, %v2122_v49  ;;  %v4032_v55 = vmul.f32 1.442695, %v3979_v12  ;;  %v11372_v1 = vld [vmem:[#allocation70_spill] sm:$0xff]  ;;  %v11375_v11 = vpack.c.bf16 %v9070_v15, %v9070_v15 }
 0x29f   : > { %v6011_v25 = vpop.eup %6010  ;;  %v4131_v61 = vmax.f32 %v6009_v26, 0.0  ;;  %v2660_v33 = vrot.slane %v11372_v1, 7  ;;  %v11376_v49 = vpack.c.bf16 %v9084_v46, %v9084_v46  ;;  %6020 = vrcp.f32 %v4071_v42 }
 0x2a0   : > { %2796 = vrot.lane.b32.xlu1 %v2680_v28, %s6405_s22  ;;  %2798 = vrot.lane.b32.xlu0 %v2716_v60, %s6405_s22  ;;  %v11371_v28 = vld [vmem:[#allocation51_spill] sm:$0xff]  ;;  %v9317_v45 = vpop.permute.xlu1 %2071  ;;  %v4034_v12 = vmul.f32 1.442695, %v3980_v5  ;;  %v3289_v26 = vsub.f32 0.0, %v3158_v18  ;;  %v3157_v63 = vadd.f32 %v11369_v41, %v2123_v0  ;;  %6022 = vrcp.f32 %v4072_v50 }
 0x2a1   : > { %v2125_v60 = vadd.f32 %v9039_v23, %v11371_v28  ;;  %v9323_v39 = vpop.permute.xlu0 %2069  ;;  %v11374_v23 = vld [vmem:[#allocation46_spill] sm:$0xff]  ;;  %v4132_v15 = vmax.f32 %v6011_v25, 0.0  ;;  %v3287_v54 = vsub.f32 0.0, %v3156_v36  ;;  %v11378_v42 = vrot.slane %v8826_v56, 7 }
 0x2a2   : > { %v2128_v28 = vadd.f32 %v9052_v52, %v11374_v23  ;;  %v11377_v23 = vld [vmem:[#allocation56_spill] sm:$0xff]  ;;  %v9354_v5 = vmin.f32 %v4131_v61, 1.0  ;;  %6024 = vpow2.f32 %v4032_v55  ;;  %v3274_v0 = vadd.f32 %v11082_v27, %v3134_v4  ;;  %v11382_v55 = vld [vmem:[#allocation18_spill] sm:$0xff] }
 0x2a3   : > { %v3159_v57 = vadd.f32 %v11369_v41, %v2125_v60  ;;  %v9352_v18 = vsel %vm1864_vm1, %v11378_v42, %v2660_v33  ;;  %v11380_v25 = vpack.c.bf16 %v9122_v47, %v9122_v47  ;;  %v11381_v60 = vrot.slane %v8800_v13, 7 }
 0x2a4   : > { %4557 = vrot.lane.b32.xlu1 %v11375_v11, %s6407_s24  ;;  %4563 = vrot.lane.b32.xlu0 %v11376_v49, %s6407_s24  ;;  %v9340_v1 = vpop.permute.xlu1 %2067  ;;  %v3137_v11 = vadd.f32 %v8846_v35, %v11377_v23  ;;  %v3162_v50 = vadd.f32 %v11369_v41, %v2128_v28  ;;  %v11379_v35 = vpack.c.bf16 %v9074_v29, %v9074_v29  ;;  %6026 = vpow2.f32 %v4034_v12  ;;  %v11383_v29 = vld [vmem:[#allocation58_spill] sm:$0xff] }
 0x2a5   : > { %v9346_v46 = vpop.permute.xlu0 %4507  ;;  %v9370_v61 = vsel %vm1864_vm1, %v2660_v33, %v11381_v60  ;;  %v3324_v4 = vmul.f32 1.442695, %v3289_v26  ;;  %v3288_v36 = vsub.f32 0.0, %v3157_v63  ;;  %v2127_v28 = vadd.f32 %v9082_v51, %v11382_v55  ;;  %v11386_v63 = vld [vmem:[#allocation60_spill] sm:$0xff] }
 0x2a6   : > { %v3290_v49 = vsub.f32 0.0, %v3159_v57  ;;  %v2126_v42 = vadd.f32 %v9100_v37, %v11383_v29  ;;  %v9381_v52 = vmin.f32 %v4132_v15, 1.0  ;;  %v3277_v12 = vadd.f32 %v11082_v27, %v3137_v11 }
 0x2a7   : > { %v6013_v33 = vpop.eup %6012  ;;  %v3320_v26 = vmul.f32 1.442695, %v3287_v54  ;;  %v2129_v60 = vadd.f32 %v9102_v17, %v11386_v63  ;;  %v3978_v55 = vsub.f32 0.0, %v3274_v0  ;;  %v2658_v29 = vrot.slane %v8856_v34, 7  ;;  %v11391_v63 = vld [vmem:[#allocation57_spill] sm:$0xff] }
 0x2a8   : > { %4565 = vrot.lane.b32.xlu1 %v11379_v35, %s6407_s24  ;;  %4559 = vrot.lane.b32.xlu0 %v11380_v25, %s6407_s24  ;;  %v9376_v35 = vpop.permute.xlu1 %4505  ;;  %v6015_v57 = vpop.eup %6014  ;;  %v3293_v25 = vsub.f32 0.0, %v3162_v50  ;;  %v11389_v54 = vpack.c.bf16 %v9106_v8, %v9106_v8  ;;  %v11390_v17 = vsel %vm8480_vm3, 0.0, %v9285_v22  ;;  %6028 = vpow2.f32 %v3324_v4 }
 0x2a9   : > { %11384 = vst [vmem:[#allocation76_spill] sm:$0xff] %v9376_v35  ;;  %v9386_v51 = vpop.permute.xlu0 %4503  ;;  %v11388_v35 = vld [vmem:[#allocation8_spill] sm:$0xff]  ;;  %v6017_v11 = vpop.eup %6016  ;;  %v3322_v0 = vmul.f32 1.442695, %v3288_v36  ;;  %v3161_v34 = vadd.f32 %v11369_v41, %v2127_v28  ;;  %v3326_v50 = vmul.f32 1.442695, %v3290_v49  ;;  %v3160_v37 = vadd.f32 %v11369_v41, %v2126_v42 }
 0x2aa   : > { %11387 = vst [vmem:[#allocation34_spill] sm:$0xff] %v9386_v51  ;;  %v3140_v15 = vadd.f32 %v8878_v30, %v11388_v35  ;;  %v2132_v30 = vadd.f32 %v9130_v3, %v11391_v63  ;;  %v11392_v51 = vld [vmem:[#allocation19_spill] sm:$0xff]  ;;  %v4070_v62 = vadd.f32 1.0, %v6013_v33  ;;  %6030 = vpow2.f32 %v3320_v26  ;;  %v9415_v28 = vpop.eup %6018  ;;  %v11393_v42 = vld [vmem:[#allocation81_spill] sm:$0xff] }
 0x2ab   : > { %v2131_v8 = vadd.f32 %v9138_v7, %v11392_v51  ;;  %v3163_v4 = vadd.f32 %v11369_v41, %v2129_v60  ;;  %v4030_v3 = vmul.f32 1.442695, %v3978_v55  ;;  %v3139_v7 = vadd.f32 %v8899_v10, %v11393_v42 }
 0x2ac   : > { %4561 = vrot.lane.b32.xlu1 %v11389_v54, %s6407_s24  ;;  %2802 = vrot.lane.b32.xlu0 %v11390_v17, %s6405_s22  ;;  %v9408_v54 = vpop.permute.xlu1 %2079  ;;  %v3981_v17 = vsub.f32 0.0, %v3277_v12  ;;  %v3280_v49 = vadd.f32 %v11082_v27, %v3140_v15  ;;  %v3332_v51 = vmul.f32 1.442695, %v3293_v25  ;;  %v11394_v33 = vsel %vm8518_vm4, 0.0, %v9253_v24  ;;  %v9432_v10 = vpop.eup %6020 }
 0x2ad   : > { %v9413_v36 = vpop.permute.xlu0 %2073  ;;  %6032 = vpow2.f32 %v3322_v0  ;;  %v3292_v12 = vsub.f32 0.0, %v3161_v34  ;;  %v3166_v26 = vadd.f32 %v11369_v41, %v2132_v30  ;;  %v11395_v60 = vrot.slane %v11350_v14, 7  ;;  %v9437_v24 = vpop.eup %6022 }
 0x2ae   : > { %6034 = vpow2.f32 %v3326_v50  ;;  %v3291_v25 = vsub.f32 0.0, %v3160_v37  ;;  %v4130_v53 = vmax.f32 %v6015_v57, 0.0  ;;  %v4073_v0 = vadd.f32 1.0, %v6017_v11 }
 0x2af   : > { %v2673_v55 = vsel %vm1864_vm1, %v11395_v60, %v2658_v29  ;;  %v4036_v34 = vmul.f32 1.442695, %v3981_v17  ;;  %v3294_v63 = vsub.f32 0.0, %v3163_v4  ;;  %v11396_v14 = vrot.slane %v8826_v56, 7  ;;  %v6025_v56 = vpop.eup %6024  ;;  %v11399_v4 = vld [vmem:[#allocation48_spill] sm:$0xff] }
 0x2b0   : > { %2808 = vrot.lane.b32.xlu1 %v9267_v40, %s6405_s22  ;;  %2806 = vrot.lane.b32.xlu0 %v11394_v33, %s6405_s22  ;;  %v3165_v40 = vadd.f32 %v11369_v41, %v2131_v8  ;;  %v9435_v15 = vpop.permute.xlu1 %2075  ;;  %v3984_v50 = vsub.f32 0.0, %v3280_v49  ;;  %v3279_v37 = vadd.f32 %v11082_v27, %v3139_v7  ;;  %6036 = vpow2.f32 %v3332_v51  ;;  %v11397_v8 = vld [vmem:[#allocation59_spill] sm:$0xff] }
 0x2b1   : > { %v9439_v30 = vpop.permute.xlu0 %2077  ;;  %v9445_v33 = vsel %vm1864_vm1, %v2658_v29, %v11396_v14  ;;  %v2130_v57 = vadd.f32 %v9157_v20, %v11397_v8  ;;  %v11398_v11 = vpack.c.bf16 %v9148_v48, %v9148_v48  ;;  %6038 = vrcp.f32 %v4070_v62  ;;  %v9458_v7 = vpop.eup %6026  ;;  %v11401_v48 = vld [vmem:[#allocation17_spill] sm:$0xff] }
 0x2b2   : > { %v3330_v17 = vmul.f32 1.442695, %v3292_v12  ;;  %v3297_v29 = vsub.f32 0.0, %v3166_v26  ;;  %vm11400_vm9 = vnez %v11399_v4  ;;  %6040 = vpow2.f32 %v4030_v3  ;;  %v11410_v4 = vld [vmem:[#allocation14_spill] sm:$0xff] }
 0x2b3   : > { %v2722_v49 = vsel %vm11400_vm9, 0.0, %v2673_v55  ;;  %v3328_v51 = vmul.f32 1.442695, %v3291_v25  ;;  %v3296_v20 = vsub.f32 0.0, %v3165_v40  ;;  %6042 = vrcp.f32 %v4073_v0  ;;  %v11404_v40 = vld [vmem:[#allocation73_spill] sm:$0xff] }
 0x2b4   : > { %2804 = vrot.lane.b32.xlu1 %v9302_v58, %s6405_s22  ;;  %4957 = vrot.lane.b32.xlu0 %v11398_v11, %s6405_s22  ;;  %v9460_v60 = vpop.permute.xlu1 %4509  ;;  %v9462_v58 = vmin.f32 %v4130_v53, 1.0  ;;  %v3334_v14 = vmul.f32 1.442695, %v3294_v63  ;;  %v2133_v8 = vadd.f32 %v9159_v6, %v11401_v48  ;;  %v4133_v12 = vmax.f32 %v9415_v28, 0.0  ;;  %v11406_v6 = vld [vmem:[#allocation83_spill] sm:$0xff]  ;;  %v11407_v28 = vld [vmem:[#allocation21_spill] sm:$0xff] }
 0x2b5   : > { %v9466_v62 = vpop.permute.xlu0 %4515  ;;  %6044 = vpow2.f32 %v4036_v34  ;;  %v4042_v26 = vmul.f32 1.442695, %v3984_v50  ;;  %v3983_v55 = vsub.f32 0.0, %v3279_v37  ;;  %v3164_v3 = vadd.f32 %v11369_v41, %v2130_v57  ;;  %v11408_v34 = vld [vmem:[#allocation20_spill] sm:$0xff]  ;;  %v6029_v37 = vpop.eup %6028 }
 0x2b6   : > { %11402 = vst [vmem:[#allocation32_spill] sm:$0xff] %v9466_v62  ;;  %v11403_v25 = vpack.c.bf16 %v9128_v19, %v9128_v19  ;;  %v11405_v53 = vpack.c.bf16 %v11404_v40, %v11404_v40  ;;  %v10814_v0 = vrot.slane %v11406_v6, 7  ;;  %6046 = vpow2.f32 %v3330_v17  ;;  %v11409_v11 = vld [vmem:[#allocation16_spill] sm:$0xff]  ;;  %v11412_v17 = vld [vmem:[#allocation25_spill] sm:$0xff] }
 0x2b7   : > { %v3340_v63 = vmul.f32 1.442695, %v3297_v29  ;;  %v2136_v50 = vadd.f32 %v11408_v34, %v11407_v28  ;;  %6048 = vpow2.f32 %v3328_v51  ;;  %v3338_v57 = vmul.f32 1.442695, %v3296_v20  ;;  %v6031_v28 = vpop.eup %6030  ;;  %v11414_v34 = vld [vmem:[#allocation31_spill] sm:$0xff] }
 0x2b8   : > { %4955 = vrot.lane.b32.xlu1 %v11403_v25, %s6405_s22  ;;  %4953 = vrot.lane.b32.xlu0 %v11405_v53, %s6405_s22  ;;  %v2135_v48 = vadd.f32 %v11410_v4, %v11409_v11  ;;  %v9483_v19 = vpop.permute.xlu1 %4513  ;;  %v4075_v40 = vadd.f32 1.0, %v6025_v56  ;;  %6050 = vpow2.f32 %v3334_v14  ;;  %v3167_v53 = vadd.f32 %v11369_v41, %v2133_v8  ;;  %v11415_v4 = vld [vmem:[#allocation112_spill] sm:$0xff] }
 0x2b9   : > { %11411 = vst [vmem:[#allocation84_spill] sm:$0xff] %v9483_v19  ;;  %v2134_v29 = vadd.f32 %v9216_v21, %v11412_v17  ;;  %v9490_v22 = vpop.permute.xlu0 %4511  ;;  %6052 = vpow2.f32 %v4042_v26  ;;  %v4040_v51 = vmul.f32 1.442695, %v3983_v55  ;;  %v3295_v20 = vsub.f32 0.0, %v3164_v3  ;;  %v11416_v26 = vld [vmem:[#allocation113_spill] sm:$0xff] }
 0x2ba   : > { %11413 = vst [vmem:[#allocation89_spill] sm:$0xff] %v9490_v22  ;;  %v2137_v11 = vadd.f32 %v9220_v31, %v11414_v34  ;;  %v3385_v56 = vadd.f32 1.0, %v6029_v37  ;;  %6054 = vpow2.f32 %v3340_v63  ;;  %v3170_v14 = vadd.f32 %v11369_v41, %v2136_v50  ;;  %v6033_v21 = vpop.eup %6032  ;;  %v11428_v19 = vld [vmem:[#allocation49_spill] sm:$0xff] }
 0x2bb   : > { %v9498_v8 = vmin.f32 %v4133_v12, 1.0  ;;  %v2665_v17 = vrot.slane %v11415_v4, 7  ;;  %v10815_v55 = vrot.slane %v11416_v26, 7  ;;  %6056 = vpow2.f32 %v3338_v57  ;;  %v6035_v34 = vpop.eup %6034  ;;  %v11417_v4 = vld [vmem:[#allocation35_spill] sm:$0xff] }
 0x2bc   : > { %2816 = vrot.lane.b32.xlu1 %v9370_v61, %s6405_s22  ;;  %2810 = vrot.lane.b32.xlu0 %v2722_v49, %s6405_s22  ;;  %v3169_v3 = vadd.f32 %v11369_v41, %v2135_v48  ;;  %v9503_v31 = vpop.permute.xlu1 %2087  ;;  %6058 = vrcp.f32 %v4075_v40  ;;  %v3383_v61 = vadd.f32 1.0, %v6031_v28  ;;  %v3298_v49 = vsub.f32 0.0, %v3167_v53 }
 0x2bd   : > { %v3168_v63 = vadd.f32 %v11369_v41, %v2134_v29  ;;  %v9506_v37 = vpop.permute.xlu0 %2081  ;;  %6060 = vpow2.f32 %v4040_v51  ;;  %v3336_v12 = vmul.f32 1.442695, %v3295_v20  ;;  %v3171_v50 = vadd.f32 %v11369_v41, %v2137_v11  ;;  %v6037_v48 = vpop.eup %6036 }
 0x2be   : > { %v2140_v25 = vadd.f32 %v9249_v38, %v11417_v4  ;;  %v11418_v57 = vsel %vm8580_vm6, 0.0, %v9352_v18  ;;  %6062 = vrcp.f32 %v3385_v56  ;;  %v3384_v40 = vadd.f32 1.0, %v6033_v21  ;;  %v9519_v28 = vpop.eup %6038  ;;  %v11420_v21 = vld [vmem:[#allocation30_spill] sm:$0xff] }
 0x2bf   : > { %v3301_v53 = vsub.f32 0.0, %v3170_v14  ;;  %v3386_v51 = vadd.f32 1.0, %v6035_v34  ;;  %v3300_v20 = vsub.f32 0.0, %v3169_v3  ;;  %v2666_v47 = vsel %vm1864_vm1, %v10814_v0, %v2665_v17  ;;  %v9533_v11 = vpop.eup %6040  ;;  %v11421_v0 = vld [vmem:[#allocation27_spill] sm:$0xff] }
 0x2c0   : > { %2812 = vrot.lane.b32.xlu1 %v9445_v33, %s6405_s22  ;;  %2814 = vrot.lane.b32.xlu0 %v11418_v57, %s6405_s22  ;;  %v11419_v18 = vrot.slane %v8800_v13, 7  ;;  %6064 = vrcp.f32 %v3383_v61  ;;  %v3342_v56 = vmul.f32 1.442695, %v3298_v49  ;;  %v3299_v14 = vsub.f32 0.0, %v3168_v63  ;;  %v9539_v4 = vpop.eup %6042  ;;  %v11424_v63 = vld [vmem:[#allocation38_spill] sm:$0xff] }
 0x2c1   : > { %v9521_v38 = vpop.permute.xlu1 %2083  ;;  %v2139_v3 = vadd.f32 %v9259_v2, %v11420_v21  ;;  %v9537_v34 = vpop.permute.xlu0 %2025  ;;  %v3389_v57 = vadd.f32 1.0, %v6037_v48  ;;  %6066 = vpow2.f32 %v3336_v12  ;;  %v3302_v29 = vsub.f32 0.0, %v3171_v50  ;;  %v11425_v50 = vld [vmem:[#allocation12_spill] sm:$0xff] }
 0x2c2   : > { %v2669_v33 = vsel %vm1864_vm1, %v11419_v18, %v10815_v55  ;;  %v3174_v13 = vadd.f32 %v11369_v41, %v2140_v25  ;;  %v11422_v18 = vpack.c.bf16 %v11421_v0, %v11421_v0  ;;  %v11423_v61 = vpack.c.bf16 %v9226_v9, %v9226_v9  ;;  %v9550_v2 = vpop.eup %6044  ;;  %v11427_v0 = vld [vmem:[#allocation39_spill] sm:$0xff] }
 0x2c3   : > { %6068 = vrcp.f32 %v3384_v40  ;;  %v3348_v49 = vmul.f32 1.442695, %v3301_v53  ;;  %v2138_v12 = vadd.f32 %v9290_v32, %v11424_v63  ;;  %v11426_v48 = vrot.slane %v11425_v50, 7  ;;  %v6047_v21 = vpop.eup %6046 }
 0x2c4   : > { %4959 = vrot.lane.b32.xlu1 %v11422_v18, %s6405_s22  ;;  %4961 = vrot.lane.b32.xlu0 %v11423_v61, %s6405_s22  ;;  %v2663_v18 = vrot.slane %v11427_v0, 7  ;;  %6070 = vrcp.f32 %v3386_v51  ;;  %v3346_v55 = vmul.f32 1.442695, %v3300_v20  ;;  %v2141_v9 = vadd.f32 %v9298_v16, %v11428_v19  ;;  %v6049_v40 = vpop.eup %6048 }
 0x2c5   : > { %v2697_v25 = vsel %vm1864_vm1, %v2665_v17, %v11426_v48  ;;  %v9561_v61 = vpop.permute.xlu1 %4517  ;;  %6072 = vpow2.f32 %v3342_v56  ;;  %v3344_v53 = vmul.f32 1.442695, %v3299_v14  ;;  %v3173_v32 = vadd.f32 %v11369_v41, %v2139_v3  ;;  %v9564_v63 = vpop.permute.xlu0 %2085  ;;  %v11440_v14 = vld [vmem:[#allocation85_spill] sm:$0xff] }
 0x2c6   : > { %11429 = vst [vmem:[#allocation68_spill] sm:$0xff] %v9561_v61  ;;  %v2726_v17 = vsel %vm8658_vm7, 0.0, %v2669_v33  ;;  %v6051_v48 = vpop.eup %6050  ;;  %6074 = vrcp.f32 %v3389_v57  ;;  %v3350_v0 = vmul.f32 1.442695, %v3302_v29  ;;  %v3305_v51 = vsub.f32 0.0, %v3174_v13  ;;  %v11432_v57 = vld [vmem:[#allocation55_spill] sm:$0xff] }
 0x2c7   : > { %v4136_v16 = vmax.f32 %v9437_v24, 0.0  ;;  %v9571_v19 = vpop.eup %6052  ;;  %v3388_v20 = vadd.f32 1.0, %v6047_v21  ;;  %6076 = vpow2.f32 %v3348_v49  ;;  %v3172_v56 = vadd.f32 %v11369_v41, %v2138_v12 }
 0x2c8   : > { %2824 = vrot.lane.b32.xlu1 %v2666_v47, %s6405_s22  ;;  %2818 = vrot.lane.b32.xlu0 %v2726_v17, %s6405_s22  ;;  %v2698_v3 = vsel %vm8690_vm0, 0.0, %v2697_v25  ;;  %v6055_v33 = vpop.eup %6054  ;;  %v3387_v50 = vadd.f32 1.0, %v6049_v40  ;;  %6078 = vpow2.f32 %v3346_v55  ;;  %v3175_v29 = vadd.f32 %v11369_v41, %v2141_v9  ;;  %v11437_v9 = vld [vmem:[#allocation43_spill] sm:$0xff] }
 0x2c9   : > { %v2144_v47 = vadd.f32 %v9317_v45, %v11432_v57  ;;  %v9579_v13 = vpop.permute.xlu1 %4521  ;;  %v6057_v24 = vpop.eup %6056  ;;  %v3390_v17 = vadd.f32 1.0, %v6051_v48  ;;  %6080 = vpow2.f32 %v3344_v53  ;;  %v3304_v21 = vsub.f32 0.0, %v3173_v32  ;;  %v11439_v48 = vld [vmem:[#allocation74_spill] sm:$0xff] }
 0x2ca   : > { %11433 = vst [vmem:[#allocation61_spill] sm:$0xff] %v9579_v13  ;;  %v9581_v49 = vpop.permute.xlu0 %4523  ;;  %v11435_v12 = vrot.slane %v11416_v26, 7  ;;  %v9587_v40 = vpop.eup %6058  ;;  %6082 = vpow2.f32 %v3350_v0  ;;  %v3356_v55 = vmul.f32 1.442695, %v3305_v51  ;;  %v2143_v45 = vadd.f32 %v9323_v39, %v11437_v9 }
 0x2cb   : > { %11434 = vst [vmem:[#allocation63_spill] sm:$0xff] %v9581_v49  ;;  %11436 = vst [vmem:[#allocation106_spill] sm:$0xff] %v9587_v40  ;;  %v11438_v53 = vrot.slane %v11406_v6, 7  ;;  %v9597_v26 = vpop.eup %6060  ;;  %v3138_v57 = vadd.f32 %v11440_v14, %v11439_v48  ;;  %6084 = vrcp.f32 %v3388_v20  ;;  %v3393_v0 = vadd.f32 1.0, %v6055_v33  ;;  %v11443_v33 = vld [vmem:[#allocation71_spill] sm:$0xff] }
 0x2cc   : > { %v2668_v25 = vsel %vm1864_vm1, %v11435_v12, %v2663_v18  ;;  %2762 = vrot.lane.b32.xlu0 %v2698_v3, %s6405_s22  ;;  %v3303_v51 = vsub.f32 0.0, %v3172_v56  ;;  %v6063_v12 = vpop.eup %6062  ;;  %6086 = vrcp.f32 %v3387_v50  ;;  %v3392_v39 = vadd.f32 1.0, %v6057_v24 }
 0x2cd   : > { %2820 = vrot.lane.b32.xlu1 %v2668_v25, %s6405_s22  ;;  %v2667_v32 = vsel %vm1864_vm1, %v2663_v18, %v11438_v53  ;;  %v3306_v9 = vsub.f32 0.0, %v3175_v29  ;;  %v3178_v25 = vadd.f32 %v11369_v41, %v2144_v47  ;;  %v9602_v3 = vpop.permute.xlu1 %2768  ;;  %6088 = vrcp.f32 %v3390_v17  ;;  %v6065_v20 = vpop.eup %6064 }
 0x2ce   : > { %v3354_v6 = vmul.f32 1.442695, %v3304_v21  ;;  %v9604_v59 = vpop.permute.xlu0 %4519  ;;  %v2728_v53 = vsel %vm8722_vm5, 0.0, %v2667_v32  ;;  %v4134_v14 = vmax.f32 %v9519_v28, 0.0  ;;  %6090 = vpow2.f32 %v3356_v55  ;;  %v6067_v17 = vpop.eup %6066  ;;  %v11446_v21 = vld [vmem:[#allocation65_spill] sm:$0xff] }
 0x2cf   : > { %11441 = vst [vmem:[#allocation26_spill] sm:$0xff] %v9604_v59  ;;  %v3177_v56 = vadd.f32 %v11369_v41, %v2143_v45  ;;  %v11444_v50 = vpack.c.bf16 %v11443_v33, %v11443_v33  ;;  %v11445_v29 = vmax.f32 %v9432_v10, 0.0  ;;  %v4137_v24 = vmax.f32 %v9539_v4, 0.0 }
 0x2d0   : > { %2822 = vrot.lane.b32.xlu0 %v2728_v53, %s6405_s22  ;;  %6092 = vrcp.f32 %v3393_v0  ;;  %v3352_v28 = vmul.f32 1.442695, %v3303_v51  ;;  %v2142_v55 = vadd.f32 %v9340_v1, %v11446_v21  ;;  %v3449_v45 = vmax.f32 %v6063_v12, 0.0  ;;  %v6069_v32 = vpop.eup %6068 }
 0x2d1   : > { %4963 = vrot.lane.b32.xlu1 %v11444_v50, %s6405_s22  ;;  %v9617_v47 = vmin.f32 %v11445_v29, 1.0  ;;  %6094 = vrcp.f32 %v3392_v39  ;;  %v3358_v18 = vmul.f32 1.442695, %v3306_v9  ;;  %v3309_v33 = vsub.f32 0.0, %v3178_v25  ;;  %v9622_v50 = vpop.permute.xlu1 %2764  ;;  %v6071_v10 = vpop.eup %6070  ;;  %v11447_v9 = vld [vmem:[#allocation72_spill] sm:$0xff]  ;;  %v11449_v25 = vld [vmem:[#allocation82_spill] sm:$0xff] }
 0x2d2   : > { %v9624_v53 = vmin.f32 %v4136_v16, 1.0  ;;  %v9627_v29 = vadd.f32 %v11082_v27, %v3138_v57  ;;  %6096 = vpow2.f32 %v3354_v6  ;;  %v9629_v4 = vpop.permute.xlu0 %2766  ;;  %v9633_v1 = vmin.f32 %v4134_v14, 1.0  ;;  %v6073_v51 = vpop.eup %6072  ;;  %v11452_v6 = vld [vmem:[#allocation109_spill] sm:$0xff] }
 0x2d3   : > { %v3391_v12 = vadd.f32 1.0, %v6067_v17  ;;  %v3308_v39 = vsub.f32 0.0, %v3177_v56  ;;  %v11448_v16 = vpack.c.bf16 %v11447_v9, %v11447_v9  ;;  %v11450_v57 = vpack.c.bf16 %v11449_v25, %v11449_v25  ;;  %v6075_v14 = vpop.eup %6074 }
 0x2d4   : > { %v9645_v21 = vmin.f32 %v4137_v24, 1.0  ;;  %6098 = vpow2.f32 %v3352_v28  ;;  %v3176_v17 = vadd.f32 %v11369_v41, %v2142_v55  ;;  %v9648_v56 = vmin.f32 %v3449_v45, 1.0  ;;  %v6077_v13 = vpop.eup %6076  ;;  %v11453_v24 = vld [vmem:[#allocation114_spill] sm:$0xff] }
 0x2d5   : > { %4967 = vrot.lane.b32.xlu1 %v11448_v16, %s6405_s22  ;;  %4965 = vrot.lane.b32.xlu0 %v11450_v57, %s6405_s22  ;;  %v3447_v0 = vmax.f32 %v6065_v20, 0.0  ;;  %6100 = vpow2.f32 %v3358_v18  ;;  %v3364_v9 = vmul.f32 1.442695, %v3309_v33  ;;  %v9650_v16 = vpop.permute.xlu1 %4525  ;;  %v3448_v57 = vmax.f32 %v6069_v32, 0.0  ;;  %v6079_v49 = vpop.eup %6078  ;;  %v11455_v33 = vld [vmem:[#allocation15_spill] sm:$0xff]  ;;  %v11456_v32 = vld [vmem:[#allocation108_spill] sm:$0xff] }
 0x2d6   : > { %11451 = vst [vmem:[#allocation111_spill] sm:$0xff] %v9650_v16  ;;  %v9656_v59 = vadd.f32 %v11453_v24, %v11452_v6  ;;  %v3394_v28 = vadd.f32 1.0, %v6073_v51  ;;  %v9658_v62 = vpop.permute.xlu0 %4531  ;;  %v3450_v55 = vmax.f32 %v6071_v10, 0.0  ;;  %v6081_v45 = vpop.eup %6080  ;;  %6102 = vrcp.f32 %v3391_v12  ;;  %v11458_v24 = vld [vmem:[#allocation40_spill] sm:$0xff]  ;;  %v11461_v20 = vld [vmem:[#allocation13_spill] sm:$0xff] }
 0x2d7   : > { %11454 = vst [vmem:[#allocation62_spill] sm:$0xff] %v9658_v62  ;;  %v3362_v18 = vmul.f32 1.442695, %v3308_v39  ;;  %v2148_v16 = vadd.f32 %v9408_v54, %v11455_v33  ;;  %v11457_v25 = vpack.c.bf16 %v11456_v32, %v11456_v32  ;;  %v11459_v51 = vpack.c.bf16 %v11458_v24, %v11458_v24  ;;  %v6083_v10 = vpop.eup %6082 }
 0x2d8   : > { %v3397_v62 = vadd.f32 1.0, %v6077_v13  ;;  %v3307_v12 = vsub.f32 0.0, %v3176_v17  ;;  %v9676_v54 = vmin.f32 %v3447_v0, 1.0  ;;  %v6085_v33 = vpop.eup %6084  ;;  %v3396_v61 = vadd.f32 1.0, %v6079_v49 }
 0x2d9   : > { %4971 = vrot.lane.b32.xlu1 %v11457_v25, %s6405_s22  ;;  %4969 = vrot.lane.b32.xlu0 %v11459_v51, %s6405_s22  ;;  %6104 = vpow2.f32 %v3364_v9  ;;  %v9678_v25 = vpop.permute.xlu1 %4529  ;;  %v9680_v32 = vmin.f32 %v3448_v57, 1.0  ;;  %v3453_v24 = vmax.f32 %v6075_v14, 0.0  ;;  %v6087_v51 = vpop.eup %6086  ;;  %v3395_v22 = vadd.f32 1.0, %v6081_v45  ;;  %v11463_v9 = vld [vmem:[#allocation22_spill] sm:$0xff]  ;;  %v11467_v45 = vld [vmem:[#allocation11_spill] sm:$0xff] }
 0x2da   : > { %11460 = vst [vmem:[#allocation23_spill] sm:$0xff] %v9678_v25  ;;  %6106 = vrcp.f32 %v3394_v28  ;;  %v2145_v13 = vadd.f32 %v9413_v36, %v11461_v20  ;;  %v9684_v17 = vpop.permute.xlu0 %4527  ;;  %v9686_v40 = vmin.f32 %v3450_v55, 1.0  ;;  %v6089_v0 = vpop.eup %6088  ;;  %v3398_v39 = vadd.f32 1.0, %v6083_v10  ;;  %v11465_v28 = vld [vmem:[#allocation9_spill] sm:$0xff] }
 0x2db   : > { %11462 = vst [vmem:[#allocation44_spill] sm:$0xff] %v9684_v17  ;;  %6108 = vpow2.f32 %v3362_v18  ;;  %v3182_v49 = vadd.f32 %v11369_v41, %v2148_v16  ;;  %v2146_v57 = vadd.f32 %v9435_v15, %v11463_v9  ;;  %v11464_v14 = vpack.c.bf16 %v9319_v44, %v9319_v44  ;;  %v6091_v20 = vpop.eup %6090 }
 0x2dc   : > { %v11466_v36 = vpack.c.bf16 %v11465_v28, %v11465_v28  ;;  %6110 = vrcp.f32 %v3397_v62  ;;  %v3360_v55 = vmul.f32 1.442695, %v3307_v12  ;;  %v2147_v18 = vadd.f32 %v9439_v30, %v11467_v45 }
 0x2dd   : > { %4975 = vrot.lane.b32.xlu1 %v11464_v14, %s6405_s22  ;;  %v3452_v16 = vmax.f32 %v6085_v33, 0.0  ;;  %v6093_v10 = vpop.eup %6092  ;;  %6112 = vrcp.f32 %v3396_v61  ;;  %v9701_v15 = vpop.permute.xlu1 %2776  ;;  %v9705_v9 = vmin.f32 %v3453_v24, 1.0  ;;  %v3451_v14 = vmax.f32 %v6087_v51, 0.0 }
 0x2de   : > { %4973 = vrot.lane.b32.xlu0 %v11466_v36, %s6405_s22  ;;  %v6095_v25 = vpop.eup %6094  ;;  %6114 = vrcp.f32 %v3395_v22  ;;  %v3179_v28 = vadd.f32 %v11369_v41, %v2145_v13  ;;  %v9708_v62 = vpop.permute.xlu0 %2770  ;;  %v3454_v12 = vmax.f32 %v6089_v0, 0.0  ;;  %v3401_v61 = vadd.f32 1.0, %v6091_v20 }
 0x2df   : > { %v6097_v33 = vpop.eup %6096  ;;  %6116 = vrcp.f32 %v3398_v39  ;;  %v3313_v36 = vsub.f32 0.0, %v3182_v49  ;;  %v3180_v45 = vadd.f32 %v11369_v41, %v2146_v57  ;;  %v11468_v24 = vpack.c.bf16 %v9354_v5, %v9354_v5  ;;  %v11470_v49 = vld [vmem:[#allocation36_spill] sm:$0xff] }
 0x2e0   : > { %v11469_v22 = vpack.c.bf16 %v9462_v58, %v9462_v58  ;;  %6118 = vpow2.f32 %v3360_v55  ;;  %v3181_v51 = vadd.f32 %v11369_v41, %v2147_v18  ;;  %v9724_v13 = vmin.f32 %v3452_v16, 1.0 }
 0x2e1   : > { %4979 = vrot.lane.b32.xlu1 %v11468_v24, %s6405_s22  ;;  %v6099_v0 = vpop.eup %6098  ;;  %v2152_v57 = vadd.f32 %v9503_v31, %v11470_v49  ;;  %v9732_v24 = vmin.f32 %v3451_v14, 1.0  ;;  %v3457_v58 = vmax.f32 %v6093_v10, 0.0  ;;  %v3310_v18 = vsub.f32 0.0, %v3179_v28  ;;  %v11471_v31 = vld [vmem:[#allocation33_spill] sm:$0xff] }
 0x2e2   : > { %4977 = vrot.lane.b32.xlu0 %v11469_v22, %s6405_s22  ;;  %v9728_v20 = vpop.permute.xlu1 %2772  ;;  %v6101_v55 = vpop.eup %6100  ;;  %v3400_v22 = vadd.f32 1.0, %v6097_v33  ;;  %v9736_v39 = vmin.f32 %v3454_v12, 1.0  ;;  %v3456_v16 = vmax.f32 %v6095_v25, 0.0  ;;  %6120 = vrcp.f32 %v3401_v61  ;;  %v11474_v25 = vld [vmem:[#allocation66_spill] sm:$0xff] }
 0x2e3   : > { %v9734_v44 = vpop.permute.xlu0 %2774  ;;  %v3372_v30 = vmul.f32 1.442695, %v3313_v36  ;;  %v3311_v17 = vsub.f32 0.0, %v3180_v45  ;;  %v2149_v49 = vadd.f32 %v9506_v37, %v11471_v31  ;;  %v11472_v14 = vpack.c.bf16 %v9498_v8, %v9498_v8  ;;  %v6103_v28 = vpop.eup %6102 }
 0x2e4   : > { %v11473_v10 = vpack.c.bf16 %v9381_v52, %v9381_v52  ;;  %v3399_v12 = vadd.f32 1.0, %v6099_v0  ;;  %v3312_v33 = vsub.f32 0.0, %v3181_v51  ;;  %v2150_v61 = vadd.f32 %v9521_v38, %v11474_v25 }
 0x2e5   : > { %4983 = vrot.lane.b32.xlu1 %v11472_v14, %s6405_s22  ;;  %v3402_v37 = vadd.f32 1.0, %v6101_v55  ;;  %v3186_v45 = vadd.f32 %v11369_v41, %v2152_v57  ;;  %v9757_v14 = vmin.f32 %v3457_v58, 1.0  ;;  %6122 = vrcp.f32 %v3400_v22 }
 0x2e6   : > { %4981 = vrot.lane.b32.xlu0 %v11473_v10, %s6405_s22  ;;  %v9753_v31 = vpop.permute.xlu1 %4533  ;;  %v6105_v52 = vpop.eup %6104  ;;  %v3366_v0 = vmul.f32 1.442695, %v3310_v18  ;;  %v9763_v10 = vmin.f32 %v3456_v16, 1.0  ;;  %6124 = vpow2.f32 %v3372_v30  ;;  %v3368_v57 = vmul.f32 1.442695, %v3311_v17  ;;  %v11478_v30 = vld [vmem:[#allocation41_spill] sm:$0xff] }
 0x2e7   : > { %v9759_v51 = vpop.permute.xlu0 %4539  ;;  %v6107_v55 = vpop.eup %6106  ;;  %v3183_v25 = vadd.f32 %v11369_v41, %v2149_v49  ;;  %v11476_v58 = vpack.c.bf16 %v9617_v47, %v9617_v47  ;;  %v11477_v22 = vpack.c.bf16 %v9633_v1, %v9633_v1  ;;  %v3455_v18 = vmax.f32 %v6103_v28, 0.0  ;;  %v11479_v47 = vld [vmem:[#allocation29_spill] sm:$0xff] }
 0x2e8   : > { %11475 = vst [vmem:[#allocation37_spill] sm:$0xff] %v9759_v51  ;;  %v6109_v8 = vpop.eup %6108  ;;  %6126 = vrcp.f32 %v3399_v12  ;;  %v3370_v16 = vmul.f32 1.442695, %v3312_v33  ;;  %v3184_v38 = vadd.f32 %v11369_v41, %v2150_v61  ;;  %v2121_v17 = vadd.f32 %v9537_v34, %v11478_v30 }
 0x2e9   : > { %4987 = vrot.lane.b32.xlu1 %v11476_v58, %s6405_s22  ;;  %v6111_v49 = vpop.eup %6110  ;;  %6128 = vrcp.f32 %v3402_v37  ;;  %v3405_v36 = vadd.f32 1.0, %v6105_v52  ;;  %v3317_v5 = vsub.f32 0.0, %v3186_v45  ;;  %v2151_v58 = vadd.f32 %v9564_v63, %v11479_v47 }
 0x2ea   : > { %4985 = vrot.lane.b32.xlu0 %v11477_v22, %s6405_s22  ;;  %v9779_v51 = vpop.permute.xlu1 %4537  ;;  %v6113_v1 = vpop.eup %6112  ;;  %6130 = vpow2.f32 %v3366_v0  ;;  %v3458_v34 = vmax.f32 %v6107_v55, 0.0  ;;  %v3404_v37 = vadd.f32 1.0, %v6109_v8  ;;  %v3314_v45 = vsub.f32 0.0, %v3183_v25  ;;  %v11482_v8 = vld [vmem:[#allocation80_spill] sm:$0xff] }
 0x2eb   : > { %v9781_v28 = vpop.permute.xlu0 %4535  ;;  %v6115_v61 = vpop.eup %6114  ;;  %6132 = vpow2.f32 %v3368_v57  ;;  %v11480_v63 = vpack.c.bf16 %v9645_v21, %v9645_v21  ;;  %v11481_v52 = vpack.c.bf16 %v9624_v53, %v9624_v53  ;;  %v9795_v0 = vmin.f32 %v3455_v18, 1.0 }
 0x2ec   : > { %v6117_v22 = vpop.eup %6116  ;;  %6134 = vpow2.f32 %v3370_v16  ;;  %v3315_v30 = vsub.f32 0.0, %v3184_v38  ;;  %v3155_v55 = vadd.f32 %v11369_v41, %v2121_v17  ;;  %v2861_v57 = vadd.f32 %v9602_v3, %v11482_v8 }
 0x2ed   : > { %4991 = vrot.lane.b32.xlu1 %v11480_v63, %s6405_s22  ;;  %v6119_v25 = vpop.eup %6118  ;;  %6136 = vrcp.f32 %v3405_v36  ;;  %v3380_v47 = vmul.f32 1.442695, %v3317_v5  ;;  %v3185_v21 = vadd.f32 %v11369_v41, %v2151_v58  ;;  %v11483_v63 = vld [vmem:[#allocation75_spill] sm:$0xff]  ;;  %v3461_v38 = vmax.f32 %v6111_v49, 0.0 }
 0x2ee   : > { %4989 = vrot.lane.b32.xlu0 %v11481_v52, %s6405_s22  ;;  %v2860_v33 = vadd.f32 %v9629_v4, %v11483_v63  ;;  %v9803_v53 = vpop.permute.xlu1 %2784  ;;  %v9807_v52 = vmin.f32 %v3458_v34, 1.0  ;;  %v3460_v16 = vmax.f32 %v6113_v1, 0.0  ;;  %v3459_v17 = vmax.f32 %v6115_v61, 0.0 }
 0x2ef   : > { %v9805_v18 = vpop.permute.xlu0 %2778  ;;  %6138 = vrcp.f32 %v3404_v37  ;;  %v3374_v12 = vmul.f32 1.442695, %v3314_v45  ;;  %v11484_v3 = vpack.c.bf16 %v9648_v56, %v9648_v56  ;;  %v11485_v4 = vpack.c.bf16 %v9680_v32, %v9680_v32  ;;  %v6121_v58 = vpop.eup %6120  ;;  %v11486_v45 = vld [vmem:[#allocation79_spill] sm:$0xff] }
 0x2f0   : > { %v3462_v36 = vmax.f32 %v6117_v22, 0.0  ;;  %v3403_v49 = vadd.f32 1.0, %v6119_v25  ;;  %v3376_v1 = vmul.f32 1.442695, %v3315_v30  ;;  %v3286_v34 = vsub.f32 0.0, %v3155_v55  ;;  %v11487_v25 = vld [vmem:[#allocation94_spill] sm:$0xff] }
 0x2f1   : > { %4284 = vrot.lane.b32.xlu1 %v11484_v3, %s6407_s24  ;;  %v3225_v61 = vadd.f32 %v11369_v41, %v2861_v57  ;;  %6140 = vpow2.f32 %v3380_v47  ;;  %v3316_v37 = vsub.f32 0.0, %v3185_v21  ;;  %v2859_v56 = vadd.f32 %v9622_v50, %v11486_v45 }
 0x2f2   : > { %4282 = vrot.lane.b32.xlu0 %v11485_v4, %s6407_s24  ;;  %v3224_v8 = vadd.f32 %v11369_v41, %v2860_v33  ;;  %v9823_v63 = vpop.permute.xlu1 %2780  ;;  %v9829_v3 = vmin.f32 %v3461_v38, 1.0  ;;  %v9831_v30 = vmin.f32 %v3460_v16, 1.0  ;;  %v9833_v55 = vmin.f32 %v3459_v17, 1.0  ;;  %v6123_v57 = vpop.eup %6122  ;;  %v11490_v4 = vld [vmem:[#allocation93_spill] sm:$0xff] }
 0x2f3   : > { %v9825_v32 = vpop.permute.xlu0 %2782  ;;  %6142 = vpow2.f32 %v3374_v12  ;;  %v2865_v50 = vadd.f32 %v9701_v15, %v11487_v25  ;;  %v11488_v33 = vpack.c.bf16 %v9676_v54, %v9676_v54  ;;  %v11489_v47 = vpack.c.bf16 %v9686_v40, %v9686_v40  ;;  %v6125_v16 = vpop.eup %6124 }
 0x2f4   : > { %v9845_v21 = vmin.f32 %v3462_v36, 1.0  ;;  %v3465_v38 = vmax.f32 %v6121_v58, 0.0  ;;  %6144 = vpow2.f32 %v3376_v1  ;;  %v3318_v17 = vmul.f32 1.442695, %v3286_v34  ;;  %v11491_v36 = vld [vmem:[#allocation92_spill] sm:$0xff]  ;;  %v11494_v34 = vld [vmem:[#allocation95_spill] sm:$0xff] }
 0x2f5   : > { %4280 = vrot.lane.b32.xlu1 %v11488_v33, %s6407_s24  ;;  %v3737_v12 = vsub.f32 0.0, %v3225_v61  ;;  %v2862_v15 = vadd.f32 %v9708_v62, %v11490_v4  ;;  %v9849_v45 = vpop.eup %6126  ;;  %6146 = vrcp.f32 %v3403_v49  ;;  %v3378_v54 = vmul.f32 1.442695, %v3316_v37 }
 0x2f6   : > { %4286 = vrot.lane.b32.xlu0 %v11489_v47, %s6407_s24  ;;  %v3223_v25 = vadd.f32 %v11369_v41, %v2859_v56  ;;  %v3736_v33 = vsub.f32 0.0, %v3224_v8  ;;  %v9852_v22 = vpop.permute.xlu1 %4541  ;;  %v9854_v40 = vpop.eup %6128  ;;  %v2864_v58 = vadd.f32 %v9734_v44, %v11491_v36  ;;  %v3409_v37 = vadd.f32 1.0, %v6125_v16 }
 0x2f7   : > { %v9858_v1 = vpop.permute.xlu0 %4547  ;;  %v6131_v61 = vpop.eup %6130  ;;  %v3229_v56 = vadd.f32 %v11369_v41, %v2865_v50  ;;  %v11492_v8 = vpack.c.bf16 %v9705_v9, %v9705_v9  ;;  %v11493_v44 = vpack.c.bf16 %v9724_v13, %v9724_v13  ;;  %v3464_v4 = vmax.f32 %v6123_v57, 0.0 }
 0x2f8   : > { %v6133_v36 = vpop.eup %6132  ;;  %6148 = vpow2.f32 %v3318_v17  ;;  %v3772_v49 = vmul.f32 1.442695, %v3737_v12  ;;  %v3226_v16 = vadd.f32 %v11369_v41, %v2862_v15  ;;  %v9878_v50 = vmin.f32 %v3465_v38, 1.0  ;;  %v11495_v17 = vld [vmem:[#allocation98_spill] sm:$0xff] }
 0x2f9   : > { %4292 = vrot.lane.b32.xlu1 %v11492_v8, %s6407_s24  ;;  %v6135_v62 = vpop.eup %6134  ;;  %6150 = vpow2.f32 %v3378_v54  ;;  %v3735_v9 = vsub.f32 0.0, %v3223_v25  ;;  %v3770_v8 = vmul.f32 1.442695, %v3736_v33  ;;  %v2863_v5 = vadd.f32 %v9728_v20, %v11494_v34  ;;  %v11496_v33 = vld [vmem:[#allocation97_spill] sm:$0xff] }
 0x2fa   : > { %4290 = vrot.lane.b32.xlu0 %v11493_v44, %s6407_s24  ;;  %v9882_v13 = vpop.permute.xlu1 %4545  ;;  %v9884_v44 = vpop.eup %6136  ;;  %v3406_v47 = vadd.f32 1.0, %v6131_v61  ;;  %v3228_v57 = vadd.f32 %v11369_v41, %v2864_v58  ;;  %v2869_v12 = vadd.f32 %v9803_v53, %v11495_v17  ;;  %v3463_v38 = vmax.f32 %v9849_v45, 0.0 }
 0x2fb   : > { %v9889_v15 = vpop.permute.xlu0 %4543  ;;  %6152 = vrcp.f32 %v3409_v37  ;;  %v3407_v54 = vadd.f32 1.0, %v6133_v36  ;;  %v3741_v25 = vsub.f32 0.0, %v3229_v56  ;;  %v2866_v20 = vadd.f32 %v9805_v18, %v11496_v33 }
 0x2fc   : > { %v11497_v34 = vpack.c.bf16 %v9732_v24, %v9732_v24  ;;  %v11498_v58 = vpack.c.bf16 %v9736_v39, %v9736_v39  ;;  %v9902_v53 = vpop.eup %6138  ;;  %v3408_v61 = vadd.f32 1.0, %v6135_v62  ;;  %6154 = vpow2.f32 %v3772_v49 }
 0x2fd   : > { %v3738_v45 = vsub.f32 0.0, %v3226_v16  ;;  %v9904_v37 = vmin.f32 %v3464_v4, 1.0  ;;  %v3768_v56 = vmul.f32 1.442695, %v3735_v9  ;;  %6156 = vpow2.f32 %v3770_v8 }
 0x2fe   : > { %4288 = vrot.lane.b32.xlu1 %v11497_v34, %s6407_s24  ;;  %4294 = vrot.lane.b32.xlu0 %v11498_v58, %s6407_s24  ;;  %v3227_v18 = vadd.f32 %v11369_v41, %v2863_v5  ;;  %v2793_v36 = vpop.permute.xlu1 %2792  ;;  %v3466_v24 = vmax.f32 %v9854_v40, 0.0  ;;  %v6141_v17 = vpop.eup %6140  ;;  %6158 = vrcp.f32 %v3406_v47  ;;  %v3740_v33 = vsub.f32 0.0, %v3228_v57  ;;  %v11499_v34 = vld [vmem:[#allocation96_spill] sm:$0xff] }
 0x2ff   : > { %v3233_v39 = vadd.f32 %v11369_v41, %v2869_v12  ;;  %v2868_v58 = vadd.f32 %v9825_v32, %v11499_v34  ;;  %v2787_v62 = vpop.permute.xlu0 %2786  ;;  %6160 = vrcp.f32 %v3407_v54  ;;  %v3780_v49 = vmul.f32 1.442695, %v3741_v25 }
 0x300   : > { %v3230_v4 = vadd.f32 %v11369_v41, %v2866_v20  ;;  %v11500_v5 = vpack.c.bf16 %v9757_v14, %v9757_v14  ;;  %v11501_v40 = vpack.c.bf16 %v9763_v10, %v9763_v10  ;;  %v6143_v16 = vpop.eup %6142  ;;  %6162 = vrcp.f32 %v3408_v61 }
 0x301   : > { %v3774_v32 = vmul.f32 1.442695, %v3738_v45  ;;  %v5388_v9 = vpack.c.bf16 %v9904_v37, %v9904_v37  ;;  %v9924_v8 = vmin.f32 %v3463_v38, 1.0  ;;  %v6145_v57 = vpop.eup %6144  ;;  %v3413_v12 = vadd.f32 1.0, %v6141_v17 }
 0x302   : > { %4300 = vrot.lane.b32.xlu1 %v11500_v5, %s6407_s24  ;;  %4298 = vrot.lane.b32.xlu0 %v11501_v40, %s6407_s24  ;;  %6164 = vpow2.f32 %v3768_v56  ;;  %v3739_v14 = vsub.f32 0.0, %v3227_v18  ;;  %v2789_v54 = vpop.permute.xlu1 %2788  ;;  %v9926_v25 = vmin.f32 %v3466_v24, 1.0  ;;  %v6147_v10 = vpop.eup %6146  ;;  %v3778_v20 = vmul.f32 1.442695, %v3740_v33  ;;  %v11502_v5 = vld [vmem:[#allocation99_spill] sm:$0xff] }
 0x303   : > { %v3745_v34 = vsub.f32 0.0, %v3233_v39  ;;  %v2867_v40 = vadd.f32 %v9823_v63, %v11502_v5  ;;  %v3232_v61 = vadd.f32 %v11369_v41, %v2868_v58  ;;  %v2791_v45 = vpop.permute.xlu0 %2790  ;;  %v3410_v47 = vadd.f32 1.0, %v6143_v16  ;;  %v11505_v63 = vld [vmem:[#allocation101_spill] sm:$0xff] }
 0x304   : > { %6166 = vpow2.f32 %v3780_v49  ;;  %v3742_v38 = vsub.f32 0.0, %v3230_v4  ;;  %v11503_v56 = vpack.c.bf16 %v9795_v0, %v9795_v0  ;;  %v11504_v18 = vpack.c.bf16 %v9807_v52, %v9807_v52  ;;  %v11506_v4 = vld [vmem:[#allocation102_spill] sm:$0xff] }
 0x305   : > { %v3469_v24 = vmax.f32 %v9884_v44, 0.0  ;;  %v3411_v17 = vadd.f32 1.0, %v6145_v57  ;;  %6168 = vpow2.f32 %v3774_v32  ;;  %v2870_v33 = vadd.f32 %v2787_v62, %v11505_v63  ;;  %v6149_v58 = vpop.eup %6148 }
 0x306   : > { %4296 = vrot.lane.b32.xlu1 %v11503_v56, %s6407_s24  ;;  %4302 = vrot.lane.b32.xlu0 %v11504_v18, %s6407_s24  ;;  %6170 = vrcp.f32 %v3413_v12  ;;  %v3776_v49 = vmul.f32 1.442695, %v3739_v14  ;;  %v2873_v0 = vadd.f32 %v2793_v36, %v11506_v4  ;;  %v9944_v16 = vpop.permute.xlu1 %4549  ;;  %v3468_v5 = vmax.f32 %v9902_v53, 0.0  ;;  %v6151_v52 = vpop.eup %6150  ;;  %v11509_v18 = vld [vmem:[#allocation100_spill] sm:$0xff] }
 0x307   : > { %6172 = vpow2.f32 %v3778_v20  ;;  %v3788_v56 = vmul.f32 1.442695, %v3745_v34  ;;  %v3231_v44 = vadd.f32 %v11369_v41, %v2867_v40  ;;  %v3744_v32 = vsub.f32 0.0, %v3232_v61  ;;  %v9948_v57 = vpop.permute.xlu0 %4555 }
 0x308   : > { %6174 = vrcp.f32 %v3410_v47  ;;  %v3782_v62 = vmul.f32 1.442695, %v3742_v38  ;;  %v11507_v12 = vpack.c.bf16 %v9829_v3, %v9829_v3  ;;  %v11508_v36 = vpack.c.bf16 %v9831_v30, %v9831_v30  ;;  %v6153_v20 = vpop.eup %6152 }
 0x309   : > { %v9958_v53 = vmin.f32 %v3469_v24, 1.0  ;;  %v3467_v14 = vmax.f32 %v6147_v10, 0.0  ;;  %6176 = vrcp.f32 %v3411_v17  ;;  %v3382_v34 = vadd.f32 1.0, %v6149_v58  ;;  %v6155_v61 = vpop.eup %6154 }
 0x30a   : > { %4308 = vrot.lane.b32.xlu1 %v11507_v12, %s6407_s24  ;;  %4306 = vrot.lane.b32.xlu0 %v11508_v36, %s6407_s24  ;;  %v3234_v40 = vadd.f32 %v11369_v41, %v2870_v33  ;;  %v3412_v38 = vadd.f32 1.0, %v6151_v52  ;;  %6178 = vpow2.f32 %v3776_v49  ;;  %v3237_v3 = vadd.f32 %v11369_v41, %v2873_v0  ;;  %v9965_v30 = vpop.permute.xlu1 %4553  ;;  %v6157_v24 = vpop.eup %6156  ;;  %v11510_v12 = vld [vmem:[#allocation103_spill] sm:$0xff] }
 0x30b   : > { %v2872_v63 = vadd.f32 %v2791_v45, %v11509_v18  ;;  %6180 = vpow2.f32 %v3788_v56  ;;  %v3743_v10 = vsub.f32 0.0, %v3231_v44  ;;  %v3786_v4 = vmul.f32 1.442695, %v3744_v32  ;;  %v9967_v17 = vpop.permute.xlu0 %4551  ;;  %v6159_v33 = vpop.eup %6158 }
 0x30c   : > { %v9969_v58 = vmin.f32 %v3468_v5, 1.0  ;;  %6182 = vpow2.f32 %v3782_v62  ;;  %v2871_v36 = vadd.f32 %v2789_v54, %v11510_v12  ;;  %v11511_v49 = vpack.c.bf16 %v9833_v55, %v9833_v55  ;;  %v9984_v5 = vpop.eup %6160 }
 0x30d   : > { %v11512_v45 = vpack.c.bf16 %v9845_v21, %v9845_v21  ;;  %v9982_v52 = vmin.f32 %v3467_v14, 1.0  ;;  %6184 = vrcp.f32 %v3382_v34  ;;  %v3833_v56 = vadd.f32 1.0, %v6155_v61  ;;  %v6163_v32 = vpop.eup %6162 }
 0x30e   : > { %4304 = vrot.lane.b32.xlu1 %v11511_v49, %s6407_s24  ;;  %v3746_v54 = vsub.f32 0.0, %v3234_v40  ;;  %v3473_v44 = vmax.f32 %v6153_v20, 0.0  ;;  %6186 = vrcp.f32 %v3412_v38  ;;  %v3832_v55 = vadd.f32 1.0, %v6157_v24  ;;  %v2801_v12 = vpop.permute.xlu1 %2800  ;;  %v11513_v20 = vld [vmem:[#allocation105_spill] sm:$0xff] }
 0x30f   : > { %4310 = vrot.lane.b32.xlu0 %v11512_v45, %s6407_s24  ;;  %v3749_v62 = vsub.f32 0.0, %v3237_v3  ;;  %v3236_v18 = vadd.f32 %v11369_v41, %v2872_v63  ;;  %v6165_v21 = vpop.eup %6164  ;;  %v3784_v49 = vmul.f32 1.442695, %v3743_v10  ;;  %6188 = vpow2.f32 %v3786_v4  ;;  %v2795_v45 = vpop.permute.xlu0 %2794  ;;  %v11515_v10 = vld [vmem:[#allocation42_spill] sm:$0xff] }
 0x310   : > { %v5392_v14 = vpack.c.bf16 %v9969_v58, %v9969_v58  ;;  %v3470_v0 = vmax.f32 %v6159_v33, 0.0  ;;  %v3235_v40 = vadd.f32 %v11369_v41, %v2871_v36  ;;  %v2874_v61 = vadd.f32 %v2795_v45, %v11513_v20 }
 0x311   : > { %v11514_v38 = vpack.c.bf16 %v9878_v50, %v9878_v50  ;;  %v6167_v63 = vpop.eup %6166  ;;  %6190 = vrcp.f32 %v3833_v56  ;;  %v3790_v24 = vmul.f32 1.442695, %v3746_v54  ;;  %v2877_v4 = vadd.f32 %v2801_v12, %v11515_v10  ;;  %v11516_v12 = vld [vmem:[#allocation54_spill] sm:$0xff]  ;;  %v11517_v10 = vld [vmem:[#allocation104_spill] sm:$0xff] }
 0x312   : > { %v10003_v58 = vmin.f32 %v3473_v44, 1.0  ;;  %v6169_v33 = vpop.eup %6168  ;;  %6192 = vrcp.f32 %v3832_v55  ;;  %v3796_v36 = vmul.f32 1.442695, %v3749_v62  ;;  %v3748_v50 = vsub.f32 0.0, %v3236_v18  ;;  %v2797_v20 = vpop.permute.xlu1 %2796 }
 0x313   : > { %4316 = vrot.lane.b32.xlu1 %v11514_v38, %s6407_s24  ;;  %4314 = vrot.lane.b32.xlu0 %v5388_v9, %s6407_s24  ;;  %v3238_v45 = vadd.f32 %v11369_v41, %v2874_v61  ;;  %v10006_v38 = vpop.eup %6170  ;;  %v3831_v37 = vadd.f32 1.0, %v6165_v21  ;;  %6194 = vpow2.f32 %v3784_v49  ;;  %v2799_v9 = vpop.permute.xlu0 %2798  ;;  %v3502_v34 = vmin.f32 %v3470_v0, 1.0 }
 0x314   : > { %v3472_v3 = vmax.f32 %v6163_v32, 0.0  ;;  %v6173_v56 = vpop.eup %6172  ;;  %v3837_v54 = vadd.f32 1.0, %v6167_v63  ;;  %v3747_v47 = vsub.f32 0.0, %v3235_v40  ;;  %v2875_v44 = vadd.f32 %v2797_v20, %v11516_v12 }
 0x315   : > { %v2876_v39 = vadd.f32 %v2799_v9, %v11517_v10  ;;  %v11518_v55 = vpack.c.bf16 %v9924_v8, %v9924_v8  ;;  %v11519_v62 = vpack.c.bf16 %v9926_v25, %v9926_v25  ;;  %v6175_v18 = vpop.eup %6174  ;;  %v3834_v0 = vadd.f32 1.0, %v6169_v33 }
 0x316   : > { %6196 = vpow2.f32 %v3790_v24  ;;  %v3241_v32 = vadd.f32 %v11369_v41, %v2877_v4  ;;  %v3750_v21 = vsub.f32 0.0, %v3238_v45  ;;  %v10019_v49 = vpop.eup %6176  ;;  %v3794_v40 = vmul.f32 1.442695, %v3748_v50  ;;  %v10022_v63 = vpop.permute.xlu1 %4557 }
 0x317   : > { %4312 = vrot.lane.b32.xlu1 %v11518_v55, %s6407_s24  ;;  %4318 = vrot.lane.b32.xlu0 %v11519_v62, %s6407_s24  ;;  %6198 = vpow2.f32 %v3796_v36  ;;  %v3240_v61 = vadd.f32 %v11369_v41, %v2876_v39  ;;  %v5397_v8 = vpack.c.bf16 %v10003_v58, %v10003_v58  ;;  %v6179_v20 = vpop.eup %6178  ;;  %v3836_v25 = vadd.f32 1.0, %v6173_v56  ;;  %v10026_v9 = vpop.permute.xlu0 %4563 }
 0x318   : > { %6200 = vrcp.f32 %v3831_v37  ;;  %v3504_v24 = vmin.f32 %v3472_v3, 1.0  ;;  %v3471_v4 = vmax.f32 %v9984_v5, 0.0  ;;  %v6181_v33 = vpop.eup %6180  ;;  %v3792_v45 = vmul.f32 1.442695, %v3747_v47 }
 0x319   : > { %6202 = vrcp.f32 %v3837_v54  ;;  %v3239_v36 = vadd.f32 %v11369_v41, %v2875_v44  ;;  %v11520_v39 = vpack.c.bf16 %v9958_v53, %v9958_v53  ;;  %v5394_v58 = vpack.c.bf16 %v3502_v34, %v3502_v34  ;;  %v6183_v50 = vpop.eup %6182 }
 0x31a   : > { %6204 = vrcp.f32 %v3834_v0  ;;  %v3753_v37 = vsub.f32 0.0, %v3241_v32  ;;  %v3798_v56 = vmul.f32 1.442695, %v3750_v21  ;;  %v3477_v3 = vmax.f32 %v10006_v38, 0.0  ;;  %v6185_v5 = vpop.eup %6184  ;;  %v10036_v54 = vpop.permute.xlu1 %4565 }
 0x31b   : > { %4324 = vrot.lane.b32.xlu1 %v11520_v39, %s6407_s24  ;;  %4322 = vrot.lane.b32.xlu0 %v5392_v14, %s6407_s24  ;;  %v3835_v12 = vadd.f32 1.0, %v6179_v20  ;;  %6206 = vpow2.f32 %v3794_v40  ;;  %v3752_v47 = vsub.f32 0.0, %v3240_v61  ;;  %v3474_v44 = vmax.f32 %v6175_v18, 0.0  ;;  %v6187_v10 = vpop.eup %6186  ;;  %v10038_v55 = vpop.permute.xlu0 %4559 }
 0x31c   : > { %6208 = vrcp.f32 %v3836_v25  ;;  %v3841_v53 = vadd.f32 1.0, %v6181_v33  ;;  %v5396_v14 = vpack.c.bf16 %v3504_v24, %v3504_v24  ;;  %v3503_v34 = vmin.f32 %v3471_v4, 1.0  ;;  %v6189_v62 = vpop.eup %6188 }
 0x31d   : > { %v3838_v0 = vadd.f32 1.0, %v6183_v50  ;;  %6210 = vpow2.f32 %v3792_v45  ;;  %v3751_v32 = vsub.f32 0.0, %v3239_v36  ;;  %v11521_v38 = vpack.c.bf16 %v9982_v52, %v9982_v52 }
 0x31e   : > { %v3475_v18 = vmax.f32 %v10019_v49, 0.0  ;;  %v3804_v21 = vmul.f32 1.442695, %v3753_v37  ;;  %6212 = vpow2.f32 %v3798_v56  ;;  %v10046_v40 = vmin.f32 %v3477_v3, 1.0  ;;  %v6191_v20 = vpop.eup %6190  ;;  %v10048_v24 = vpop.permute.xlu1 %4561 }
 0x31f   : > { %4320 = vrot.lane.b32.xlu1 %v11521_v38, %s6407_s24  ;;  %4326 = vrot.lane.b32.xlu0 %v5394_v58, %s6407_s24  ;;  %v3446_v61 = vmax.f32 %v6185_v5, 0.0  ;;  %6214 = vrcp.f32 %v3835_v12  ;;  %v3802_v25 = vmul.f32 1.442695, %v3752_v47  ;;  %v3506_v4 = vmin.f32 %v3474_v44, 1.0  ;;  %v10050_v45 = vpop.eup %6192  ;;  %v2803_v58 = vpop.permute.xlu0 %2802  ;;  %v11523_v38 = vld [vmem:[#allocation67_spill] sm:$0xff] }
 0x320   : > { %v3476_v33 = vmax.f32 %v6187_v10, 0.0  ;;  %v11522_v52 = vsub.f32 0.0, %v9627_v29  ;;  %v10058_v49 = vadd.f32 %v11082_v27, %v9656_v59  ;;  %6216 = vrcp.f32 %v3841_v53  ;;  %v6195_v50 = vpop.eup %6194 }
 0x321   : > { %v3840_v39 = vadd.f32 1.0, %v6189_v62  ;;  %6218 = vrcp.f32 %v3838_v0  ;;  %v3800_v37 = vmul.f32 1.442695, %v3751_v32  ;;  %v2878_v56 = vadd.f32 %v2803_v58, %v11373_v43 }
 0x322   : > { %v10054_v36 = vmul.f32 1.442695, %v11522_v52  ;;  %v10063_v3 = vmin.f32 %v3475_v18, 1.0  ;;  %6220 = vpow2.f32 %v3804_v21  ;;  %v5395_v29 = vpack.c.bf16 %v3503_v34, %v3503_v34  ;;  %v2809_v44 = vpop.permute.xlu1 %2808 }
 0x323   : > { %4332 = vrot.lane.b32.xlu1 %v5397_v8, %s6407_s24  ;;  %4330 = vrot.lane.b32.xlu0 %v5396_v14, %s6407_s24  ;;  %v5401_v59 = vpack.c.bf16 %v10046_v40, %v10046_v40  ;;  %v3478_v5 = vmin.f32 %v3446_v61, 1.0  ;;  %v6197_v12 = vpop.eup %6196  ;;  %6222 = vpow2.f32 %v3802_v25  ;;  %v3242_v47 = vadd.f32 %v11369_v41, %v2878_v56  ;;  %v2807_v14 = vpop.permute.xlu0 %2806 }
 0x324   : > { %v5398_v10 = vpack.c.bf16 %v3506_v4, %v3506_v4  ;;  %v3508_v53 = vmin.f32 %v3476_v33, 1.0  ;;  %v6199_v43 = vpop.eup %6198  ;;  %v3839_v62 = vadd.f32 1.0, %v6195_v50  ;;  %6224 = vrcp.f32 %v3840_v39 }
 0x325   : > { %v2881_v8 = vadd.f32 %v2809_v44, %v11377_v23  ;;  %v3897_v0 = vmax.f32 %v6191_v20, 0.0  ;;  %v6201_v32 = vpop.eup %6200  ;;  %6226 = vpow2.f32 %v3800_v37  ;;  %v3754_v34 = vsub.f32 0.0, %v3242_v47 }
 0x326   : > { %v2880_v18 = vadd.f32 %v2807_v14, %v11523_v38  ;;  %v5399_v21 = vpack.c.bf16 %v10063_v3, %v10063_v3  ;;  %v6203_v40 = vpop.eup %6202  ;;  %v3842_v61 = vadd.f32 1.0, %v6197_v12  ;;  %v5370_v4 = vpack.c.bf16 %v3478_v5, %v3478_v5  ;;  %v2805_v58 = vpop.permute.xlu1 %2804 }
 0x327   : > { %4328 = vrot.lane.b32.xlu1 %v5395_v29, %s6407_s24  ;;  %4334 = vrot.lane.b32.xlu0 %v5398_v10, %s6407_s24  ;;  %v3245_v25 = vadd.f32 %v11369_v41, %v2881_v8  ;;  %v3896_v23 = vmax.f32 %v10050_v45, 0.0  ;;  %v6205_v20 = vpop.eup %6204  ;;  %v3845_v33 = vadd.f32 1.0, %v6199_v43  ;;  %v3806_v52 = vmul.f32 1.442695, %v3754_v34  ;;  %v11524_v29 = vld [vmem:[#allocation69_spill] sm:$0xff]  ;;  %v10078_v3 = vpop.permute.xlu0 %4957 }
 0x328   : > { %v3244_v39 = vadd.f32 %v11369_v41, %v2880_v18  ;;  %v5400_v50 = vpack.c.bf16 %v3508_v53, %v3508_v53  ;;  %v6207_v37 = vpop.eup %6206  ;;  %6228 = vrcp.f32 %v3839_v62  ;;  %v2879_v47 = vadd.f32 %v2805_v58, %v11524_v29 }
 0x329   : > { %v3757_v56 = vsub.f32 0.0, %v3245_v25  ;;  %v3929_v12 = vmin.f32 %v3897_v0, 1.0  ;;  %v6209_v44 = vpop.eup %6208  ;;  %6230 = vpow2.f32 %v3806_v52  ;;  %v3895_v45 = vmax.f32 %v6201_v32, 0.0 }
 0x32a   : > { %v3756_v5 = vsub.f32 0.0, %v3244_v39  ;;  %v3901_v10 = vmax.f32 %v6203_v40, 0.0  ;;  %v6211_v43 = vpop.eup %6210  ;;  %6232 = vrcp.f32 %v3842_v61  ;;  %v3243_v62 = vadd.f32 %v11369_v41, %v2879_v47  ;;  %v10083_v0 = vpop.permute.xlu1 %4955 }
 0x32b   : > { %4340 = vrot.lane.b32.xlu1 %v5401_v59, %s6407_s24  ;;  %4278 = vrot.lane.b32.xlu0 %v5370_v4, %s6407_s24  ;;  %v3812_v53 = vmul.f32 1.442695, %v3757_v56  ;;  %v3928_v8 = vmin.f32 %v3896_v23, 1.0  ;;  %v6213_v14 = vpop.eup %6212  ;;  %6234 = vrcp.f32 %v3845_v33  ;;  %v3844_v34 = vadd.f32 1.0, %v6207_v37  ;;  %v10088_v40 = vpop.permute.xlu0 %4953 }
 0x32c   : > { %v3810_v38 = vmul.f32 1.442695, %v3756_v5  ;;  %v3898_v18 = vmax.f32 %v6205_v20, 0.0  ;;  %v6215_v25 = vpop.eup %6214  ;;  %v10086_v59 = vadd.f32 1.0, %v9533_v11  ;;  %v3755_v32 = vsub.f32 0.0, %v3243_v62 }
 0x32d   : > { %6236 = vpow2.f32 %v3812_v53  ;;  %v3900_v61 = vmax.f32 %v6209_v44, 0.0  ;;  %v10090_v4 = vpop.eup %6216  ;;  %v3843_v52 = vadd.f32 1.0, %v6211_v43  ;;  %v3927_v23 = vmin.f32 %v3895_v45, 1.0  ;;  %v11525_v53 = vld [vmem:[#allocation91_spill] sm:$0xff] }
 0x32e   : > { %6238 = vpow2.f32 %v3810_v38  ;;  %v10094_v33 = vmin.f32 %v3901_v10, 1.0  ;;  %v6219_v20 = vpop.eup %6218  ;;  %v3985_v11 = vsub.f32 0.0, %v10058_v49  ;;  %v3846_v39 = vadd.f32 1.0, %v6213_v14  ;;  %v2817_v29 = vpop.permute.xlu1 %2816 }
 0x32f   : > { %4336 = vrot.lane.b32.xlu1 %v5399_v21, %s6407_s24  ;;  %4338 = vrot.lane.b32.xlu0 %v5400_v50, %s6407_s24  ;;  %v3808_v58 = vmul.f32 1.442695, %v3755_v32  ;;  %v5437_v37 = vpack.c.bf16 %v3929_v12, %v3929_v12  ;;  %v6221_v56 = vpop.eup %6220  ;;  %6240 = vrcp.f32 %v3844_v34  ;;  %v5436_v47 = vpack.c.bf16 %v3928_v8, %v3928_v8  ;;  %v11526_v21 = vld [vmem:[#allocation87_spill] sm:$0xff]  ;;  %v2811_v45 = vpop.permute.xlu0 %2810 }
 0x330   : > { %v3930_v44 = vmin.f32 %v3898_v18, 1.0  ;;  %v3899_v5 = vmax.f32 %v6215_v25, 0.0  ;;  %v6223_v43 = vpop.eup %6222  ;;  %v10099_v62 = vadd.f32 %v11526_v21, %v11525_v53  ;;  %v2885_v50 = vadd.f32 %v2817_v29, %v11452_v6 }
 0x331   : > { %6242 = vpow2.f32 %v3808_v58  ;;  %v3932_v10 = vmin.f32 %v3900_v61, 1.0  ;;  %v6225_v38 = vpop.eup %6224  ;;  %v2882_v12 = vadd.f32 %v2811_v45, %v11439_v48  ;;  %v5435_v8 = vpack.c.bf16 %v3927_v23, %v3927_v23 }
 0x332   : > { %6244 = vrcp.f32 %v3843_v52  ;;  %v5441_v14 = vpack.c.bf16 %v10094_v33, %v10094_v33  ;;  %v6227_v34 = vpop.eup %6226  ;;  %v3849_v18 = vadd.f32 1.0, %v6221_v56  ;;  %v3249_v25 = vadd.f32 %v11369_v41, %v2885_v50  ;;  %v2813_v52 = vpop.permute.xlu1 %2812 }
 0x333   : > { %4734 = vrot.lane.b32.xlu1 %v5437_v37, %s6405_s22  ;;  %4732 = vrot.lane.b32.xlu0 %v5436_v47, %s6405_s22  ;;  %6246 = vrcp.f32 %v3846_v39  ;;  %v3902_v6 = vmax.f32 %v6219_v20, 0.0  ;;  %v3848_v32 = vadd.f32 1.0, %v6223_v43  ;;  %v3246_v61 = vadd.f32 %v11369_v41, %v2882_v12  ;;  %v2815_v47 = vpop.permute.xlu0 %2814 }
 0x334   : > { %v5438_v58 = vpack.c.bf16 %v3930_v44, %v3930_v44  ;;  %v3931_v48 = vmin.f32 %v3899_v5, 1.0  ;;  %v3761_v29 = vsub.f32 0.0, %v3249_v25  ;;  %v2883_v37 = vadd.f32 %v2813_v52, %v11393_v42 }
 0x335   : > { %v5440_v23 = vpack.c.bf16 %v3932_v10, %v3932_v10  ;;  %v3905_v21 = vmax.f32 %v10090_v4, 0.0  ;;  %v6229_v33 = vpop.eup %6228  ;;  %v3847_v45 = vadd.f32 1.0, %v6227_v34  ;;  %v3758_v56 = vsub.f32 0.0, %v3246_v61 }
 0x336   : > { %v2884_v39 = vadd.f32 %v2815_v47, %v11388_v35  ;;  %v3904_v20 = vmax.f32 %v6225_v38, 0.0  ;;  %v6231_v43 = vpop.eup %6230  ;;  %6248 = vrcp.f32 %v3849_v18  ;;  %v3820_v44 = vmul.f32 1.442695, %v3761_v29  ;;  %v10116_v34 = vpop.permute.xlu1 %4959 }
 0x337   : > { %4730 = vrot.lane.b32.xlu1 %v5435_v8, %s6405_s22  ;;  %4736 = vrot.lane.b32.xlu0 %v5438_v58, %s6405_s22  ;;  %v3247_v5 = vadd.f32 %v11369_v41, %v2883_v37  ;;  %v3934_v42 = vmin.f32 %v3902_v6, 1.0  ;;  %v6233_v50 = vpop.eup %6232  ;;  %6250 = vrcp.f32 %v3848_v32  ;;  %v3850_v10 = vadd.f32 1.0, %v6231_v43  ;;  %v10118_v25 = vpop.permute.xlu0 %4961 }
 0x338   : > { %v3814_v4 = vmul.f32 1.442695, %v3758_v56  ;;  %v3248_v12 = vadd.f32 %v11369_v41, %v2884_v39  ;;  %v6235_v35 = vpop.eup %6234  ;;  %6252 = vpow2.f32 %v3820_v44  ;;  %v5439_v38 = vpack.c.bf16 %v3931_v48, %v3931_v48  ;;  %v11527_v44 = vld [vmem:[#allocation78_spill] sm:$0xff] }
 0x339   : > { %v3759_v8 = vsub.f32 0.0, %v3247_v5  ;;  %v3937_v61 = vmin.f32 %v3905_v21, 1.0  ;;  %6254 = vrcp.f32 %v3847_v45  ;;  %v3936_v6 = vmin.f32 %v3904_v20, 1.0 }
 0x33a   : > { %v6237_v18 = vpop.eup %6236  ;;  %v3760_v52 = vsub.f32 0.0, %v3248_v12  ;;  %v3903_v32 = vmax.f32 %v6229_v33, 0.0  ;;  %6256 = vpow2.f32 %v3814_v4  ;;  %v3906_v47 = vmax.f32 %v6233_v50, 0.0  ;;  %v2825_v43 = vpop.permute.xlu1 %2824 }
 0x33b   : > { %4742 = vrot.lane.b32.xlu1 %v5441_v14, %s6405_s22  ;;  %4740 = vrot.lane.b32.xlu0 %v5440_v23, %s6405_s22  ;;  %v6239_v58 = vpop.eup %6238  ;;  %v3853_v29 = vadd.f32 1.0, %v6237_v18  ;;  %v3816_v37 = vmul.f32 1.442695, %v3759_v8  ;;  %6258 = vrcp.f32 %v3850_v10  ;;  %v5442_v48 = vpack.c.bf16 %v3934_v42, %v3934_v42  ;;  %v2819_v23 = vpop.permute.xlu0 %2818 }
 0x33c   : > { %v3852_v56 = vadd.f32 1.0, %v6239_v58  ;;  %v3818_v39 = vmul.f32 1.442695, %v3760_v52  ;;  %v6241_v21 = vpop.eup %6240  ;;  %v10124_v45 = vmul.f32 1.442695, %v3985_v11  ;;  %v2889_v14 = vadd.f32 %v2825_v43, %v11525_v53  ;;  %v11528_v52 = vld [vmem:[#allocation88_spill] sm:$0xff] }
 0x33d   : > { %6260 = vrcp.f32 %v3853_v29  ;;  %v3909_v33 = vmax.f32 %v6235_v35, 0.0  ;;  %v2886_v5 = vadd.f32 %v2819_v23, %v11527_v44  ;;  %v5445_v50 = vpack.c.bf16 %v3937_v61, %v3937_v61  ;;  %v11529_v58 = vld [vmem:[#allocation10_spill] sm:$0xff] }
 0x33e   : > { %v6243_v20 = vpop.eup %6242  ;;  %6262 = vrcp.f32 %v3852_v56  ;;  %v3935_v42 = vmin.f32 %v3903_v32, 1.0  ;;  %v3253_v49 = vadd.f32 %v11369_v41, %v2889_v14  ;;  %v5444_v11 = vpack.c.bf16 %v3936_v6, %v3936_v6  ;;  %v11530_v43 = vld [vmem:[#allocation86_spill] sm:$0xff] }
 0x33f   : > { %4738 = vrot.lane.b32.xlu1 %v5439_v38, %s6405_s22  ;;  %4744 = vrot.lane.b32.xlu0 %v5442_v48, %s6405_s22  ;;  %v6245_v10 = vpop.eup %6244  ;;  %6264 = vpow2.f32 %v3816_v37  ;;  %v3938_v4 = vmin.f32 %v3906_v47, 1.0  ;;  %v3851_v53 = vadd.f32 1.0, %v6243_v20  ;;  %v3250_v35 = vadd.f32 %v11369_v41, %v2886_v5  ;;  %v2821_v8 = vpop.permute.xlu1 %2820 }
 0x340   : > { %v6247_v12 = vpop.eup %6246  ;;  %6266 = vpow2.f32 %v3818_v39  ;;  %v3908_v18 = vmax.f32 %v6241_v21, 0.0  ;;  %v3143_v38 = vadd.f32 %v11529_v58, %v11528_v52  ;;  %v3765_v29 = vsub.f32 0.0, %v3253_v49  ;;  %v2763_v32 = vpop.permute.xlu0 %2762 }
 0x341   : > { %v2887_v61 = vadd.f32 %v2821_v8, %v11528_v52  ;;  %v3941_v56 = vmin.f32 %v3909_v33, 1.0  ;;  %v3762_v37 = vsub.f32 0.0, %v3250_v35  ;;  %v2858_v48 = vadd.f32 %v2763_v32, %v11530_v43 }
 0x342   : > { %v5443_v6 = vpack.c.bf16 %v3935_v42, %v3935_v42  ;;  %v3907_v47 = vmax.f32 %v6245_v10, 0.0  ;;  %v3828_v39 = vmul.f32 1.442695, %v3765_v29  ;;  %v5446_v14 = vpack.c.bf16 %v3938_v4, %v3938_v4  ;;  %v11531_v4 = vld [vmem:[#allocation77_spill] sm:$0xff] }
 0x343   : > { %4750 = vrot.lane.b32.xlu1 %v5445_v50, %s6405_s22  ;;  %4748 = vrot.lane.b32.xlu0 %v5444_v11, %s6405_s22  ;;  %v3251_v21 = vadd.f32 %v11369_v41, %v2887_v61  ;;  %v3910_v23 = vmax.f32 %v6247_v12, 0.0  ;;  %v6249_v20 = vpop.eup %6248  ;;  %6268 = vrcp.f32 %v3851_v53  ;;  %v3822_v5 = vmul.f32 1.442695, %v3762_v37  ;;  %v10140_v33 = vpop.permute.xlu1 %4963 }
 0x344   : > { %v3222_v49 = vadd.f32 %v11369_v41, %v2858_v48  ;;  %v3940_v35 = vmin.f32 %v3908_v18, 1.0  ;;  %v6251_v8 = vpop.eup %6250  ;;  %v3283_v50 = vadd.f32 %v11082_v27, %v3143_v38  ;;  %6270 = vpow2.f32 %v3828_v39  ;;  %v2823_v42 = vpop.permute.xlu0 %2822 }
 0x345   : > { %v3763_v11 = vsub.f32 0.0, %v3251_v21  ;;  %v5449_v10 = vpack.c.bf16 %v3941_v56, %v3941_v56  ;;  %v6253_v52 = vpop.eup %6252  ;;  %6272 = vpow2.f32 %v3822_v5  ;;  %v2888_v12 = vadd.f32 %v2823_v42, %v11531_v4 }
 0x346   : > { %v3734_v58 = vsub.f32 0.0, %v3222_v49  ;;  %v3939_v53 = vmin.f32 %v3907_v47, 1.0  ;;  %v6255_v29 = vpop.eup %6254  ;;  %v3857_v61 = vadd.f32 1.0, %v6253_v52  ;;  %v3942_v32 = vmin.f32 %v3910_v23, 1.0 }
 0x347   : > { %4746 = vrot.lane.b32.xlu1 %v5443_v6, %s6405_s22  ;;  %4752 = vrot.lane.b32.xlu0 %v5446_v14, %s6405_s22  ;;  %v3824_v18 = vmul.f32 1.442695, %v3763_v11  ;;  %v3913_v37 = vmax.f32 %v6249_v20, 0.0  ;;  %v6257_v38 = vpop.eup %6256  ;;  %v3252_v48 = vadd.f32 %v11369_v41, %v2888_v12  ;;  %v10147_v56 = vpop.permute.xlu1 %4967  ;;  %v5448_v39 = vpack.c.bf16 %v3940_v35, %v3940_v35  ;;  %v11532_v14 = vld [vmem:[#allocation90_spill] sm:$0xff] }
 0x348   : > { %v3766_v43 = vmul.f32 1.442695, %v3734_v58  ;;  %v3912_v21 = vmax.f32 %v6251_v8, 0.0  ;;  %v6259_v5 = vpop.eup %6258  ;;  %v3285_v6 = vadd.f32 %v11082_v27, %v10099_v62  ;;  %v3142_v47 = vadd.f32 %v11532_v14, %v11527_v44  ;;  %v10153_v11 = vpop.permute.xlu0 %4965 }
 0x349   : > { %6274 = vrcp.f32 %v3857_v61  ;;  %v3854_v49 = vadd.f32 1.0, %v6257_v38  ;;  %v3987_v20 = vsub.f32 0.0, %v3283_v50  ;;  %v3764_v42 = vsub.f32 0.0, %v3252_v48 }
 0x34a   : > { %v6261_v23 = vpop.eup %6260  ;;  %6276 = vpow2.f32 %v3824_v18  ;;  %v5447_v41 = vpack.c.bf16 %v3939_v53, %v3939_v53  ;;  %v5450_v8 = vpack.c.bf16 %v3942_v32, %v3942_v32  ;;  %v3945_v62 = vmin.f32 %v3913_v37, 1.0 }
 0x34b   : > { %4758 = vrot.lane.b32.xlu1 %v5449_v10, %s6405_s22  ;;  %4756 = vrot.lane.b32.xlu0 %v5448_v39, %s6405_s22  ;;  %v6263_v35 = vpop.eup %6262  ;;  %6278 = vrcp.f32 %v3854_v49  ;;  %v3911_v52 = vmax.f32 %v6255_v29, 0.0  ;;  %v3826_v44 = vmul.f32 1.442695, %v3764_v42  ;;  %v10157_v12 = vpop.permute.xlu1 %4971  ;;  %v3944_v61 = vmin.f32 %v3912_v21, 1.0  ;;  %v11533_v10 = vld [vmem:[#allocation64_spill] sm:$0xff] }
 0x34c   : > { %v6265_v58 = vpop.eup %6264  ;;  %6280 = vpow2.f32 %v3766_v43  ;;  %v3914_v38 = vmax.f32 %v6259_v5, 0.0  ;;  %v3144_v18 = vadd.f32 %v11533_v10, %v11531_v4  ;;  %v3282_v53 = vadd.f32 %v11082_v27, %v3142_v47  ;;  %v10163_v39 = vpop.permute.xlu0 %4969 }
 0x34d   : > { %v6267_v50 = vpop.eup %6266  ;;  %6282 = vpow2.f32 %v10124_v45  ;;  %v3855_v48 = vadd.f32 1.0, %v6265_v58  ;;  %v3989_v32 = vsub.f32 0.0, %v3285_v6  ;;  %v4048_v29 = vmul.f32 1.442695, %v3987_v20 }
 0x34e   : > { %v3856_v37 = vadd.f32 1.0, %v6267_v50  ;;  %6284 = vpow2.f32 %v3826_v44  ;;  %v5453_v43 = vpack.c.bf16 %v3945_v62, %v3945_v62  ;;  %v3943_v21 = vmin.f32 %v3911_v52, 1.0 }
 0x34f   : > { %4754 = vrot.lane.b32.xlu1 %v5447_v41, %s6405_s22  ;;  %4760 = vrot.lane.b32.xlu0 %v5450_v8, %s6405_s22  ;;  %6286 = vrcp.f32 %v3855_v48  ;;  %v3917_v45 = vmax.f32 %v6261_v23, 0.0  ;;  %v10167_v5 = vpop.permute.xlu1 %4975  ;;  %v5452_v4 = vpack.c.bf16 %v3944_v61, %v3944_v61  ;;  %v3946_v14 = vmin.f32 %v3914_v38, 1.0 }
 0x350   : > { %6288 = vrcp.f32 %v3856_v37  ;;  %v3916_v47 = vmax.f32 %v6263_v35, 0.0  ;;  %v6269_v49 = vpop.eup %6268  ;;  %v3284_v6 = vadd.f32 %v11082_v27, %v3144_v18  ;;  %v3986_v20 = vsub.f32 0.0, %v3282_v53  ;;  %v10171_v42 = vpop.permute.xlu0 %4973 }
 0x351   : > { %6290 = vpow2.f32 %v10054_v36  ;;  %v6271_v41 = vpop.eup %6270  ;;  %v4052_v8 = vmul.f32 1.442695, %v3989_v32  ;;  %v5451_v35 = vpack.c.bf16 %v3943_v21, %v3943_v21  ;;  %v3949_v52 = vmin.f32 %v3917_v45, 1.0 }
 0x352   : > { %6292 = vrcp.f32 %v10086_v59  ;;  %v6273_v23 = vpop.eup %6272  ;;  %v3861_v62 = vadd.f32 1.0, %v6271_v41  ;;  %v5454_v27 = vpack.c.bf16 %v3946_v14, %v3946_v14  ;;  %v3948_v44 = vmin.f32 %v3916_v47, 1.0 }
 0x353   : > { %4766 = vrot.lane.b32.xlu1 %v5453_v43, %s6405_s22  ;;  %4764 = vrot.lane.b32.xlu0 %v5452_v4, %s6405_s22  ;;  %6294 = vpow2.f32 %v4048_v29  ;;  %v3858_v58 = vadd.f32 1.0, %v6273_v23  ;;  %v10176_v36 = vpop.permute.xlu1 %4979  ;;  %v3915_v61 = vmax.f32 %v6269_v49, 0.0  ;;  %v3988_v38 = vsub.f32 0.0, %v3284_v6 }
 0x354   : > { %v4046_v50 = vmul.f32 1.442695, %v3986_v20  ;;  %6296 = vrcp.f32 %v3861_v62  ;;  %v10178_v59 = vpop.permute.xlu0 %4977  ;;  %v4077_v53 = vadd.f32 1.0, %v9550_v2  ;;  %v5457_v48 = vpack.c.bf16 %v3949_v52, %v3949_v52 }
 0x355   : > { %6298 = vrcp.f32 %v3858_v58  ;;  %v5456_v43 = vpack.c.bf16 %v3948_v44, %v3948_v44  ;;  %v3947_v21 = vmin.f32 %v3915_v61, 1.0  ;;  %v4050_v14 = vmul.f32 1.442695, %v3988_v38 }
 0x356   : > { %v6275_v10 = vpop.eup %6274  ;;  %6300 = vpow2.f32 %v4052_v8  ;;  %v4079_v41 = vadd.f32 1.0, %v9597_v26  ;;  %v4076_v26 = vadd.f32 1.0, %v9458_v7  ;;  %vm4374_vm1 = vcmask 19456  }
 0x357   : > { %4762 = vrot.lane.b32.xlu1 %v5451_v35, %s6405_s22  ;;  %4768 = vrot.lane.b32.xlu0 %v5454_v27, %s6405_s22  ;;  %v6277_v18 = vpop.eup %6276  ;;  %v10184_v37 = vpop.permute.xlu1 %4983  ;;  %v3921_v45 = vmax.f32 %v6275_v10, 0.0  ;;  %6302 = vpow2.f32 %v4046_v50  ;;  %v5455_v52 = vpack.c.bf16 %v3947_v21, %v3947_v21  ;;  %vm4599_vm10 = vcmask 44056  }
 0x358   : > { %v6279_v32 = vpop.eup %6278  ;;  %v3859_v29 = vadd.f32 1.0, %v6277_v18  ;;  %v10186_v47 = vpop.permute.xlu0 %4981  ;;  %vm4824_vm11 = vcmask 68656   ;;  %vm5049_vm12 = vcmask 93256  }
 0x359   : > { %v6281_v4 = vpop.eup %6280  ;;  %v3918_v49 = vmax.f32 %v6279_v32, 0.0  ;;  %v3953_v58 = vmin.f32 %v3921_v45, 1.0 }
 0x35a   : > { %v6283_v6 = vpop.eup %6282  ;;  %6304 = vrcp.f32 %v3859_v29  ;;  %v3830_v2 = vadd.f32 1.0, %v6281_v4 }
 0x35b   : > { %4774 = vrot.lane.b32.xlu1 %v5457_v48, %s6405_s22  ;;  %4772 = vrot.lane.b32.xlu0 %v5456_v43, %s6405_s22  ;;  %v6285_v20 = vpop.eup %6284  ;;  %6306 = vrcp.f32 %v4077_v53  ;;  %v3950_v8 = vmin.f32 %v3918_v49, 1.0  ;;  %v10196_v35 = vpop.permute.xlu1 %4987  ;;  %v4081_v48 = vadd.f32 1.0, %v6283_v6  ;;  %v5461_v29 = vpack.c.bf16 %v3953_v58, %v3953_v58 }
 0x35c   : > { %v6287_v23 = vpop.eup %6286  ;;  %6308 = vrcp.f32 %v3830_v2  ;;  %v3860_v62 = vadd.f32 1.0, %v6285_v20  ;;  %v10198_v44 = vpop.permute.xlu0 %4985 }
 0x35d   : > { %v6289_v27 = vpop.eup %6288  ;;  %6310 = vpow2.f32 %v4050_v14  ;;  %v5458_v61 = vpack.c.bf16 %v3950_v8, %v3950_v8  ;;  %v3919_v38 = vmax.f32 %v6287_v23, 0.0 }
 0x35e   : > { %v6291_v50 = vpop.eup %6290  ;;  %6312 = vrcp.f32 %v3860_v62  ;;  %v3920_v10 = vmax.f32 %v6289_v27, 0.0  ;;  %v4080_v27 = vadd.f32 1.0, %v9571_v19 }
 0x35f   : > { %4770 = vrot.lane.b32.xlu1 %v5455_v52, %s6405_s22  ;;  %v10202_v18 = vpop.eup %6292  ;;  %6314 = vrcp.f32 %v4079_v41  ;;  %4776 = vrot.lane.b32.xlu0 %v5458_v61, %s6405_s22  ;;  %v10206_v32 = vpop.permute.xlu1 %4991  ;;  %v3951_v21 = vmin.f32 %v3919_v38, 1.0  ;;  %v4078_v4 = vadd.f32 1.0, %v6291_v50 }
 0x360   : > { %v6295_v53 = vpop.eup %6294  ;;  %v3952_v43 = vmin.f32 %v3920_v10, 1.0  ;;  %v10208_v45 = vpop.permute.xlu0 %4989  ;;  %6316 = vrcp.f32 %v4076_v26  ;;  %v11534_v26 = vld [vmem:[#allocation106_spill] sm:$0xff] }
 0x361   : > { %v6297_v7 = vpop.eup %6296  ;;  %6318 = vrcp.f32 %v4081_v48  ;;  %v4083_v20 = vadd.f32 1.0, %v6295_v53  ;;  %v5459_v8 = vpack.c.bf16 %v3951_v21, %v3951_v21  ;;  %v4139_v10 = vmax.f32 %v11534_v26, 0.0 }
 0x362   : > { %v5460_v14 = vpack.c.bf16 %v3952_v43, %v3952_v43  ;;  %v6299_v49 = vpop.eup %6298  ;;  %v3925_v6 = vmax.f32 %v6297_v7, 0.0  ;;  %6320 = vrcp.f32 %v4078_v4 }
 0x363   : > { %4782 = vrot.lane.b32.xlu1 %v5461_v29, %s6405_s22  ;;  %v6301_v2 = vpop.eup %6300  ;;  %v4285_v41 = vpop.permute.xlu1 %4284  ;;  %v3922_v23 = vmax.f32 %v6299_v49, 0.0  ;;  %6322 = vrcp.f32 %v4083_v20  ;;  %v4171_v20 = vmin.f32 %v4139_v10, 1.0 }
 0x364   : > { %4780 = vrot.lane.b32.xlu0 %v5460_v14, %s6405_s22  ;;  %4378 = vst.msk [vmem:[%s10214_s28 + $0xc] sm:$0xf] %vm4374_vm1, %v4285_v41  ;;  %v4283_v62 = vpop.permute.xlu0 %4282  ;;  %v3957_v52 = vmin.f32 %v3925_v6, 1.0  ;;  %v6303_v58 = vpop.eup %6302  ;;  %v4085_v53 = vadd.f32 1.0, %v6301_v2  ;;  %6324 = vrcp.f32 %v4080_v27  ;;  %v11535_v14 = vld [vmem:[#allocation76_spill] sm:$0xff]  ;;  %v11536_v2 = vld [vmem:[#allocation89_spill] sm:$0xff] }
 0x365   : > { %4603 = vst.msk [vmem:[%s10214_s28 + $0xc] sm:$0xf] %vm4599_vm10, %v9460_v60  ;;  %v3954_v61 = vmin.f32 %v3922_v23, 1.0  ;;  %v4082_v4 = vadd.f32 1.0, %v6303_v58 }
 0x366   : > { %4377 = vst.msk [vmem:[%s10214_s28 + $0x8] sm:$0xf] %vm4374_vm1, %v4283_v62  ;;  %v5465_v50 = vpack.c.bf16 %v3957_v52, %v3957_v52  ;;  %6326 = vrcp.f32 %v4085_v53  ;;  %v11538_v53 = vld [vmem:[#allocation32_spill] sm:$0xff] }
 0x367   : > { %4778 = vrot.lane.b32.xlu1 %v5459_v8, %s6405_s22  ;;  %v6305_v38 = vpop.eup %6304  ;;  %4602 = vst.msk [vmem:[%s10214_s28 + $0x8] sm:$0xf] %vm4599_vm10, %v9346_v46  ;;  %v4281_v48 = vpop.permute.xlu1 %4280  ;;  %v5462_v60 = vpack.c.bf16 %v3954_v61, %v3954_v61  ;;  %v4138_v61 = vmax.f32 %v10202_v18, 0.0  ;;  %6328 = vrcp.f32 %v4082_v4  ;;  %v11539_v4 = vld [vmem:[#allocation84_spill] sm:$0xff] }
 0x368   : > { %v6307_v19 = vpop.eup %6306  ;;  %v3923_v29 = vmax.f32 %v6305_v38, 0.0  ;;  %4376 = vst.msk [vmem:[%s10214_s28 + $0x4] sm:$0xf] %vm4374_vm1, %v4281_v48  ;;  %v4287_v21 = vpop.permute.xlu0 %4286 }
 0x369   : > { %v6309_v43 = vpop.eup %6308  ;;  %4601 = vst.msk [vmem:[%s10214_s28 + $0x4] sm:$0xf] %vm4599_vm10, %v11535_v14  ;;  %4784 = vrot.lane.b32.xlu0 %v5462_v60, %s6405_s22  ;;  %v4141_v41 = vmax.f32 %v6307_v19, 0.0  ;;  %v5487_v60 = vpack.c.bf16 %v4171_v20, %v4171_v20  ;;  %v4170_v14 = vmin.f32 %v4138_v61, 1.0 }
 0x36a   : > { %v6311_v7 = vpop.eup %6310  ;;  %4379 = vst.msk [vmem:[%s10214_s28 + $0x10] sm:$0xf] %vm4374_vm1, %v4287_v21  ;;  %v3894_v46 = vmax.f32 %v6309_v43, 0.0  ;;  %v3955_v49 = vmin.f32 %v3923_v29, 1.0 }
 0x36b   : > { %4790 = vrot.lane.b32.xlu1 %v5465_v50, %s6405_s22  ;;  %v6313_v6 = vpop.eup %6312  ;;  %4604 = vst.msk [vmem:[%s10214_s28 + $0x10] sm:$0xf] %vm4599_vm10, %v11536_v2  ;;  %v4293_v23 = vpop.permute.xlu1 %4292  ;;  %v4084_v38 = vadd.f32 1.0, %v6311_v7  ;;  %v11537_v50 = vld [vmem:[#allocation68_spill] sm:$0xff]  ;;  %v4173_v29 = vmin.f32 %v4141_v41, 1.0 }
 0x36c   : > { %v6315_v8 = vpop.eup %6314  ;;  %v3926_v62 = vmin.f32 %v3894_v46, 1.0  ;;  %v5463_v52 = vpack.c.bf16 %v3955_v49, %v3955_v49  ;;  %v3924_v58 = vmax.f32 %v6313_v6, 0.0  ;;  %4382 = vst.msk [vmem:[%s10214_s28 + $0x1c] sm:$0xf] %vm4374_vm1, %v4293_v23  ;;  %v4291_v27 = vpop.permute.xlu0 %4290  ;;  %v11540_v6 = vld [vmem:[#allocation26_spill] sm:$0xff] }
 0x36d   : > { %4607 = vst.msk [vmem:[%s10214_s28 + $0x1c] sm:$0xf] %vm4599_vm10, %v11537_v50  ;;  %v6317_v19 = vpop.eup %6316  ;;  %v4143_v43 = vmax.f32 %v6315_v8, 0.0  ;;  %6330 = vrcp.f32 %v4084_v38  ;;  %v5489_v20 = vpack.c.bf16 %v4173_v29, %v4173_v29  ;;  %v11542_v50 = vld [vmem:[#allocation63_spill] sm:$0xff] }
 0x36e   : > { %4381 = vst.msk [vmem:[%s10214_s28 + $0x18] sm:$0xf] %vm4374_vm1, %v4291_v27  ;;  %v5434_v26 = vpack.c.bf16 %v3926_v62, %v3926_v62  ;;  %v3956_v10 = vmin.f32 %v3924_v58, 1.0  ;;  %v6319_v21 = vpop.eup %6318  ;;  %v4140_v46 = vmax.f32 %v6317_v19, 0.0  ;;  %v5486_v58 = vpack.c.bf16 %v4170_v14, %v4170_v14 }
 0x36f   : > { %4786 = vrot.lane.b32.xlu1 %v5463_v52, %s6405_s22  ;;  %4606 = vst.msk [vmem:[%s10214_s28 + $0x18] sm:$0xf] %vm4599_vm10, %v11538_v53  ;;  %v6321_v49 = vpop.eup %6320  ;;  %v4175_v41 = vmin.f32 %v4143_v43, 1.0  ;;  %v4145_v8 = vmax.f32 %v6319_v21, 0.0  ;;  %v11541_v52 = vld [vmem:[#allocation111_spill] sm:$0xff] }
 0x370   : > { %4728 = vrot.lane.b32.xlu0 %v5434_v26, %s6405_s22  ;;  %v4289_v18 = vpop.permute.xlu1 %4288  ;;  %v5464_v48 = vpack.c.bf16 %v3956_v10, %v3956_v10  ;;  %v4295_v7 = vpop.permute.xlu0 %4294  ;;  %v4172_v27 = vmin.f32 %v4140_v46, 1.0  ;;  %v4142_v61 = vmax.f32 %v6321_v49, 0.0 }
 0x371   : > { %4380 = vst.msk [vmem:[%s10214_s28 + $0x14] sm:$0xf] %vm4374_vm1, %v4289_v18  ;;  %4383 = vst.msk [vmem:[%s10214_s28 + $0x20] sm:$0xf] %vm4374_vm1, %v4295_v7  ;;  %v6323_v23 = vpop.eup %6322  ;;  %v5491_v10 = vpack.c.bf16 %v4175_v41, %v4175_v41  ;;  %v4177_v19 = vmin.f32 %v4145_v8, 1.0 }
 0x372   : > { %4605 = vst.msk [vmem:[%s10214_s28 + $0x14] sm:$0xf] %vm4599_vm10, %v11539_v4  ;;  %4608 = vst.msk [vmem:[%s10214_s28 + $0x20] sm:$0xf] %vm4599_vm10, %v11540_v6  ;;  %v6325_v38 = vpop.eup %6324  ;;  %v4147_v53 = vmax.f32 %v6323_v23, 0.0  ;;  %v5488_v29 = vpack.c.bf16 %v4172_v27, %v4172_v27  ;;  %v4174_v43 = vmin.f32 %v4142_v61, 1.0 }
 0x373   : > { %4995 = vrot.lane.b32.xlu1 %v5487_v60, %s6405_s22  ;;  %v6327_v18 = vpop.eup %6326  ;;  %v11543_v60 = vld [vmem:[#allocation61_spill] sm:$0xff]  ;;  %v4144_v21 = vmax.f32 %v6325_v38, 0.0  ;;  %v11544_v4 = vld [vmem:[#allocation44_spill] sm:$0xff]  ;;  %v5493_v46 = vpack.c.bf16 %v4177_v19, %v4177_v19  ;;  %v11546_v61 = vld [vmem:[#allocation23_spill] sm:$0xff] }
 0x374   : > { %4788 = vrot.lane.b32.xlu0 %v5464_v48, %s6405_s22  ;;  %v4301_v2 = vpop.permute.xlu1 %4300  ;;  %v4299_v62 = vpop.permute.xlu0 %4298  ;;  %v4179_v49 = vmin.f32 %v4147_v53, 1.0  ;;  %v4149_v6 = vmax.f32 %v6327_v18, 0.0 }
 0x375   : > { %4386 = vst.msk [vmem:[%s10214_s28 + $0x2c] sm:$0xf] %vm4374_vm1, %v4301_v2  ;;  %4385 = vst.msk [vmem:[%s10214_s28 + $0x28] sm:$0xf] %vm4374_vm1, %v4299_v62  ;;  %v6329_v7 = vpop.eup %6328  ;;  %v4176_v41 = vmin.f32 %v4144_v21, 1.0  ;;  %v11545_v62 = vld [vmem:[#allocation62_spill] sm:$0xff] }
 0x376   : > { %4611 = vst.msk [vmem:[%s10214_s28 + $0x2c] sm:$0xf] %vm4599_vm10, %v11541_v52  ;;  %4610 = vst.msk [vmem:[%s10214_s28 + $0x28] sm:$0xf] %vm4599_vm10, %v11542_v50  ;;  %v4146_v8 = vmax.f32 %v6329_v7, 0.0  ;;  %v4181_v27 = vmin.f32 %v4149_v6, 1.0 }
 0x377   : > { %4999 = vrot.lane.b32.xlu1 %v5489_v20, %s6405_s22  ;;  %v5490_v20 = vpack.c.bf16 %v4174_v43, %v4174_v43  ;;  %v5492_v38 = vpack.c.bf16 %v4176_v41, %v4176_v41  ;;  %v11548_v7 = vld [vmem:[#allocation34_spill] sm:$0xff] }
 0x378   : > { %4993 = vrot.lane.b32.xlu0 %v5486_v58, %s6405_s22  ;;  %v4297_v26 = vpop.permute.xlu1 %4296  ;;  %v4303_v48 = vpop.permute.xlu0 %4302  ;;  %v5495_v58 = vpack.c.bf16 %v4179_v49, %v4179_v49  ;;  %v4178_v50 = vmin.f32 %v4146_v8, 1.0  ;;  %v5497_v19 = vpack.c.bf16 %v4181_v27, %v4181_v27 }
 0x379   : > { %4384 = vst.msk [vmem:[%s10214_s28 + $0x24] sm:$0xf] %vm4374_vm1, %v4297_v26  ;;  %4387 = vst.msk [vmem:[%s10214_s28 + $0x30] sm:$0xf] %vm4374_vm1, %v4303_v48  ;;  %v11547_v48 = vld [vmem:[#allocation37_spill] sm:$0xff] }
 0x37a   : > { %4609 = vst.msk [vmem:[%s10214_s28 + $0x24] sm:$0xf] %vm4599_vm10, %v11543_v60  ;;  %4612 = vst.msk [vmem:[%s10214_s28 + $0x30] sm:$0xf] %vm4599_vm10, %v11544_v4  ;;  %v6331_v23 = vpop.eup %6330  ;;  %v5494_v18 = vpack.c.bf16 %v4178_v50, %v4178_v50 }
 0x37b   : > { %5003 = vrot.lane.b32.xlu1 %v5491_v10, %s6405_s22  ;;  %v4148_v26 = vmax.f32 %v6331_v23, 0.0 }
 0x37c   : > { %4997 = vrot.lane.b32.xlu0 %v5488_v29, %s6405_s22  ;;  %v4309_v14 = vpop.permute.xlu1 %4308  ;;  %v4307_v2 = vpop.permute.xlu0 %4306 }
 0x37d   : > { %4390 = vst.msk [vmem:[%s10214_s28 + $0x3c] sm:$0xf] %vm4374_vm1, %v4309_v14  ;;  %4389 = vst.msk [vmem:[%s10214_s28 + $0x38] sm:$0xf] %vm4374_vm1, %v4307_v2 }
 0x37e   : > { %4615 = vst.msk [vmem:[%s10214_s28 + $0x3c] sm:$0xf] %vm4599_vm10, %v9753_v31  ;;  %4614 = vst.msk [vmem:[%s10214_s28 + $0x38] sm:$0xf] %vm4599_vm10, %v11545_v62 }
 0x37f   : > { %5007 = vrot.lane.b32.xlu1 %v5493_v46, %s6405_s22 }
 0x380   : > { %5001 = vrot.lane.b32.xlu0 %v5490_v20, %s6405_s22  ;;  %v4305_v52 = vpop.permute.xlu1 %4304 }
 0x381   : > { %4388 = vst.msk [vmem:[%s10214_s28 + $0x34] sm:$0xf] %vm4374_vm1, %v4305_v52  ;;  %v4311_v31 = vpop.permute.xlu0 %4310 }
 0x382   : > { %4613 = vst.msk [vmem:[%s10214_s28 + $0x34] sm:$0xf] %vm4599_vm10, %v11546_v61 }
 0x383   : > { %4391 = vst.msk [vmem:[%s10214_s28 + $0x40] sm:$0xf] %vm4374_vm1, %v4311_v31  ;;  %5011 = vrot.lane.b32.xlu1 %v5495_v58, %s6405_s22 }
 0x384   : > { %4616 = vst.msk [vmem:[%s10214_s28 + $0x40] sm:$0xf] %vm4599_vm10, %v9781_v28  ;;  %5005 = vrot.lane.b32.xlu0 %v5492_v38, %s6405_s22  ;;  %v4180_v28 = vmin.f32 %v4148_v26, 1.0 }
 0x385   : > { %v4317_v10 = vpop.permute.xlu1 %4316  ;;  %v4315_v53 = vpop.permute.xlu0 %4314 }
 0x386   : > { %4394 = vst.msk [vmem:[%s10214_s28 + $0x4c] sm:$0xf] %vm4374_vm1, %v4317_v10  ;;  %4393 = vst.msk [vmem:[%s10214_s28 + $0x48] sm:$0xf] %vm4374_vm1, %v4315_v53  ;;  %v5496_v29 = vpack.c.bf16 %v4180_v28, %v4180_v28 }
 0x387   : > { %4619 = vst.msk [vmem:[%s10214_s28 + $0x4c] sm:$0xf] %vm4599_vm10, %v9852_v22  ;;  %5015 = vrot.lane.b32.xlu1 %v5497_v19, %s6405_s22  ;;  %4618 = vst.msk [vmem:[%s10214_s28 + $0x48] sm:$0xf] %vm4599_vm10, %v11547_v48 }
 0x388   : > { %5009 = vrot.lane.b32.xlu0 %v5494_v18, %s6405_s22 }
 0x389   : > { %v4313_v60 = vpop.permute.xlu1 %4312  ;;  %v4319_v22 = vpop.permute.xlu0 %4318 }
 0x38a   : > { %4392 = vst.msk [vmem:[%s10214_s28 + $0x44] sm:$0xf] %vm4374_vm1, %v4313_v60  ;;  %4395 = vst.msk [vmem:[%s10214_s28 + $0x50] sm:$0xf] %vm4374_vm1, %v4319_v22 }
 0x38b   : > { %4617 = vst.msk [vmem:[%s10214_s28 + $0x44] sm:$0xf] %vm4599_vm10, %v9779_v51  ;;  %4620 = vst.msk [vmem:[%s10214_s28 + $0x50] sm:$0xf] %vm4599_vm10, %v9889_v15 }
 0x38c   : > { %5013 = vrot.lane.b32.xlu0 %v5496_v29, %s6405_s22 }
 0x38d   : > { %v4325_v43 = vpop.permute.xlu1 %4324  ;;  %v4323_v21 = vpop.permute.xlu0 %4322 }
 0x38e   : > { %4398 = vst.msk [vmem:[%s10214_s28 + $0x5c] sm:$0xf] %vm4374_vm1, %v4325_v43  ;;  %4397 = vst.msk [vmem:[%s10214_s28 + $0x58] sm:$0xf] %vm4374_vm1, %v4323_v21 }
 0x38f   : > { %4623 = vst.msk [vmem:[%s10214_s28 + $0x5c] sm:$0xf] %vm4599_vm10, %v9944_v16  ;;  %4622 = vst.msk [vmem:[%s10214_s28 + $0x58] sm:$0xf] %vm4599_vm10, %v9858_v1 }
 0x391   : > { %v4321_v51 = vpop.permute.xlu1 %4320  ;;  %v4327_v15 = vpop.permute.xlu0 %4326 }
 0x392   : > { %4396 = vst.msk [vmem:[%s10214_s28 + $0x54] sm:$0xf] %vm4374_vm1, %v4321_v51  ;;  %4399 = vst.msk [vmem:[%s10214_s28 + $0x60] sm:$0xf] %vm4374_vm1, %v4327_v15 }
 0x393   : > { %4621 = vst.msk [vmem:[%s10214_s28 + $0x54] sm:$0xf] %vm4599_vm10, %v9882_v13  ;;  %4624 = vst.msk [vmem:[%s10214_s28 + $0x60] sm:$0xf] %vm4599_vm10, %v9967_v17 }
 0x395   : > { %v4333_v16 = vpop.permute.xlu1 %4332  ;;  %v4331_v1 = vpop.permute.xlu0 %4330 }
 0x396   : > { %4402 = vst.msk [vmem:[%s10214_s28 + $0x6c] sm:$0xf] %vm4374_vm1, %v4333_v16  ;;  %4401 = vst.msk [vmem:[%s10214_s28 + $0x68] sm:$0xf] %vm4374_vm1, %v4331_v1 }
 0x397   : > { %4627 = vst.msk [vmem:[%s10214_s28 + $0x6c] sm:$0xf] %vm4599_vm10, %v10022_v63  ;;  %4626 = vst.msk [vmem:[%s10214_s28 + $0x68] sm:$0xf] %vm4599_vm10, %v9948_v57 }
 0x399   : > { %v4329_v13 = vpop.permute.xlu1 %4328  ;;  %v4335_v17 = vpop.permute.xlu0 %4334 }
 0x39a   : > { %4400 = vst.msk [vmem:[%s10214_s28 + $0x64] sm:$0xf] %vm4374_vm1, %v4329_v13  ;;  %4403 = vst.msk [vmem:[%s10214_s28 + $0x70] sm:$0xf] %vm4374_vm1, %v4335_v17 }
 0x39b   : > { %4625 = vst.msk [vmem:[%s10214_s28 + $0x64] sm:$0xf] %vm4599_vm10, %v9965_v30  ;;  %4628 = vst.msk [vmem:[%s10214_s28 + $0x70] sm:$0xf] %vm4599_vm10, %v10038_v55 }
 0x39d   : > { %v4341_v63 = vpop.permute.xlu1 %4340  ;;  %v4279_v57 = vpop.permute.xlu0 %4278 }
 0x39e   : > { %4406 = vst.msk [vmem:[%s10214_s28 + $0x7c] sm:$0xf] %vm4374_vm1, %v4341_v63  ;;  %4375 = vst.msk [vmem:[%s10214_s28] sm:$0xf] %vm4374_vm1, %v4279_v57 }
 0x39f   : > { %4631 = vst.msk [vmem:[%s10214_s28 + $0x7c] sm:$0xf] %vm4599_vm10, %v10036_v54  ;;  %4600 = vst.msk [vmem:[%s10214_s28] sm:$0xf] %vm4599_vm10, %v11548_v7 }
 0x3a1   : > { %v4337_v30 = vpop.permute.xlu1 %4336  ;;  %v4339_v55 = vpop.permute.xlu0 %4338 }
 0x3a2   : > { %4404 = vst.msk [vmem:[%s10214_s28 + $0x74] sm:$0xf] %vm4374_vm1, %v4337_v30  ;;  %4405 = vst.msk [vmem:[%s10214_s28 + $0x78] sm:$0xf] %vm4374_vm1, %v4339_v55 }
 0x3a3   : > { %4629 = vst.msk [vmem:[%s10214_s28 + $0x74] sm:$0xf] %vm4599_vm10, %v10048_v24  ;;  %4630 = vst.msk [vmem:[%s10214_s28 + $0x78] sm:$0xf] %vm4599_vm10, %v10026_v9 }
 0x3a5   : > { %v4735_v54 = vpop.permute.xlu1 %4734  ;;  %v4733_v4 = vpop.permute.xlu0 %4732 }
 0x3a6   : > { %4828 = vst.msk [vmem:[%s10214_s28 + $0xc] sm:$0xf] %vm4824_vm11, %v4735_v54  ;;  %4827 = vst.msk [vmem:[%s10214_s28 + $0x8] sm:$0xf] %vm4824_vm11, %v4733_v4 }
 0x3a7   : > { %5053 = vst.msk [vmem:[%s10214_s28 + $0xc] sm:$0xf] %vm5049_vm12, %v10116_v34  ;;  %5052 = vst.msk [vmem:[%s10214_s28 + $0x8] sm:$0xf] %vm5049_vm12, %v10078_v3 }
 0x3a9   : > { %v4731_v24 = vpop.permute.xlu1 %4730  ;;  %v4737_v9 = vpop.permute.xlu0 %4736 }
 0x3aa   : > { %4826 = vst.msk [vmem:[%s10214_s28 + $0x4] sm:$0xf] %vm4824_vm11, %v4731_v24  ;;  %4829 = vst.msk [vmem:[%s10214_s28 + $0x10] sm:$0xf] %vm4824_vm11, %v4737_v9 }
 0x3ab   : > { %5051 = vst.msk [vmem:[%s10214_s28 + $0x4] sm:$0xf] %vm5049_vm12, %v10083_v0  ;;  %5054 = vst.msk [vmem:[%s10214_s28 + $0x10] sm:$0xf] %vm5049_vm12, %v10118_v25 }
 0x3ad   : > { %v4743_v34 = vpop.permute.xlu1 %4742  ;;  %v4741_v3 = vpop.permute.xlu0 %4740 }
 0x3ae   : > { %4832 = vst.msk [vmem:[%s10214_s28 + $0x1c] sm:$0xf] %vm4824_vm11, %v4743_v34  ;;  %4831 = vst.msk [vmem:[%s10214_s28 + $0x18] sm:$0xf] %vm4824_vm11, %v4741_v3 }
 0x3af   : > { %5057 = vst.msk [vmem:[%s10214_s28 + $0x1c] sm:$0xf] %vm5049_vm12, %v10147_v56  ;;  %5056 = vst.msk [vmem:[%s10214_s28 + $0x18] sm:$0xf] %vm5049_vm12, %v10153_v11 }
 0x3b1   : > { %v4739_v0 = vpop.permute.xlu1 %4738  ;;  %v4745_v25 = vpop.permute.xlu0 %4744 }
 0x3b2   : > { %4830 = vst.msk [vmem:[%s10214_s28 + $0x14] sm:$0xf] %vm4824_vm11, %v4739_v0  ;;  %4833 = vst.msk [vmem:[%s10214_s28 + $0x20] sm:$0xf] %vm4824_vm11, %v4745_v25 }
 0x3b3   : > { %5055 = vst.msk [vmem:[%s10214_s28 + $0x14] sm:$0xf] %vm5049_vm12, %v10140_v33  ;;  %5058 = vst.msk [vmem:[%s10214_s28 + $0x20] sm:$0xf] %vm5049_vm12, %v10163_v39 }
 0x3b5   : > { %v4751_v56 = vpop.permute.xlu1 %4750  ;;  %v4749_v11 = vpop.permute.xlu0 %4748 }
 0x3b6   : > { %4836 = vst.msk [vmem:[%s10214_s28 + $0x2c] sm:$0xf] %vm4824_vm11, %v4751_v56  ;;  %4835 = vst.msk [vmem:[%s10214_s28 + $0x28] sm:$0xf] %vm4824_vm11, %v4749_v11 }
 0x3b7   : > { %5061 = vst.msk [vmem:[%s10214_s28 + $0x2c] sm:$0xf] %vm5049_vm12, %v10167_v5  ;;  %5060 = vst.msk [vmem:[%s10214_s28 + $0x28] sm:$0xf] %vm5049_vm12, %v10171_v42 }
 0x3b9   : > { %v4747_v33 = vpop.permute.xlu1 %4746  ;;  %v4753_v39 = vpop.permute.xlu0 %4752 }
 0x3ba   : > { %4834 = vst.msk [vmem:[%s10214_s28 + $0x24] sm:$0xf] %vm4824_vm11, %v4747_v33  ;;  %4837 = vst.msk [vmem:[%s10214_s28 + $0x30] sm:$0xf] %vm4824_vm11, %v4753_v39 }
 0x3bb   : > { %5059 = vst.msk [vmem:[%s10214_s28 + $0x24] sm:$0xf] %vm5049_vm12, %v10157_v12  ;;  %5062 = vst.msk [vmem:[%s10214_s28 + $0x30] sm:$0xf] %vm5049_vm12, %v10178_v59 }
 0x3bd   : > { %v4759_v5 = vpop.permute.xlu1 %4758  ;;  %v4757_v42 = vpop.permute.xlu0 %4756 }
 0x3be   : > { %4840 = vst.msk [vmem:[%s10214_s28 + $0x3c] sm:$0xf] %vm4824_vm11, %v4759_v5  ;;  %4839 = vst.msk [vmem:[%s10214_s28 + $0x38] sm:$0xf] %vm4824_vm11, %v4757_v42 }
 0x3bf   : > { %5065 = vst.msk [vmem:[%s10214_s28 + $0x3c] sm:$0xf] %vm5049_vm12, %v10184_v37  ;;  %5064 = vst.msk [vmem:[%s10214_s28 + $0x38] sm:$0xf] %vm5049_vm12, %v10186_v47 }
 0x3c1   : > { %v4755_v12 = vpop.permute.xlu1 %4754  ;;  %v4761_v59 = vpop.permute.xlu0 %4760 }
 0x3c2   : > { %4838 = vst.msk [vmem:[%s10214_s28 + $0x34] sm:$0xf] %vm4824_vm11, %v4755_v12  ;;  %4841 = vst.msk [vmem:[%s10214_s28 + $0x40] sm:$0xf] %vm4824_vm11, %v4761_v59 }
 0x3c3   : > { %5063 = vst.msk [vmem:[%s10214_s28 + $0x34] sm:$0xf] %vm5049_vm12, %v10176_v36  ;;  %5066 = vst.msk [vmem:[%s10214_s28 + $0x40] sm:$0xf] %vm5049_vm12, %v10198_v44 }
 0x3c5   : > { %v4767_v37 = vpop.permute.xlu1 %4766  ;;  %v4765_v47 = vpop.permute.xlu0 %4764 }
 0x3c6   : > { %4844 = vst.msk [vmem:[%s10214_s28 + $0x4c] sm:$0xf] %vm4824_vm11, %v4767_v37  ;;  %4843 = vst.msk [vmem:[%s10214_s28 + $0x48] sm:$0xf] %vm4824_vm11, %v4765_v47 }
 0x3c7   : > { %5069 = vst.msk [vmem:[%s10214_s28 + $0x4c] sm:$0xf] %vm5049_vm12, %v10206_v32  ;;  %5068 = vst.msk [vmem:[%s10214_s28 + $0x48] sm:$0xf] %vm5049_vm12, %v10208_v45 }
 0x3c9   : > { %v4763_v36 = vpop.permute.xlu1 %4762  ;;  %v4769_v44 = vpop.permute.xlu0 %4768 }
 0x3ca   : > { %4842 = vst.msk [vmem:[%s10214_s28 + $0x44] sm:$0xf] %vm4824_vm11, %v4763_v36  ;;  %4845 = vst.msk [vmem:[%s10214_s28 + $0x50] sm:$0xf] %vm4824_vm11, %v4769_v44 }
 0x3cb   : > { %5067 = vst.msk [vmem:[%s10214_s28 + $0x44] sm:$0xf] %vm5049_vm12, %v10196_v35 }
 0x3cd   : > { %v4775_v14 = vpop.permute.xlu1 %4774  ;;  %v4773_v32 = vpop.permute.xlu0 %4772 }
 0x3ce   : > { %4848 = vst.msk [vmem:[%s10214_s28 + $0x5c] sm:$0xf] %vm4824_vm11, %v4775_v14  ;;  %4847 = vst.msk [vmem:[%s10214_s28 + $0x58] sm:$0xf] %vm4824_vm11, %v4773_v32 }
 0x3d1   : > { %v4771_v45 = vpop.permute.xlu1 %4770  ;;  %v4777_v46 = vpop.permute.xlu0 %4776 }
 0x3d2   : > { %4846 = vst.msk [vmem:[%s10214_s28 + $0x54] sm:$0xf] %vm4824_vm11, %v4771_v45  ;;  %4849 = vst.msk [vmem:[%s10214_s28 + $0x60] sm:$0xf] %vm4824_vm11, %v4777_v46 }
 0x3d5   : > { %v4783_v35 = vpop.permute.xlu1 %4782 }
 0x3d6   : > { %4852 = vst.msk [vmem:[%s10214_s28 + $0x6c] sm:$0xf] %vm4824_vm11, %v4783_v35  ;;  %v4781_v49 = vpop.permute.xlu0 %4780 }
 0x3d7   : > { %4851 = vst.msk [vmem:[%s10214_s28 + $0x68] sm:$0xf] %vm4824_vm11, %v4781_v49 }
 0x3d9   : > { %v4779_v6 = vpop.permute.xlu1 %4778 }
 0x3da   : > { %4850 = vst.msk [vmem:[%s10214_s28 + $0x64] sm:$0xf] %vm4824_vm11, %v4779_v6 }
 0x3db   : > { %v4785_v2 = vpop.permute.xlu0 %4784 }
 0x3dc   : > { %4853 = vst.msk [vmem:[%s10214_s28 + $0x70] sm:$0xf] %vm4824_vm11, %v4785_v2 }
 0x3dd   : > { %v4791_v20 = vpop.permute.xlu1 %4790 }
 0x3de   : > { %4856 = vst.msk [vmem:[%s10214_s28 + $0x7c] sm:$0xf] %vm4824_vm11, %v4791_v20 }
 0x3e1   : > { %v4787_v41 = vpop.permute.xlu1 %4786 }
 0x3e2   : > { %4854 = vst.msk [vmem:[%s10214_s28 + $0x74] sm:$0xf] %vm4824_vm11, %v4787_v41  ;;  %v4729_v8 = vpop.permute.xlu0 %4728 }
 0x3e3   : > { %4825 = vst.msk [vmem:[%s10214_s28] sm:$0xf] %vm4824_vm11, %v4729_v8 }
 0x3e4   : > { %5050 = vst.msk [vmem:[%s10214_s28] sm:$0xf] %vm5049_vm12, %v10088_v40 }
 0x3e5   : > { %v4996_v23 = vpop.permute.xlu1 %4995 }
 0x3e6   : > { %5071 = vst.msk [vmem:[%s10214_s28 + $0x54] sm:$0xf] %vm5049_vm12, %v4996_v23  ;;  %v4789_v62 = vpop.permute.xlu0 %4788 }
 0x3e7   : > { %4855 = vst.msk [vmem:[%s10214_s28 + $0x78] sm:$0xf] %vm4824_vm11, %v4789_v62 }
 0x3e9   : > { %v5000_v52 = vpop.permute.xlu1 %4999 }
 0x3ea   : > { %5073 = vst.msk [vmem:[%s10214_s28 + $0x5c] sm:$0xf] %vm5049_vm12, %v5000_v52  ;;  %v4994_v58 = vpop.permute.xlu0 %4993 }
 0x3eb   : > { %5070 = vst.msk [vmem:[%s10214_s28 + $0x50] sm:$0xf] %vm5049_vm12, %v4994_v58 }
 0x3ed   : > { %v5004_v27 = vpop.permute.xlu1 %5003 }
 0x3ee   : > { %5075 = vst.msk [vmem:[%s10214_s28 + $0x64] sm:$0xf] %vm5049_vm12, %v5004_v27  ;;  %v4998_v40 = vpop.permute.xlu0 %4997 }
 0x3ef   : > { %5072 = vst.msk [vmem:[%s10214_s28 + $0x58] sm:$0xf] %vm5049_vm12, %v4998_v40 }
 0x3f1   : > { %v5008_v31 = vpop.permute.xlu1 %5007 }
 0x3f2   : > { %5077 = vst.msk [vmem:[%s10214_s28 + $0x6c] sm:$0xf] %vm5049_vm12, %v5008_v31  ;;  %v5002_v61 = vpop.permute.xlu0 %5001 }
 0x3f3   : > { %5074 = vst.msk [vmem:[%s10214_s28 + $0x60] sm:$0xf] %vm5049_vm12, %v5002_v61 }
 0x3f5   : > { %v5012_v38 = vpop.permute.xlu1 %5011 }
 0x3f6   : > { %5079 = vst.msk [vmem:[%s10214_s28 + $0x74] sm:$0xf] %vm5049_vm12, %v5012_v38  ;;  %v5006_v50 = vpop.permute.xlu0 %5005 }
 0x3f7   : > { %5076 = vst.msk [vmem:[%s10214_s28 + $0x68] sm:$0xf] %vm5049_vm12, %v5006_v50 }
 0x3f9   : > { %v5016_v26 = vpop.permute.xlu1 %5015 }
 0x3fa   : > { %5081 = vst.msk [vmem:[%s10214_s28 + $0x7c] sm:$0xf] %vm5049_vm12, %v5016_v26  ;;  %v5010_v10 = vpop.permute.xlu0 %5009 }
 0x3fb   : > { %5078 = vst.msk [vmem:[%s10214_s28 + $0x70] sm:$0xf] %vm5049_vm12, %v5010_v10 }
 0x3fe   : > { %v5014_v19 = vpop.permute.xlu0 %5013 }
 0x3ff   : > { %5080 = vst.msk [vmem:[%s10214_s28 + $0x78] sm:$0xf] %vm5049_vm12, %v5014_v19 }
 0x400 PF: > { %s17_s18 = sadd.s32 1, %s6398_s18  }
 0x401   : > { %p14_p3 = scmp.ge.s32.totalorder %s17_s18, 4  }
 0x403   :  { %16 = sbr.rel (!%p14_p3) target bundleno = 2 (0x2), region = 82 }
 0x408   :  { %5103 = vsyncpa [#allocation3], 1 }
 0x409   :  { %5105 = vsyncpa [#allocation3 + $0x1], 1 }
 0x40a   :  { %5106 = vsyncpa [#allocation5], 1 }

</bundles_post_ra>
